<compile_context>
chip_gen: v6e
topology: v6e:2x2x1
jax: 0.10.0
libtpu: 0.0.40
codegen_flags: <defaults>
</compile_context>

<pallas_src>
import jax
import jax.numpy as jnp
from jax.experimental import pallas as pl
from jax.experimental.pallas import tpu as pltpu


def _round_up(v, m):
    return ((v + m - 1) // m) * m


def _gelu_tanh_f32(h):
    # GELU, tanh approximation (matches the PyTorch GELU module), all in f32.
    c = jnp.sqrt(jnp.float32(2.0 / jnp.pi))
    return 0.5 * h * (1.0 + jnp.tanh(c * (h + 0.044715 * (h * h * h))))


# ---------------------------------------------------------------------------
# Fast path: W1 / W2 fully resident in VMEM, grid only over M tiles.
# ---------------------------------------------------------------------------
def ffn_resident_kernel(x_ref, w1_ref, b1_ref, w2_ref, b2_ref, o_ref):
    # x: (tm, E) bf16 ; W1: (E, H) bf16 ; b1: (1, H) f32 ; W2: (H, E) bf16 ; b2: (1, E) f32
    h = jnp.dot(x_ref[...], w1_ref[...], preferred_element_type=jnp.float32)
    h = h + b1_ref[...]                               # (1, H) broadcast, f32
    g = _gelu_tanh_f32(h)
    out = jnp.dot(g.astype(jnp.bfloat16), w2_ref[...],
                  preferred_element_type=jnp.float32)
    o_ref[...] = (out + b2_ref[...]).astype(o_ref.dtype)


# ---------------------------------------------------------------------------
# Fallback path: tile the hidden (reduction) dim, accumulate into the f32 output.
# ---------------------------------------------------------------------------
def ffn_tiled_kernel(x_ref, w1_ref, b1_ref, w2_ref, b2_ref, o_ref):
    j = pl.program_id(1)

    # Fold the output bias in once per M tile (output block is resident across j).
    @pl.when(j == 0)
    def _():
        o_ref[...] = jnp.broadcast_to(b2_ref[...], o_ref.shape).astype(o_ref.dtype)

    h = jnp.dot(x_ref[...], w1_ref[...], preferred_element_type=jnp.float32)
    h = h + b1_ref[...]
    g = _gelu_tanh_f32(h)
    o_ref[...] += jnp.dot(g.astype(jnp.bfloat16), w2_ref[...],
                          preferred_element_type=jnp.float32)


def _largest_div_mult128(H, cap):
    """Largest multiple of 128 that divides H and is <= cap (H must be %128==0)."""
    cap = max(128, min(cap, H))
    best = 128
    d = 128
    while d <= cap:
        if H % d == 0:
            best = d
        d += 128
    return best


def _vmem_limit(bytes_needed):
    # 1.5x margin, floored at the default scoped limit, capped well under physical.
    return int(min(max(int(bytes_needed * 1.5), 32 << 20), 100 << 20))


def feed_forward(x, w1, b1, w2, b2, *, tm=512, th=1024,
                 resident_weight_limit_bytes=24 << 20):
    """x: (B, S, E). w1: (E, 4E), b1: (1, 4E), w2: (4E, E), b2: (1, E)."""
    B, S, E = x.shape
    H = w1.shape[1]
    assert E % 128 == 0 and H % 128 == 0, "emb/hidden dims must be multiples of 128"
    M = B * S

    # x in bf16: halves x DMA and matches the bf16 MXU inputs; tiles rounded to 16
    # (bf16 sublane packing).
    x2d = x.reshape(M, E).astype(jnp.bfloat16)
    tm_eff = min(tm, _round_up(M, 16))
    tm_eff = _round_up(tm_eff, 16)
    m_tiles = pl.cdiv(M, tm_eff)
    m_pad = m_tiles * tm_eff
    if m_pad != M:
        x2d = jnp.pad(x2d, ((0, m_pad - M), (0, 0)))

    # bf16 weights for the MXU (halves weight DMA); biases stay f32.
    w1c = w1.astype(jnp.bfloat16)
    w2c = w2.astype(jnp.bfloat16)
    b1c = b1.reshape(1, H).astype(jnp.float32)
    b2c = b2.reshape(1, E).astype(jnp.float32)

    weight_bytes = 2 * (E * H) * 2  # W1 + W2 in bf16
    use_resident = weight_bytes <= resident_weight_limit_bytes

    out_dtype = jnp.float32  # f32 accumulation / output; cast to x.dtype at the end

    if use_resident:
        # Single grid axis over M; weights/biases fully resident (constant index_map).
        need = (2 * tm_eff * E * 2          # x block, double-buffered, bf16
                + 2 * E * H * 2             # W1 (conservatively x2)
                + 2 * H * E * 2             # W2
                + 2 * (H + E) * 4           # biases
                + 2 * tm_eff * E * 4        # output block, f32
                + tm_eff * H * 6)           # f32 GELU intermediate + bf16 copy
        out = pl.pallas_call(
            ffn_resident_kernel,
            out_shape=jax.ShapeDtypeStruct((m_pad, E), out_dtype),
            grid_spec=pltpu.PrefetchScalarGridSpec(
                num_scalar_prefetch=0,
                grid=(m_tiles,),
                in_specs=[
                    pl.BlockSpec((tm_eff, E), lambda i: (i, 0)),   # x
                    pl.BlockSpec((E, H), lambda i: (0, 0)),        # W1 (resident)
                    pl.BlockSpec((1, H), lambda i: (0, 0)),        # b1 (resident)
                    pl.BlockSpec((H, E), lambda i: (0, 0)),        # W2 (resident)
                    pl.BlockSpec((1, E), lambda i: (0, 0)),        # b2 (resident)
                ],
                out_specs=pl.BlockSpec((tm_eff, E), lambda i: (i, 0)),
            ),
            compiler_params=pltpu.CompilerParams(
                dimension_semantics=("parallel",),   # M tiles shard across TensorCores
                vmem_limit_bytes=_vmem_limit(need),
            ),
        )(x2d, w1c, b1c, w2c, b2c)
    else:
        # Hidden (reduction) tile: largest 128-multiple divisor of H <= th.
        th_eff = _largest_div_mult128(H, th)
        h_tiles = H // th_eff
        need = (2 * tm_eff * E * 2
                + 2 * E * th_eff * 2
                + 2 * th_eff * E * 2
                + 2 * (th_eff + E) * 4
                + 2 * tm_eff * E * 4
                + tm_eff * th_eff * 6)
        out = pl.pallas_call(
            ffn_tiled_kernel,
            out_shape=jax.ShapeDtypeStruct((m_pad, E), out_dtype),
            grid_spec=pltpu.PrefetchScalarGridSpec(
                num_scalar_prefetch=0,
                grid=(m_tiles, h_tiles),
                in_specs=[
                    pl.BlockSpec((tm_eff, E), lambda i, j: (i, 0)),   # x
                    pl.BlockSpec((E, th_eff), lambda i, j: (0, j)),   # W1
                    pl.BlockSpec((1, th_eff), lambda i, j: (0, j)),   # b1
                    pl.BlockSpec((th_eff, E), lambda i, j: (j, 0)),   # W2
                    pl.BlockSpec((1, E), lambda i, j: (0, 0)),        # b2
                ],
                out_specs=pl.BlockSpec((tm_eff, E), lambda i, j: (i, 0)),
            ),
            compiler_params=pltpu.CompilerParams(
                dimension_semantics=("parallel", "arbitrary"),
                vmem_limit_bytes=_vmem_limit(need),
            ),
        )(x2d, w1c, b1c, w2c, b2c)

    return out[:M].reshape(B, S, E).astype(x.dtype)


if __name__ == "__main__":
    # Shapes consistent with the module spec: x = torch.rand(2, 3, 768), emb_dim=768.
    batch, seq, emb = 2, 3, 768
    hidden = 4 * emb

    key = jax.random.PRNGKey(0)
    kx, kw1, kb1, kw2, kb2 = jax.random.split(key, 5)

    x = jax.random.uniform(kx, (batch, seq, emb), dtype=jnp.float32)
    w1 = jax.random.normal(kw1, (emb, hidden), dtype=jnp.float32) * 0.02
    b1 = jax.random.normal(kb1, (1, hidden), dtype=jnp.float32) * 0.02
    w2 = jax.random.normal(kw2, (hidden, emb), dtype=jnp.float32) * 0.02
    b2 = jax.random.normal(kb2, (1, emb), dtype=jnp.float32) * 0.02

    y = feed_forward(x, w1, b1, w2, b2)
    y = jax.block_until_ready(y)

    # Reference 1: same bf16-MXU semantics (tight tolerance).
    c = jnp.sqrt(jnp.float32(2.0 / jnp.pi))
    xb = x.reshape(-1, emb).astype(jnp.bfloat16)
    h_ref = jnp.dot(xb, w1.astype(jnp.bfloat16), preferred_element_type=jnp.float32) + b1
    g_ref = 0.5 * h_ref * (1.0 + jnp.tanh(c * (h_ref + 0.044715 * h_ref**3)))
    y_bf16ref = (jnp.dot(g_ref.astype(jnp.bfloat16), w2.astype(jnp.bfloat16),
                         preferred_element_type=jnp.float32) + b2).reshape(batch, seq, emb)
    assert jnp.allclose(y, y_bf16ref, atol=2e-3, rtol=2e-3), "mismatch vs bf16-MXU reference"

    # Reference 2: pure f32 PyTorch semantics (loose tolerance, bf16 input rounding).
    h32 = x.reshape(-1, emb) @ w1 + b1
    g32 = 0.5 * h32 * (1.0 + jnp.tanh(c * (h32 + 0.044715 * h32**3)))
    y_f32ref = (g32 @ w2 + b2).reshape(batch, seq, emb)
    assert jnp.allclose(y, y_f32ref, atol=5e-2, rtol=5e-2), "mismatch vs f32 reference"

    print("KERNEL_OK")
</pallas_src>

<mosaic_0001>
module attributes {stable_mosaic.version = 11 : i64} {
  func.func @ffn_resident_kernel(%arg0: i32, %arg1: memref<16x768xbf16, #tpu.memory_space<vmem>>, %arg2: memref<768x3072xbf16, #tpu.memory_space<vmem>>, %arg3: memref<1x3072xf32, #tpu.memory_space<vmem>>, %arg4: memref<3072x768xbf16, #tpu.memory_space<vmem>>, %arg5: memref<1x768xf32, #tpu.memory_space<vmem>>, %arg6: memref<16x768xf32, #tpu.memory_space<vmem>>) attributes {dimension_semantics = [#tpu.dimension_semantics<parallel>], iteration_bounds = array<i64: 1>, scalar_prefetch = 0 : i64, scratch_operands = 0 : i64, tpu.core_type = #tpu.core_type<tc>, window_params = [{transform_indices = @transform_0, window_bounds = array<i64: 16, 768>}, {pipeline_mode = #tpu.pipeline_mode<synchronous>, transform_indices = @transform_1, window_bounds = array<i64: 768, 3072>}, {pipeline_mode = #tpu.pipeline_mode<synchronous>, transform_indices = @transform_2, window_bounds = array<i64: 1, 3072>}, {pipeline_mode = #tpu.pipeline_mode<synchronous>, transform_indices = @transform_3, window_bounds = array<i64: 3072, 768>}, {pipeline_mode = #tpu.pipeline_mode<synchronous>, transform_indices = @transform_4, window_bounds = array<i64: 1, 768>}, {transform_indices = @transform_5, window_bounds = array<i64: 16, 768>}]} {
    %c0 = arith.constant 0 : index
    %c0_0 = arith.constant 0 : index
    %0 = vector.load %arg1[%c0, %c0_0] : memref<16x768xbf16, #tpu.memory_space<vmem>>, vector<16x768xbf16>
    %c0_1 = arith.constant 0 : index
    %c0_2 = arith.constant 0 : index
    %1 = vector.load %arg2[%c0_1, %c0_2] : memref<768x3072xbf16, #tpu.memory_space<vmem>>, vector<768x3072xbf16>
    %cst = arith.constant dense<0.000000e+00> : vector<16x3072xf32>
    %2 = tpu.matmul %0, %1, %cst {dimension_numbers = #tpu.dot_dimension_numbers<[1], [0], [0], [1], [0, 0, 1, 1], [], []>} : vector<16x768xbf16>, vector<768x3072xbf16>, vector<16x3072xf32> -> vector<16x3072xf32>
    %c0_3 = arith.constant 0 : index
    %c0_4 = arith.constant 0 : index
    %3 = vector.load %arg3[%c0_3, %c0_4] : memref<1x3072xf32, #tpu.memory_space<vmem>>, vector<1x3072xf32>
    %4 = vector.broadcast %3 : vector<1x3072xf32> to vector<16x3072xf32>
    %5 = arith.addf %2, %4 : vector<16x3072xf32>
    %cst_5 = arith.constant 0.636619746 : f32
    %6 = math.sqrt %cst_5 : f32
    %cst_6 = arith.constant 5.000000e-01 : f32
    %7 = vector.broadcast %cst_6 : f32 to vector<16x3072xf32>
    %8 = arith.mulf %7, %5 : vector<16x3072xf32>
    %9 = arith.mulf %5, %5 : vector<16x3072xf32>
    %10 = arith.mulf %9, %5 : vector<16x3072xf32>
    %cst_7 = arith.constant 4.471500e-02 : f32
    %11 = vector.broadcast %cst_7 : f32 to vector<16x3072xf32>
    %12 = arith.mulf %11, %10 : vector<16x3072xf32>
    %13 = arith.addf %5, %12 : vector<16x3072xf32>
    %14 = vector.broadcast %6 : f32 to vector<16x3072xf32>
    %15 = arith.mulf %14, %13 : vector<16x3072xf32>
    %16 = math.tanh %15 : vector<16x3072xf32>
    %cst_8 = arith.constant 1.000000e+00 : f32
    %17 = vector.broadcast %cst_8 : f32 to vector<16x3072xf32>
    %18 = arith.addf %17, %16 : vector<16x3072xf32>
    %19 = arith.mulf %8, %18 : vector<16x3072xf32>
    %20 = arith.truncf %19 : vector<16x3072xf32> to vector<16x3072xbf16>
    %c0_9 = arith.constant 0 : index
    %c0_10 = arith.constant 0 : index
    %21 = vector.load %arg4[%c0_9, %c0_10] : memref<3072x768xbf16, #tpu.memory_space<vmem>>, vector<3072x768xbf16>
    %cst_11 = arith.constant dense<0.000000e+00> : vector<16x768xf32>
    %22 = tpu.matmul %20, %21, %cst_11 {dimension_numbers = #tpu.dot_dimension_numbers<[1], [0], [0], [1], [0, 0, 1, 1], [], []>} : vector<16x3072xbf16>, vector<3072x768xbf16>, vector<16x768xf32> -> vector<16x768xf32>
    %c0_12 = arith.constant 0 : index
    %c0_13 = arith.constant 0 : index
    %23 = vector.load %arg5[%c0_12, %c0_13] : memref<1x768xf32, #tpu.memory_space<vmem>>, vector<1x768xf32>
    %24 = vector.broadcast %23 : vector<1x768xf32> to vector<16x768xf32>
    %25 = arith.addf %22, %24 : vector<16x768xf32>
    %c0_14 = arith.constant 0 : index
    %c0_15 = arith.constant 0 : index
    %26 = vector.load %arg6[%c0_14, %c0_15] : memref<16x768xf32, #tpu.memory_space<vmem>>, vector<16x768xf32>
    tpu.vector_store %arg6[%c0_14, %c0_15], %25 {strides = array<i32>} : memref<16x768xf32, #tpu.memory_space<vmem>>, vector<16x768xf32>,
    return
  }
  func.func @transform_0(%arg0: i32) -> (i32, i32) {
    %c0_i32 = arith.constant 0 : i32
    %c0_i32_0 = arith.constant 0 : i32
    return %arg0, %c0_i32 : i32, i32
  }
  func.func @transform_1(%arg0: i32) -> (i32, i32) {
    %c0_i32 = arith.constant 0 : i32
    %c0_i32_0 = arith.constant 0 : i32
    %c0_i32_1 = arith.constant 0 : i32
    return %c0_i32, %c0_i32_0 : i32, i32
  }
  func.func @transform_2(%arg0: i32) -> (i32, i32) {
    %c0_i32 = arith.constant 0 : i32
    %c0_i32_0 = arith.constant 0 : i32
    %c0_i32_1 = arith.constant 0 : i32
    return %c0_i32, %c0_i32_0 : i32, i32
  }
  func.func @transform_3(%arg0: i32) -> (i32, i32) {
    %c0_i32 = arith.constant 0 : i32
    %c0_i32_0 = arith.constant 0 : i32
    %c0_i32_1 = arith.constant 0 : i32
    return %c0_i32, %c0_i32_0 : i32, i32
  }
  func.func @transform_4(%arg0: i32) -> (i32, i32) {
    %c0_i32 = arith.constant 0 : i32
    %c0_i32_0 = arith.constant 0 : i32
    %c0_i32_1 = arith.constant 0 : i32
    return %c0_i32, %c0_i32_0 : i32, i32
  }
  func.func @transform_5(%arg0: i32) -> (i32, i32) {
    %c0_i32 = arith.constant 0 : i32
    %c0_i32_0 = arith.constant 0 : i32
    return %arg0, %c0_i32 : i32, i32
  }
}

</mosaic_0001>

<bundles_post_ra>
// kernel: tpu_custom_call.1
= control target key start
LH: loop header
LB: loop body
LE: loop exit
PB: predicated region body
PF: predicated region fallthrough
CT: control target
= control target key end

     0   :  { %10 = vsyncpa [#allocation3], 0  ;;  %s23160_s0 = inlined_call_operand.hbm [shape: bf16[16,768], index: 0, kind: input, shape index: {}]   ;;  %s23161_s1 = inlined_call_operand.hbm [shape: bf16[768,3072], index: 1, kind: input, shape index: {}]   ;;  %s23162_s2 = inlined_call_operand.hbm [shape: f32[1,3072], index: 2, kind: input, shape index: {}]   ;;  %s23163_s3 = inlined_call_operand.hbm [shape: bf16[3072,768], index: 3, kind: input, shape index: {}]   ;;  %s23164_s4 = inlined_call_operand.hbm [shape: f32[1,768], index: 4, kind: input, shape index: {}]   ;;  %s23165_s5 = inlined_call_operand.hbm [shape: f32[16,768], index: 5, kind: output, shape index: {}]  }
   0x1   :  { %11 = vsyncpa [#allocation6], 0 }
   0x2   :  { %12 = vsyncpa [#allocation9], 0 }
   0x3   :  { %13 = vsyncpa [#allocation4], 0  ;;  %s22010_s18 = smov [#allocation5]  }
   0x4   :  { %s31_s19 = sshll.u32 %s22010_s18, 4  ;;  %s32_s19 = int_to_ptr.vmem [resolvable:$true] %s31_s19 }
   0x5   :  { %s21890_s20 = scalar_lea.vmem %s32_s19, 147456  ;;  %p21895_p1 = scmp.lt.s32.totalorder %s32_s19, %s32_s19 }
   0x6   :  { %p21891_p0 = scmp.ne.s32.totalorder %s32_s19, %s21890_s20  ;;  %p21896_p2 = scmp.lt.s32.totalorder %s21890_s20, %s21890_s20 }
   0x8   :  { %p21897_p3 = por %p21896_p2, %p21895_p1 }
   0xa   :  { %p21898_p4 = pnand %p21897_p3, %p21891_p0 }
   0xc   :  { %21901 = shalt.err (!%p21898_p4)
}
   0xd   :  { %s22011_s21 = smov 1536   ;;  %s22012_s22 = smov 96  }
   0xe   :  { %37 = dma.hbm_to_vmem [thread:$0]  %s23161_s1, 147456, %s32_s19, [#allocation6], %s22011_s21, %s22011_s21, %s22012_s22  }
   0xf   :  { %s22013_s25 = smov [#allocation8]   ;;  %s22014_s27 = smov [#allocation2]  }
  0x10   :  { %s53_s26 = sshll.u32 %s22013_s25, 4  ;;  %s19_s28 = sshll.u32 %s22014_s27, 4  ;;  %s54_s26 = int_to_ptr.vmem [resolvable:$true] %s53_s26  ;;  %s20_s28 = int_to_ptr.vmem [resolvable:$true] %s19_s28 }
  0x11   :  { %s21910_s29 = scalar_lea.vmem %s54_s26, 147456  ;;  %p21915_p6 = scmp.lt.s32.totalorder %s54_s26, %s54_s26 }
  0x12   :  { %p21911_p5 = scmp.ne.s32.totalorder %s54_s26, %s21910_s29  ;;  %p21916_p7 = scmp.lt.s32.totalorder %s21910_s29, %s21910_s29 }
  0x14   :  { %p21917_p8 = por %p21916_p7, %p21915_p6 }
  0x16   :  { %p21918_p9 = pnand %p21917_p8, %p21911_p5 }
  0x18   :  { %21921 = shalt.err (!%p21918_p9)
}
  0x19   :  { %s22015_s30 = smov 384   ;;  %s22016_s6 = smov 24  }
  0x1a   :  { %59 = dma.hbm_to_vmem [thread:$0]  %s23163_s3, 147456, %s54_s26, [#allocation9], %s22015_s30, %s22015_s30, %s22016_s6  }
  0x1b   :  { %s21930_s1 = scalar_lea.vmem %s20_s28, 768  ;;  %p21935_p11 = scmp.lt.s32.totalorder %s20_s28, %s20_s28 }
  0x1c   :  { %p21931_p10 = scmp.ne.s32.totalorder %s20_s28, %s21930_s1  ;;  %p21936_p12 = scmp.lt.s32.totalorder %s21930_s1, %s21930_s1 }
  0x1e   :  { %p21937_p13 = por %p21936_p12, %p21935_p11 }
  0x20   :  { %p21938_p0 = pnand %p21937_p13, %p21931_p10 }
  0x22   :  { %21941 = shalt.err (!%p21938_p0)
}
  0x23   :  { %25 = dma.hbm_to_vmem [thread:$0]  %s23160_s0, 768, %s20_s28, [#allocation3], %s22015_s30, %s22015_s30, %s22016_s6  }
  0x24   :  { %s22017_s11 = smov [#allocation7]   ;;  %s22018_s13 = smov [#allocation10]  }
  0x25   :  { %s44_s12 = sshll.u32 %s22017_s11, 4  ;;  %s66_s14 = sshll.u32 %s22018_s13, 4  ;;  %s45_s12 = int_to_ptr.vmem [resolvable:$true] %s44_s12  ;;  %s67_s14 = int_to_ptr.vmem [resolvable:$true] %s66_s14 }
  0x26   :  { %s21950_s15 = scalar_lea.vmem %s45_s12, 384  ;;  %p21955_p2 = scmp.lt.s32.totalorder %s45_s12, %s45_s12 }
  0x27   :  { %p21951_p1 = scmp.ne.s32.totalorder %s45_s12, %s21950_s15  ;;  %p21956_p3 = scmp.lt.s32.totalorder %s21950_s15, %s21950_s15 }
  0x29   :  { %p21957_p4 = por %p21956_p3, %p21955_p2 }
  0x2b   :  { %p21958_p5 = pnand %p21957_p4, %p21951_p1 }
  0x2d   :  { %21961 = shalt.err (!%p21958_p5)
}
  0x2e   :  { %47 = dma.hbm_to_vmem [thread:$0]  %s23162_s2, 384, %s45_s12, [#allocation6]  }
  0x2f   :  { %s21970_s17 = scalar_lea.vmem %s67_s14, 96  ;;  %p21975_p7 = scmp.lt.s32.totalorder %s67_s14, %s67_s14 }
  0x30   :  { %p21971_p6 = scmp.ne.s32.totalorder %s67_s14, %s21970_s17  ;;  %p21976_p8 = scmp.lt.s32.totalorder %s21970_s17, %s21970_s17 }
  0x32   :  { %p21977_p9 = por %p21976_p8, %p21975_p7 }
  0x34   :  { %p21978_p10 = pnand %p21977_p9, %p21971_p6 }
  0x36   :  { %21981 = shalt.err (!%p21978_p10)
}
  0x37   :  { %69 = dma.hbm_to_vmem [thread:$0]  %s23164_s4, 96, %s67_s14, [#allocation9]  }
  0x38   :  { %22002 = dma.done.wait [#allocation3], 768  }
  0x39   :  { %22003 = vsyncadd [#allocation3], 4294966528 }
  0x3a   :  { %22004 = dma.done.wait [#allocation6], 147840  }
  0x3b   :  { %22005 = vsyncadd [#allocation6], 4294819456 }
  0x3c   :  { %22006 = dma.done.wait [#allocation9], 147552  }
  0x3d   :  { %22007 = vsyncadd [#allocation9], 4294819744  ;;  %v259_v0 = vld [vmem:[#allocation5 + $0x540] sm:$0xff]  ;;  %v22067_v56 = vld [vmem:[#allocation2 + $0x4] ss:$24 sps:$4 sm:$0xff]   ;;  %s22019_s2 = smov [#allocation11]  }
  0x3e   :  { %v271_v1 = vld [vmem:[#allocation5 + $0x5a0] sm:$0xff]  ;;  %v22069_v59 = vld [vmem:[#allocation2 + $0xc] ss:$24 sps:$4 sm:$0xff]   ;;  %7191 = vmatprep.mubr.bf16.mxu0 %v22067_v56  ;;  %s17672_s4 = sshll.u32 %s22019_s2, 4  ;;  %s17673_s4 = int_to_ptr.vmem [resolvable:$true] %s17672_s4 }
  0x3f   :  { %v643_v2 = vld [vmem:[#allocation5 + $0x1140] sm:$0xff]  ;;  %v17861_v3 = vcombine.high %v259_v0, %v271_v1  ;;  %v17860_v5 = vcombine.low %v259_v0, %v271_v1  ;;  %7234 = vmatprep.mubr.bf16.mxu1 %v22069_v59  ;;  %s21982_s19 = scalar_lea.vmem %s17673_s4, 1536  ;;  %p21987_p12 = scmp.lt.s32.totalorder %s17673_s4, %s17673_s4 }
  0x40   :  { %v655_v4 = vld [vmem:[#allocation5 + $0x11a0] sm:$0xff]  ;;  %p21983_p11 = scmp.ne.s32.totalorder %s17673_s4, %s21982_s19  ;;  %p21988_p13 = scmp.lt.s32.totalorder %s21982_s19, %s21982_s19 }
  0x41   :  { %v235_v6 = vld [vmem:[#allocation5 + $0x480] sm:$0xff]  ;;  %v18245_v8 = vcombine.high %v643_v2, %v655_v4  ;;  %v18244_v9 = vcombine.low %v643_v2, %v655_v4  ;;  %7159 = vmatprep.subr.bf16.mxu0 %v17861_v3 }
  0x42   :  { %v247_v7 = vld [vmem:[#allocation5 + $0x4e0] sm:$0xff]  ;;  %7160 = vmatpush1.bf16.msra.mxu0 %v17860_v5  ;;  %p21989_p0 = por %p21988_p13, %p21987_p12 }
  0x43   :  { %v17837_v10 = vcombine.high %v235_v6, %v247_v7  ;;  %v619_v11 = vld [vmem:[#allocation5 + $0x1080] sm:$0xff]  ;;  %7202 = vmatprep.subr.bf16.mxu1 %v18245_v8  ;;  %v17836_v18 = vcombine.low %v235_v6, %v247_v7 }
  0x44   :  { %v631_v12 = vld [vmem:[#allocation5 + $0x10e0] sm:$0xff]  ;;  %7203 = vmatpush1.bf16.msra.mxu1 %v18244_v9  ;;  %p21990_p1 = pnand %p21989_p0, %p21983_p11 }
  0x45   :  { %v211_v13 = vld [vmem:[#allocation5 + $0x3c0] sm:$0xff]  ;;  %v18221_v14 = vcombine.high %v619_v11, %v631_v12  ;;  %7161 = vmatprep.subr.bf16.mxu0 %v17837_v10  ;;  %v18220_v19 = vcombine.low %v619_v11, %v631_v12 }
  0x46   :  { %v223_v15 = vld [vmem:[#allocation5 + $0x420] sm:$0xff]  ;;  %7162 = vmatpush1.bf16.msra.mxu0 %v17836_v18 }
  0x47   :  { %v595_v16 = vld [vmem:[#allocation5 + $0xfc0] sm:$0xff]  ;;  %v17813_v20 = vcombine.high %v211_v13, %v223_v15  ;;  %7204 = vmatprep.subr.bf16.mxu1 %v18221_v14  ;;  %v17812_v26 = vcombine.low %v211_v13, %v223_v15 }
  0x48   :  { %v607_v17 = vld [vmem:[#allocation5 + $0x1020] sm:$0xff]  ;;  %7205 = vmatpush1.bf16.msra.mxu1 %v18220_v19 }
  0x49   :  { %v18197_v21 = vcombine.high %v595_v16, %v607_v17  ;;  %v187_v22 = vld [vmem:[#allocation5 + $0x300] sm:$0xff]  ;;  %7163 = vmatprep.subr.bf16.mxu0 %v17813_v20  ;;  %v18196_v27 = vcombine.low %v595_v16, %v607_v17 }
  0x4a   :  { %v199_v23 = vld [vmem:[#allocation5 + $0x360] sm:$0xff]  ;;  %7164 = vmatpush1.bf16.msra.mxu0 %v17812_v26 }
  0x4b   :  { %v571_v24 = vld [vmem:[#allocation5 + $0xf00] sm:$0xff]  ;;  %v17789_v28 = vcombine.high %v187_v22, %v199_v23  ;;  %7206 = vmatprep.subr.bf16.mxu1 %v18197_v21  ;;  %v17788_v34 = vcombine.low %v187_v22, %v199_v23 }
  0x4c   :  { %v583_v25 = vld [vmem:[#allocation5 + $0xf60] sm:$0xff]  ;;  %7207 = vmatpush1.bf16.msra.mxu1 %v18196_v27 }
  0x4d   :  { %v18173_v29 = vcombine.high %v571_v24, %v583_v25  ;;  %v163_v30 = vld [vmem:[#allocation5 + $0x240] sm:$0xff]  ;;  %7165 = vmatprep.subr.bf16.mxu0 %v17789_v28  ;;  %v18172_v35 = vcombine.low %v571_v24, %v583_v25 }
  0x4e   :  { %v175_v31 = vld [vmem:[#allocation5 + $0x2a0] sm:$0xff]  ;;  %7166 = vmatpush1.bf16.msra.mxu0 %v17788_v34 }
  0x4f   :  { %v547_v32 = vld [vmem:[#allocation5 + $0xe40] sm:$0xff]  ;;  %v17765_v36 = vcombine.high %v163_v30, %v175_v31  ;;  %7208 = vmatprep.subr.bf16.mxu1 %v18173_v29  ;;  %v17764_v42 = vcombine.low %v163_v30, %v175_v31 }
  0x50   :  { %v559_v33 = vld [vmem:[#allocation5 + $0xea0] sm:$0xff]  ;;  %7209 = vmatpush1.bf16.msra.mxu1 %v18172_v35 }
  0x51   :  { %v18149_v37 = vcombine.high %v547_v32, %v559_v33  ;;  %v139_v38 = vld [vmem:[#allocation5 + $0x180] sm:$0xff]  ;;  %7167 = vmatprep.subr.bf16.mxu0 %v17765_v36  ;;  %v18148_v43 = vcombine.low %v547_v32, %v559_v33 }
  0x52   :  { %v151_v39 = vld [vmem:[#allocation5 + $0x1e0] sm:$0xff]  ;;  %7168 = vmatpush1.bf16.msra.mxu0 %v17764_v42 }
  0x53   :  { %v523_v40 = vld [vmem:[#allocation5 + $0xd80] sm:$0xff]  ;;  %v17741_v44 = vcombine.high %v139_v38, %v151_v39  ;;  %7210 = vmatprep.subr.bf16.mxu1 %v18149_v37  ;;  %v17740_v50 = vcombine.low %v139_v38, %v151_v39 }
  0x54   :  { %v535_v41 = vld [vmem:[#allocation5 + $0xde0] sm:$0xff]  ;;  %7211 = vmatpush1.bf16.msra.mxu1 %v18148_v43 }
  0x55   :  { %v18125_v45 = vcombine.high %v523_v40, %v535_v41  ;;  %v115_v46 = vld [vmem:[#allocation5 + $0xc0] sm:$0xff]  ;;  %7169 = vmatprep.subr.bf16.mxu0 %v17741_v44  ;;  %v18124_v52 = vcombine.low %v523_v40, %v535_v41 }
  0x56   :  { %v127_v47 = vld [vmem:[#allocation5 + $0x120] sm:$0xff]  ;;  %7170 = vmatpush1.bf16.msra.mxu0 %v17740_v50 }
  0x57   :  { %v499_v48 = vld [vmem:[#allocation5 + $0xcc0] sm:$0xff]  ;;  %v17717_v53 = vcombine.high %v115_v46, %v127_v47  ;;  %7212 = vmatprep.subr.bf16.mxu1 %v18125_v45  ;;  %v17716_v60 = vcombine.low %v115_v46, %v127_v47 }
  0x58   :  { %v511_v49 = vld [vmem:[#allocation5 + $0xd20] sm:$0xff]  ;;  %7213 = vmatpush1.bf16.msra.mxu1 %v18124_v52 }
  0x59   :  { %v91_v51 = vld [vmem:[#allocation5] sm:$0xff]  ;;  %v18101_v55 = vcombine.high %v499_v48, %v511_v49  ;;  %7171 = vmatprep.subr.bf16.mxu0 %v17717_v53  ;;  %v18100_v61 = vcombine.low %v499_v48, %v511_v49 }
  0x5a   :  { %v103_v54 = vld [vmem:[#allocation5 + $0x60] sm:$0xff]  ;;  %7172 = vmatpush1.bf16.msra.mxu0 %v17716_v60 }
  0x5b   :  { %v475_v57 = vld [vmem:[#allocation5 + $0xc00] sm:$0xff]  ;;  %v17693_v62 = vcombine.high %v91_v51, %v103_v54  ;;  %7214 = vmatprep.subr.bf16.mxu1 %v18101_v55  ;;  %v17692_v4 = vcombine.low %v91_v51, %v103_v54 }
  0x5c   :  { %v487_v58 = vld [vmem:[#allocation5 + $0xc60] sm:$0xff]  ;;  %7215 = vmatpush1.bf16.msra.mxu1 %v18100_v61 }
  0x5d   :  { %v18077_v63 = vcombine.high %v475_v57, %v487_v58  ;;  %v451_v0 = vld [vmem:[#allocation5 + $0xb40] sm:$0xff]  ;;  %7173 = vmatprep.subr.bf16.mxu0 %v17693_v62  ;;  %v18076_v5 = vcombine.low %v475_v57, %v487_v58 }
  0x5e   :  { %v463_v1 = vld [vmem:[#allocation5 + $0xba0] sm:$0xff]  ;;  %7174 = vmatpush1.bf16.msra.mxu0 %v17692_v4  ;;  %v260_v4 = vld [vmem:[#allocation5 + $0x548] sm:$0xff] }
  0x5f   :  { %v835_v2 = vld [vmem:[#allocation5 + $0x1740] sm:$0xff]  ;;  %v18053_v6 = vcombine.high %v451_v0, %v463_v1  ;;  %7216 = vmatprep.subr.bf16.mxu1 %v18077_v63  ;;  %v18052_v12 = vcombine.low %v451_v0, %v463_v1 }
  0x60   :  { %v847_v3 = vld [vmem:[#allocation5 + $0x17a0] sm:$0xff]  ;;  %7217 = vmatpush1.bf16.msra.mxu1 %v18076_v5  ;;  %v272_v5 = vld [vmem:[#allocation5 + $0x5a8] sm:$0xff] }
  0x61   :  { %v18437_v7 = vcombine.high %v835_v2, %v847_v3  ;;  %v427_v8 = vld [vmem:[#allocation5 + $0xa80] sm:$0xff]  ;;  %7175 = vmatprep.subr.bf16.mxu0 %v18053_v6  ;;  %v18436_v13 = vcombine.low %v835_v2, %v847_v3 }
  0x62   :  { %v439_v9 = vld [vmem:[#allocation5 + $0xae0] sm:$0xff]  ;;  %7176 = vmatpush2.bf16.msra.mxu0 %v18052_v12  ;;  %v22073_v12 = vld [vmem:[#allocation2] ss:$24 sps:$4 sm:$0xff]  }
  0x63   :  { %v811_v10 = vld [vmem:[#allocation5 + $0x1680] sm:$0xff]  ;;  %v18029_v14 = vcombine.high %v427_v8, %v439_v9  ;;  %7218 = vmatprep.subr.bf16.mxu1 %v18437_v7  ;;  %v18028_v20 = vcombine.low %v427_v8, %v439_v9  ;;  %v17863_v9 = vcombine.high %v260_v4, %v272_v5 }
  0x64   :  { %v823_v11 = vld [vmem:[#allocation5 + $0x16e0] sm:$0xff]  ;;  %7219 = vmatpush2.bf16.msra.mxu1 %v18436_v13  ;;  %v236_v13 = vld [vmem:[#allocation5 + $0x488] sm:$0xff] }
  0x65   :  { %v18413_v15 = vcombine.high %v811_v10, %v823_v11  ;;  %v403_v16 = vld [vmem:[#allocation5 + $0x9c0] sm:$0xff]  ;;  %7177 = vmatprep.subr.bf16.mxu0 %v18029_v14  ;;  %v18412_v21 = vcombine.low %v811_v10, %v823_v11  ;;  %v248_v14 = vld [vmem:[#allocation5 + $0x4e8] sm:$0xff] }
  0x66   :  { %v415_v17 = vld [vmem:[#allocation5 + $0xa20] sm:$0xff]  ;;  %7178 = vmatpush2.bf16.msra.mxu0 %v18028_v20 }
  0x67   :  { %v787_v18 = vld [vmem:[#allocation5 + $0x15c0] sm:$0xff]  ;;  %v18005_v22 = vcombine.high %v403_v16, %v415_v17  ;;  %7220 = vmatprep.subr.bf16.mxu1 %v18413_v15  ;;  %v18004_v28 = vcombine.low %v403_v16, %v415_v17  ;;  %v20013_v15 = vld [vmem:[#allocation2 + $0x8] ss:$24 sps:$4 sm:$0xff]   ;;  %v17862_v17 = vcombine.low %v260_v4, %v272_v5 }
  0x68   :  { %v799_v19 = vld [vmem:[#allocation5 + $0x1620] sm:$0xff]  ;;  %7221 = vmatpush2.bf16.msra.mxu1 %v18412_v21 }
  0x69   :  { %v18389_v23 = vcombine.high %v787_v18, %v799_v19  ;;  %v379_v24 = vld [vmem:[#allocation5 + $0x900] sm:$0xff]  ;;  %7179 = vmatprep.subr.bf16.mxu0 %v18005_v22  ;;  %v18388_v29 = vcombine.low %v787_v18, %v799_v19  ;;  %v17839_v19 = vcombine.high %v236_v13, %v248_v14 }
  0x6a   :  { %v391_v25 = vld [vmem:[#allocation5 + $0x960] sm:$0xff]  ;;  %7180 = vmatpush2.bf16.msra.mxu0 %v18004_v28 }
  0x6b   :  { %v763_v26 = vld [vmem:[#allocation5 + $0x1500] sm:$0xff]  ;;  %v17981_v30 = vcombine.high %v379_v24, %v391_v25  ;;  %7222 = vmatprep.subr.bf16.mxu1 %v18389_v23  ;;  %v17980_v36 = vcombine.low %v379_v24, %v391_v25  ;;  %v212_v23 = vld [vmem:[#allocation5 + $0x3c8] sm:$0xff] }
  0x6c   :  { %v775_v27 = vld [vmem:[#allocation5 + $0x1560] sm:$0xff]  ;;  %7223 = vmatpush2.bf16.msra.mxu1 %v18388_v29  ;;  %v224_v24 = vld [vmem:[#allocation5 + $0x428] sm:$0xff] }
  0x6d   :  { %v18365_v31 = vcombine.high %v763_v26, %v775_v27  ;;  %v355_v32 = vld [vmem:[#allocation5 + $0x840] sm:$0xff]  ;;  %7181 = vmatprep.subr.bf16.mxu0 %v17981_v30  ;;  %v18364_v37 = vcombine.low %v763_v26, %v775_v27  ;;  %v17838_v26 = vcombine.low %v236_v13, %v248_v14  ;;  %v17815_v30 = vcombine.high %v212_v23, %v224_v24 }
  0x6e   :  { %v367_v33 = vld [vmem:[#allocation5 + $0x8a0] sm:$0xff]  ;;  %7182 = vmatpush2.bf16.msra.mxu0 %v17980_v36 }
  0x6f   :  { %v739_v34 = vld [vmem:[#allocation5 + $0x1440] sm:$0xff]  ;;  %v17957_v38 = vcombine.high %v355_v32, %v367_v33  ;;  %7224 = vmatprep.subr.bf16.mxu1 %v18365_v31  ;;  %v17956_v44 = vcombine.low %v355_v32, %v367_v33  ;;  %v188_v31 = vld [vmem:[#allocation5 + $0x308] sm:$0xff] }
  0x70   :  { %v751_v35 = vld [vmem:[#allocation5 + $0x14a0] sm:$0xff]  ;;  %7225 = vmatpush2.bf16.msra.mxu1 %v18364_v37  ;;  %v200_v32 = vld [vmem:[#allocation5 + $0x368] sm:$0xff] }
  0x71   :  { %v18341_v39 = vcombine.high %v739_v34, %v751_v35  ;;  %v331_v40 = vld [vmem:[#allocation5 + $0x780] sm:$0xff]  ;;  %7183 = vmatprep.subr.bf16.mxu0 %v17957_v38  ;;  %v18340_v45 = vcombine.low %v739_v34, %v751_v35  ;;  %v17814_v34 = vcombine.low %v212_v23, %v224_v24  ;;  %v164_v38 = vld [vmem:[#allocation5 + $0x248] sm:$0xff] }
  0x72   :  { %v343_v41 = vld [vmem:[#allocation5 + $0x7e0] sm:$0xff]  ;;  %7184 = vmatpush2.bf16.msra.mxu0 %v17956_v44 }
  0x73   :  { %v715_v42 = vld [vmem:[#allocation5 + $0x1380] sm:$0xff]  ;;  %v17933_v46 = vcombine.high %v331_v40, %v343_v41  ;;  %7226 = vmatprep.subr.bf16.mxu1 %v18341_v39  ;;  %v17932_v52 = vcombine.low %v331_v40, %v343_v41  ;;  %v17791_v39 = vcombine.high %v188_v31, %v200_v32  ;;  %v176_v40 = vld [vmem:[#allocation5 + $0x2a8] sm:$0xff] }
  0x74   :  { %v727_v43 = vld [vmem:[#allocation5 + $0x13e0] sm:$0xff]  ;;  %7227 = vmatpush2.bf16.msra.mxu1 %v18340_v45  ;;  %v140_v45 = vld [vmem:[#allocation5 + $0x188] sm:$0xff] }
  0x75   :  { %v18317_v47 = vcombine.high %v715_v42, %v727_v43  ;;  %v307_v48 = vld [vmem:[#allocation5 + $0x6c0] sm:$0xff]  ;;  %7185 = vmatprep.subr.bf16.mxu0 %v17933_v46  ;;  %v18316_v53 = vcombine.low %v715_v42, %v727_v43  ;;  %v17790_v42 = vcombine.low %v188_v31, %v200_v32  ;;  %v17767_v46 = vcombine.high %v164_v38, %v176_v40 }
  0x76   :  { %v319_v49 = vld [vmem:[#allocation5 + $0x720] sm:$0xff]  ;;  %7186 = vmatpush2.bf16.msra.mxu0 %v17932_v52 }
  0x77   :  { %v691_v50 = vld [vmem:[#allocation5 + $0x12c0] sm:$0xff]  ;;  %v17909_v54 = vcombine.high %v307_v48, %v319_v49  ;;  %7228 = vmatprep.subr.bf16.mxu1 %v18317_v47  ;;  %v17908_v62 = vcombine.low %v307_v48, %v319_v49  ;;  %v152_v47 = vld [vmem:[#allocation5 + $0x1e8] sm:$0xff]  ;;  %v17766_v49 = vcombine.low %v164_v38, %v176_v40 }
  0x78   :  { %v703_v51 = vld [vmem:[#allocation5 + $0x1320] sm:$0xff]  ;;  %7229 = vmatpush2.bf16.msra.mxu1 %v18316_v53  ;;  %v116_v53 = vld [vmem:[#allocation5 + $0xc8] sm:$0xff] }
  0x79   :  { %v18293_v55 = vcombine.high %v691_v50, %v703_v51  ;;  %v283_v57 = vld [vmem:[#allocation5 + $0x600] sm:$0xff]  ;;  %7187 = vmatprep.subr.bf16.mxu0 %v17909_v54  ;;  %v18292_v63 = vcombine.low %v691_v50, %v703_v51  ;;  %v17743_v54 = vcombine.high %v140_v45, %v152_v47 }
  0x7a   :  { %v295_v58 = vld [vmem:[#allocation5 + $0x660] sm:$0xff]  ;;  %7188 = vmatpush2.bf16.msra.mxu0 %v17908_v62 }
  0x7b   :  { %v667_v60 = vld [vmem:[#allocation5 + $0x1200] sm:$0xff]  ;;  %v17885_v0 = vcombine.high %v283_v57, %v295_v58  ;;  %7230 = vmatprep.subr.bf16.mxu1 %v18293_v55  ;;  %v17884_v6 = vcombine.low %v283_v57, %v295_v58  ;;  %v128_v55 = vld [vmem:[#allocation5 + $0x128] sm:$0xff]  ;;  %v17742_v58 = vcombine.low %v140_v45, %v152_v47 }
  0x7c   :  { %v679_v61 = vld [vmem:[#allocation5 + $0x1260] sm:$0xff]  ;;  %7231 = vmatpush2.bf16.msra.mxu1 %v18292_v63  ;;  %v92_v63 = vld [vmem:[#allocation5 + $0x8] sm:$0xff] }
  0x7d   :  { %v18269_v1 = vcombine.high %v667_v60, %v679_v61  ;;  %v1027_v2 = vld [vmem:[#allocation5 + $0x1d40] sm:$0xff]  ;;  %7189 = vmatprep.subr.bf16.mxu0 %v17885_v0  ;;  %v18268_v7 = vcombine.low %v667_v60, %v679_v61  ;;  %v17719_v0 = vcombine.high %v116_v53, %v128_v55 }
  0x7e   :  { %v1039_v3 = vld [vmem:[#allocation5 + $0x1da0] sm:$0xff]  ;;  %7190 = vmatpush2.bf16.msra.mxu0 %v17884_v6 }
  0x7f   :  { %v18629_v8 = vcombine.high %v1027_v2, %v1039_v3  ;;  %7232 = vmatprep.subr.bf16.mxu1 %v18269_v1  ;;  %v1003_v10 = vld [vmem:[#allocation5 + $0x1c80] sm:$0xff]  ;;  %v18628_v16 = vcombine.low %v1027_v2, %v1039_v3  ;;  %v104_v1 = vld [vmem:[#allocation5 + $0x68] sm:$0xff]  ;;  %v17718_v3 = vcombine.low %v116_v53, %v128_v55 }
  0x80   :  { %v1015_v11 = vld [vmem:[#allocation5 + $0x1ce0] sm:$0xff]  ;;  %7233 = vmatpush2.bf16.msra.mxu1 %v18268_v7  ;;  %v452_v7 = vld [vmem:[#allocation5 + $0xb48] sm:$0xff] }
  0x81   :  { %7245 = vmatprep.subr.bf16.mxu0 %v18629_v8  ;;  %v18605_v18 = vcombine.high %v1003_v10, %v1015_v11  ;;  %7288 = vmatprep.subr.bf16.mxu1 %v17863_v9  ;;  %v979_v20 = vld [vmem:[#allocation5 + $0x1bc0] sm:$0xff]  ;;  %v18604_v25 = vcombine.low %v1003_v10, %v1015_v11  ;;  %v17695_v8 = vcombine.high %v92_v63, %v104_v1  ;;  %v464_v9 = vld [vmem:[#allocation5 + $0xba8] sm:$0xff] }
  0x82   :  { %v991_v21 = vld [vmem:[#allocation5 + $0x1c20] sm:$0xff]  ;;  %7192 = vmatmul.mubr.bf16.vlgmr.msra.gmra.mxu0 %v22073_v12  ;;  %v17694_v11 = vcombine.low %v92_v63, %v104_v1 }
  0x83   :  { %v22075_v22 = vld [vmem:[#allocation2 + $0x14] ss:$24 sps:$4 sm:$0xff]   ;;  %7235 = vmatmul.mubr.bf16.vlgmr.msra.gmra.mxu1 %v20013_v15  ;;  %7246 = vmatpush1.bf16.msra.mxu0 %v18628_v16  ;;  %v18581_v27 = vcombine.high %v979_v20, %v991_v21  ;;  %v18580_v33 = vcombine.low %v979_v20, %v991_v21  ;;  %v428_v16 = vld [vmem:[#allocation5 + $0xa88] sm:$0xff]  ;;  %v18054_v20 = vcombine.low %v452_v7, %v464_v9 }
  0x84   :  { %7289 = vmatpush1.bf16.msra.mxu1 %v17862_v17  ;;  %7247 = vmatprep.subr.bf16.mxu0 %v18605_v18  ;;  %v955_v28 = vld [vmem:[#allocation5 + $0x1b00] sm:$0xff]  ;;  %v18055_v17 = vcombine.high %v452_v7, %v464_v9  ;;  %v440_v18 = vld [vmem:[#allocation5 + $0xae8] sm:$0xff] }
  0x85   :  { %v967_v29 = vld [vmem:[#allocation5 + $0x1b60] sm:$0xff]  ;;  %7290 = vmatprep.subr.bf16.mxu1 %v17839_v19  ;;  %7277 = vmatprep.mubr.bf16.mxu0 %v22075_v22  ;;  %v656_v9 = vld [vmem:[#allocation5 + $0x11a8] sm:$0xff] }
  0x86   :  { %7320 = vmatprep.mubr.bf16.mxu1 %v22067_v56  ;;  %v18557_v35 = vcombine.high %v955_v28, %v967_v29  ;;  %v931_v36 = vld [vmem:[#allocation5 + $0x1a40] sm:$0xff]  ;;  %v18556_v41 = vcombine.low %v955_v28, %v967_v29  ;;  %v18030_v29 = vcombine.low %v428_v16, %v440_v18 }
  0x87   :  { %7248 = vmatpush1.bf16.msra.mxu0 %v18604_v25  ;;  %v943_v37 = vld [vmem:[#allocation5 + $0x1aa0] sm:$0xff]  ;;  %v404_v25 = vld [vmem:[#allocation5 + $0x9c8] sm:$0xff] }
  0x88   :  { %7291 = vmatpush1.bf16.msra.mxu1 %v17838_v26  ;;  %7249 = vmatprep.subr.bf16.mxu0 %v18581_v27  ;;  %v18533_v43 = vcombine.high %v931_v36, %v943_v37  ;;  %v907_v44 = vld [vmem:[#allocation5 + $0x1980] sm:$0xff]  ;;  %v18532_v48 = vcombine.low %v931_v36, %v943_v37  ;;  %v18031_v26 = vcombine.high %v428_v16, %v440_v18  ;;  %v416_v27 = vld [vmem:[#allocation5 + $0xa28] sm:$0xff] }
  0x89   :  { %7292 = vmatprep.subr.bf16.mxu1 %v17815_v30  ;;  %v919_v56 = vld [vmem:[#allocation5 + $0x19e0] sm:$0xff]  ;;  %v18006_v37 = vcombine.low %v404_v25, %v416_v27  ;;  %v620_v18 = vld [vmem:[#allocation5 + $0x1088] sm:$0xff] }
  0x8a   :  { %v18509_v50 = vcombine.high %v907_v44, %v919_v56  ;;  %v883_v51 = vld [vmem:[#allocation5 + $0x18c0] sm:$0xff]  ;;  %v18508_v57 = vcombine.low %v907_v44, %v919_v56 }
  0x8b   :  { %7250 = vmatpush1.bf16.msra.mxu0 %v18580_v33  ;;  %v895_v52 = vld [vmem:[#allocation5 + $0x1920] sm:$0xff]  ;;  %v380_v33 = vld [vmem:[#allocation5 + $0x908] sm:$0xff] }
  0x8c   :  { %7293 = vmatpush1.bf16.msra.mxu1 %v17814_v34  ;;  %7251 = vmatprep.subr.bf16.mxu0 %v18557_v35  ;;  %v18485_v60 = vcombine.high %v883_v51, %v895_v52  ;;  %v859_v61 = vld [vmem:[#allocation5 + $0x1800] sm:$0xff]  ;;  %v18484_v2 = vcombine.low %v883_v51, %v895_v52  ;;  %v18007_v34 = vcombine.high %v404_v25, %v416_v27  ;;  %v392_v35 = vld [vmem:[#allocation5 + $0x968] sm:$0xff] }
  0x8d   :  { %7294 = vmatprep.subr.bf16.mxu1 %v17791_v39  ;;  %v871_v62 = vld [vmem:[#allocation5 + $0x1860] sm:$0xff]  ;;  %v17982_v56 = vcombine.low %v380_v33, %v392_v35  ;;  %v596_v27 = vld [vmem:[#allocation5 + $0xfc8] sm:$0xff] }
  0x8e   :  { %v18461_v4 = vcombine.high %v859_v61, %v871_v62  ;;  %v1219_v5 = vld [vmem:[#allocation5 + $0x2340] sm:$0xff]  ;;  %v18460_v10 = vcombine.low %v859_v61, %v871_v62 }
  0x8f   :  { %7252 = vmatpush1.bf16.msra.mxu0 %v18556_v41  ;;  %v1231_v6 = vld [vmem:[#allocation5 + $0x23a0] sm:$0xff]  ;;  %v356_v41 = vld [vmem:[#allocation5 + $0x848] sm:$0xff] }
  0x90   :  { %7295 = vmatpush1.bf16.msra.mxu1 %v17790_v42  ;;  %7253 = vmatprep.subr.bf16.mxu0 %v18533_v43  ;;  %v18821_v13 = vcombine.high %v1219_v5, %v1231_v6  ;;  %v1195_v14 = vld [vmem:[#allocation5 + $0x2280] sm:$0xff]  ;;  %v18820_v19 = vcombine.low %v1219_v5, %v1231_v6  ;;  %v17983_v42 = vcombine.high %v380_v33, %v392_v35  ;;  %v368_v43 = vld [vmem:[#allocation5 + $0x8a8] sm:$0xff] }
  0x91   :  { %7296 = vmatprep.subr.bf16.mxu1 %v17767_v46  ;;  %v1207_v15 = vld [vmem:[#allocation5 + $0x22e0] sm:$0xff]  ;;  %v17958_v52 = vcombine.low %v356_v41, %v368_v43  ;;  %v572_v35 = vld [vmem:[#allocation5 + $0xf08] sm:$0xff] }
  0x92   :  { %v18797_v21 = vcombine.high %v1195_v14, %v1207_v15  ;;  %v1171_v23 = vld [vmem:[#allocation5 + $0x21c0] sm:$0xff]  ;;  %v18796_v28 = vcombine.low %v1195_v14, %v1207_v15 }
  0x93   :  { %7254 = vmatpush1.bf16.msra.mxu0 %v18532_v48  ;;  %v1183_v24 = vld [vmem:[#allocation5 + $0x2220] sm:$0xff]  ;;  %v332_v48 = vld [vmem:[#allocation5 + $0x788] sm:$0xff] }
  0x94   :  { %7297 = vmatpush1.bf16.msra.mxu1 %v17766_v49  ;;  %7255 = vmatprep.subr.bf16.mxu0 %v18509_v50  ;;  %v18773_v30 = vcombine.high %v1171_v23, %v1183_v24  ;;  %v1147_v31 = vld [vmem:[#allocation5 + $0x2100] sm:$0xff]  ;;  %v18772_v36 = vcombine.low %v1171_v23, %v1183_v24  ;;  %v17959_v49 = vcombine.high %v356_v41, %v368_v43  ;;  %v344_v50 = vld [vmem:[#allocation5 + $0x7e8] sm:$0xff] }
  0x95   :  { %7298 = vmatprep.subr.bf16.mxu1 %v17743_v54  ;;  %v1159_v32 = vld [vmem:[#allocation5 + $0x2160] sm:$0xff]  ;;  %v17934_v62 = vcombine.low %v332_v48, %v344_v50  ;;  %v1016_v23 = vld [vmem:[#allocation5 + $0x1ce8] sm:$0xff] }
  0x96   :  { %v18749_v38 = vcombine.high %v1147_v31, %v1159_v32  ;;  %v1123_v39 = vld [vmem:[#allocation5 + $0x2040] sm:$0xff]  ;;  %v18748_v44 = vcombine.low %v1147_v31, %v1159_v32  ;;  %v992_v31 = vld [vmem:[#allocation5 + $0x1c28] sm:$0xff] }
  0x97   :  { %7256 = vmatpush1.bf16.msra.mxu0 %v18508_v57  ;;  %v1135_v40 = vld [vmem:[#allocation5 + $0x20a0] sm:$0xff]  ;;  %v308_v57 = vld [vmem:[#allocation5 + $0x6c8] sm:$0xff] }
  0x98   :  { %7299 = vmatpush1.bf16.msra.mxu1 %v17742_v58  ;;  %7257 = vmatprep.subr.bf16.mxu0 %v18485_v60  ;;  %v18725_v45 = vcombine.high %v1123_v39, %v1135_v40  ;;  %v1099_v46 = vld [vmem:[#allocation5 + $0x1f80] sm:$0xff]  ;;  %v18724_v51 = vcombine.low %v1123_v39, %v1135_v40  ;;  %v17935_v58 = vcombine.high %v332_v48, %v344_v50  ;;  %v320_v60 = vld [vmem:[#allocation5 + $0x728] sm:$0xff] }
  0x99   :  { %7300 = vmatprep.subr.bf16.mxu1 %v17719_v0  ;;  %v1111_v47 = vld [vmem:[#allocation5 + $0x1fe0] sm:$0xff]  ;;  %v17910_v6 = vcombine.low %v308_v57, %v320_v60  ;;  %v968_v39 = vld [vmem:[#allocation5 + $0x1b68] sm:$0xff] }
  0x9a   :  { %v18701_v53 = vcombine.high %v1099_v46, %v1111_v47  ;;  %v1075_v54 = vld [vmem:[#allocation5 + $0x1ec0] sm:$0xff]  ;;  %v18700_v61 = vcombine.low %v1099_v46, %v1111_v47  ;;  %v560_v43 = vld [vmem:[#allocation5 + $0xea8] sm:$0xff] }
  0x9b   :  { %7258 = vmatpush1.bf16.msra.mxu0 %v18484_v2  ;;  %v1087_v55 = vld [vmem:[#allocation5 + $0x1f20] sm:$0xff]  ;;  %v284_v2 = vld [vmem:[#allocation5 + $0x608] sm:$0xff] }
  0x9c   :  { %7301 = vmatpush1.bf16.msra.mxu1 %v17718_v3  ;;  %7259 = vmatprep.subr.bf16.mxu0 %v18461_v4  ;;  %v18677_v63 = vcombine.high %v1075_v54, %v1087_v55  ;;  %v1051_v0 = vld [vmem:[#allocation5 + $0x1e00] sm:$0xff]  ;;  %v17911_v3 = vcombine.high %v308_v57, %v320_v60  ;;  %v296_v4 = vld [vmem:[#allocation5 + $0x668] sm:$0xff]  ;;  %v18676_v5 = vcombine.low %v1075_v54, %v1087_v55 }
  0x9d   :  { %7302 = vmatprep.subr.bf16.mxu1 %v17695_v8  ;;  %v1063_v1 = vld [vmem:[#allocation5 + $0x1e60] sm:$0xff]  ;;  %v644_v8 = vld [vmem:[#allocation5 + $0x1148] sm:$0xff]  ;;  %v17886_v15 = vcombine.low %v284_v2, %v296_v4 }
  0x9e   :  { %v18653_v7 = vcombine.high %v1051_v0, %v1063_v1  ;;  %v18652_v14 = vcombine.low %v1051_v0, %v1063_v1  ;;  %v22080_v16 = vld [vmem:[#allocation2 + $0x10] ss:$24 sps:$4 sm:$0xff]   ;;  %v18246_v24 = vcombine.low %v644_v8, %v656_v9  ;;  %v524_v48 = vld [vmem:[#allocation5 + $0xd88] sm:$0xff] }
  0x9f   :  { %7260 = vmatpush1.bf16.msra.mxu0 %v18460_v10  ;;  %v1028_v10 = vld [vmem:[#allocation5 + $0x1d48] sm:$0xff] }
  0xa0   :  { %7303 = vmatpush1.bf16.msra.mxu1 %v17694_v11  ;;  %7261 = vmatprep.subr.bf16.mxu0 %v18821_v13  ;;  %v17887_v11 = vcombine.high %v284_v2, %v296_v4  ;;  %v1040_v13 = vld [vmem:[#allocation5 + $0x1da8] sm:$0xff] }
  0xa1   :  { %7304 = vmatprep.subr.bf16.mxu1 %v18055_v17  ;;  %v18247_v17 = vcombine.high %v644_v8, %v656_v9  ;;  %v18630_v25 = vcombine.low %v1028_v10, %v1040_v13  ;;  %v500_v55 = vld [vmem:[#allocation5 + $0xcc8] sm:$0xff] }
  0xa2   :  { %v512_v57 = vld [vmem:[#allocation5 + $0xd28] sm:$0xff] }
  0xa3   :  { %7262 = vmatpush2.bf16.msra.mxu0 %v18820_v19  ;;  %v632_v19 = vld [vmem:[#allocation5 + $0x10e8] sm:$0xff]  ;;  %v18103_v0 = vcombine.high %v500_v55, %v512_v57 }
  0xa4   :  { %7305 = vmatpush2.bf16.msra.mxu1 %v18054_v20  ;;  %7263 = vmatprep.subr.bf16.mxu0 %v18797_v21  ;;  %v1004_v20 = vld [vmem:[#allocation5 + $0x1c88] sm:$0xff]  ;;  %v18631_v21 = vcombine.high %v1028_v10, %v1040_v13  ;;  %v18222_v32 = vcombine.low %v620_v18, %v632_v19 }
  0xa5   :  { %7306 = vmatprep.subr.bf16.mxu1 %v18031_v26  ;;  %v18223_v26 = vcombine.high %v620_v18, %v632_v19  ;;  %v18606_v33 = vcombine.low %v1004_v20, %v1016_v23  ;;  %v476_v1 = vld [vmem:[#allocation5 + $0xc08] sm:$0xff] }
  0xa6   :  { %v488_v2 = vld [vmem:[#allocation5 + $0xc68] sm:$0xff] }
  0xa7   :  { %7264 = vmatpush2.bf16.msra.mxu0 %v18796_v28  ;;  %v608_v28 = vld [vmem:[#allocation5 + $0x1028] sm:$0xff]  ;;  %v18079_v8 = vcombine.high %v476_v1, %v488_v2 }
  0xa8   :  { %7307 = vmatpush2.bf16.msra.mxu1 %v18030_v29  ;;  %7265 = vmatprep.subr.bf16.mxu0 %v18773_v30  ;;  %v18607_v29 = vcombine.high %v1004_v20, %v1016_v23  ;;  %v980_v30 = vld [vmem:[#allocation5 + $0x1bc8] sm:$0xff]  ;;  %v18198_v40 = vcombine.low %v596_v27, %v608_v28 }
  0xa9   :  { %7308 = vmatprep.subr.bf16.mxu1 %v18007_v34  ;;  %v18199_v34 = vcombine.high %v596_v27, %v608_v28  ;;  %v836_v9 = vld [vmem:[#allocation5 + $0x1748] sm:$0xff] }
  0xaa   :  { %v848_v10 = vld [vmem:[#allocation5 + $0x17a8] sm:$0xff] }
  0xab   :  { %7266 = vmatpush2.bf16.msra.mxu0 %v18772_v36  ;;  %v584_v36 = vld [vmem:[#allocation5 + $0xf68] sm:$0xff]  ;;  %v18439_v18 = vcombine.high %v836_v9, %v848_v10 }
  0xac   :  { %7309 = vmatpush2.bf16.msra.mxu1 %v18006_v37  ;;  %7267 = vmatprep.subr.bf16.mxu0 %v18749_v38  ;;  %v956_v37 = vld [vmem:[#allocation5 + $0x1b08] sm:$0xff]  ;;  %v18583_v38 = vcombine.high %v980_v30, %v992_v31  ;;  %v18175_v41 = vcombine.high %v572_v35, %v584_v36  ;;  %v18174_v46 = vcombine.low %v572_v35, %v584_v36 }
  0xad   :  { %7310 = vmatprep.subr.bf16.mxu1 %v17983_v42  ;;  %v548_v42 = vld [vmem:[#allocation5 + $0xe48] sm:$0xff]  ;;  %v18558_v47 = vcombine.low %v956_v37, %v968_v39 }
  0xae   :  { %v812_v19 = vld [vmem:[#allocation5 + $0x1688] sm:$0xff] }
  0xaf   :  { %7268 = vmatpush2.bf16.msra.mxu0 %v18748_v44  ;;  %v932_v44 = vld [vmem:[#allocation5 + $0x1a48] sm:$0xff] }
  0xb0   :  { %7311 = vmatpush2.bf16.msra.mxu1 %v17982_v56  ;;  %7269 = vmatprep.subr.bf16.mxu0 %v18725_v45  ;;  %v18559_v56 = vcombine.high %v956_v37, %v968_v39  ;;  %v944_v45 = vld [vmem:[#allocation5 + $0x1aa8] sm:$0xff] }
  0xb1   :  { %7312 = vmatprep.subr.bf16.mxu1 %v17959_v49  ;;  %v908_v49 = vld [vmem:[#allocation5 + $0x1988] sm:$0xff]  ;;  %v18535_v50 = vcombine.high %v932_v44, %v944_v45 }
  0xb2   :  { %v824_v20 = vld [vmem:[#allocation5 + $0x16e8] sm:$0xff] }
  0xb3   :  { %7270 = vmatpush2.bf16.msra.mxu0 %v18724_v51  ;;  %v920_v51 = vld [vmem:[#allocation5 + $0x19e8] sm:$0xff]  ;;  %v18415_v27 = vcombine.high %v812_v19, %v824_v20 }
  0xb4   :  { %7313 = vmatpush2.bf16.msra.mxu1 %v17958_v52  ;;  %7271 = vmatprep.subr.bf16.mxu0 %v18701_v53  ;;  %v18150_v52 = vcombine.low %v548_v42, %v560_v43  ;;  %v18534_v53 = vcombine.low %v932_v44, %v944_v45  ;;  %v18511_v60 = vcombine.high %v908_v49, %v920_v51  ;;  %v788_v28 = vld [vmem:[#allocation5 + $0x15c8] sm:$0xff] }
  0xb5   :  { %7314 = vmatprep.subr.bf16.mxu1 %v17935_v58  ;;  %v884_v58 = vld [vmem:[#allocation5 + $0x18c8] sm:$0xff] }
  0xb6   :  { %v764_v36 = vld [vmem:[#allocation5 + $0x1508] sm:$0xff] }
  0xb7   :  { %7272 = vmatpush2.bf16.msra.mxu0 %v18700_v61  ;;  %v896_v61 = vld [vmem:[#allocation5 + $0x1928] sm:$0xff] }
  0xb8   :  { %7315 = vmatpush2.bf16.msra.mxu1 %v17934_v62  ;;  %7273 = vmatprep.subr.bf16.mxu0 %v18677_v63  ;;  %v18510_v63 = vcombine.low %v908_v49, %v920_v51  ;;  %v18487_v4 = vcombine.high %v884_v58, %v896_v61  ;;  %v776_v37 = vld [vmem:[#allocation5 + $0x1568] sm:$0xff] }
  0xb9   :  { %7316 = vmatprep.subr.bf16.mxu1 %v17911_v3  ;;  %v860_v3 = vld [vmem:[#allocation5 + $0x1808] sm:$0xff] }
  0xba   :  { %v752_v44 = vld [vmem:[#allocation5 + $0x14a8] sm:$0xff] }
  0xbb   :  { %7274 = vmatpush2.bf16.msra.mxu0 %v18676_v5  ;;  %v872_v5 = vld [vmem:[#allocation5 + $0x1868] sm:$0xff] }
  0xbc   :  { %7317 = vmatpush2.bf16.msra.mxu1 %v17910_v6  ;;  %7275 = vmatprep.subr.bf16.mxu0 %v18653_v7  ;;  %v18102_v6 = vcombine.low %v500_v55, %v512_v57  ;;  %v18486_v7 = vcombine.low %v884_v58, %v896_v61  ;;  %v18463_v13 = vcombine.high %v860_v3, %v872_v5  ;;  %v728_v49 = vld [vmem:[#allocation5 + $0x13e8] sm:$0xff] }
  0xbd   :  { %7318 = vmatprep.subr.bf16.mxu1 %v17887_v11  ;;  %v1220_v11 = vld [vmem:[#allocation5 + $0x2348] sm:$0xff] }
  0xbe   :  { %v692_v57 = vld [vmem:[#allocation5 + $0x12c8] sm:$0xff] }
  0xbf   :  { %7276 = vmatpush2.bf16.msra.mxu0 %v18652_v14  ;;  %v1232_v14 = vld [vmem:[#allocation5 + $0x23a8] sm:$0xff] }
  0xc0   :  { %7319 = vmatpush2.bf16.msra.mxu1 %v17886_v15  ;;  %7331 = vmatprep.subr.bf16.mxu0 %v18247_v17  ;;  %v18078_v15 = vcombine.low %v476_v1, %v488_v2  ;;  %v18462_v17 = vcombine.low %v860_v3, %v872_v5  ;;  %v18823_v23 = vcombine.high %v1220_v11, %v1232_v14  ;;  %v704_v58 = vld [vmem:[#allocation5 + $0x1328] sm:$0xff] }
  0xc1   :  { %7374 = vmatprep.subr.bf16.mxu1 %v18631_v21  ;;  %v1196_v21 = vld [vmem:[#allocation5 + $0x2288] sm:$0xff]  ;;  %v18295_v1 = vcombine.high %v692_v57, %v704_v58 }
  0xc2   :  { %7278 = vmatmul.mubr.bf16.vlgmr.msra.gmra.mxu0 %v22080_v16  ;;  %v668_v2 = vld [vmem:[#allocation5 + $0x1208] sm:$0xff] }
  0xc3   :  { %7321 = vmatmul.mubr.bf16.vlgmr.msra.gmra.mxu1 %v22073_v12  ;;  %7332 = vmatpush1.bf16.msra.mxu0 %v18246_v24  ;;  %v18582_v12 = vcombine.low %v980_v30, %v992_v31  ;;  %v1208_v24 = vld [vmem:[#allocation5 + $0x22e8] sm:$0xff] }
  0xc4   :  { %7375 = vmatpush1.bf16.msra.mxu1 %v18630_v25  ;;  %7333 = vmatprep.subr.bf16.mxu0 %v18223_v26  ;;  %v18438_v25 = vcombine.low %v836_v9, %v848_v10  ;;  %v18822_v26 = vcombine.low %v1220_v11, %v1232_v14  ;;  %v1172_v30 = vld [vmem:[#allocation5 + $0x21c8] sm:$0xff]  ;;  %v18799_v31 = vcombine.high %v1196_v21, %v1208_v24  ;;  %v261_v10 = vld [vmem:[#allocation5 + $0x550] sm:$0xff] }
  0xc5   :  { %7376 = vmatprep.subr.bf16.mxu1 %v18607_v29  ;;  %7363 = vmatprep.mubr.bf16.mxu0 %v22069_v59  ;;  %v18151_v59 = vcombine.high %v548_v42, %v560_v43  ;;  %v800_v29 = vld [vmem:[#allocation5 + $0x1628] sm:$0xff]  ;;  %v18367_v42 = vcombine.high %v764_v36, %v776_v37  ;;  %v273_v11 = vld [vmem:[#allocation5 + $0x5b0] sm:$0xff] }
  0xc6   :  { %7406 = vmatprep.mubr.bf16.mxu1 %v22075_v22  ;;  %v536_v22 = vld [vmem:[#allocation5 + $0xde8] sm:$0xff]  ;;  %v18391_v35 = vcombine.high %v788_v28, %v800_v29 }
  0xc7   :  { %7334 = vmatpush1.bf16.msra.mxu0 %v18222_v32  ;;  %v18127_v54 = vcombine.high %v524_v48, %v536_v22  ;;  %v18126_v62 = vcombine.low %v524_v48, %v536_v22  ;;  %v1184_v32 = vld [vmem:[#allocation5 + $0x2228] sm:$0xff] }
  0xc8   :  { %7377 = vmatpush1.bf16.msra.mxu1 %v18606_v33  ;;  %7335 = vmatprep.subr.bf16.mxu0 %v18199_v34  ;;  %v18414_v33 = vcombine.low %v812_v19, %v824_v20  ;;  %v18798_v34 = vcombine.low %v1196_v21, %v1208_v24  ;;  %v18775_v39 = vcombine.high %v1172_v30, %v1184_v32  ;;  %v740_v43 = vld [vmem:[#allocation5 + $0x1448] sm:$0xff]  ;;  %v237_v20 = vld [vmem:[#allocation5 + $0x490] sm:$0xff] }
  0xc9   :  { %7378 = vmatprep.subr.bf16.mxu1 %v18583_v38  ;;  %v1148_v38 = vld [vmem:[#allocation5 + $0x2108] sm:$0xff]  ;;  %v18343_v48 = vcombine.high %v740_v43, %v752_v44  ;;  %v17865_v19 = vcombine.high %v261_v10, %v273_v11  ;;  %v249_v21 = vld [vmem:[#allocation5 + $0x4f0] sm:$0xff] }
  0xca   :  { %v716_v22 = vld [vmem:[#allocation5 + $0x1388] sm:$0xff] }
  0xcb   :  { %7336 = vmatpush1.bf16.msra.mxu0 %v18198_v40  ;;  %v1160_v40 = vld [vmem:[#allocation5 + $0x2168] sm:$0xff]  ;;  %v18319_v55 = vcombine.high %v716_v22, %v728_v49 }
  0xcc   :  { %7379 = vmatpush1.bf16.msra.mxu1 %v18582_v12  ;;  %7337 = vmatprep.subr.bf16.mxu0 %v18175_v41  ;;  %v18390_v12 = vcombine.low %v788_v28, %v800_v29  ;;  %v18774_v41 = vcombine.low %v1172_v30, %v1184_v32  ;;  %v18751_v45 = vcombine.high %v1148_v38, %v1160_v40  ;;  %v680_v3 = vld [vmem:[#allocation5 + $0x1268] sm:$0xff]  ;;  %v213_v29 = vld [vmem:[#allocation5 + $0x3d0] sm:$0xff] }
  0xcd   :  { %7380 = vmatprep.subr.bf16.mxu1 %v18559_v56  ;;  %v1124_v56 = vld [vmem:[#allocation5 + $0x2048] sm:$0xff]  ;;  %v18271_v9 = vcombine.high %v668_v2, %v680_v3  ;;  %v17841_v28 = vcombine.high %v237_v20, %v249_v21  ;;  %v225_v30 = vld [vmem:[#allocation5 + $0x430] sm:$0xff] }
  0xcf   :  { %7338 = vmatpush1.bf16.msra.mxu0 %v18174_v46  ;;  %v1136_v46 = vld [vmem:[#allocation5 + $0x20a8] sm:$0xff] }
  0xd0   :  { %7381 = vmatpush1.bf16.msra.mxu1 %v18558_v47  ;;  %7339 = vmatprep.subr.bf16.mxu0 %v18151_v59  ;;  %v18366_v47 = vcombine.low %v764_v36, %v776_v37  ;;  %v18750_v59 = vcombine.low %v1148_v38, %v1160_v40  ;;  %v18727_v51 = vcombine.high %v1124_v56, %v1136_v46  ;;  %v189_v38 = vld [vmem:[#allocation5 + $0x310] sm:$0xff] }
  0xd1   :  { %7382 = vmatprep.subr.bf16.mxu1 %v18535_v50  ;;  %v1100_v50 = vld [vmem:[#allocation5 + $0x1f88] sm:$0xff]  ;;  %v17817_v37 = vcombine.high %v213_v29, %v225_v30  ;;  %v573_v40 = vld [vmem:[#allocation5 + $0xf10] sm:$0xff] }
  0xd3   :  { %7340 = vmatpush1.bf16.msra.mxu0 %v18150_v52  ;;  %v1112_v52 = vld [vmem:[#allocation5 + $0x1fe8] sm:$0xff] }
  0xd4   :  { %7383 = vmatpush1.bf16.msra.mxu1 %v18534_v53  ;;  %7341 = vmatprep.subr.bf16.mxu0 %v18127_v54  ;;  %v18342_v53 = vcombine.low %v740_v43, %v752_v44  ;;  %v18726_v54 = vcombine.low %v1124_v56, %v1136_v46  ;;  %v18703_v61 = vcombine.high %v1100_v50, %v1112_v52  ;;  %v21843_v43 = vld [vmem:[#allocation2 + $0xc] ss:$24 sps:$4 sm:$0xff]  }
  0xd5   :  { %7384 = vmatprep.subr.bf16.mxu1 %v18511_v60  ;;  %v1076_v60 = vld [vmem:[#allocation5 + $0x1ec8] sm:$0xff]  ;;  %v177_v46 = vld [vmem:[#allocation5 + $0x2b0] sm:$0xff] }
  0xd7   :  { %7342 = vmatpush1.bf16.msra.mxu0 %v18126_v62  ;;  %v1088_v62 = vld [vmem:[#allocation5 + $0x1f28] sm:$0xff] }
  0xd8   :  { %7385 = vmatpush1.bf16.msra.mxu1 %v18510_v63  ;;  %7343 = vmatprep.subr.bf16.mxu0 %v18103_v0  ;;  %v18318_v63 = vcombine.low %v716_v22, %v728_v49  ;;  %v18702_v0 = vcombine.low %v1100_v50, %v1112_v52  ;;  %v18679_v5 = vcombine.high %v1076_v60, %v1088_v62  ;;  %v153_v52 = vld [vmem:[#allocation5 + $0x1f0] sm:$0xff] }
  0xd9   :  { %7386 = vmatprep.subr.bf16.mxu1 %v18487_v4  ;;  %v1052_v4 = vld [vmem:[#allocation5 + $0x1e08] sm:$0xff] }
  0xdb   :  { %7344 = vmatpush1.bf16.msra.mxu0 %v18102_v6  ;;  %v1064_v6 = vld [vmem:[#allocation5 + $0x1e68] sm:$0xff] }
  0xdc   :  { %7387 = vmatpush1.bf16.msra.mxu1 %v18486_v7  ;;  %7345 = vmatprep.subr.bf16.mxu0 %v18079_v8  ;;  %v18294_v7 = vcombine.low %v692_v57, %v704_v58  ;;  %v18678_v8 = vcombine.low %v1076_v60, %v1088_v62  ;;  %v18655_v14 = vcombine.high %v1052_v4, %v1064_v6  ;;  %v129_v62 = vld [vmem:[#allocation5 + $0x130] sm:$0xff] }
  0xdd   :  { %7388 = vmatprep.subr.bf16.mxu1 %v18463_v13  ;;  %v645_v13 = vld [vmem:[#allocation5 + $0x1150] sm:$0xff] }
  0xdf   :  { %7346 = vmatpush1.bf16.msra.mxu0 %v18078_v15  ;;  %v657_v15 = vld [vmem:[#allocation5 + $0x11b0] sm:$0xff] }
  0xe0   :  { %7389 = vmatpush1.bf16.msra.mxu1 %v18462_v17  ;;  %7347 = vmatprep.subr.bf16.mxu0 %v18439_v18  ;;  %v18270_v17 = vcombine.low %v668_v2, %v680_v3  ;;  %v18654_v18 = vcombine.low %v1052_v4, %v1064_v6  ;;  %v18249_v24 = vcombine.high %v645_v13, %v657_v15  ;;  %v105_v6 = vld [vmem:[#allocation5 + $0x70] sm:$0xff] }
  0xe1   :  { %7390 = vmatprep.subr.bf16.mxu1 %v18823_v23  ;;  %v621_v23 = vld [vmem:[#allocation5 + $0x1090] sm:$0xff] }
  0xe3   :  { %7348 = vmatpush2.bf16.msra.mxu0 %v18438_v25  ;;  %v633_v25 = vld [vmem:[#allocation5 + $0x10f0] sm:$0xff] }
  0xe4   :  { %7391 = vmatpush2.bf16.msra.mxu1 %v18822_v26  ;;  %7349 = vmatprep.subr.bf16.mxu0 %v18415_v27  ;;  %v17864_v26 = vcombine.low %v261_v10, %v273_v11  ;;  %v18248_v27 = vcombine.low %v645_v13, %v657_v15  ;;  %v18225_v32 = vcombine.high %v621_v23, %v633_v25  ;;  %v465_v15 = vld [vmem:[#allocation5 + $0xbb0] sm:$0xff] }
  0xe5   :  { %7392 = vmatprep.subr.bf16.mxu1 %v18799_v31  ;;  %v597_v31 = vld [vmem:[#allocation5 + $0xfd0] sm:$0xff]  ;;  %v18224_v36 = vcombine.low %v621_v23, %v633_v25 }
  0xe6   :  { %v441_v25 = vld [vmem:[#allocation5 + $0xaf0] sm:$0xff] }
  0xe7   :  { %7350 = vmatpush2.bf16.msra.mxu0 %v18414_v33  ;;  %v609_v33 = vld [vmem:[#allocation5 + $0x1030] sm:$0xff] }
  0xe8   :  { %7393 = vmatpush2.bf16.msra.mxu1 %v18798_v34  ;;  %7351 = vmatprep.subr.bf16.mxu0 %v18391_v35  ;;  %v22086_v34 = vld [vmem:[#allocation2 + $0x8] ss:$24 sps:$4 sm:$0xff]   ;;  %v17840_v35 = vcombine.low %v237_v20, %v249_v21  ;;  %v18200_v44 = vcombine.low %v597_v31, %v609_v33 }
  0xe9   :  { %7394 = vmatprep.subr.bf16.mxu1 %v18775_v39  ;;  %v201_v39 = vld [vmem:[#allocation5 + $0x370] sm:$0xff] }
  0xea   :  { %v17793_v56 = vcombine.high %v189_v38, %v201_v39  ;;  %v17792_v22 = vcombine.low %v189_v38, %v201_v39 }
  0xeb   :  { %7352 = vmatpush2.bf16.msra.mxu0 %v18390_v12  ;;  %v18201_v12 = vcombine.high %v597_v31, %v609_v33  ;;  %v417_v33 = vld [vmem:[#allocation5 + $0xa30] sm:$0xff] }
  0xec   :  { %7395 = vmatpush2.bf16.msra.mxu1 %v18774_v41  ;;  %7353 = vmatprep.subr.bf16.mxu0 %v18367_v42  ;;  %v585_v41 = vld [vmem:[#allocation5 + $0xf70] sm:$0xff] }
  0xed   :  { %7396 = vmatprep.subr.bf16.mxu1 %v18751_v45  ;;  %v22090_v42 = vld [vmem:[#allocation2 + $0x4] ss:$24 sps:$4 sm:$0xff]   ;;  %v18176_v49 = vcombine.low %v573_v40, %v585_v41 }
  0xee   :  { %v165_v45 = vld [vmem:[#allocation5 + $0x250] sm:$0xff] }
  0xef   :  { %7354 = vmatpush2.bf16.msra.mxu0 %v18366_v47  ;;  %v549_v47 = vld [vmem:[#allocation5 + $0xe50] sm:$0xff]  ;;  %v17769_v50 = vcombine.high %v165_v45, %v177_v46  ;;  %v17768_v57 = vcombine.low %v165_v45, %v177_v46 }
  0xf0   :  { %7397 = vmatpush2.bf16.msra.mxu1 %v18750_v59  ;;  %7355 = vmatprep.subr.bf16.mxu0 %v18343_v48  ;;  %v18177_v59 = vcombine.high %v573_v40, %v585_v41  ;;  %v561_v48 = vld [vmem:[#allocation5 + $0xeb0] sm:$0xff] }
  0xf1   :  { %7398 = vmatprep.subr.bf16.mxu1 %v18727_v51  ;;  %v141_v51 = vld [vmem:[#allocation5 + $0x190] sm:$0xff]  ;;  %v18152_v58 = vcombine.low %v549_v47, %v561_v48 }
  0xf2   :  { %v17745_v60 = vcombine.high %v141_v51, %v153_v52  ;;  %v17744_v2 = vcombine.low %v141_v51, %v153_v52  ;;  %v393_v41 = vld [vmem:[#allocation5 + $0x970] sm:$0xff] }
  0xf3   :  { %7356 = vmatpush2.bf16.msra.mxu0 %v18342_v53  ;;  %v525_v53 = vld [vmem:[#allocation5 + $0xd90] sm:$0xff] }
  0xf4   :  { %7399 = vmatpush2.bf16.msra.mxu1 %v18726_v54  ;;  %7357 = vmatprep.subr.bf16.mxu0 %v18319_v55  ;;  %v18153_v54 = vcombine.high %v549_v47, %v561_v48  ;;  %v537_v55 = vld [vmem:[#allocation5 + $0xdf0] sm:$0xff] }
  0xf5   :  { %7400 = vmatprep.subr.bf16.mxu1 %v18703_v61  ;;  %v117_v61 = vld [vmem:[#allocation5 + $0xd0] sm:$0xff]  ;;  %v18128_v3 = vcombine.low %v525_v53, %v537_v55 }
  0xf6   :  { %v17721_v4 = vcombine.high %v117_v61, %v129_v62  ;;  %v17720_v10 = vcombine.low %v117_v61, %v129_v62  ;;  %v357_v47 = vld [vmem:[#allocation5 + $0x850] sm:$0xff] }
  0xf7   :  { %7358 = vmatpush2.bf16.msra.mxu0 %v18318_v63  ;;  %v501_v63 = vld [vmem:[#allocation5 + $0xcd0] sm:$0xff] }
  0xf8   :  { %7401 = vmatpush2.bf16.msra.mxu1 %v18702_v0  ;;  %7359 = vmatprep.subr.bf16.mxu0 %v18295_v1  ;;  %v18129_v0 = vcombine.high %v525_v53, %v537_v55  ;;  %v513_v1 = vld [vmem:[#allocation5 + $0xd30] sm:$0xff] }
  0xf9   :  { %7402 = vmatprep.subr.bf16.mxu1 %v18679_v5  ;;  %v93_v5 = vld [vmem:[#allocation5 + $0x10] sm:$0xff]  ;;  %v18104_v11 = vcombine.low %v501_v63, %v513_v1 }
  0xfa   :  { %v17697_v13 = vcombine.high %v93_v5, %v105_v6  ;;  %v17696_v20 = vcombine.low %v93_v5, %v105_v6  ;;  %v741_v48 = vld [vmem:[#allocation5 + $0x1450] sm:$0xff]  ;;  %v1249_v5 = vlaneseq }
  0xfb   :  { %7360 = vmatpush2.bf16.msra.mxu0 %v18294_v7  ;;  %v477_v7 = vld [vmem:[#allocation5 + $0xc10] sm:$0xff] }
  0xfc   :  { %7403 = vmatpush2.bf16.msra.mxu1 %v18678_v8  ;;  %7361 = vmatprep.subr.bf16.mxu0 %v18271_v9  ;;  %v18105_v8 = vcombine.high %v501_v63, %v513_v1  ;;  %v489_v9 = vld [vmem:[#allocation5 + $0xc70] sm:$0xff] }
  0xfd   :  { %7404 = vmatprep.subr.bf16.mxu1 %v18655_v14  ;;  %v453_v14 = vld [vmem:[#allocation5 + $0xb50] sm:$0xff]  ;;  %v18080_v21 = vcombine.low %v477_v7, %v489_v9 }
  0xfe   :  { %v18057_v23 = vcombine.high %v453_v14, %v465_v15  ;;  %v333_v53 = vld [vmem:[#allocation5 + $0x790] sm:$0xff] }
  0xff   :  { %7362 = vmatpush2.bf16.msra.mxu0 %v18270_v17  ;;  %v837_v17 = vld [vmem:[#allocation5 + $0x1750] sm:$0xff] }
 0x100   :  { %7405 = vmatpush2.bf16.msra.mxu1 %v18654_v18  ;;  %7417 = vmatprep.subr.bf16.mxu0 %v17865_v19  ;;  %v18081_v18 = vcombine.high %v477_v7, %v489_v9  ;;  %v849_v19 = vld [vmem:[#allocation5 + $0x17b0] sm:$0xff] }
 0x101   :  { %7460 = vmatprep.subr.bf16.mxu1 %v18249_v24  ;;  %v429_v24 = vld [vmem:[#allocation5 + $0xa90] sm:$0xff] }
 0x102   :  { %7364 = vmatmul.mubr.bf16.vlgmr.msra.gmra.mxu0 %v22086_v34  ;;  %v18033_v31 = vcombine.high %v429_v24, %v441_v25  ;;  %v18032_v38 = vcombine.low %v429_v24, %v441_v25  ;;  %v717_v55 = vld [vmem:[#allocation5 + $0x1390] sm:$0xff]  ;;  %v274_v24 = vld [vmem:[#allocation5 + $0x5b8] sm:$0xff]  ;;  %v1243_v25 = vld [vmem:[#allocation7] sm:$0xff] }
 0x103   :  { %7407 = vmatmul.mubr.bf16.vlgmr.msra.gmra.mxu1 %v22080_v16  ;;  %7418 = vmatpush1.bf16.msra.mxu0 %v17864_v26  ;;  %v17816_v16 = vcombine.low %v213_v29, %v225_v30  ;;  %v813_v26 = vld [vmem:[#allocation5 + $0x1690] sm:$0xff]  ;;  %v18056_v29 = vcombine.low %v453_v14, %v465_v15  ;;  %v18440_v30 = vcombine.low %v837_v17, %v849_v19  ;;  %v22093_v15 = vshrl.u32 %v1249_v5, 7  ;;  %v178_v5 = vld [vmem:[#allocation5 + $0x2b8] sm:$0xff] }
 0x104   :  { %7461 = vmatpush1.bf16.msra.mxu1 %v18248_v27  ;;  %7419 = vmatprep.subr.bf16.mxu0 %v17841_v28  ;;  %v18441_v27 = vcombine.high %v837_v17, %v849_v19  ;;  %v825_v28 = vld [vmem:[#allocation5 + $0x16f0] sm:$0xff] }
 0x105   :  { %7462 = vmatprep.subr.bf16.mxu1 %v18225_v32  ;;  %7449 = vmatprep.mubr.bf16.mxu0 %v22090_v42  ;;  %v405_v32 = vld [vmem:[#allocation5 + $0x9d0] sm:$0xff]  ;;  %v18416_v39 = vcombine.low %v813_v26, %v825_v28 }
 0x106   :  { %7492 = vmatprep.mubr.bf16.mxu1 %v21843_v43  ;;  %v18009_v40 = vcombine.high %v405_v32, %v417_v33  ;;  %v765_v43 = vld [vmem:[#allocation5 + $0x1510] sm:$0xff] }
 0x107   :  { %7420 = vmatpush1.bf16.msra.mxu0 %v17840_v35  ;;  %v789_v35 = vld [vmem:[#allocation5 + $0x15d0] sm:$0xff] }
 0x108   :  { %7463 = vmatpush1.bf16.msra.mxu1 %v18224_v36  ;;  %7421 = vmatprep.subr.bf16.mxu0 %v17817_v37  ;;  %v18417_v36 = vcombine.high %v813_v26, %v825_v28  ;;  %v801_v37 = vld [vmem:[#allocation5 + $0x1630] sm:$0xff] }
 0x109   :  { %7464 = vmatprep.subr.bf16.mxu1 %v18201_v12  ;;  %v381_v12 = vld [vmem:[#allocation5 + $0x910] sm:$0xff]  ;;  %v18392_v45 = vcombine.low %v789_v35, %v801_v37 }
 0x10a   :  { %v17985_v46 = vcombine.high %v381_v12, %v393_v41  ;;  %v309_v63 = vld [vmem:[#allocation5 + $0x6d0] sm:$0xff] }
 0x10b   :  { %7422 = vmatpush1.bf16.msra.mxu0 %v17816_v16  ;;  %v18393_v16 = vcombine.high %v789_v35, %v801_v37  ;;  %v693_v1 = vld [vmem:[#allocation5 + $0x12d0] sm:$0xff]  ;;  %v250_v35 = vld [vmem:[#allocation5 + $0x4f8] sm:$0xff] }
 0x10c   :  { %7465 = vmatpush1.bf16.msra.mxu1 %v18200_v44  ;;  %7423 = vmatprep.subr.bf16.mxu0 %v17793_v56  ;;  %v777_v44 = vld [vmem:[#allocation5 + $0x1570] sm:$0xff]  ;;  %v18008_v56 = vcombine.low %v405_v32, %v417_v33  ;;  %v238_v32 = vld [vmem:[#allocation5 + $0x498] sm:$0xff] }
 0x10d   :  { %7466 = vmatprep.subr.bf16.mxu1 %v18177_v59  ;;  %v369_v59 = vld [vmem:[#allocation5 + $0x8b0] sm:$0xff]  ;;  %v18368_v51 = vcombine.low %v765_v43, %v777_v44 }
 0x10e   :  { %v17961_v52 = vcombine.high %v357_v47, %v369_v59  ;;  %v297_v9 = vld [vmem:[#allocation5 + $0x670] sm:$0xff] }
 0x10f   :  { %7424 = vmatpush1.bf16.msra.mxu0 %v17792_v22  ;;  %v18369_v22 = vcombine.high %v765_v43, %v777_v44  ;;  %v1029_v19 = vld [vmem:[#allocation5 + $0x1d50] sm:$0xff]  ;;  %v17843_v43 = vcombine.high %v238_v32, %v250_v35 }
 0x110   :  { %7467 = vmatpush1.bf16.msra.mxu1 %v18176_v49  ;;  %7425 = vmatprep.subr.bf16.mxu0 %v17769_v50  ;;  %v753_v49 = vld [vmem:[#allocation5 + $0x14b0] sm:$0xff]  ;;  %v17984_v50 = vcombine.low %v381_v12, %v393_v41  ;;  %v214_v41 = vld [vmem:[#allocation5 + $0x3d8] sm:$0xff] }
 0x111   :  { %7468 = vmatprep.subr.bf16.mxu1 %v18153_v54  ;;  %v345_v54 = vld [vmem:[#allocation5 + $0x7f0] sm:$0xff]  ;;  %v18344_v61 = vcombine.low %v741_v48, %v753_v49 }
 0x112   :  { %v17937_v62 = vcombine.high %v333_v53, %v345_v54  ;;  %v993_v12 = vld [vmem:[#allocation5 + $0x1c30] sm:$0xff] }
 0x113   :  { %7426 = vmatpush1.bf16.msra.mxu0 %v17768_v57  ;;  %v18345_v57 = vcombine.high %v741_v48, %v753_v49  ;;  %v17842_v48 = vcombine.low %v238_v32, %v250_v35  ;;  %v957_v49 = vld [vmem:[#allocation5 + $0x1b10] sm:$0xff] }
 0x114   :  { %7469 = vmatpush1.bf16.msra.mxu1 %v18152_v58  ;;  %7427 = vmatprep.subr.bf16.mxu0 %v17745_v60  ;;  %v729_v58 = vld [vmem:[#allocation5 + $0x13f0] sm:$0xff]  ;;  %v17960_v60 = vcombine.low %v357_v47, %v369_v59 }
 0x115   :  { %7470 = vmatprep.subr.bf16.mxu1 %v18129_v0  ;;  %v321_v0 = vld [vmem:[#allocation5 + $0x730] sm:$0xff]  ;;  %v18320_v6 = vcombine.low %v717_v55, %v729_v58 }
 0x116   :  { %v17913_v7 = vcombine.high %v309_v63, %v321_v0  ;;  %v17912_v14 = vcombine.low %v309_v63, %v321_v0  ;;  %v933_v0 = vld [vmem:[#allocation5 + $0x1a50] sm:$0xff] }
 0x117   :  { %7428 = vmatpush1.bf16.msra.mxu0 %v17744_v2  ;;  %v18321_v2 = vcombine.high %v717_v55, %v729_v58  ;;  %v202_v55 = vld [vmem:[#allocation5 + $0x378] sm:$0xff] }
 0x118   :  { %7471 = vmatpush1.bf16.msra.mxu1 %v18128_v3  ;;  %7429 = vmatprep.subr.bf16.mxu0 %v17721_v4  ;;  %v705_v3 = vld [vmem:[#allocation5 + $0x1330] sm:$0xff]  ;;  %v17936_v4 = vcombine.low %v333_v53, %v345_v54 }
 0x119   :  { %7472 = vmatprep.subr.bf16.mxu1 %v18105_v8  ;;  %v285_v8 = vld [vmem:[#allocation5 + $0x610] sm:$0xff]  ;;  %v18296_v17 = vcombine.low %v693_v1, %v705_v3 }
 0x11a   :  { %v17888_v26 = vcombine.low %v285_v8, %v297_v9 }
 0x11b   :  { %7430 = vmatpush1.bf16.msra.mxu0 %v17720_v10  ;;  %v669_v10 = vld [vmem:[#allocation5 + $0x1210] sm:$0xff] }
 0x11c   :  { %7473 = vmatpush1.bf16.msra.mxu1 %v18104_v11  ;;  %7431 = vmatprep.subr.bf16.mxu0 %v17697_v13  ;;  %v18297_v11 = vcombine.high %v693_v1, %v705_v3  ;;  %v681_v13 = vld [vmem:[#allocation5 + $0x1270] sm:$0xff] }
 0x11d   :  { %7474 = vmatprep.subr.bf16.mxu1 %v18081_v18  ;;  %v17889_v18 = vcombine.high %v285_v8, %v297_v9  ;;  %v18272_v28 = vcombine.low %v669_v10, %v681_v13  ;;  %v945_v1 = vld [vmem:[#allocation5 + $0x1ab0] sm:$0xff] }
 0x11e   :  { %v909_v8 = vld [vmem:[#allocation5 + $0x1990] sm:$0xff] }
 0x11f   :  { %7432 = vmatpush1.bf16.msra.mxu0 %v17696_v20  ;;  %v1041_v20 = vld [vmem:[#allocation5 + $0x1db0] sm:$0xff] }
 0x120   :  { %7475 = vmatpush1.bf16.msra.mxu1 %v18080_v21  ;;  %7433 = vmatprep.subr.bf16.mxu0 %v18057_v23  ;;  %v262_v21 = vld [vmem:[#allocation5 + $0x558] sm:$0xff]  ;;  %v18273_v23 = vcombine.high %v669_v10, %v681_v13  ;;  %v18632_v37 = vcombine.low %v1029_v19, %v1041_v20  ;;  %v921_v9 = vld [vmem:[#allocation5 + $0x19f0] sm:$0xff] }
 0x121   :  { %7476 = vmatprep.subr.bf16.mxu1 %v18441_v27  ;;  %v22096_v27 = vsub.s32 0, %v22093_v15  ;;  %v17867_v33 = vcombine.high %v262_v21, %v274_v24  ;;  %v142_v10 = vld [vmem:[#allocation5 + $0x198] sm:$0xff] }
 0x122   :  { %v154_v13 = vld [vmem:[#allocation5 + $0x1f8] sm:$0xff] }
 0x123   :  { %7434 = vmatpush2.bf16.msra.mxu0 %v18056_v29  ;;  %23181 = vst [vmem:[#allocation16_spill] sm:$0xff] %v22096_v27  ;;  %v18633_v29 = vcombine.high %v1029_v19, %v1041_v20  ;;  %v885_v19 = vld [vmem:[#allocation5 + $0x18d0] sm:$0xff] }
 0x124   :  { %7477 = vmatpush2.bf16.msra.mxu1 %v18440_v30  ;;  %7435 = vmatprep.subr.bf16.mxu0 %v18033_v31  ;;  %v1005_v30 = vld [vmem:[#allocation5 + $0x1c90] sm:$0xff] }
 0x125   :  { %7478 = vmatprep.subr.bf16.mxu1 %v18417_v36  ;;  %v1017_v31 = vld [vmem:[#allocation5 + $0x1cf0] sm:$0xff]  ;;  %v1252_v36 = vrot.slane %v1243_v25, %v22096_v27  ;;  %v18512_v25 = vcombine.low %v909_v8, %v921_v9 }
 0x126   :  { %v18608_v47 = vcombine.low %v1005_v30, %v1017_v31  ;;  %v897_v20 = vld [vmem:[#allocation5 + $0x1930] sm:$0xff] }
 0x127   :  { %7436 = vmatpush2.bf16.msra.mxu0 %v18032_v38  ;;  %v17866_v38 = vcombine.low %v262_v21, %v274_v24  ;;  %v118_v21 = vld [vmem:[#allocation5 + $0xd8] sm:$0xff]  ;;  %v18488_v35 = vcombine.low %v885_v19, %v897_v20 }
 0x128   :  { %7479 = vmatpush2.bf16.msra.mxu1 %v18416_v39  ;;  %7437 = vmatprep.subr.bf16.mxu0 %v18009_v40  ;;  %v18609_v39 = vcombine.high %v1005_v30, %v1017_v31  ;;  %v981_v40 = vld [vmem:[#allocation5 + $0x1bd0] sm:$0xff]  ;;  %v130_v24 = vld [vmem:[#allocation5 + $0x138] sm:$0xff] }
 0x129   :  { %7480 = vmatprep.subr.bf16.mxu1 %v18393_v16  ;;  %v226_v16 = vld [vmem:[#allocation5 + $0x438] sm:$0xff]  ;;  %v873_v30 = vld [vmem:[#allocation5 + $0x1870] sm:$0xff]  ;;  %v17723_v32 = vcombine.high %v118_v21, %v130_v24 }
 0x12a   :  { %v17819_v54 = vcombine.high %v214_v41, %v226_v16  ;;  %v94_v31 = vld [vmem:[#allocation5 + $0x18] sm:$0xff] }
 0x12b   :  { %7438 = vmatpush2.bf16.msra.mxu0 %v18008_v56  ;;  %v22099_v56 = vld [vmem:[#allocation2] ss:$24 sps:$4 sm:$0xff]  }
 0x12c   :  { %7481 = vmatpush2.bf16.msra.mxu1 %v18392_v45  ;;  %7439 = vmatprep.subr.bf16.mxu0 %v17985_v46 }
 0x12d   :  { %7482 = vmatprep.subr.bf16.mxu1 %v18369_v22  ;;  %v18585_v22 = vcombine.high %v981_v40, %v993_v12 }
 0x12f   :  { %7440 = vmatpush2.bf16.msra.mxu0 %v17984_v50  ;;  %v969_v50 = vld [vmem:[#allocation5 + $0x1b70] sm:$0xff] }
 0x130   :  { %7483 = vmatpush2.bf16.msra.mxu1 %v18368_v51  ;;  %7441 = vmatprep.subr.bf16.mxu0 %v17961_v52  ;;  %v190_v51 = vld [vmem:[#allocation5 + $0x318] sm:$0xff]  ;;  %v18561_v63 = vcombine.high %v957_v49, %v969_v50 }
 0x131   :  { %7484 = vmatprep.subr.bf16.mxu1 %v18345_v57  ;;  %v22109_v57 = vld [vmem:[#allocation2 + $0x14] ss:$24 sps:$4 sm:$0xff]  }
 0x133   :  { %7442 = vmatpush2.bf16.msra.mxu0 %v17960_v60  ;;  %v18584_v60 = vcombine.low %v981_v40, %v993_v12  ;;  %v454_v40 = vld [vmem:[#allocation5 + $0xb58] sm:$0xff] }
 0x134   :  { %7485 = vmatpush2.bf16.msra.mxu1 %v18344_v61  ;;  %7443 = vmatprep.subr.bf16.mxu0 %v17937_v62  ;;  %v17818_v62 = vcombine.low %v214_v41, %v226_v16  ;;  %v466_v41 = vld [vmem:[#allocation5 + $0xbb8] sm:$0xff] }
 0x135   :  { %7486 = vmatprep.subr.bf16.mxu1 %v18321_v2  ;;  %v166_v2 = vld [vmem:[#allocation5 + $0x258] sm:$0xff] }
 0x137   :  { %7444 = vmatpush2.bf16.msra.mxu0 %v17936_v4  ;;  %v17795_v4 = vcombine.high %v190_v51, %v202_v55 }
 0x138   :  { %7487 = vmatpush2.bf16.msra.mxu1 %v18320_v6  ;;  %7445 = vmatprep.subr.bf16.mxu0 %v17913_v7  ;;  %v18560_v6 = vcombine.low %v957_v49, %v969_v50  ;;  %v18537_v7 = vcombine.high %v933_v0, %v945_v1  ;;  %v18058_v50 = vcombine.low %v454_v40, %v466_v41 }
 0x139   :  { %7488 = vmatprep.subr.bf16.mxu1 %v18297_v11  ;;  %v17771_v11 = vcombine.high %v166_v2, %v178_v5 }
 0x13b   :  { %7446 = vmatpush2.bf16.msra.mxu0 %v17912_v14  ;;  %v18536_v14 = vcombine.low %v933_v0, %v945_v1  ;;  %v1149_v0 = vld [vmem:[#allocation5 + $0x2110] sm:$0xff] }
 0x13c   :  { %7489 = vmatpush2.bf16.msra.mxu1 %v18296_v17  ;;  %7447 = vmatprep.subr.bf16.mxu0 %v17889_v18  ;;  %v17770_v17 = vcombine.low %v166_v2, %v178_v5  ;;  %v18513_v18 = vcombine.high %v909_v8, %v921_v9  ;;  %v1161_v1 = vld [vmem:[#allocation5 + $0x2170] sm:$0xff]  ;;  %v382_v2 = vld [vmem:[#allocation5 + $0x918] sm:$0xff] }
 0x13d   :  { %7490 = vmatprep.subr.bf16.mxu1 %v18273_v23  ;;  %v17747_v23 = vcombine.high %v142_v10, %v154_v13  ;;  %v394_v5 = vld [vmem:[#allocation5 + $0x978] sm:$0xff]  ;;  %v1125_v8 = vld [vmem:[#allocation5 + $0x2050] sm:$0xff] }
 0x13e   :  { %v1137_v9 = vld [vmem:[#allocation5 + $0x20b0] sm:$0xff] }
 0x13f   :  { %7448 = vmatpush2.bf16.msra.mxu0 %v17888_v26  ;;  %v17746_v26 = vcombine.low %v142_v10, %v154_v13  ;;  %v358_v10 = vld [vmem:[#allocation5 + $0x858] sm:$0xff] }
 0x140   :  { %7491 = vmatpush2.bf16.msra.mxu1 %v18272_v28  ;;  %7503 = vmatprep.subr.bf16.mxu0 %v18633_v29  ;;  %v18489_v28 = vcombine.high %v885_v19, %v897_v20  ;;  %v861_v29 = vld [vmem:[#allocation5 + $0x1810] sm:$0xff]  ;;  %v370_v13 = vld [vmem:[#allocation5 + $0x8b8] sm:$0xff] }
 0x141   :  { %7546 = vmatprep.subr.bf16.mxu1 %v17867_v33  ;;  %v106_v33 = vld [vmem:[#allocation5 + $0x78] sm:$0xff]  ;;  %v1101_v19 = vld [vmem:[#allocation5 + $0x1f90] sm:$0xff] }
 0x142   :  { %v7193_v44 = vpop.f32.mrf.mxu0  ;;  %7450 = vmatmul.mubr.bf16.vlgmr.msra.gmra.mxu0 %v22099_v56  ;;  %v17699_v12 = vcombine.high %v94_v31, %v106_v33  ;;  %v17698_v16 = vcombine.low %v94_v31, %v106_v33  ;;  %v1113_v20 = vld [vmem:[#allocation5 + $0x1ff0] sm:$0xff]  ;;  %v310_v31 = vld [vmem:[#allocation5 + $0x6d8] sm:$0xff] }
 0x143   :  { %v7194_v45 = vadd.f32 %v7193_v44, %v1252_v36  ;;  %v7236_v46 = vpop.f32.mrf.mxu1  ;;  %7493 = vmatmul.mubr.bf16.vlgmr.msra.gmra.mxu1 %v22086_v34  ;;  %7504 = vmatpush1.bf16.msra.mxu0 %v18632_v37  ;;  %v18465_v37 = vcombine.high %v861_v29, %v873_v30  ;;  %v322_v33 = vld [vmem:[#allocation5 + $0x738] sm:$0xff] }
 0x144   :  { %7547 = vmatpush1.bf16.msra.mxu1 %v17866_v38  ;;  %v22103_v59 = vpop.f32.mrf.mxu0  ;;  %7505 = vmatprep.subr.bf16.mxu0 %v18609_v39  ;;  %v1221_v38 = vld [vmem:[#allocation5 + $0x2350] sm:$0xff] }
 0x145   :  { %v22105_v52 = vadd.f32 %v7236_v46, %v7194_v45  ;;  %v22107_v53 = vpop.f32.mrf.mxu1  ;;  %7548 = vmatprep.subr.bf16.mxu1 %v17843_v43  ;;  %7535 = vmatprep.mubr.bf16.mxu0 %v22109_v57  ;;  %v1233_v39 = vld [vmem:[#allocation5 + $0x23b0] sm:$0xff]  ;;  %v18464_v43 = vcombine.low %v861_v29, %v873_v30 }
 0x146   :  { %v7197_v34 = vpop.f32.mrf.mxu0  ;;  %7578 = vmatprep.mubr.bf16.mxu1 %v22090_v42  ;;  %v17794_v42 = vcombine.low %v190_v51, %v202_v55  ;;  %v18825_v44 = vcombine.high %v1221_v38, %v1233_v39  ;;  %v1197_v45 = vld [vmem:[#allocation5 + $0x2290] sm:$0xff]  ;;  %v18824_v49 = vcombine.low %v1221_v38, %v1233_v39 }
 0x147   :  { %v7198_v58 = vadd.f32 %v7197_v34, %v1252_v36  ;;  %7506 = vmatpush1.bf16.msra.mxu0 %v18608_v47  ;;  %v7240_v61 = vpop.f32.mrf.mxu1  ;;  %v17722_v36 = vcombine.low %v118_v21, %v130_v24  ;;  %v1209_v46 = vld [vmem:[#allocation5 + $0x22f0] sm:$0xff]  ;;  %v430_v47 = vld [vmem:[#allocation5 + $0xa98] sm:$0xff] }
 0x148   :  { %7549 = vmatpush1.bf16.msra.mxu1 %v17842_v48  ;;  %7507 = vmatprep.subr.bf16.mxu0 %v18585_v22  ;;  %v18059_v48 = vcombine.high %v454_v40, %v466_v41  ;;  %v442_v22 = vld [vmem:[#allocation5 + $0xaf8] sm:$0xff]  ;;  %v18801_v51 = vcombine.high %v1197_v45, %v1209_v46  ;;  %v1185_v55 = vld [vmem:[#allocation5 + $0x2230] sm:$0xff] }
 0x149   :  { %v22113_v3 = vadd.f32 %v7240_v61, %v7198_v58  ;;  %7550 = vmatprep.subr.bf16.mxu1 %v17819_v54  ;;  %v1173_v54 = vld [vmem:[#allocation5 + $0x21d0] sm:$0xff]  ;;  %v406_v34 = vld [vmem:[#allocation5 + $0x9d8] sm:$0xff]  ;;  %v18035_v58 = vcombine.high %v430_v47, %v442_v22  ;;  %v18800_v61 = vcombine.low %v1197_v45, %v1209_v46 }
 0x14a   :  { %v334_v21 = vld [vmem:[#allocation5 + $0x798] sm:$0xff]  ;;  %v1077_v29 = vld [vmem:[#allocation5 + $0x1ed0] sm:$0xff] }
 0x14b   :  { %7508 = vmatpush1.bf16.msra.mxu0 %v18584_v60  ;;  %v418_v60 = vld [vmem:[#allocation5 + $0xa38] sm:$0xff]  ;;  %v1089_v30 = vld [vmem:[#allocation5 + $0x1f30] sm:$0xff] }
 0x14c   :  { %7551 = vmatpush1.bf16.msra.mxu1 %v17818_v62  ;;  %7509 = vmatprep.subr.bf16.mxu0 %v18561_v63  ;;  %v18034_v62 = vcombine.low %v430_v47, %v442_v22  ;;  %v18777_v63 = vcombine.high %v1173_v54, %v1185_v55  ;;  %v346_v24 = vld [vmem:[#allocation5 + $0x7f8] sm:$0xff]  ;;  %v1053_v38 = vld [vmem:[#allocation5 + $0x1e10] sm:$0xff] }
 0x14d   :  { %7552 = vmatprep.subr.bf16.mxu1 %v17795_v4  ;;  %v18011_v4 = vcombine.high %v406_v34, %v418_v60  ;;  %v1065_v39 = vld [vmem:[#allocation5 + $0x1e70] sm:$0xff]  ;;  %v286_v40 = vld [vmem:[#allocation5 + $0x618] sm:$0xff] }
 0x14e   :  { %v298_v41 = vld [vmem:[#allocation5 + $0x678] sm:$0xff] }
 0x14f   :  { %7510 = vmatpush1.bf16.msra.mxu0 %v18560_v6  ;;  %v18776_v6 = vcombine.low %v1173_v54, %v1185_v55  ;;  %v646_v45 = vld [vmem:[#allocation5 + $0x1158] sm:$0xff] }
 0x150   :  { %7553 = vmatpush1.bf16.msra.mxu1 %v17794_v42  ;;  %7511 = vmatprep.subr.bf16.mxu0 %v18537_v7  ;;  %v18010_v42 = vcombine.low %v406_v34, %v418_v60  ;;  %v18753_v7 = vcombine.high %v1149_v0, %v1161_v1  ;;  %v658_v46 = vld [vmem:[#allocation5 + $0x11b8] sm:$0xff] }
 0x151   :  { %7554 = vmatprep.subr.bf16.mxu1 %v17771_v11  ;;  %v17987_v11 = vcombine.high %v382_v2, %v394_v5  ;;  %v1030_v47 = vld [vmem:[#allocation5 + $0x1d58] sm:$0xff] }
 0x152   :  { %v1042_v22 = vld [vmem:[#allocation5 + $0x1db8] sm:$0xff] }
 0x153   :  { %7512 = vmatpush1.bf16.msra.mxu0 %v18536_v14  ;;  %v18752_v14 = vcombine.low %v1149_v0, %v1161_v1  ;;  %v622_v54 = vld [vmem:[#allocation5 + $0x1098] sm:$0xff] }
 0x154   :  { %7555 = vmatpush1.bf16.msra.mxu1 %v17770_v17  ;;  %7513 = vmatprep.subr.bf16.mxu0 %v18513_v18  ;;  %v17986_v17 = vcombine.low %v382_v2, %v394_v5  ;;  %v18729_v18 = vcombine.high %v1125_v8, %v1137_v9  ;;  %v634_v55 = vld [vmem:[#allocation5 + $0x10f8] sm:$0xff] }
 0x155   :  { %7556 = vmatprep.subr.bf16.mxu1 %v17747_v23  ;;  %v17963_v23 = vcombine.high %v358_v10, %v370_v13  ;;  %v1006_v34 = vld [vmem:[#allocation5 + $0x1c98] sm:$0xff]  ;;  %v18227_v0 = vcombine.high %v622_v54, %v634_v55 }
 0x156   :  { %v1018_v60 = vld [vmem:[#allocation5 + $0x1cf8] sm:$0xff] }
 0x157   :  { %7514 = vmatpush1.bf16.msra.mxu0 %v18512_v25  ;;  %v18728_v25 = vcombine.low %v1125_v8, %v1137_v9  ;;  %v598_v1 = vld [vmem:[#allocation5 + $0xfd8] sm:$0xff]  ;;  %v18611_v5 = vcombine.high %v1006_v34, %v1018_v60  ;;  %v18226_v9 = vcombine.low %v622_v54, %v634_v55 }
 0x158   :  { %7557 = vmatpush1.bf16.msra.mxu1 %v17746_v26  ;;  %7515 = vmatprep.subr.bf16.mxu0 %v18489_v28  ;;  %v17962_v26 = vcombine.low %v358_v10, %v370_v13  ;;  %v18705_v28 = vcombine.high %v1101_v19, %v1113_v20  ;;  %v610_v2 = vld [vmem:[#allocation5 + $0x1038] sm:$0xff] }
 0x159   :  { %7558 = vmatprep.subr.bf16.mxu1 %v17723_v32  ;;  %v17939_v32 = vcombine.high %v334_v21, %v346_v24  ;;  %v18203_v13 = vcombine.high %v598_v1, %v610_v2 }
 0x15b   :  { %7516 = vmatpush1.bf16.msra.mxu0 %v18488_v35  ;;  %v18704_v35 = vcombine.low %v1101_v19, %v1113_v20 }
 0x15c   :  { %7559 = vmatpush1.bf16.msra.mxu1 %v17722_v36  ;;  %7517 = vmatprep.subr.bf16.mxu0 %v18465_v37  ;;  %v17938_v36 = vcombine.low %v334_v21, %v346_v24  ;;  %v18681_v37 = vcombine.high %v1077_v29, %v1089_v30  ;;  %v22128_v21 = vld [vmem:[#allocation2 + $0xc] ss:$24 sps:$4 sm:$0xff]  }
 0x15d   :  { %7560 = vmatprep.subr.bf16.mxu1 %v17699_v12  ;;  %v17915_v12 = vcombine.high %v310_v31, %v322_v33 }
 0x15f   :  { %7518 = vmatpush1.bf16.msra.mxu0 %v18464_v43  ;;  %v18680_v43 = vcombine.low %v1077_v29, %v1089_v30  ;;  %v550_v29 = vld [vmem:[#allocation5 + $0xe58] sm:$0xff] }
 0x160   :  { %7561 = vmatpush1.bf16.msra.mxu1 %v17698_v16  ;;  %7519 = vmatprep.subr.bf16.mxu0 %v18825_v44  ;;  %v17914_v16 = vcombine.low %v310_v31, %v322_v33  ;;  %v18657_v44 = vcombine.high %v1053_v38, %v1065_v39  ;;  %v562_v30 = vld [vmem:[#allocation5 + $0xeb8] sm:$0xff] }
 0x161   :  { %7562 = vmatprep.subr.bf16.mxu1 %v18059_v48  ;;  %v17891_v48 = vcombine.high %v286_v40, %v298_v41  ;;  %v934_v31 = vld [vmem:[#allocation5 + $0x1a58] sm:$0xff] }
 0x163   :  { %7520 = vmatpush2.bf16.msra.mxu0 %v18824_v49  ;;  %v18656_v49 = vcombine.low %v1053_v38, %v1065_v39  ;;  %v18155_v39 = vcombine.high %v550_v29, %v562_v30 }
 0x164   :  { %7563 = vmatpush2.bf16.msra.mxu1 %v18058_v50  ;;  %7521 = vmatprep.subr.bf16.mxu0 %v18801_v51  ;;  %v17890_v50 = vcombine.low %v286_v40, %v298_v41  ;;  %v18251_v51 = vcombine.high %v646_v45, %v658_v46  ;;  %v526_v40 = vld [vmem:[#allocation5 + $0xd98] sm:$0xff] }
 0x165   :  { %7564 = vmatprep.subr.bf16.mxu1 %v18035_v58  ;;  %v18635_v58 = vcombine.high %v1030_v47, %v1042_v22  ;;  %v910_v41 = vld [vmem:[#allocation5 + $0x1998] sm:$0xff] }
 0x167   :  { %7522 = vmatpush2.bf16.msra.mxu0 %v18800_v61  ;;  %v18250_v61 = vcombine.low %v646_v45, %v658_v46  ;;  %v922_v45 = vld [vmem:[#allocation5 + $0x19f8] sm:$0xff] }
 0x168   :  { %7565 = vmatpush2.bf16.msra.mxu1 %v18034_v62  ;;  %7523 = vmatprep.subr.bf16.mxu0 %v18777_v63  ;;  %v22115_v62 = vpop.f32.mrf.mxu0  ;;  %v18634_v63 = vcombine.low %v1030_v47, %v1042_v22  ;;  %v18154_v47 = vcombine.low %v550_v29, %v562_v30  ;;  %v18515_v55 = vcombine.high %v910_v41, %v922_v45 }
 0x169   :  { %7566 = vmatprep.subr.bf16.mxu1 %v18011_v4  ;;  %v982_v4 = vld [vmem:[#allocation5 + $0x1bd8] sm:$0xff] }
 0x16b   :  { %7524 = vmatpush2.bf16.msra.mxu0 %v18776_v6  ;;  %v994_v6 = vld [vmem:[#allocation5 + $0x1c38] sm:$0xff] }
 0x16c   :  { %7567 = vmatpush2.bf16.msra.mxu1 %v18010_v42  ;;  %7525 = vmatprep.subr.bf16.mxu0 %v18753_v7  ;;  %v22117_v7 = vld [vmem:[#allocation2 + $0x10] ss:$24 sps:$4 sm:$0xff]   ;;  %v18587_v20 = vcombine.high %v982_v4, %v994_v6 }
 0x16d   :  { %7568 = vmatprep.subr.bf16.mxu1 %v17987_v11  ;;  %v18610_v11 = vcombine.low %v1006_v34, %v1018_v60  ;;  %v898_v34 = vld [vmem:[#allocation5 + $0x1938] sm:$0xff]  ;;  %v18514_v60 = vcombine.low %v910_v41, %v922_v45 }
 0x16e   :  { %v766_v45 = vld [vmem:[#allocation5 + $0x1518] sm:$0xff] }
 0x16f   :  { %7526 = vmatpush2.bf16.msra.mxu0 %v18752_v14  ;;  %v574_v14 = vld [vmem:[#allocation5 + $0xf18] sm:$0xff] }
 0x170   :  { %7569 = vmatpush2.bf16.msra.mxu1 %v17986_v17  ;;  %7527 = vmatprep.subr.bf16.mxu0 %v18729_v18  ;;  %v586_v17 = vld [vmem:[#allocation5 + $0xf78] sm:$0xff] }
 0x171   :  { %7570 = vmatprep.subr.bf16.mxu1 %v17963_v23  ;;  %v958_v18 = vld [vmem:[#allocation5 + $0x1b18] sm:$0xff] }
 0x173   :  { %7528 = vmatpush2.bf16.msra.mxu0 %v18728_v25  ;;  %v18202_v25 = vcombine.low %v598_v1, %v610_v2  ;;  %v862_v1 = vld [vmem:[#allocation5 + $0x1818] sm:$0xff] }
 0x174   :  { %7571 = vmatpush2.bf16.msra.mxu1 %v17962_v26  ;;  %7529 = vmatprep.subr.bf16.mxu0 %v18705_v28  ;;  %v18586_v26 = vcombine.low %v982_v4, %v994_v6  ;;  %v18179_v28 = vcombine.high %v574_v14, %v586_v17  ;;  %v874_v4 = vld [vmem:[#allocation5 + $0x1878] sm:$0xff] }
 0x175   :  { %7572 = vmatprep.subr.bf16.mxu1 %v17939_v32 }
 0x177   :  { %7530 = vmatpush2.bf16.msra.mxu0 %v18704_v35  ;;  %v946_v35 = vld [vmem:[#allocation5 + $0x1ab8] sm:$0xff] }
 0x178   :  { %7573 = vmatpush2.bf16.msra.mxu1 %v17938_v36  ;;  %7531 = vmatprep.subr.bf16.mxu0 %v18681_v37  ;;  %v18178_v37 = vcombine.low %v574_v14, %v586_v17  ;;  %v18467_v14 = vcombine.high %v862_v1, %v874_v4  ;;  %v1234_v17 = vld [vmem:[#allocation5 + $0x23b8] sm:$0xff] }
 0x179   :  { %7574 = vmatprep.subr.bf16.mxu1 %v17915_v12  ;;  %v538_v12 = vld [vmem:[#allocation5 + $0xdf8] sm:$0xff] }
 0x17a   :  { %v18131_v22 = vcombine.high %v526_v40, %v538_v12 }
 0x17b   :  { %7532 = vmatpush2.bf16.msra.mxu0 %v18680_v43 }
 0x17c   :  { %7575 = vmatpush2.bf16.msra.mxu1 %v17914_v16  ;;  %7533 = vmatprep.subr.bf16.mxu0 %v18657_v44  ;;  %v18539_v44 = vcombine.high %v934_v31, %v946_v35 }
 0x17d   :  { %7576 = vmatprep.subr.bf16.mxu1 %v17891_v48  ;;  %v18538_v48 = vcombine.low %v934_v31, %v946_v35  ;;  %v802_v35 = vld [vmem:[#allocation5 + $0x1638] sm:$0xff] }
 0x17f   :  { %7534 = vmatpush2.bf16.msra.mxu0 %v18656_v49  ;;  %v502_v49 = vld [vmem:[#allocation5 + $0xcd8] sm:$0xff] }
 0x180   :  { %7577 = vmatpush2.bf16.msra.mxu1 %v17890_v50  ;;  %7589 = vmatprep.subr.bf16.mxu0 %v18251_v51  ;;  %v514_v50 = vld [vmem:[#allocation5 + $0xd38] sm:$0xff] }
 0x181   :  { %7632 = vmatprep.subr.bf16.mxu1 %v18635_v58  ;;  %v886_v51 = vld [vmem:[#allocation5 + $0x18d8] sm:$0xff]  ;;  %v18130_v58 = vcombine.low %v526_v40, %v538_v12 }
 0x182   :  { %v7279_v42 = vpop.f32.mrf.mxu0  ;;  %7536 = vmatmul.mubr.bf16.vlgmr.msra.gmra.mxu0 %v22117_v7  ;;  %v18491_v2 = vcombine.high %v886_v51, %v898_v34  ;;  %v18490_v6 = vcombine.low %v886_v51, %v898_v34  ;;  %v742_v51 = vld [vmem:[#allocation5 + $0x1458] sm:$0xff] }
 0x183   :  { %v22121_v8 = vadd.f32 %v7279_v42, %v22105_v52  ;;  %7579 = vmatmul.mubr.bf16.vlgmr.msra.gmra.mxu1 %v22099_v56  ;;  %7590 = vmatpush1.bf16.msra.mxu0 %v18250_v61  ;;  %v970_v52 = vld [vmem:[#allocation5 + $0x1b78] sm:$0xff]  ;;  %v18107_v61 = vcombine.high %v502_v49, %v514_v50 }
 0x184   :  { %7633 = vmatpush1.bf16.msra.mxu1 %v18634_v63  ;;  %v22124_v10 = vpop.f32.mrf.mxu0  ;;  %7591 = vmatprep.subr.bf16.mxu0 %v18227_v0  ;;  %v18562_v38 = vcombine.low %v958_v18, %v970_v52  ;;  %v478_v63 = vld [vmem:[#allocation5 + $0xc18] sm:$0xff] }
 0x185   :  { %v8755_v19 = vmul.f32 %v22121_v8, %v22121_v8  ;;  %7634 = vmatprep.subr.bf16.mxu1 %v18611_v5  ;;  %7621 = vmatprep.mubr.bf16.mxu0 %v22128_v21  ;;  %v490_v0 = vld [vmem:[#allocation5 + $0xc78] sm:$0xff]  ;;  %v18106_v5 = vcombine.low %v502_v49, %v514_v50 }
 0x186   :  { %v7283_v56 = vpop.f32.mrf.mxu0  ;;  %7664 = vmatprep.mubr.bf16.mxu1 %v22109_v57  ;;  %v18563_v57 = vcombine.high %v958_v18, %v970_v52  ;;  %v18083_v42 = vcombine.high %v478_v63, %v490_v0  ;;  %v18082_v18 = vcombine.low %v478_v63, %v490_v0  ;;  %v718_v0 = vld [vmem:[#allocation5 + $0x1398] sm:$0xff] }
 0x187   :  { %v8803_v23 = vmul.f32 %v8755_v19, %v22121_v8  ;;  %v22134_v24 = vadd.f32 %v7283_v56, %v22113_v3  ;;  %7592 = vmatpush1.bf16.msra.mxu0 %v18226_v9  ;;  %v838_v9 = vld [vmem:[#allocation5 + $0x1758] sm:$0xff] }
 0x188   :  { %7635 = vmatpush1.bf16.msra.mxu1 %v18610_v11  ;;  %7593 = vmatprep.subr.bf16.mxu0 %v18203_v13  ;;  %v850_v11 = vld [vmem:[#allocation5 + $0x17b8] sm:$0xff] }
 0x189   :  { %v8851_v32 = vmul.f32 0.044715, %v8803_v23  ;;  %v8779_v33 = vmul.f32 %v22134_v24, %v22134_v24  ;;  %7636 = vmatprep.subr.bf16.mxu1 %v18587_v20  ;;  %v1222_v13 = vld [vmem:[#allocation5 + $0x2358] sm:$0xff]  ;;  %v18466_v20 = vcombine.low %v862_v1, %v874_v4  ;;  %v18443_v52 = vcombine.high %v838_v9, %v850_v11 }
 0x18a   :  { %v814_v56 = vld [vmem:[#allocation5 + $0x1698] sm:$0xff]  ;;  %v18442_v29 = vcombine.low %v838_v9, %v850_v11 }
 0x18b   :  { %v8899_v36 = vadd.f32 %v8851_v32, %v22121_v8  ;;  %v8827_v3 = vmul.f32 %v8779_v33, %v22134_v24  ;;  %7594 = vmatpush1.bf16.msra.mxu0 %v18202_v25  ;;  %v826_v23 = vld [vmem:[#allocation5 + $0x16f8] sm:$0xff]  ;;  %v18826_v32 = vcombine.low %v1222_v13, %v1234_v17 }
 0x18c   :  { %7637 = vmatpush1.bf16.msra.mxu1 %v18586_v26  ;;  %7595 = vmatprep.subr.bf16.mxu0 %v18179_v28  ;;  %v1198_v25 = vld [vmem:[#allocation5 + $0x2298] sm:$0xff]  ;;  %v18827_v26 = vcombine.high %v1222_v13, %v1234_v17  ;;  %v18419_v33 = vcombine.high %v814_v56, %v826_v23  ;;  %v18418_v12 = vcombine.low %v814_v56, %v826_v23 }
 0x18d   :  { %v8947_v43 = vmul.f32 0.7978845, %v8899_v36  ;;  %v8875_v16 = vmul.f32 0.044715, %v8827_v3  ;;  %7638 = vmatprep.subr.bf16.mxu1 %v18563_v57  ;;  %v1210_v28 = vld [vmem:[#allocation5 + $0x22f8] sm:$0xff]  ;;  %v8707_v3 = vmul.f32 0.5, %v22121_v8 }
 0x18e   :  { %v790_v57 = vld [vmem:[#allocation5 + $0x15d8] sm:$0xff] }
 0x18f   :  { %21745 = vtanh.f32 %v8947_v43  ;;  %v8923_v46 = vadd.f32 %v8875_v16, %v22134_v24  ;;  %7596 = vmatpush1.bf16.msra.mxu0 %v18178_v37  ;;  %v1174_v36 = vld [vmem:[#allocation5 + $0x21d8] sm:$0xff]  ;;  %v8731_v37 = vmul.f32 0.5, %v22134_v24  ;;  %v18802_v16 = vcombine.low %v1198_v25, %v1210_v28 }
 0x190   :  { %7639 = vmatpush1.bf16.msra.mxu1 %v18562_v38  ;;  %7597 = vmatprep.subr.bf16.mxu0 %v18155_v39  ;;  %v18803_v38 = vcombine.high %v1198_v25, %v1210_v28  ;;  %v1186_v39 = vld [vmem:[#allocation5 + $0x2238] sm:$0xff]  ;;  %v18394_v24 = vcombine.low %v790_v57, %v802_v35 }
 0x191   :  { %v8971_v54 = vmul.f32 0.7978845, %v8923_v46  ;;  %7640 = vmatprep.subr.bf16.mxu1 %v18539_v44  ;;  %v18395_v44 = vcombine.high %v790_v57, %v802_v35  ;;  %v778_v46 = vld [vmem:[#allocation5 + $0x1578] sm:$0xff]  ;;  %v18778_v49 = vcombine.low %v1174_v36, %v1186_v39  ;;  %v263_v57 = vld [vmem:[#allocation5 + $0x560] sm:$0xff] }
 0x192   :  { %v1162_v8 = vld [vmem:[#allocation5 + $0x2178] sm:$0xff]  ;;  %v18371_v50 = vcombine.high %v766_v45, %v778_v46  ;;  %v275_v35 = vld [vmem:[#allocation5 + $0x5c0] sm:$0xff] }
 0x193   :  { %21747 = vtanh.f32 %v8971_v54  ;;  %7598 = vmatpush1.bf16.msra.mxu0 %v18154_v47  ;;  %v1150_v47 = vld [vmem:[#allocation5 + $0x2118] sm:$0xff] }
 0x194   :  { %7641 = vmatpush1.bf16.msra.mxu1 %v18538_v48  ;;  %7599 = vmatprep.subr.bf16.mxu0 %v18131_v22  ;;  %v18779_v48 = vcombine.high %v1174_v36, %v1186_v39  ;;  %v754_v54 = vld [vmem:[#allocation5 + $0x14b8] sm:$0xff]  ;;  %v18755_v34 = vcombine.high %v1150_v47, %v1162_v8  ;;  %v647_v36 = vld [vmem:[#allocation5 + $0x1160] sm:$0xff] }
 0x195   :  { %7642 = vmatprep.subr.bf16.mxu1 %v18515_v55  ;;  %v1126_v55 = vld [vmem:[#allocation5 + $0x2058] sm:$0xff]  ;;  %v18347_v63 = vcombine.high %v742_v51, %v754_v54  ;;  %v659_v39 = vld [vmem:[#allocation5 + $0x11c0] sm:$0xff] }
 0x196   :  { %v730_v1 = vld [vmem:[#allocation5 + $0x13f8] sm:$0xff] }
 0x197   :  { %7600 = vmatpush1.bf16.msra.mxu0 %v18130_v58  ;;  %v1138_v58 = vld [vmem:[#allocation5 + $0x20b8] sm:$0xff]  ;;  %v18323_v9 = vcombine.high %v718_v0, %v730_v1 }
 0x198   :  { %7643 = vmatpush1.bf16.msra.mxu1 %v18514_v60  ;;  %7601 = vmatprep.subr.bf16.mxu0 %v18107_v61  ;;  %v18370_v60 = vcombine.low %v766_v45, %v778_v46  ;;  %v18754_v61 = vcombine.low %v1150_v47, %v1162_v8  ;;  %v18731_v4 = vcombine.high %v1126_v55, %v1138_v58  ;;  %v694_v11 = vld [vmem:[#allocation5 + $0x12d8] sm:$0xff]  ;;  %v22152_v45 = vld [vmem:[#allocation7] sm:$0xff] }
 0x199   :  { %7644 = vmatprep.subr.bf16.mxu1 %v18491_v2  ;;  %v1102_v2 = vld [vmem:[#allocation5 + $0x1f98] sm:$0xff]  ;;  %v635_v8 = vld [vmem:[#allocation5 + $0x1100] sm:$0xff] }
 0x19a   :  { %v706_v13 = vld [vmem:[#allocation5 + $0x1338] sm:$0xff] }
 0x19b   :  { %7602 = vmatpush1.bf16.msra.mxu0 %v18106_v5  ;;  %v1114_v5 = vld [vmem:[#allocation5 + $0x1ff8] sm:$0xff]  ;;  %v18299_v56 = vcombine.high %v694_v11, %v706_v13 }
 0x19c   :  { %v21746_v19 = vpop.eup %21745  ;;  %7645 = vmatpush1.bf16.msra.mxu1 %v18490_v6  ;;  %7603 = vmatprep.subr.bf16.mxu0 %v18083_v42  ;;  %v18346_v6 = vcombine.low %v742_v51, %v754_v54  ;;  %v18730_v42 = vcombine.low %v1126_v55, %v1138_v58  ;;  %v18707_v17 = vcombine.high %v1102_v2, %v1114_v5  ;;  %v670_v23 = vld [vmem:[#allocation5 + $0x1218] sm:$0xff]  ;;  %v215_v54 = vld [vmem:[#allocation5 + $0x3e0] sm:$0xff] }
 0x19d   :  { %7646 = vmatprep.subr.bf16.mxu1 %v18467_v14  ;;  %v9043_v30 = vadd.f32 1.0, %v21746_v19  ;;  %v1078_v14 = vld [vmem:[#allocation5 + $0x1ed8] sm:$0xff]  ;;  %v22145_v19 = vpop.f32.mrf.mxu1  ;;  %v227_v55 = vld [vmem:[#allocation5 + $0x440] sm:$0xff] }
 0x19e   :  { %v682_v25 = vld [vmem:[#allocation5 + $0x1278] sm:$0xff] }
 0x19f   :  { %7604 = vmatpush1.bf16.msra.mxu0 %v18082_v18  ;;  %v9091_v41 = vmul.f32 %v9043_v30, %v8707_v3  ;;  %v1090_v18 = vld [vmem:[#allocation5 + $0x1f38] sm:$0xff]  ;;  %v7322_v28 = vpop.f32.mrf.mxu1  ;;  %v22148_v3 = vsub.s32 2, %v22093_v15 }
 0x1a0   :  { %v21748_v31 = vpop.eup %21747  ;;  %7647 = vmatpush1.bf16.msra.mxu1 %v18466_v20  ;;  %7605 = vmatprep.subr.bf16.mxu0 %v18443_v52  ;;  %v18322_v20 = vcombine.low %v718_v0, %v730_v1  ;;  %v18706_v52 = vcombine.low %v1102_v2, %v1114_v5  ;;  %v1066_v30 = vld [vmem:[#allocation5 + $0x1e78] sm:$0xff] }
 0x1a1   :  { %7648 = vmatprep.subr.bf16.mxu1 %v18827_v26  ;;  %v9067_v40 = vadd.f32 1.0, %v21748_v31  ;;  %v1054_v26 = vld [vmem:[#allocation5 + $0x1e18] sm:$0xff]  ;;  %v18298_v31 = vcombine.low %v694_v11, %v706_v13  ;;  %23182 = vst [vmem:[#allocation17_spill] sm:$0xff] %v22148_v3  ;;  %v1260_v46 = vrot.slane %v22152_v45, %v22148_v3  ;;  %v191_v11 = vld [vmem:[#allocation5 + $0x320] sm:$0xff] }
 0x1a2   :  { %v22160_v1 = vld [vmem:[#allocation2 + $0x8] ss:$24 sps:$4 sm:$0xff]   ;;  %v203_v13 = vld [vmem:[#allocation5 + $0x380] sm:$0xff] }
 0x1a3   :  { %7606 = vmatpush2.bf16.msra.mxu0 %v18442_v29  ;;  %v9115_v43 = vmul.f32 %v9067_v40, %v8731_v37  ;;  %v18683_v29 = vcombine.high %v1078_v14, %v1090_v18  ;;  %v22150_v37 = vpop.f32.mrf.mxu1  ;;  %v18274_v40 = vcombine.low %v670_v23, %v682_v25  ;;  %v7323_v58 = vadd.f32 %v7322_v28, %v1260_v46 }
 0x1a4   :  { %7649 = vmatpush2.bf16.msra.mxu1 %v18826_v32  ;;  %7607 = vmatprep.subr.bf16.mxu0 %v18419_v33  ;;  %v18682_v32 = vcombine.low %v1078_v14, %v1090_v18  ;;  %v18275_v33 = vcombine.high %v670_v23, %v682_v25  ;;  %v575_v14 = vld [vmem:[#allocation5 + $0xf20] sm:$0xff]  ;;  %v17820_v28 = vcombine.low %v215_v54, %v227_v55 }
 0x1a5   :  { %7650 = vmatprep.subr.bf16.mxu1 %v18803_v38  ;;  %v22143_v22 = vpack.c.bf16 %v9115_v43, %v9091_v41  ;;  %v18659_v38 = vcombine.high %v1054_v26, %v1066_v30  ;;  %v17869_v41 = vcombine.high %v263_v57, %v275_v35  ;;  %v239_v43 = vld [vmem:[#allocation5 + $0x4a0] sm:$0xff]  ;;  %v7326_v47 = vpop.f32.mrf.mxu1 }
 0x1a7   :  { %7608 = vmatpush2.bf16.msra.mxu0 %v18418_v12  ;;  %v18658_v12 = vcombine.low %v1054_v26, %v1066_v30 }
 0x1a8   :  { %7651 = vmatpush2.bf16.msra.mxu1 %v18802_v16  ;;  %7609 = vmatprep.subr.bf16.mxu0 %v18395_v44  ;;  %v251_v16 = vld [vmem:[#allocation5 + $0x500] sm:$0xff] }
 0x1a9   :  { %7652 = vmatprep.subr.bf16.mxu1 %v18779_v48  ;;  %v623_v44 = vld [vmem:[#allocation5 + $0x10a0] sm:$0xff]  ;;  %v18253_v48 = vcombine.high %v647_v36, %v659_v39  ;;  %v17845_v51 = vcombine.high %v239_v43, %v251_v16  ;;  %v17844_v5 = vcombine.low %v239_v43, %v251_v16 }
 0x1aa   :  { %v143_v16 = vld [vmem:[#allocation5 + $0x1a0] sm:$0xff] }
 0x1ab   :  { %7610 = vmatpush2.bf16.msra.mxu0 %v18394_v24  ;;  %v17868_v24 = vcombine.low %v263_v57, %v275_v35  ;;  %v551_v57 = vld [vmem:[#allocation5 + $0xe60] sm:$0xff] }
 0x1ac   :  { %7653 = vmatpush2.bf16.msra.mxu1 %v18778_v49  ;;  %7611 = vmatprep.subr.bf16.mxu0 %v18371_v50  ;;  %v22156_v49 = vpop.f32.mrf.mxu0  ;;  %v18252_v50 = vcombine.low %v647_v36, %v659_v39 }
 0x1ad   :  { %7654 = vmatprep.subr.bf16.mxu1 %v18755_v34  ;;  %v599_v34 = vld [vmem:[#allocation5 + $0xfe0] sm:$0xff] }
 0x1af   :  { %7612 = vmatpush2.bf16.msra.mxu0 %v18370_v60  ;;  %v22158_v60 = vpop.f32.mrf.mxu1 }
 0x1b0   :  { %7655 = vmatpush2.bf16.msra.mxu1 %v18754_v61  ;;  %7613 = vmatprep.subr.bf16.mxu0 %v18347_v63  ;;  %v18229_v61 = vcombine.high %v623_v44, %v635_v8  ;;  %v611_v63 = vld [vmem:[#allocation5 + $0x1040] sm:$0xff] }
 0x1b1   :  { %7656 = vmatprep.subr.bf16.mxu1 %v18731_v4  ;;  %v18204_v30 = vcombine.low %v599_v34, %v611_v63 }
 0x1b3   :  { %7614 = vmatpush2.bf16.msra.mxu0 %v18346_v6 }
 0x1b4   :  { %7657 = vmatpush2.bf16.msra.mxu1 %v18730_v42  ;;  %7615 = vmatprep.subr.bf16.mxu0 %v18323_v9  ;;  %v18228_v42 = vcombine.low %v623_v44, %v635_v8  ;;  %v17821_v9 = vcombine.high %v215_v54, %v227_v55  ;;  %v155_v44 = vld [vmem:[#allocation5 + $0x200] sm:$0xff] }
 0x1b5   :  { %7658 = vmatprep.subr.bf16.mxu1 %v18707_v17  ;;  %v7327_v17 = vadd.f32 %v7326_v47, %v1260_v46  ;;  %v527_v46 = vld [vmem:[#allocation5 + $0xda0] sm:$0xff] }
 0x1b7   :  { %7616 = vmatpush2.bf16.msra.mxu0 %v18322_v20 }
 0x1b8   :  { %7659 = vmatpush2.bf16.msra.mxu1 %v18706_v52  ;;  %7617 = vmatprep.subr.bf16.mxu0 %v18299_v56  ;;  %v18205_v52 = vcombine.high %v599_v34, %v611_v63  ;;  %v587_v56 = vld [vmem:[#allocation5 + $0xf80] sm:$0xff]  ;;  %v17749_v34 = vcombine.high %v143_v16, %v155_v44 }
 0x1b9   :  { %7660 = vmatprep.subr.bf16.mxu1 %v18683_v29  ;;  %v503_v63 = vld [vmem:[#allocation5 + $0xce0] sm:$0xff] }
 0x1bb   :  { %7618 = vmatpush2.bf16.msra.mxu0 %v18298_v31  ;;  %v17797_v31 = vcombine.high %v191_v11, %v203_v13 }
 0x1bc   :  { %7661 = vmatpush2.bf16.msra.mxu1 %v18682_v32  ;;  %7619 = vmatprep.subr.bf16.mxu0 %v18275_v33  ;;  %v167_v32 = vld [vmem:[#allocation5 + $0x260] sm:$0xff] }
 0x1bd   :  { %7662 = vmatprep.subr.bf16.mxu1 %v18659_v38  ;;  %v179_v33 = vld [vmem:[#allocation5 + $0x2c0] sm:$0xff] }
 0x1be   :  { %v563_v38 = vld [vmem:[#allocation5 + $0xec0] sm:$0xff]  ;;  %v17773_v43 = vcombine.high %v167_v32, %v179_v33  ;;  %v17772_v54 = vcombine.low %v167_v32, %v179_v33 }
 0x1bf   :  { %7620 = vmatpush2.bf16.msra.mxu0 %v18274_v40  ;;  %v18157_v8 = vcombine.high %v551_v57, %v563_v38  ;;  %v18156_v55 = vcombine.low %v551_v57, %v563_v38  ;;  %v851_v32 = vld [vmem:[#allocation5 + $0x17c0] sm:$0xff] }
 0x1c0   :  { %7663 = vmatpush2.bf16.msra.mxu1 %v18658_v12  ;;  %7675 = vmatprep.subr.bf16.mxu0 %v17869_v41  ;;  %v17796_v12 = vcombine.low %v191_v11, %v203_v13  ;;  %v18180_v41 = vcombine.low %v575_v14, %v587_v56  ;;  %v95_v13 = vld [vmem:[#allocation5 + $0x20] sm:$0xff] }
 0x1c1   :  { %7718 = vmatprep.subr.bf16.mxu1 %v18253_v48  ;;  %v443_v38 = vld [vmem:[#allocation5 + $0xb00] sm:$0xff] }
 0x1c2   :  { %v7365_v0 = vpop.f32.mrf.mxu0  ;;  %7622 = vmatmul.mubr.bf16.vlgmr.msra.gmra.mxu0 %v22160_v1 }
 0x1c3   :  { %v7366_v2 = vadd.f32 %v7365_v0, %v7323_v58  ;;  %v7408_v4 = vpop.f32.mrf.mxu1  ;;  %7665 = vmatmul.mubr.bf16.vlgmr.msra.gmra.mxu1 %v22117_v7  ;;  %7676 = vmatpush1.bf16.msra.mxu0 %v17868_v24  ;;  %v22170_v7 = vld [vmem:[#allocation2 + $0x4] ss:$24 sps:$4 sm:$0xff]   ;;  %v539_v24 = vld [vmem:[#allocation5 + $0xe00] sm:$0xff] }
 0x1c4   :  { %7719 = vmatpush1.bf16.msra.mxu1 %v18252_v50  ;;  %v22164_v6 = vpop.f32.mrf.mxu0  ;;  %7677 = vmatprep.subr.bf16.mxu0 %v17845_v51  ;;  %v119_v58 = vld [vmem:[#allocation5 + $0xe0] sm:$0xff] }
 0x1c5   :  { %v22166_v18 = vadd.f32 %v7408_v4, %v7366_v2  ;;  %v22168_v20 = vpop.f32.mrf.mxu1  ;;  %7720 = vmatprep.subr.bf16.mxu1 %v18229_v61  ;;  %7707 = vmatprep.mubr.bf16.mxu0 %v22170_v7  ;;  %v131_v61 = vld [vmem:[#allocation5 + $0x140] sm:$0xff]  ;;  %v18133_v2 = vcombine.high %v527_v46, %v539_v24 }
 0x1c6   :  { %v7369_v23 = vpop.f32.mrf.mxu0  ;;  %7750 = vmatprep.mubr.bf16.mxu1 %v22128_v21  ;;  %v18181_v21 = vcombine.high %v575_v14, %v587_v56  ;;  %v515_v4 = vld [vmem:[#allocation5 + $0xd40] sm:$0xff]  ;;  %v17725_v11 = vcombine.high %v119_v58, %v131_v61 }
 0x1c7   :  { %v8757_v25 = vmul.f32 %v22166_v18, %v22166_v18  ;;  %v7370_v26 = vadd.f32 %v7369_v23, %v7327_v17  ;;  %7678 = vmatpush1.bf16.msra.mxu0 %v17844_v5  ;;  %v7412_v29 = vpop.f32.mrf.mxu1  ;;  %v107_v14 = vld [vmem:[#allocation5 + $0x80] sm:$0xff]  ;;  %v17724_v23 = vcombine.low %v119_v58, %v131_v61 }
 0x1c8   :  { %7721 = vmatpush1.bf16.msra.mxu1 %v18228_v42  ;;  %7679 = vmatprep.subr.bf16.mxu0 %v17821_v9  ;;  %v17748_v42 = vcombine.low %v143_v16, %v155_v44  ;;  %v18132_v9 = vcombine.low %v527_v46, %v539_v24  ;;  %v479_v17 = vld [vmem:[#allocation5 + $0xc20] sm:$0xff]  ;;  %v17700_v33 = vcombine.low %v95_v13, %v107_v14 }
 0x1c9   :  { %v8805_v35 = vmul.f32 %v8757_v25, %v22166_v18  ;;  %v22177_v36 = vadd.f32 %v7412_v29, %v7370_v26  ;;  %7722 = vmatprep.subr.bf16.mxu1 %v18205_v52  ;;  %v18109_v52 = vcombine.high %v503_v63, %v515_v4  ;;  %v491_v56 = vld [vmem:[#allocation5 + $0xc80] sm:$0xff]  ;;  %v18108_v25 = vcombine.low %v503_v63, %v515_v4 }
 0x1ca   :  { %v17701_v26 = vcombine.high %v95_v13, %v107_v14  ;;  %v467_v29 = vld [vmem:[#allocation5 + $0xbc0] sm:$0xff]  ;;  %v18084_v57 = vcombine.low %v479_v17, %v491_v56 }
 0x1cb   :  { %v8853_v39 = vmul.f32 0.044715, %v8805_v35  ;;  %v8781_v40 = vmul.f32 %v22177_v36, %v22177_v36  ;;  %7680 = vmatpush1.bf16.msra.mxu0 %v17820_v28  ;;  %v455_v28 = vld [vmem:[#allocation5 + $0xb60] sm:$0xff] }
 0x1cc   :  { %7723 = vmatpush1.bf16.msra.mxu1 %v18204_v30  ;;  %7681 = vmatprep.subr.bf16.mxu0 %v17797_v31  ;;  %v839_v30 = vld [vmem:[#allocation5 + $0x1760] sm:$0xff]  ;;  %v18085_v31 = vcombine.high %v479_v17, %v491_v56  ;;  %v18061_v35 = vcombine.high %v455_v28, %v467_v29 }
 0x1cd   :  { %v8901_v47 = vadd.f32 %v8853_v39, %v22166_v18  ;;  %v8829_v48 = vmul.f32 %v8781_v40, %v22177_v36  ;;  %7724 = vmatprep.subr.bf16.mxu1 %v18181_v21  ;;  %v431_v21 = vld [vmem:[#allocation5 + $0xaa0] sm:$0xff]  ;;  %v18445_v40 = vcombine.high %v839_v30, %v851_v32  ;;  %v18444_v16 = vcombine.low %v839_v30, %v851_v32 }
 0x1ce   :  { %v815_v39 = vld [vmem:[#allocation5 + $0x16a0] sm:$0xff]  ;;  %v18037_v44 = vcombine.high %v431_v21, %v443_v38 }
 0x1cf   :  { %v8949_v50 = vmul.f32 0.7978845, %v8901_v47  ;;  %v8877_v51 = vmul.f32 0.044715, %v8829_v48  ;;  %7682 = vmatpush1.bf16.msra.mxu0 %v17796_v12  ;;  %v827_v12 = vld [vmem:[#allocation5 + $0x1700] sm:$0xff] }
 0x1d0   :  { %7725 = vmatpush1.bf16.msra.mxu1 %v18180_v41  ;;  %7683 = vmatprep.subr.bf16.mxu0 %v17773_v43  ;;  %v18060_v43 = vcombine.low %v455_v28, %v467_v29  ;;  %v407_v46 = vld [vmem:[#allocation5 + $0x9e0] sm:$0xff]  ;;  %v18420_v61 = vcombine.low %v815_v39, %v827_v12 }
 0x1d1   :  { %21749 = vtanh.f32 %v8949_v50  ;;  %v8925_v0 = vadd.f32 %v8877_v51, %v22177_v36  ;;  %7726 = vmatprep.subr.bf16.mxu1 %v18157_v8  ;;  %v419_v47 = vld [vmem:[#allocation5 + $0xa40] sm:$0xff]  ;;  %v18421_v8 = vcombine.high %v815_v39, %v827_v12 }
 0x1d2   :  { %v791_v48 = vld [vmem:[#allocation5 + $0x15e0] sm:$0xff]  ;;  %v18013_v63 = vcombine.high %v407_v46, %v419_v47  ;;  %v18012_v13 = vcombine.low %v407_v46, %v419_v47 }
 0x1d3   :  { %v8973_v5 = vmul.f32 0.7978845, %v8925_v0  ;;  %7684 = vmatpush1.bf16.msra.mxu0 %v17772_v54  ;;  %v803_v24 = vld [vmem:[#allocation5 + $0x1640] sm:$0xff]  ;;  %v8709_v54 = vmul.f32 0.5, %v22166_v18 }
 0x1d4   :  { %7727 = vmatpush1.bf16.msra.mxu1 %v18156_v55  ;;  %7685 = vmatprep.subr.bf16.mxu0 %v17749_v34  ;;  %v8733_v55 = vmul.f32 0.5, %v22177_v36  ;;  %v18036_v34 = vcombine.low %v431_v21, %v443_v38  ;;  %v383_v0 = vld [vmem:[#allocation5 + $0x920] sm:$0xff]  ;;  %v18396_v36 = vcombine.low %v791_v48, %v803_v24 }
 0x1d5   :  { %21751 = vtanh.f32 %v8973_v5  ;;  %7728 = vmatprep.subr.bf16.mxu1 %v18133_v2  ;;  %v395_v2 = vld [vmem:[#allocation5 + $0x980] sm:$0xff]  ;;  %v18397_v5 = vcombine.high %v791_v48, %v803_v24 }
 0x1d6   :  { %v767_v4 = vld [vmem:[#allocation5 + $0x1520] sm:$0xff]  ;;  %v17989_v14 = vcombine.high %v383_v0, %v395_v2 }
 0x1d7   :  { %7686 = vmatpush1.bf16.msra.mxu0 %v17748_v42  ;;  %v779_v42 = vld [vmem:[#allocation5 + $0x1580] sm:$0xff] }
 0x1d8   :  { %7729 = vmatpush1.bf16.msra.mxu1 %v18132_v9  ;;  %7687 = vmatprep.subr.bf16.mxu0 %v17725_v11  ;;  %v359_v17 = vld [vmem:[#allocation5 + $0x860] sm:$0xff]  ;;  %v18372_v28 = vcombine.low %v767_v4, %v779_v42 }
 0x1d9   :  { %7730 = vmatprep.subr.bf16.mxu1 %v18109_v52  ;;  %v371_v52 = vld [vmem:[#allocation5 + $0x8c0] sm:$0xff] }
 0x1da   :  { %v743_v56 = vld [vmem:[#allocation5 + $0x1460] sm:$0xff]  ;;  %v17965_v29 = vcombine.high %v359_v17, %v371_v52 }
 0x1db   :  { %7688 = vmatpush1.bf16.msra.mxu0 %v17724_v23  ;;  %v18373_v23 = vcombine.high %v767_v4, %v779_v42  ;;  %v335_v30 = vld [vmem:[#allocation5 + $0x7a0] sm:$0xff]  ;;  %v22189_v4 = vsub.s32 4, %v22093_v15 }
 0x1dc   :  { %7731 = vmatpush1.bf16.msra.mxu1 %v18108_v25  ;;  %7689 = vmatprep.subr.bf16.mxu0 %v17701_v26  ;;  %v755_v25 = vld [vmem:[#allocation5 + $0x14c0] sm:$0xff]  ;;  %v17988_v26 = vcombine.low %v383_v0, %v395_v2  ;;  %v276_v0 = vld [vmem:[#allocation5 + $0x5c8] sm:$0xff] }
 0x1dd   :  { %7732 = vmatprep.subr.bf16.mxu1 %v18085_v31  ;;  %v347_v31 = vld [vmem:[#allocation5 + $0x800] sm:$0xff]  ;;  %v18348_v21 = vcombine.low %v743_v56, %v755_v25  ;;  %23183 = vst [vmem:[#allocation18_spill] sm:$0xff] %v22189_v4 }
 0x1de   :  { %v21750_v41 = vpop.eup %21749  ;;  %v719_v32 = vld [vmem:[#allocation5 + $0x13a0] sm:$0xff]  ;;  %v17941_v38 = vcombine.high %v335_v30, %v347_v31 }
 0x1df   :  { %7690 = vmatpush1.bf16.msra.mxu0 %v17700_v33  ;;  %v9045_v50 = vadd.f32 1.0, %v21750_v41  ;;  %v18349_v33 = vcombine.high %v743_v56, %v755_v25  ;;  %v311_v39 = vld [vmem:[#allocation5 + $0x6e0] sm:$0xff]  ;;  %v22193_v56 = vpop.f32.mrf.mxu0 }
 0x1e0   :  { %7733 = vmatpush1.bf16.msra.mxu1 %v18084_v57  ;;  %7691 = vmatprep.subr.bf16.mxu0 %v18061_v35  ;;  %v731_v57 = vld [vmem:[#allocation5 + $0x1400] sm:$0xff]  ;;  %v17964_v35 = vcombine.low %v359_v17, %v371_v52  ;;  %v1268_v17 = vrot.slane %v22152_v45, %v22189_v4 }
 0x1e1   :  { %7734 = vmatprep.subr.bf16.mxu1 %v18445_v40  ;;  %v9093_v9 = vmul.f32 %v9045_v50, %v8709_v54  ;;  %v323_v40 = vld [vmem:[#allocation5 + $0x740] sm:$0xff]  ;;  %v18325_v41 = vcombine.high %v719_v32, %v731_v57 }
 0x1e2   :  { %v21752_v51 = vpop.eup %21751  ;;  %v695_v12 = vld [vmem:[#allocation5 + $0x12e0] sm:$0xff]  ;;  %v17917_v46 = vcombine.high %v311_v39, %v323_v40 }
 0x1e3   :  { %7692 = vmatpush2.bf16.msra.mxu0 %v18060_v43  ;;  %v9069_v58 = vadd.f32 1.0, %v21752_v51  ;;  %v707_v43 = vld [vmem:[#allocation5 + $0x1340] sm:$0xff]  ;;  %v17916_v51 = vcombine.low %v311_v39, %v323_v40 }
 0x1e4   :  { %7735 = vmatpush2.bf16.msra.mxu1 %v18444_v16  ;;  %7693 = vmatprep.subr.bf16.mxu0 %v18037_v44  ;;  %v17940_v16 = vcombine.low %v335_v30, %v347_v31  ;;  %v18324_v44 = vcombine.low %v719_v32, %v731_v57  ;;  %v287_v47 = vld [vmem:[#allocation5 + $0x620] sm:$0xff]  ;;  %v18301_v24 = vcombine.high %v695_v12, %v707_v43  ;;  %v22195_v30 = vpop.f32.mrf.mxu1  ;;  %v228_v32 = vld [vmem:[#allocation5 + $0x448] sm:$0xff] }
 0x1e5   :  { %7736 = vmatprep.subr.bf16.mxu1 %v18421_v8  ;;  %v9117_v11 = vmul.f32 %v9069_v58, %v8733_v55  ;;  %v299_v48 = vld [vmem:[#allocation5 + $0x680] sm:$0xff]  ;;  %v18300_v54 = vcombine.low %v695_v12, %v707_v43  ;;  %v22197_v57 = vld [vmem:[#allocation2] ss:$24 sps:$4 sm:$0xff]  }
 0x1e6   :  { %v671_v8 = vld [vmem:[#allocation5 + $0x1220] sm:$0xff]  ;;  %v17893_v55 = vcombine.high %v287_v47, %v299_v48  ;;  %v17892_v2 = vcombine.low %v287_v47, %v299_v48  ;;  %v192_v43 = vld [vmem:[#allocation5 + $0x328] sm:$0xff] }
 0x1e7   :  { %7694 = vmatpush2.bf16.msra.mxu0 %v18036_v34  ;;  %v22186_v18 = vpack.c.bf16 %v9117_v11, %v9093_v9  ;;  %v683_v50 = vld [vmem:[#allocation5 + $0x1280] sm:$0xff]  ;;  %v204_v47 = vld [vmem:[#allocation5 + $0x388] sm:$0xff] }
 0x1e8   :  { %7737 = vmatpush2.bf16.msra.mxu1 %v18420_v61  ;;  %7695 = vmatprep.subr.bf16.mxu0 %v18013_v63  ;;  %v1031_v34 = vld [vmem:[#allocation5 + $0x1d60] sm:$0xff]  ;;  %v264_v61 = vld [vmem:[#allocation5 + $0x568] sm:$0xff]  ;;  %v18277_v63 = vcombine.high %v671_v8, %v683_v50 }
 0x1e9   :  { %7738 = vmatprep.subr.bf16.mxu1 %v18397_v5  ;;  %v1043_v58 = vld [vmem:[#allocation5 + $0x1dc0] sm:$0xff]  ;;  %v18276_v5 = vcombine.low %v671_v8, %v683_v50 }
 0x1ea   :  { %v18637_v42 = vcombine.high %v1031_v34, %v1043_v58  ;;  %v1007_v9 = vld [vmem:[#allocation5 + $0x1ca0] sm:$0xff]  ;;  %v18636_v52 = vcombine.low %v1031_v34, %v1043_v58  ;;  %v168_v58 = vld [vmem:[#allocation5 + $0x268] sm:$0xff] }
 0x1eb   :  { %7696 = vmatpush2.bf16.msra.mxu0 %v18012_v13  ;;  %v1019_v11 = vld [vmem:[#allocation5 + $0x1d00] sm:$0xff]  ;;  %v240_v13 = vld [vmem:[#allocation5 + $0x4a8] sm:$0xff] }
 0x1ec   :  { %7739 = vmatpush2.bf16.msra.mxu1 %v18396_v36  ;;  %7697 = vmatprep.subr.bf16.mxu0 %v17989_v14  ;;  %v17871_v36 = vcombine.high %v264_v61, %v276_v0  ;;  %v252_v14 = vld [vmem:[#allocation5 + $0x508] sm:$0xff]  ;;  %v18613_v25 = vcombine.high %v1007_v9, %v1019_v11  ;;  %v959_v12 = vld [vmem:[#allocation5 + $0x1b20] sm:$0xff] }
 0x1ed   :  { %7740 = vmatprep.subr.bf16.mxu1 %v18373_v23  ;;  %v17870_v23 = vcombine.low %v264_v61, %v276_v0  ;;  %v17847_v31 = vcombine.high %v240_v13, %v252_v14  ;;  %v17846_v39 = vcombine.low %v240_v13, %v252_v14  ;;  %v22207_v48 = vld [vmem:[#allocation2 + $0x14] ss:$24 sps:$4 sm:$0xff]   ;;  %v180_v0 = vld [vmem:[#allocation5 + $0x2c8] sm:$0xff] }
 0x1ee   :  { %v947_v34 = vld [vmem:[#allocation5 + $0x1ac0] sm:$0xff]  ;;  %v17775_v13 = vcombine.high %v168_v58, %v180_v0 }
 0x1ef   :  { %7698 = vmatpush2.bf16.msra.mxu0 %v17988_v26  ;;  %v983_v26 = vld [vmem:[#allocation5 + $0x1be0] sm:$0xff] }
 0x1f0   :  { %7741 = vmatpush2.bf16.msra.mxu1 %v18372_v28  ;;  %7699 = vmatprep.subr.bf16.mxu0 %v17965_v29  ;;  %v995_v28 = vld [vmem:[#allocation5 + $0x1c40] sm:$0xff]  ;;  %v216_v29 = vld [vmem:[#allocation5 + $0x3e8] sm:$0xff] }
 0x1f1   :  { %7742 = vmatprep.subr.bf16.mxu1 %v18349_v33  ;;  %v18589_v40 = vcombine.high %v983_v26, %v995_v28 }
 0x1f3   :  { %7700 = vmatpush2.bf16.msra.mxu0 %v17964_v35 }
 0x1f4   :  { %7743 = vmatpush2.bf16.msra.mxu1 %v18348_v21  ;;  %7701 = vmatprep.subr.bf16.mxu0 %v17941_v38  ;;  %v18612_v21 = vcombine.low %v1007_v9, %v1019_v11  ;;  %v923_v9 = vld [vmem:[#allocation5 + $0x1a00] sm:$0xff]  ;;  %v144_v11 = vld [vmem:[#allocation5 + $0x1a8] sm:$0xff] }
 0x1f5   :  { %7744 = vmatprep.subr.bf16.mxu1 %v18325_v41  ;;  %v971_v41 = vld [vmem:[#allocation5 + $0x1b80] sm:$0xff] }
 0x1f7   :  { %7702 = vmatpush2.bf16.msra.mxu0 %v17940_v16 }
 0x1f8   :  { %7745 = vmatpush2.bf16.msra.mxu1 %v18324_v44  ;;  %7703 = vmatprep.subr.bf16.mxu0 %v17917_v46  ;;  %v17823_v46 = vcombine.high %v216_v29, %v228_v32 }
 0x1f9   :  { %7746 = vmatprep.subr.bf16.mxu1 %v18301_v24  ;;  %v18588_v24 = vcombine.low %v983_v26, %v995_v28  ;;  %v120_v26 = vld [vmem:[#allocation5 + $0xe8] sm:$0xff] }
 0x1fb   :  { %7704 = vmatpush2.bf16.msra.mxu0 %v17916_v51  ;;  %v17822_v51 = vcombine.low %v216_v29, %v228_v32  ;;  %v132_v29 = vld [vmem:[#allocation5 + $0x148] sm:$0xff] }
 0x1fc   :  { %7747 = vmatpush2.bf16.msra.mxu1 %v18300_v54  ;;  %7705 = vmatprep.subr.bf16.mxu0 %v17893_v55  ;;  %v18565_v54 = vcombine.high %v959_v12, %v971_v41  ;;  %v935_v55 = vld [vmem:[#allocation5 + $0x1a60] sm:$0xff] }
 0x1fd   :  { %7748 = vmatprep.subr.bf16.mxu1 %v18277_v63  ;;  %v17799_v63 = vcombine.high %v192_v43, %v204_v47  ;;  %v18540_v14 = vcombine.low %v935_v55, %v947_v34 }
 0x1ff   :  { %7706 = vmatpush2.bf16.msra.mxu0 %v17892_v2  ;;  %v18564_v2 = vcombine.low %v959_v12, %v971_v41  ;;  %v17726_v41 = vcombine.low %v120_v26, %v132_v29 }
 0x200   :  { %7749 = vmatpush2.bf16.msra.mxu1 %v18276_v5  ;;  %7761 = vmatprep.subr.bf16.mxu0 %v18637_v42  ;;  %v18541_v5 = vcombine.high %v935_v55, %v947_v34  ;;  %v911_v42 = vld [vmem:[#allocation5 + $0x19a0] sm:$0xff] }
 0x201   :  { %7804 = vmatprep.subr.bf16.mxu1 %v17871_v36  ;;  %v156_v36 = vld [vmem:[#allocation5 + $0x208] sm:$0xff]  ;;  %v1199_v55 = vld [vmem:[#allocation5 + $0x22a0] sm:$0xff] }
 0x202   :  { %v7451_v33 = vpop.f32.mrf.mxu0  ;;  %7708 = vmatmul.mubr.bf16.vlgmr.msra.gmra.mxu0 %v22197_v57  ;;  %v17751_v28 = vcombine.high %v144_v11, %v156_v36  ;;  %v17750_v32 = vcombine.low %v144_v11, %v156_v36  ;;  %v1211_v34 = vld [vmem:[#allocation5 + $0x2300] sm:$0xff]  ;;  %v408_v11 = vld [vmem:[#allocation5 + $0x9e8] sm:$0xff] }
 0x203   :  { %v7452_v45 = vadd.f32 %v7451_v33, %v1268_v17  ;;  %v7494_v35 = vpop.f32.mrf.mxu1  ;;  %7751 = vmatmul.mubr.bf16.vlgmr.msra.gmra.mxu1 %v22160_v1  ;;  %7762 = vmatpush1.bf16.msra.mxu0 %v18636_v52  ;;  %v18517_v52 = vcombine.high %v911_v42, %v923_v9  ;;  %v420_v36 = vld [vmem:[#allocation5 + $0xa48] sm:$0xff] }
 0x204   :  { %7805 = vmatpush1.bf16.msra.mxu1 %v17870_v23  ;;  %v22201_v38 = vpop.f32.mrf.mxu0  ;;  %7763 = vmatprep.subr.bf16.mxu0 %v18613_v25  ;;  %v887_v23 = vld [vmem:[#allocation5 + $0x18e0] sm:$0xff] }
 0x205   :  { %v22203_v16 = vadd.f32 %v7494_v35, %v7452_v45  ;;  %v22205_v44 = vpop.f32.mrf.mxu1  ;;  %7806 = vmatprep.subr.bf16.mxu1 %v17847_v31  ;;  %7793 = vmatprep.mubr.bf16.mxu0 %v22207_v48  ;;  %v899_v25 = vld [vmem:[#allocation5 + $0x1940] sm:$0xff]  ;;  %v18516_v31 = vcombine.low %v911_v42, %v923_v9 }
 0x206   :  { %v7455_v1 = vpop.f32.mrf.mxu0  ;;  %7836 = vmatprep.mubr.bf16.mxu1 %v22170_v7  ;;  %v17798_v7 = vcombine.low %v192_v43, %v204_v47  ;;  %v18493_v33 = vcombine.high %v887_v23, %v899_v25  ;;  %v863_v45 = vld [vmem:[#allocation5 + $0x1820] sm:$0xff]  ;;  %v18492_v12 = vcombine.low %v887_v23, %v899_v25 }
 0x207   :  { %v7456_v8 = vadd.f32 %v7455_v1, %v1268_v17  ;;  %7764 = vmatpush1.bf16.msra.mxu0 %v18612_v21  ;;  %v7498_v50 = vpop.f32.mrf.mxu1  ;;  %v17774_v17 = vcombine.low %v168_v58, %v180_v0  ;;  %v875_v35 = vld [vmem:[#allocation5 + $0x1880] sm:$0xff]  ;;  %v96_v21 = vld [vmem:[#allocation5 + $0x28] sm:$0xff] }
 0x208   :  { %7807 = vmatpush1.bf16.msra.mxu1 %v17846_v39  ;;  %7765 = vmatprep.subr.bf16.mxu0 %v18589_v40  ;;  %v17727_v39 = vcombine.high %v120_v26, %v132_v29  ;;  %v108_v40 = vld [vmem:[#allocation5 + $0x88] sm:$0xff]  ;;  %v18469_v43 = vcombine.high %v863_v45, %v875_v35  ;;  %v1235_v47 = vld [vmem:[#allocation5 + $0x23c0] sm:$0xff] }
 0x209   :  { %v22211_v61 = vadd.f32 %v7498_v50, %v7456_v8  ;;  %7808 = vmatprep.subr.bf16.mxu1 %v17823_v46  ;;  %v1223_v46 = vld [vmem:[#allocation5 + $0x2360] sm:$0xff]  ;;  %v456_v1 = vld [vmem:[#allocation5 + $0xb68] sm:$0xff]  ;;  %v17703_v8 = vcombine.high %v96_v21, %v108_v40  ;;  %v18468_v50 = vcombine.low %v863_v45, %v875_v35 }
 0x20a   :  { %v432_v58 = vld [vmem:[#allocation5 + $0xaa8] sm:$0xff]  ;;  %v1175_v42 = vld [vmem:[#allocation5 + $0x21e0] sm:$0xff] }
 0x20b   :  { %7766 = vmatpush1.bf16.msra.mxu0 %v18588_v24  ;;  %v468_v24 = vld [vmem:[#allocation5 + $0xbc8] sm:$0xff]  ;;  %v1187_v9 = vld [vmem:[#allocation5 + $0x2240] sm:$0xff] }
 0x20c   :  { %7809 = vmatpush1.bf16.msra.mxu1 %v17822_v51  ;;  %7767 = vmatprep.subr.bf16.mxu0 %v18565_v54  ;;  %v17702_v51 = vcombine.low %v96_v21, %v108_v40  ;;  %v18829_v54 = vcombine.high %v1223_v46, %v1235_v47  ;;  %v444_v0 = vld [vmem:[#allocation5 + $0xb08] sm:$0xff]  ;;  %v1151_v23 = vld [vmem:[#allocation5 + $0x2120] sm:$0xff] }
 0x20d   :  { %7810 = vmatprep.subr.bf16.mxu1 %v17799_v63  ;;  %v18063_v63 = vcombine.high %v456_v1, %v468_v24  ;;  %v1163_v25 = vld [vmem:[#allocation5 + $0x2180] sm:$0xff]  ;;  %v384_v26 = vld [vmem:[#allocation5 + $0x928] sm:$0xff] }
 0x20e   :  { %v396_v29 = vld [vmem:[#allocation5 + $0x988] sm:$0xff]  ;;  %v1127_v45 = vld [vmem:[#allocation5 + $0x2060] sm:$0xff] }
 0x20f   :  { %7768 = vmatpush1.bf16.msra.mxu0 %v18564_v2  ;;  %v18828_v2 = vcombine.low %v1223_v46, %v1235_v47  ;;  %v1139_v35 = vld [vmem:[#allocation5 + $0x20c0] sm:$0xff]  ;;  %v360_v21 = vld [vmem:[#allocation5 + $0x868] sm:$0xff] }
 0x210   :  { %7811 = vmatpush1.bf16.msra.mxu1 %v17798_v7  ;;  %7769 = vmatprep.subr.bf16.mxu0 %v18541_v5  ;;  %v18062_v7 = vcombine.low %v456_v1, %v468_v24  ;;  %v18805_v5 = vcombine.high %v1199_v55, %v1211_v34  ;;  %v372_v40 = vld [vmem:[#allocation5 + $0x8c8] sm:$0xff]  ;;  %v1103_v46 = vld [vmem:[#allocation5 + $0x1fa0] sm:$0xff] }
 0x211   :  { %7812 = vmatprep.subr.bf16.mxu1 %v17775_v13  ;;  %v18039_v13 = vcombine.high %v432_v58, %v444_v0  ;;  %v1115_v47 = vld [vmem:[#allocation5 + $0x2000] sm:$0xff]  ;;  %v336_v1 = vld [vmem:[#allocation5 + $0x7a8] sm:$0xff] }
 0x212   :  { %v348_v24 = vld [vmem:[#allocation5 + $0x808] sm:$0xff] }
 0x213   :  { %7770 = vmatpush1.bf16.msra.mxu0 %v18540_v14  ;;  %v18804_v14 = vcombine.low %v1199_v55, %v1211_v34  ;;  %v1079_v55 = vld [vmem:[#allocation5 + $0x1ee0] sm:$0xff] }
 0x214   :  { %7813 = vmatpush1.bf16.msra.mxu1 %v17774_v17  ;;  %7771 = vmatprep.subr.bf16.mxu0 %v18517_v52  ;;  %v18038_v17 = vcombine.low %v432_v58, %v444_v0  ;;  %v18781_v52 = vcombine.high %v1175_v42, %v1187_v9  ;;  %v1091_v34 = vld [vmem:[#allocation5 + $0x1f40] sm:$0xff]  ;;  %v312_v58 = vld [vmem:[#allocation5 + $0x6e8] sm:$0xff] }
 0x215   :  { %7814 = vmatprep.subr.bf16.mxu1 %v17751_v28  ;;  %v18015_v28 = vcombine.high %v408_v11, %v420_v36  ;;  %v324_v0 = vld [vmem:[#allocation5 + $0x748] sm:$0xff] }
 0x217   :  { %7772 = vmatpush1.bf16.msra.mxu0 %v18516_v31  ;;  %v18780_v31 = vcombine.low %v1175_v42, %v1187_v9  ;;  %v1055_v42 = vld [vmem:[#allocation5 + $0x1e20] sm:$0xff] }
 0x218   :  { %7815 = vmatpush1.bf16.msra.mxu1 %v17750_v32  ;;  %7773 = vmatprep.subr.bf16.mxu0 %v18493_v33  ;;  %v18014_v32 = vcombine.low %v408_v11, %v420_v36  ;;  %v18757_v33 = vcombine.high %v1151_v23, %v1163_v25  ;;  %v1067_v9 = vld [vmem:[#allocation5 + $0x1e80] sm:$0xff]  ;;  %v288_v11 = vld [vmem:[#allocation5 + $0x628] sm:$0xff] }
 0x219   :  { %7816 = vmatprep.subr.bf16.mxu1 %v17727_v39  ;;  %v17991_v39 = vcombine.high %v384_v26, %v396_v29  ;;  %v300_v36 = vld [vmem:[#allocation5 + $0x688] sm:$0xff] }
 0x21b   :  { %7774 = vmatpush1.bf16.msra.mxu0 %v18492_v12  ;;  %v18756_v12 = vcombine.low %v1151_v23, %v1163_v25  ;;  %v648_v23 = vld [vmem:[#allocation5 + $0x1168] sm:$0xff] }
 0x21c   :  { %7817 = vmatpush1.bf16.msra.mxu1 %v17726_v41  ;;  %7775 = vmatprep.subr.bf16.mxu0 %v18469_v43  ;;  %v17990_v41 = vcombine.low %v384_v26, %v396_v29  ;;  %v18733_v43 = vcombine.high %v1127_v45, %v1139_v35  ;;  %v660_v25 = vld [vmem:[#allocation5 + $0x11c8] sm:$0xff] }
 0x21d   :  { %7818 = vmatprep.subr.bf16.mxu1 %v17703_v8  ;;  %v17967_v8 = vcombine.high %v360_v21, %v372_v40  ;;  %v1032_v26 = vld [vmem:[#allocation5 + $0x1d68] sm:$0xff] }
 0x21e   :  { %v1044_v29 = vld [vmem:[#allocation5 + $0x1dc8] sm:$0xff] }
 0x21f   :  { %7776 = vmatpush1.bf16.msra.mxu0 %v18468_v50  ;;  %v18732_v50 = vcombine.low %v1127_v45, %v1139_v35  ;;  %v624_v45 = vld [vmem:[#allocation5 + $0x10a8] sm:$0xff] }
 0x220   :  { %7819 = vmatpush1.bf16.msra.mxu1 %v17702_v51  ;;  %7777 = vmatprep.subr.bf16.mxu0 %v18829_v54  ;;  %v17966_v51 = vcombine.low %v360_v21, %v372_v40  ;;  %v18709_v54 = vcombine.high %v1103_v46, %v1115_v47  ;;  %v636_v35 = vld [vmem:[#allocation5 + $0x1108] sm:$0xff] }
 0x221   :  { %7820 = vmatprep.subr.bf16.mxu1 %v18063_v63  ;;  %v17943_v63 = vcombine.high %v336_v1, %v348_v24  ;;  %v1008_v21 = vld [vmem:[#allocation5 + $0x1ca8] sm:$0xff] }
 0x222   :  { %v1020_v40 = vld [vmem:[#allocation5 + $0x1d08] sm:$0xff] }
 0x223   :  { %7778 = vmatpush2.bf16.msra.mxu0 %v18828_v2  ;;  %v18708_v2 = vcombine.low %v1103_v46, %v1115_v47  ;;  %v18231_v46 = vcombine.high %v624_v45, %v636_v35  ;;  %v600_v47 = vld [vmem:[#allocation5 + $0xfe8] sm:$0xff] }
 0x224   :  { %7821 = vmatpush2.bf16.msra.mxu1 %v18062_v7  ;;  %7779 = vmatprep.subr.bf16.mxu0 %v18805_v5  ;;  %v17942_v7 = vcombine.low %v336_v1, %v348_v24  ;;  %v18685_v5 = vcombine.high %v1079_v55, %v1091_v34  ;;  %v612_v1 = vld [vmem:[#allocation5 + $0x1048] sm:$0xff] }
 0x225   :  { %7822 = vmatprep.subr.bf16.mxu1 %v18039_v13  ;;  %v17919_v13 = vcombine.high %v312_v58, %v324_v0  ;;  %v984_v24 = vld [vmem:[#allocation5 + $0x1be8] sm:$0xff] }
 0x227   :  { %7780 = vmatpush2.bf16.msra.mxu0 %v18804_v14  ;;  %v18684_v14 = vcombine.low %v1079_v55, %v1091_v34  ;;  %v18230_v34 = vcombine.low %v624_v45, %v636_v35 }
 0x228   :  { %7823 = vmatpush2.bf16.msra.mxu1 %v18038_v17  ;;  %7781 = vmatprep.subr.bf16.mxu0 %v18781_v52  ;;  %v17918_v17 = vcombine.low %v312_v58, %v324_v0  ;;  %v18661_v52 = vcombine.high %v1055_v42, %v1067_v9  ;;  %v18207_v0 = vcombine.high %v600_v47, %v612_v1 }
 0x229   :  { %7824 = vmatprep.subr.bf16.mxu1 %v18015_v28  ;;  %v17895_v28 = vcombine.high %v288_v11, %v300_v36 }
 0x22b   :  { %7782 = vmatpush2.bf16.msra.mxu0 %v18780_v31  ;;  %v18660_v31 = vcombine.low %v1055_v42, %v1067_v9 }
 0x22c   :  { %7825 = vmatpush2.bf16.msra.mxu1 %v18014_v32  ;;  %7783 = vmatprep.subr.bf16.mxu0 %v18757_v33  ;;  %v17894_v32 = vcombine.low %v288_v11, %v300_v36  ;;  %v18255_v33 = vcombine.high %v648_v23, %v660_v25  ;;  %v22226_v11 = vld [vmem:[#allocation2 + $0xc] ss:$24 sps:$4 sm:$0xff]  }
 0x22d   :  { %7826 = vmatprep.subr.bf16.mxu1 %v17991_v39  ;;  %v18639_v39 = vcombine.high %v1032_v26, %v1044_v29 }
 0x22f   :  { %7784 = vmatpush2.bf16.msra.mxu0 %v18756_v12  ;;  %v18254_v12 = vcombine.low %v648_v23, %v660_v25  ;;  %v552_v23 = vld [vmem:[#allocation5 + $0xe68] sm:$0xff] }
 0x230   :  { %7827 = vmatpush2.bf16.msra.mxu1 %v17990_v41  ;;  %7785 = vmatprep.subr.bf16.mxu0 %v18733_v43  ;;  %v22213_v41 = vpop.f32.mrf.mxu0  ;;  %v18638_v43 = vcombine.low %v1032_v26, %v1044_v29  ;;  %v564_v25 = vld [vmem:[#allocation5 + $0xec8] sm:$0xff] }
 0x231   :  { %7828 = vmatprep.subr.bf16.mxu1 %v17967_v8  ;;  %v18615_v8 = vcombine.high %v1008_v21, %v1020_v40  ;;  %v936_v26 = vld [vmem:[#allocation5 + $0x1a68] sm:$0xff]  ;;  %v18159_v35 = vcombine.high %v552_v23, %v564_v25 }
 0x233   :  { %7786 = vmatpush2.bf16.msra.mxu0 %v18732_v50  ;;  %v996_v50 = vld [vmem:[#allocation5 + $0x1c48] sm:$0xff] }
 0x234   :  { %7829 = vmatpush2.bf16.msra.mxu1 %v17966_v51  ;;  %7787 = vmatprep.subr.bf16.mxu0 %v18709_v54  ;;  %v22215_v54 = vld [vmem:[#allocation2 + $0x10] ss:$24 sps:$4 sm:$0xff]   ;;  %v18591_v9 = vcombine.high %v984_v24, %v996_v50 }
 0x235   :  { %7830 = vmatprep.subr.bf16.mxu1 %v17943_v63  ;;  %v18614_v63 = vcombine.low %v1008_v21, %v1020_v40  ;;  %v528_v21 = vld [vmem:[#allocation5 + $0xda8] sm:$0xff] }
 0x236   :  { %v912_v40 = vld [vmem:[#allocation5 + $0x19a8] sm:$0xff] }
 0x237   :  { %7788 = vmatpush2.bf16.msra.mxu0 %v18708_v2  ;;  %v576_v2 = vld [vmem:[#allocation5 + $0xf28] sm:$0xff] }
 0x238   :  { %7831 = vmatpush2.bf16.msra.mxu1 %v17942_v7  ;;  %7789 = vmatprep.subr.bf16.mxu0 %v18685_v5  ;;  %v588_v7 = vld [vmem:[#allocation5 + $0xf88] sm:$0xff] }
 0x239   :  { %7832 = vmatprep.subr.bf16.mxu1 %v17919_v13  ;;  %v960_v5 = vld [vmem:[#allocation5 + $0x1b28] sm:$0xff] }
 0x23b   :  { %7790 = vmatpush2.bf16.msra.mxu0 %v18684_v14  ;;  %v18206_v14 = vcombine.low %v600_v47, %v612_v1  ;;  %v924_v47 = vld [vmem:[#allocation5 + $0x1a08] sm:$0xff] }
 0x23c   :  { %7833 = vmatpush2.bf16.msra.mxu1 %v17918_v17  ;;  %7791 = vmatprep.subr.bf16.mxu0 %v18661_v52  ;;  %v18590_v17 = vcombine.low %v984_v24, %v996_v50  ;;  %v18183_v52 = vcombine.high %v576_v2, %v588_v7 }
 0x23d   :  { %7834 = vmatprep.subr.bf16.mxu1 %v17895_v28 }
 0x23f   :  { %7792 = vmatpush2.bf16.msra.mxu0 %v18660_v31  ;;  %v948_v31 = vld [vmem:[#allocation5 + $0x1ac8] sm:$0xff] }
 0x240   :  { %7835 = vmatpush2.bf16.msra.mxu1 %v17894_v32  ;;  %7847 = vmatprep.subr.bf16.mxu0 %v18255_v33  ;;  %v18182_v33 = vcombine.low %v576_v2, %v588_v7  ;;  %v18542_v24 = vcombine.low %v936_v26, %v948_v31  ;;  %v18519_v2 = vcombine.high %v912_v40, %v924_v47  ;;  %v900_v7 = vld [vmem:[#allocation5 + $0x1948] sm:$0xff] }
 0x241   :  { %7890 = vmatprep.subr.bf16.mxu1 %v18639_v39  ;;  %v540_v39 = vld [vmem:[#allocation5 + $0xe08] sm:$0xff] }
 0x242   :  { %v7537_v51 = vpop.f32.mrf.mxu0  ;;  %7794 = vmatmul.mubr.bf16.vlgmr.msra.gmra.mxu0 %v22215_v54  ;;  %v18135_v50 = vcombine.high %v528_v21, %v540_v39 }
 0x243   :  { %v22219_v55 = vadd.f32 %v7537_v51, %v22203_v16  ;;  %7837 = vmatmul.mubr.bf16.vlgmr.msra.gmra.mxu1 %v22197_v57  ;;  %7848 = vmatpush1.bf16.msra.mxu0 %v18254_v12  ;;  %v972_v16 = vld [vmem:[#allocation5 + $0x1b88] sm:$0xff] }
 0x244   :  { %7891 = vmatpush1.bf16.msra.mxu1 %v18638_v43  ;;  %v22222_v58 = vpop.f32.mrf.mxu0  ;;  %7849 = vmatprep.subr.bf16.mxu0 %v18231_v46  ;;  %v18566_v45 = vcombine.low %v960_v5, %v972_v16  ;;  %v18543_v46 = vcombine.high %v936_v26, %v948_v31  ;;  %v504_v51 = vld [vmem:[#allocation5 + $0xce8] sm:$0xff] }
 0x245   :  { %v8759_v42 = vmul.f32 %v22219_v55, %v22219_v55  ;;  %7892 = vmatprep.subr.bf16.mxu1 %v18615_v8  ;;  %7879 = vmatprep.mubr.bf16.mxu0 %v22226_v11  ;;  %v18158_v8 = vcombine.low %v552_v23, %v564_v25  ;;  %v840_v26 = vld [vmem:[#allocation5 + $0x1768] sm:$0xff] }
 0x246   :  { %v7541_v57 = vpop.f32.mrf.mxu0  ;;  %7922 = vmatprep.mubr.bf16.mxu1 %v22207_v48  ;;  %v18567_v48 = vcombine.high %v960_v5, %v972_v16  ;;  %v18134_v5 = vcombine.low %v528_v21, %v540_v39  ;;  %v480_v16 = vld [vmem:[#allocation5 + $0xc28] sm:$0xff] }
 0x247   :  { %v8807_v13 = vmul.f32 %v8759_v42, %v22219_v55  ;;  %v22232_v36 = vadd.f32 %v7541_v57, %v22211_v61  ;;  %7850 = vmatpush1.bf16.msra.mxu0 %v18230_v34  ;;  %v516_v34 = vld [vmem:[#allocation5 + $0xd48] sm:$0xff]  ;;  %v18518_v42 = vcombine.low %v912_v40, %v924_v47 }
 0x248   :  { %7893 = vmatpush1.bf16.msra.mxu1 %v18614_v63  ;;  %7851 = vmatprep.subr.bf16.mxu0 %v18207_v0  ;;  %v888_v63 = vld [vmem:[#allocation5 + $0x18e8] sm:$0xff] }
 0x249   :  { %v8855_v28 = vmul.f32 0.044715, %v8807_v13  ;;  %v8783_v29 = vmul.f32 %v22232_v36, %v22232_v36  ;;  %7894 = vmatprep.subr.bf16.mxu1 %v18591_v9  ;;  %v18111_v9 = vcombine.high %v504_v51, %v516_v34  ;;  %v492_v57 = vld [vmem:[#allocation5 + $0xc88] sm:$0xff]  ;;  %v18494_v23 = vcombine.low %v888_v63, %v900_v7 }
 0x24a   :  { %v864_v13 = vld [vmem:[#allocation5 + $0x1828] sm:$0xff]  ;;  %v18087_v25 = vcombine.high %v480_v16, %v492_v57 }
 0x24b   :  { %v8903_v32 = vadd.f32 %v8855_v28, %v22219_v55  ;;  %v8831_v61 = vmul.f32 %v8783_v29, %v22232_v36  ;;  %7852 = vmatpush1.bf16.msra.mxu0 %v18206_v14  ;;  %v18495_v14 = vcombine.high %v888_v63, %v900_v7  ;;  %v852_v28 = vld [vmem:[#allocation5 + $0x17c8] sm:$0xff]  ;;  %v8735_v63 = vmul.f32 0.5, %v22232_v36 }
 0x24c   :  { %7895 = vmatpush1.bf16.msra.mxu1 %v18590_v17  ;;  %7853 = vmatprep.subr.bf16.mxu0 %v18183_v52  ;;  %v876_v17 = vld [vmem:[#allocation5 + $0x1888] sm:$0xff]  ;;  %v18110_v52 = vcombine.low %v504_v51, %v516_v34  ;;  %v8711_v34 = vmul.f32 0.5, %v22219_v55 }
 0x24d   :  { %v8951_v12 = vmul.f32 0.7978845, %v8903_v32  ;;  %v8879_v43 = vmul.f32 0.044715, %v8831_v61  ;;  %7896 = vmatprep.subr.bf16.mxu1 %v18567_v48  ;;  %v1224_v29 = vld [vmem:[#allocation5 + $0x2368] sm:$0xff]  ;;  %v18471_v48 = vcombine.high %v864_v13, %v876_v17  ;;  %v18086_v32 = vcombine.low %v480_v16, %v492_v57 }
 0x24e   :  { %v1236_v31 = vld [vmem:[#allocation5 + $0x23c8] sm:$0xff] }
 0x24f   :  { %21753 = vtanh.f32 %v8951_v12  ;;  %v8927_v1 = vadd.f32 %v8879_v43, %v22232_v36  ;;  %7854 = vmatpush1.bf16.msra.mxu0 %v18182_v33  ;;  %v18470_v33 = vcombine.low %v864_v13, %v876_v17  ;;  %v828_v21 = vld [vmem:[#allocation5 + $0x1708] sm:$0xff]  ;;  %v18831_v40 = vcombine.high %v1224_v29, %v1236_v31 }
 0x250   :  { %7897 = vmatpush1.bf16.msra.mxu1 %v18566_v45  ;;  %7855 = vmatprep.subr.bf16.mxu0 %v18159_v35  ;;  %v18447_v45 = vcombine.high %v840_v26, %v852_v28  ;;  %v816_v35 = vld [vmem:[#allocation5 + $0x16a8] sm:$0xff]  ;;  %v18446_v43 = vcombine.low %v840_v26, %v852_v28 }
 0x251   :  { %v8975_v0 = vmul.f32 0.7978845, %v8927_v1  ;;  %7898 = vmatprep.subr.bf16.mxu1 %v18543_v46  ;;  %v1200_v39 = vld [vmem:[#allocation5 + $0x22a8] sm:$0xff]  ;;  %v18830_v1 = vcombine.low %v1224_v29, %v1236_v31 }
 0x252   :  { %v1212_v12 = vld [vmem:[#allocation5 + $0x2308] sm:$0xff] }
 0x253   :  { %21755 = vtanh.f32 %v8975_v0  ;;  %7856 = vmatpush1.bf16.msra.mxu0 %v18158_v8  ;;  %v18423_v8 = vcombine.high %v816_v35, %v828_v21  ;;  %v1176_v51 = vld [vmem:[#allocation5 + $0x21e8] sm:$0xff]  ;;  %v18807_v0 = vcombine.high %v1200_v39, %v1212_v12  ;;  %v18806_v16 = vcombine.low %v1200_v39, %v1212_v12 }
 0x254   :  { %7899 = vmatpush1.bf16.msra.mxu1 %v18542_v24  ;;  %7857 = vmatprep.subr.bf16.mxu0 %v18135_v50  ;;  %v792_v24 = vld [vmem:[#allocation5 + $0x15e8] sm:$0xff] }
 0x255   :  { %7900 = vmatprep.subr.bf16.mxu1 %v18519_v2  ;;  %v804_v50 = vld [vmem:[#allocation5 + $0x1648] sm:$0xff] }
 0x256   :  { %v1188_v2 = vld [vmem:[#allocation5 + $0x2248] sm:$0xff]  ;;  %v18399_v57 = vcombine.high %v792_v24, %v804_v50  ;;  %v18398_v36 = vcombine.low %v792_v24, %v804_v50 }
 0x257   :  { %7858 = vmatpush1.bf16.msra.mxu0 %v18134_v5  ;;  %v18422_v5 = vcombine.low %v816_v35, %v828_v21  ;;  %v768_v13 = vld [vmem:[#allocation5 + $0x1528] sm:$0xff] }
 0x258   :  { %7901 = vmatpush1.bf16.msra.mxu1 %v18518_v42  ;;  %7859 = vmatprep.subr.bf16.mxu0 %v18111_v9  ;;  %v1152_v17 = vld [vmem:[#allocation5 + $0x2128] sm:$0xff] }
 0x259   :  { %7902 = vmatprep.subr.bf16.mxu1 %v18495_v14  ;;  %v780_v14 = vld [vmem:[#allocation5 + $0x1588] sm:$0xff] }
 0x25a   :  { %v1164_v55 = vld [vmem:[#allocation5 + $0x2188] sm:$0xff]  ;;  %v18375_v26 = vcombine.high %v768_v13, %v780_v14 }
 0x25b   :  { %7860 = vmatpush1.bf16.msra.mxu0 %v18110_v52  ;;  %v18783_v52 = vcombine.high %v1176_v51, %v1188_v2  ;;  %v744_v28 = vld [vmem:[#allocation5 + $0x1468] sm:$0xff]  ;;  %v18759_v31 = vcombine.high %v1152_v17, %v1164_v55 }
 0x25c   :  { %v21754_v61 = vpop.eup %21753  ;;  %7903 = vmatpush1.bf16.msra.mxu1 %v18494_v23  ;;  %7861 = vmatprep.subr.bf16.mxu0 %v18087_v25  ;;  %v18782_v25 = vcombine.low %v1176_v51, %v1188_v2  ;;  %v756_v29 = vld [vmem:[#allocation5 + $0x14c8] sm:$0xff] }
 0x25d   :  { %7904 = vmatprep.subr.bf16.mxu1 %v18471_v48  ;;  %v9047_v46 = vadd.f32 1.0, %v21754_v61  ;;  %v1128_v48 = vld [vmem:[#allocation5 + $0x2068] sm:$0xff]  ;;  %v18374_v61 = vcombine.low %v768_v13, %v780_v14 }
 0x25e   :  { %v720_v35 = vld [vmem:[#allocation5 + $0x13a8] sm:$0xff] }
 0x25f   :  { %7862 = vmatpush1.bf16.msra.mxu0 %v18086_v32  ;;  %v9095_v42 = vmul.f32 %v9047_v46, %v8711_v34  ;;  %v1140_v32 = vld [vmem:[#allocation5 + $0x20c8] sm:$0xff]  ;;  %v22243_v34 = vpop.f32.mrf.mxu1 }
 0x260   :  { %v21756_v47 = vpop.eup %21755  ;;  %7905 = vmatpush1.bf16.msra.mxu1 %v18470_v33  ;;  %7863 = vmatprep.subr.bf16.mxu0 %v18447_v45  ;;  %v18758_v33 = vcombine.low %v1152_v17, %v1164_v55  ;;  %v18351_v45 = vcombine.high %v744_v28, %v756_v29  ;;  %v732_v21 = vld [vmem:[#allocation5 + $0x1408] sm:$0xff]  ;;  %v18734_v46 = vcombine.low %v1128_v48, %v1140_v32  ;;  %v277_v55 = vld [vmem:[#allocation5 + $0x5d0] sm:$0xff] }
 0x261   :  { %7906 = vmatprep.subr.bf16.mxu1 %v18831_v40  ;;  %v9071_v7 = vadd.f32 1.0, %v21756_v47  ;;  %v1104_v39 = vld [vmem:[#allocation5 + $0x1fa8] sm:$0xff]  ;;  %v18735_v40 = vcombine.high %v1128_v48, %v1140_v32  ;;  %v18327_v47 = vcombine.high %v720_v35, %v732_v21 }
 0x262   :  { %v1116_v12 = vld [vmem:[#allocation5 + $0x2008] sm:$0xff] }
 0x263   :  { %7864 = vmatpush2.bf16.msra.mxu0 %v18446_v43  ;;  %v9119_v9 = vmul.f32 %v9071_v7, %v8735_v63  ;;  %v18350_v43 = vcombine.low %v744_v28, %v756_v29  ;;  %v1080_v24 = vld [vmem:[#allocation5 + $0x1ee8] sm:$0xff]  ;;  %v18711_v50 = vcombine.high %v1104_v39, %v1116_v12  ;;  %v18326_v63 = vcombine.low %v720_v35, %v732_v21  ;;  %v661_v29 = vld [vmem:[#allocation5 + $0x11d0] sm:$0xff]  ;;  %v21855_v35 = vld [vmem:[#allocation7] sm:$0xff] }
 0x264   :  { %7907 = vmatpush2.bf16.msra.mxu1 %v18830_v1  ;;  %7865 = vmatprep.subr.bf16.mxu0 %v18423_v8  ;;  %v696_v1 = vld [vmem:[#allocation5 + $0x12e8] sm:$0xff] }
 0x265   :  { %7908 = vmatprep.subr.bf16.mxu1 %v18807_v0  ;;  %v22241_v23 = vpack.c.bf16 %v9119_v9, %v9095_v42  ;;  %v708_v8 = vld [vmem:[#allocation5 + $0x1348] sm:$0xff]  ;;  %v18710_v0 = vcombine.low %v1104_v39, %v1116_v12  ;;  %v7580_v9 = vpop.f32.mrf.mxu1  ;;  %v637_v12 = vld [vmem:[#allocation5 + $0x1110] sm:$0xff] }
 0x266   :  { %v1092_v51 = vld [vmem:[#allocation5 + $0x1f48] sm:$0xff]  ;;  %v18303_v2 = vcombine.high %v696_v1, %v708_v8  ;;  %v18302_v13 = vcombine.low %v696_v1, %v708_v8  ;;  %v217_v8 = vld [vmem:[#allocation5 + $0x3f0] sm:$0xff] }
 0x267   :  { %23184 = vst [vmem:[#allocation19_spill] sm:$0xff] %v22241_v23  ;;  %7866 = vmatpush2.bf16.msra.mxu0 %v18422_v5  ;;  %v672_v7 = vld [vmem:[#allocation5 + $0x1228] sm:$0xff]  ;;  %v18686_v14 = vcombine.low %v1080_v24, %v1092_v51 }
 0x268   :  { %7909 = vmatpush2.bf16.msra.mxu1 %v18806_v16  ;;  %7867 = vmatprep.subr.bf16.mxu0 %v18399_v57  ;;  %v684_v5 = vld [vmem:[#allocation5 + $0x1288] sm:$0xff]  ;;  %v18687_v16 = vcombine.high %v1080_v24, %v1092_v51  ;;  %v229_v24 = vld [vmem:[#allocation5 + $0x450] sm:$0xff] }
 0x269   :  { %7910 = vmatprep.subr.bf16.mxu1 %v18783_v52  ;;  %v1056_v42 = vld [vmem:[#allocation5 + $0x1e28] sm:$0xff]  ;;  %v18279_v17 = vcombine.high %v672_v7, %v684_v5  ;;  %v265_v52 = vld [vmem:[#allocation5 + $0x570] sm:$0xff]  ;;  %v18278_v48 = vcombine.low %v672_v7, %v684_v5 }
 0x26a   :  { %v1068_v57 = vld [vmem:[#allocation5 + $0x1e88] sm:$0xff]  ;;  %v17873_v32 = vcombine.high %v265_v52, %v277_v55  ;;  %v22255_v5 = vld [vmem:[#allocation2 + $0x8] ss:$24 sps:$4 sm:$0xff]  }
 0x26b   :  { %7868 = vmatpush2.bf16.msra.mxu0 %v18398_v36  ;;  %v649_v36 = vld [vmem:[#allocation5 + $0x1170] sm:$0xff]  ;;  %v18663_v28 = vcombine.high %v1056_v42, %v1068_v57 }
 0x26c   :  { %7911 = vmatpush2.bf16.msra.mxu1 %v18782_v25  ;;  %7869 = vmatprep.subr.bf16.mxu0 %v18375_v26  ;;  %v22246_v25 = vsub.s32 6, %v22093_v15  ;;  %v22248_v26 = vpop.f32.mrf.mxu1 }
 0x26d   :  { %7912 = vmatprep.subr.bf16.mxu1 %v18759_v31  ;;  %v18662_v31 = vcombine.low %v1056_v42, %v1068_v57 }
 0x26e   :  { %23185 = vst [vmem:[#allocation20_spill] sm:$0xff] %v22246_v25  ;;  %v1276_v21 = vrot.slane %v21855_v35, %v22246_v25  ;;  %v7584_v39 = vpop.f32.mrf.mxu1 }
 0x26f   :  { %7870 = vmatpush2.bf16.msra.mxu0 %v18374_v61  ;;  %v241_v61 = vld [vmem:[#allocation5 + $0x4b0] sm:$0xff] }
 0x270   :  { %7913 = vmatpush2.bf16.msra.mxu1 %v18758_v33  ;;  %7871 = vmatprep.subr.bf16.mxu0 %v18351_v45  ;;  %v253_v33 = vld [vmem:[#allocation5 + $0x510] sm:$0xff]  ;;  %v7581_v51 = vadd.f32 %v7580_v9, %v1276_v21 }
 0x271   :  { %7914 = vmatprep.subr.bf16.mxu1 %v18735_v40  ;;  %v625_v45 = vld [vmem:[#allocation5 + $0x10b0] sm:$0xff]  ;;  %v18257_v40 = vcombine.high %v649_v36, %v661_v29  ;;  %v17849_v1 = vcombine.high %v241_v61, %v253_v33  ;;  %v17848_v57 = vcombine.low %v241_v61, %v253_v33 }
 0x272   :  { %v18232_v9 = vcombine.low %v625_v45, %v637_v12 }
 0x273   :  { %7872 = vmatpush2.bf16.msra.mxu0 %v18350_v43  ;;  %v17872_v43 = vcombine.low %v265_v52, %v277_v55  ;;  %v205_v52 = vld [vmem:[#allocation5 + $0x390] sm:$0xff] }
 0x274   :  { %7915 = vmatpush2.bf16.msra.mxu1 %v18734_v46  ;;  %7873 = vmatprep.subr.bf16.mxu0 %v18327_v47  ;;  %v22251_v46 = vpop.f32.mrf.mxu0  ;;  %v18256_v47 = vcombine.low %v649_v36, %v661_v29  ;;  %v577_v55 = vld [vmem:[#allocation5 + $0xf30] sm:$0xff]  ;;  %v7585_v36 = vadd.f32 %v7584_v39, %v1276_v21 }
 0x275   :  { %7916 = vmatprep.subr.bf16.mxu1 %v18711_v50  ;;  %v601_v50 = vld [vmem:[#allocation5 + $0xff0] sm:$0xff] }
 0x277   :  { %7874 = vmatpush2.bf16.msra.mxu0 %v18326_v63  ;;  %v22253_v63 = vpop.f32.mrf.mxu1 }
 0x278   :  { %7917 = vmatpush2.bf16.msra.mxu1 %v18710_v0  ;;  %7875 = vmatprep.subr.bf16.mxu0 %v18303_v2  ;;  %v18233_v0 = vcombine.high %v625_v45, %v637_v12  ;;  %v613_v2 = vld [vmem:[#allocation5 + $0x1050] sm:$0xff]  ;;  %v17824_v45 = vcombine.low %v217_v8, %v229_v24 }
 0x279   :  { %7918 = vmatprep.subr.bf16.mxu1 %v18687_v16  ;;  %v18208_v21 = vcombine.low %v601_v50, %v613_v2  ;;  %v181_v12 = vld [vmem:[#allocation5 + $0x2d0] sm:$0xff] }
 0x27b   :  { %7876 = vmatpush2.bf16.msra.mxu0 %v18302_v13 }
 0x27c   :  { %7919 = vmatpush2.bf16.msra.mxu1 %v18686_v14  ;;  %7877 = vmatprep.subr.bf16.mxu0 %v18279_v17  ;;  %v17825_v14 = vcombine.high %v217_v8, %v229_v24  ;;  %v193_v17 = vld [vmem:[#allocation5 + $0x330] sm:$0xff] }
 0x27d   :  { %7920 = vmatprep.subr.bf16.mxu1 %v18663_v28  ;;  %v17801_v39 = vcombine.high %v193_v17, %v205_v52  ;;  %v17800_v8 = vcombine.low %v193_v17, %v205_v52 }
 0x27f   :  { %7878 = vmatpush2.bf16.msra.mxu0 %v18278_v48  ;;  %v18209_v48 = vcombine.high %v601_v50, %v613_v2  ;;  %v145_v2 = vld [vmem:[#allocation5 + $0x1b0] sm:$0xff] }
 0x280   :  { %7921 = vmatpush2.bf16.msra.mxu1 %v18662_v31  ;;  %7933 = vmatprep.subr.bf16.mxu0 %v17873_v32  ;;  %v589_v31 = vld [vmem:[#allocation5 + $0xf90] sm:$0xff] }
 0x281   :  { %7976 = vmatprep.subr.bf16.mxu1 %v18257_v40  ;;  %v169_v40 = vld [vmem:[#allocation5 + $0x270] sm:$0xff]  ;;  %v18184_v24 = vcombine.low %v577_v55, %v589_v31 }
 0x282   :  { %v7623_v7 = vpop.f32.mrf.mxu0  ;;  %7880 = vmatmul.mubr.bf16.vlgmr.msra.gmra.mxu0 %v22255_v5  ;;  %v17777_v50 = vcombine.high %v169_v40, %v181_v12 }
 0x283   :  { %v7624_v42 = vadd.f32 %v7623_v7, %v7581_v51  ;;  %v7666_v16 = vpop.f32.mrf.mxu1  ;;  %7923 = vmatmul.mubr.bf16.vlgmr.msra.gmra.mxu1 %v22215_v54  ;;  %7934 = vmatpush1.bf16.msra.mxu0 %v17872_v43  ;;  %v22265_v54 = vld [vmem:[#allocation2 + $0x4] ss:$24 sps:$4 sm:$0xff]  }
 0x284   :  { %7977 = vmatpush1.bf16.msra.mxu1 %v18256_v47  ;;  %v22259_v13 = vpop.f32.mrf.mxu0  ;;  %7935 = vmatprep.subr.bf16.mxu0 %v17849_v1  ;;  %v553_v43 = vld [vmem:[#allocation5 + $0xe70] sm:$0xff] }
 0x285   :  { %v22261_v28 = vadd.f32 %v7666_v16, %v7624_v42  ;;  %v22263_v29 = vpop.f32.mrf.mxu1  ;;  %7978 = vmatprep.subr.bf16.mxu1 %v18233_v0  ;;  %7965 = vmatprep.mubr.bf16.mxu0 %v22265_v54  ;;  %v565_v51 = vld [vmem:[#allocation5 + $0xed0] sm:$0xff] }
 0x286   :  { %v7627_v32 = vpop.f32.mrf.mxu0  ;;  %8008 = vmatprep.mubr.bf16.mxu1 %v22226_v11  ;;  %v18185_v11 = vcombine.high %v577_v55, %v589_v31  ;;  %v157_v42 = vld [vmem:[#allocation5 + $0x210] sm:$0xff]  ;;  %v18160_v17 = vcombine.low %v553_v43, %v565_v51 }
 0x287   :  { %v8761_v61 = vmul.f32 %v22261_v28, %v22261_v28  ;;  %v7628_v33 = vadd.f32 %v7627_v32, %v7585_v36  ;;  %7936 = vmatpush1.bf16.msra.mxu0 %v17848_v57  ;;  %v7670_v35 = vpop.f32.mrf.mxu1  ;;  %v529_v16 = vld [vmem:[#allocation5 + $0xdb0] sm:$0xff]  ;;  %v17753_v52 = vcombine.high %v145_v2, %v157_v42 }
 0x288   :  { %7979 = vmatpush1.bf16.msra.mxu1 %v18232_v9  ;;  %7937 = vmatprep.subr.bf16.mxu0 %v17825_v14  ;;  %v18161_v14 = vcombine.high %v553_v43, %v565_v51  ;;  %v541_v36 = vld [vmem:[#allocation5 + $0xe10] sm:$0xff] }
 0x289   :  { %v8809_v47 = vmul.f32 %v8761_v61, %v22261_v28  ;;  %v22272_v1 = vadd.f32 %v7670_v35, %v7628_v33  ;;  %7980 = vmatprep.subr.bf16.mxu1 %v18209_v48  ;;  %v17776_v61 = vcombine.low %v169_v40, %v181_v12  ;;  %v121_v55 = vld [vmem:[#allocation5 + $0xf0] sm:$0xff]  ;;  %v18137_v35 = vcombine.high %v529_v16, %v541_v36 }
 0x28a   :  { %v133_v31 = vld [vmem:[#allocation5 + $0x150] sm:$0xff] }
 0x28b   :  { %v8857_v0 = vmul.f32 0.044715, %v8809_v47  ;;  %v8785_v7 = vmul.f32 %v22272_v1, %v22272_v1  ;;  %7938 = vmatpush1.bf16.msra.mxu0 %v17824_v45  ;;  %v505_v33 = vld [vmem:[#allocation5 + $0xcf0] sm:$0xff]  ;;  %v17752_v47 = vcombine.low %v145_v2, %v157_v42  ;;  %v17729_v40 = vcombine.high %v121_v55, %v133_v31 }
 0x28c   :  { %7981 = vmatpush1.bf16.msra.mxu1 %v18208_v21  ;;  %7939 = vmatprep.subr.bf16.mxu0 %v17801_v39  ;;  %v517_v21 = vld [vmem:[#allocation5 + $0xd50] sm:$0xff] }
 0x28d   :  { %v8905_v57 = vadd.f32 %v8857_v0, %v22261_v28  ;;  %v8833_v9 = vmul.f32 %v8785_v7, %v22272_v1  ;;  %7982 = vmatprep.subr.bf16.mxu1 %v18185_v11  ;;  %v18136_v11 = vcombine.low %v529_v16, %v541_v36  ;;  %v97_v12 = vld [vmem:[#allocation5 + $0x30] sm:$0xff]  ;;  %v18113_v51 = vcombine.high %v505_v33, %v517_v21 }
 0x28e   :  { %v109_v0 = vld [vmem:[#allocation5 + $0x90] sm:$0xff] }
 0x28f   :  { %v8953_v48 = vmul.f32 0.7978845, %v8905_v57  ;;  %v8881_v32 = vmul.f32 0.044715, %v8833_v9  ;;  %7940 = vmatpush1.bf16.msra.mxu0 %v17800_v8  ;;  %v481_v43 = vld [vmem:[#allocation5 + $0xc30] sm:$0xff]  ;;  %v17728_v8 = vcombine.low %v121_v55, %v133_v31 }
 0x290   :  { %7983 = vmatpush1.bf16.msra.mxu1 %v18184_v24  ;;  %7941 = vmatprep.subr.bf16.mxu0 %v17777_v50  ;;  %v493_v7 = vld [vmem:[#allocation5 + $0xc90] sm:$0xff]  ;;  %v18112_v24 = vcombine.low %v505_v33, %v517_v21  ;;  %v17705_v50 = vcombine.high %v97_v12, %v109_v0 }
 0x291   :  { %21757 = vtanh.f32 %v8953_v48  ;;  %v8929_v45 = vadd.f32 %v8881_v32, %v22272_v1  ;;  %7984 = vmatprep.subr.bf16.mxu1 %v18161_v14  ;;  %v457_v57 = vld [vmem:[#allocation5 + $0xb70] sm:$0xff]  ;;  %v18089_v42 = vcombine.high %v481_v43, %v493_v7  ;;  %v17704_v14 = vcombine.low %v97_v12, %v109_v0 }
 0x292   :  { %v469_v9 = vld [vmem:[#allocation5 + $0xbd0] sm:$0xff]  ;;  %v18088_v36 = vcombine.low %v481_v43, %v493_v7  ;;  %v8713_v43 = vmul.f32 0.5, %v22261_v28 }
 0x293   :  { %v8977_v39 = vmul.f32 0.7978845, %v8929_v45  ;;  %7942 = vmatpush1.bf16.msra.mxu0 %v17776_v61  ;;  %v841_v2 = vld [vmem:[#allocation5 + $0x1770] sm:$0xff]  ;;  %v18065_v48 = vcombine.high %v457_v57, %v469_v9  ;;  %v18064_v33 = vcombine.low %v457_v57, %v469_v9 }
 0x294   :  { %7985 = vmatpush1.bf16.msra.mxu1 %v18160_v17  ;;  %7943 = vmatprep.subr.bf16.mxu0 %v17753_v52  ;;  %v853_v16 = vld [vmem:[#allocation5 + $0x17d0] sm:$0xff] }
 0x295   :  { %21759 = vtanh.f32 %v8977_v39  ;;  %7986 = vmatprep.subr.bf16.mxu1 %v18137_v35  ;;  %v433_v32 = vld [vmem:[#allocation5 + $0xab0] sm:$0xff]  ;;  %v18449_v52 = vcombine.high %v841_v2, %v853_v16  ;;  %v18448_v45 = vcombine.low %v841_v2, %v853_v16 }
 0x296   :  { %v445_v61 = vld [vmem:[#allocation5 + $0xb10] sm:$0xff] }
 0x297   :  { %7944 = vmatpush1.bf16.msra.mxu0 %v17752_v47  ;;  %v817_v17 = vld [vmem:[#allocation5 + $0x16b0] sm:$0xff]  ;;  %v18041_v35 = vcombine.high %v433_v32, %v445_v61  ;;  %v18040_v7 = vcombine.low %v433_v32, %v445_v61 }
 0x298   :  { %7987 = vmatpush1.bf16.msra.mxu1 %v18136_v11  ;;  %7945 = vmatprep.subr.bf16.mxu0 %v17729_v40  ;;  %v829_v55 = vld [vmem:[#allocation5 + $0x1710] sm:$0xff] }
 0x299   :  { %7988 = vmatprep.subr.bf16.mxu1 %v18113_v51  ;;  %v409_v21 = vld [vmem:[#allocation5 + $0x9f0] sm:$0xff]  ;;  %v18425_v11 = vcombine.high %v817_v17, %v829_v55  ;;  %v8737_v51 = vmul.f32 0.5, %v22272_v1 }
 0x29a   :  { %v421_v39 = vld [vmem:[#allocation5 + $0xa50] sm:$0xff] }
 0x29b   :  { %7946 = vmatpush1.bf16.msra.mxu0 %v17728_v8  ;;  %v793_v47 = vld [vmem:[#allocation5 + $0x15f0] sm:$0xff] }
 0x29c   :  { %7989 = vmatpush1.bf16.msra.mxu1 %v18112_v24  ;;  %7947 = vmatprep.subr.bf16.mxu0 %v17705_v50  ;;  %v805_v40 = vld [vmem:[#allocation5 + $0x1650] sm:$0xff]  ;;  %v18424_v24 = vcombine.low %v817_v17, %v829_v55  ;;  %v18017_v50 = vcombine.high %v409_v21, %v421_v39 }
 0x29d   :  { %7990 = vmatprep.subr.bf16.mxu1 %v18089_v42  ;;  %v385_v57 = vld [vmem:[#allocation5 + $0x930] sm:$0xff]  ;;  %v18401_v42 = vcombine.high %v793_v47, %v805_v40  ;;  %v18400_v1 = vcombine.low %v793_v47, %v805_v40 }
 0x29e   :  { %v21758_v31 = vpop.eup %21757  ;;  %v397_v9 = vld [vmem:[#allocation5 + $0x990] sm:$0xff] }
 0x29f   :  { %7948 = vmatpush1.bf16.msra.mxu0 %v17704_v14  ;;  %v9049_v12 = vadd.f32 1.0, %v21758_v31  ;;  %v769_v2 = vld [vmem:[#allocation5 + $0x1530] sm:$0xff]  ;;  %v17993_v32 = vcombine.high %v385_v57, %v397_v9 }
 0x2a0   :  { %7991 = vmatpush1.bf16.msra.mxu1 %v18088_v36  ;;  %7949 = vmatprep.subr.bf16.mxu0 %v18065_v48  ;;  %v781_v16 = vld [vmem:[#allocation5 + $0x1590] sm:$0xff]  ;;  %v18016_v48 = vcombine.low %v409_v21, %v421_v39 }
 0x2a1   :  { %7992 = vmatprep.subr.bf16.mxu1 %v18449_v52  ;;  %v9097_v14 = vmul.f32 %v9049_v12, %v8713_v43  ;;  %v361_v61 = vld [vmem:[#allocation5 + $0x870] sm:$0xff]  ;;  %v18377_v55 = vcombine.high %v769_v2, %v781_v16 }
 0x2a2   :  { %v21760_v0 = vpop.eup %21759  ;;  %v373_v52 = vld [vmem:[#allocation5 + $0x8d0] sm:$0xff] }
 0x2a3   :  { %7950 = vmatpush2.bf16.msra.mxu0 %v18064_v33  ;;  %v9073_v8 = vadd.f32 1.0, %v21760_v0  ;;  %v745_v17 = vld [vmem:[#allocation5 + $0x1470] sm:$0xff]  ;;  %v17992_v33 = vcombine.low %v385_v57, %v397_v9  ;;  %v17968_v47 = vcombine.low %v361_v61, %v373_v52 }
 0x2a4   :  { %7993 = vmatpush2.bf16.msra.mxu1 %v18448_v45  ;;  %7951 = vmatprep.subr.bf16.mxu0 %v18041_v35  ;;  %v757_v31 = vld [vmem:[#allocation5 + $0x14d0] sm:$0xff]  ;;  %v18376_v45 = vcombine.low %v769_v2, %v781_v16  ;;  %v17969_v35 = vcombine.high %v361_v61, %v373_v52 }
 0x2a5   :  { %7994 = vmatprep.subr.bf16.mxu1 %v18425_v11  ;;  %v9121_v36 = vmul.f32 %v9073_v8, %v8737_v51  ;;  %v337_v11 = vld [vmem:[#allocation5 + $0x7b0] sm:$0xff]  ;;  %v18353_v12 = vcombine.high %v745_v17, %v757_v31  ;;  %v18352_v40 = vcombine.low %v745_v17, %v757_v31 }
 0x2a6   :  { %v349_v21 = vld [vmem:[#allocation5 + $0x810] sm:$0xff] }
 0x2a7   :  { %7952 = vmatpush2.bf16.msra.mxu0 %v18040_v7  ;;  %v22281_v28 = vpack.c.bf16 %v9121_v36, %v9097_v14  ;;  %v721_v39 = vld [vmem:[#allocation5 + $0x13b0] sm:$0xff]  ;;  %v17945_v43 = vcombine.high %v337_v11, %v349_v21  ;;  %v17944_v57 = vcombine.low %v337_v11, %v349_v21 }
 0x2a8   :  { %7995 = vmatpush2.bf16.msra.mxu1 %v18424_v24  ;;  %7953 = vmatprep.subr.bf16.mxu0 %v18017_v50  ;;  %v733_v0 = vld [vmem:[#allocation5 + $0x1410] sm:$0xff] }
 0x2a9   :  { %23186 = vst [vmem:[#allocation21_spill] sm:$0xff] %v22281_v28  ;;  %7996 = vmatprep.subr.bf16.mxu1 %v18401_v42  ;;  %v313_v51 = vld [vmem:[#allocation5 + $0x6f0] sm:$0xff]  ;;  %v18329_v24 = vcombine.high %v721_v39, %v733_v0  ;;  %v18328_v9 = vcombine.low %v721_v39, %v733_v0  ;;  %v242_v0 = vld [vmem:[#allocation5 + $0x4b8] sm:$0xff] }
 0x2aa   :  { %v325_v7 = vld [vmem:[#allocation5 + $0x750] sm:$0xff]  ;;  %v182_v28 = vld [vmem:[#allocation5 + $0x2d8] sm:$0xff] }
 0x2ab   :  { %7954 = vmatpush2.bf16.msra.mxu0 %v18016_v48  ;;  %v697_v8 = vld [vmem:[#allocation5 + $0x12f0] sm:$0xff]  ;;  %v17921_v2 = vcombine.high %v313_v51, %v325_v7 }
 0x2ac   :  { %7997 = vmatpush2.bf16.msra.mxu1 %v18400_v1  ;;  %7955 = vmatprep.subr.bf16.mxu0 %v17993_v32  ;;  %v709_v50 = vld [vmem:[#allocation5 + $0x1350] sm:$0xff]  ;;  %v17920_v1 = vcombine.low %v313_v51, %v325_v7  ;;  %v22287_v7 = vpop.f32.mrf.mxu0 }
 0x2ad   :  { %7998 = vmatprep.subr.bf16.mxu1 %v18377_v55  ;;  %v289_v42 = vld [vmem:[#allocation5 + $0x630] sm:$0xff]  ;;  %v18305_v36 = vcombine.high %v697_v8, %v709_v50  ;;  %v18304_v32 = vcombine.low %v697_v8, %v709_v50  ;;  %v266_v55 = vld [vmem:[#allocation5 + $0x578] sm:$0xff] }
 0x2ae   :  { %v301_v16 = vld [vmem:[#allocation5 + $0x690] sm:$0xff] }
 0x2af   :  { %7956 = vmatpush2.bf16.msra.mxu0 %v17992_v33  ;;  %v673_v14 = vld [vmem:[#allocation5 + $0x1230] sm:$0xff]  ;;  %v17897_v61 = vcombine.high %v289_v42, %v301_v16  ;;  %v278_v33 = vld [vmem:[#allocation5 + $0x5d8] sm:$0xff] }
 0x2b0   :  { %7999 = vmatpush2.bf16.msra.mxu1 %v18376_v45  ;;  %7957 = vmatprep.subr.bf16.mxu0 %v17969_v35  ;;  %v685_v48 = vld [vmem:[#allocation5 + $0x1290] sm:$0xff]  ;;  %v22283_v45 = vld [vmem:[#allocation7 + $0x8] sm:$0xff]  ;;  %v17896_v35 = vcombine.low %v289_v42, %v301_v16  ;;  %v17874_v8 = vcombine.low %v266_v55, %v278_v33  ;;  %v230_v16 = vld [vmem:[#allocation5 + $0x458] sm:$0xff] }
 0x2b1   :  { %8000 = vmatprep.subr.bf16.mxu1 %v18353_v12  ;;  %v1033_v52 = vld [vmem:[#allocation5 + $0x1d70] sm:$0xff]  ;;  %v18281_v31 = vcombine.high %v673_v14, %v685_v48  ;;  %v18280_v11 = vcombine.low %v673_v14, %v685_v48 }
 0x2b2   :  { %v1045_v17 = vld [vmem:[#allocation5 + $0x1dd0] sm:$0xff] }
 0x2b3   :  { %7958 = vmatpush2.bf16.msra.mxu0 %v17968_v47  ;;  %v18641_v21 = vcombine.high %v1033_v52, %v1045_v17  ;;  %v1009_v39 = vld [vmem:[#allocation5 + $0x1cb0] sm:$0xff]  ;;  %v17875_v47 = vcombine.high %v266_v55, %v278_v33  ;;  %v18640_v51 = vcombine.low %v1033_v52, %v1045_v17  ;;  %v194_v33 = vld [vmem:[#allocation5 + $0x338] sm:$0xff] }
 0x2b4   :  { %8001 = vmatpush2.bf16.msra.mxu1 %v18352_v40  ;;  %7959 = vmatprep.subr.bf16.mxu0 %v17945_v43  ;;  %v1021_v12 = vld [vmem:[#allocation5 + $0x1d10] sm:$0xff]  ;;  %v254_v40 = vld [vmem:[#allocation5 + $0x518] sm:$0xff]  ;;  %v1284_v43 = vrot.slane %v22283_v45, %v22096_v27 }
 0x2b5   :  { %8002 = vmatprep.subr.bf16.mxu1 %v18329_v24  ;;  %v18617_v24 = vcombine.high %v1009_v39, %v1021_v12  ;;  %v985_v50 = vld [vmem:[#allocation5 + $0x1bf0] sm:$0xff]  ;;  %v17851_v42 = vcombine.high %v242_v0, %v254_v40  ;;  %v17850_v52 = vcombine.low %v242_v0, %v254_v40 }
 0x2b6   :  { %v961_v55 = vld [vmem:[#allocation5 + $0x1b30] sm:$0xff] }
 0x2b7   :  { %7960 = vmatpush2.bf16.msra.mxu0 %v17944_v57  ;;  %v997_v57 = vld [vmem:[#allocation5 + $0x1c50] sm:$0xff] }
 0x2b8   :  { %8003 = vmatpush2.bf16.msra.mxu1 %v18328_v9  ;;  %7961 = vmatprep.subr.bf16.mxu0 %v17921_v2  ;;  %v218_v9 = vld [vmem:[#allocation5 + $0x3f8] sm:$0xff]  ;;  %v22289_v2 = vpop.f32.mrf.mxu1  ;;  %v18593_v17 = vcombine.high %v985_v50, %v997_v57 }
 0x2b9   :  { %8004 = vmatprep.subr.bf16.mxu1 %v18305_v36  ;;  %v22291_v36 = vld [vmem:[#allocation2] ss:$24 sps:$4 sm:$0xff]   ;;  %v17826_v40 = vcombine.low %v218_v9, %v230_v16 }
 0x2bb   :  { %7962 = vmatpush2.bf16.msra.mxu0 %v17920_v1 }
 0x2bc   :  { %8005 = vmatpush2.bf16.msra.mxu1 %v18304_v32  ;;  %7963 = vmatprep.subr.bf16.mxu0 %v17897_v61  ;;  %v18616_v32 = vcombine.low %v1009_v39, %v1021_v12  ;;  %v18592_v12 = vcombine.low %v985_v50, %v997_v57  ;;  %v913_v57 = vld [vmem:[#allocation5 + $0x19b0] sm:$0xff] }
 0x2bd   :  { %8006 = vmatprep.subr.bf16.mxu1 %v18281_v31  ;;  %v973_v31 = vld [vmem:[#allocation5 + $0x1b90] sm:$0xff] }
 0x2be   :  { %v18568_v23 = vcombine.low %v961_v55, %v973_v31 }
 0x2bf   :  { %7964 = vmatpush2.bf16.msra.mxu0 %v17896_v35 }
 0x2c0   :  { %8007 = vmatpush2.bf16.msra.mxu1 %v18280_v11  ;;  %8019 = vmatprep.subr.bf16.mxu0 %v18641_v21  ;;  %v17827_v21 = vcombine.high %v218_v9, %v230_v16  ;;  %v146_v9 = vld [vmem:[#allocation5 + $0x1b8] sm:$0xff] }
 0x2c1   :  { %8062 = vmatprep.subr.bf16.mxu1 %v17875_v47  ;;  %v206_v47 = vld [vmem:[#allocation5 + $0x398] sm:$0xff] }
 0x2c2   :  { %v7709_v14 = vpop.f32.mrf.mxu0  ;;  %7966 = vmatmul.mubr.bf16.vlgmr.msra.gmra.mxu0 %v22291_v36  ;;  %v158_v16 = vld [vmem:[#allocation5 + $0x218] sm:$0xff] }
 0x2c3   :  { %v7710_v48 = vadd.f32 %v7709_v14, %v1284_v43  ;;  %v7752_v1 = vpop.f32.mrf.mxu1  ;;  %8009 = vmatmul.mubr.bf16.vlgmr.msra.gmra.mxu1 %v22255_v5  ;;  %8020 = vmatpush1.bf16.msra.mxu0 %v18640_v51  ;;  %v22301_v14 = vld [vmem:[#allocation2 + $0x14] ss:$24 sps:$4 sm:$0xff]   ;;  %v18569_v51 = vcombine.high %v961_v55, %v973_v31  ;;  %v901_v55 = vld [vmem:[#allocation5 + $0x1950] sm:$0xff] }
 0x2c4   :  { %8063 = vmatpush1.bf16.msra.mxu1 %v17874_v8  ;;  %v22295_v61 = vpop.f32.mrf.mxu0  ;;  %8021 = vmatprep.subr.bf16.mxu0 %v18617_v24  ;;  %v17803_v24 = vcombine.high %v194_v33, %v206_v47  ;;  %v122_v31 = vld [vmem:[#allocation5 + $0xf8] sm:$0xff] }
 0x2c5   :  { %23187 = vst [vmem:[#allocation22_spill] sm:$0xff] %v22295_v61  ;;  %v22297_v35 = vadd.f32 %v7752_v1, %v7710_v48  ;;  %v22299_v11 = vpop.f32.mrf.mxu1  ;;  %8064 = vmatprep.subr.bf16.mxu1 %v17851_v42  ;;  %8051 = vmatprep.mubr.bf16.mxu0 %v22301_v14  ;;  %v937_v42 = vld [vmem:[#allocation5 + $0x1a70] sm:$0xff]  ;;  %v170_v1 = vld [vmem:[#allocation5 + $0x278] sm:$0xff] }
 0x2c6   :  { %23188 = vst [vmem:[#allocation23_spill] sm:$0xff] %v22299_v11  ;;  %v7713_v5 = vpop.f32.mrf.mxu0  ;;  %8094 = vmatprep.mubr.bf16.mxu1 %v22265_v54  ;;  %v949_v48 = vld [vmem:[#allocation5 + $0x1ad0] sm:$0xff]  ;;  %v17802_v54 = vcombine.low %v194_v33, %v206_v47  ;;  %v17779_v50 = vcombine.high %v170_v1, %v182_v28  ;;  %v17754_v47 = vcombine.low %v146_v9, %v158_v16  ;;  %v950_v11 = vld [vmem:[#allocation5 + $0x1ad8] sm:$0xff] }
 0x2c7   :  { %v7714_v39 = vadd.f32 %v7713_v5, %v1284_v43  ;;  %8022 = vmatpush1.bf16.msra.mxu0 %v18616_v32  ;;  %v7756_v0 = vpop.f32.mrf.mxu1  ;;  %v18545_v43 = vcombine.high %v937_v42, %v949_v48  ;;  %v925_v32 = vld [vmem:[#allocation5 + $0x1a10] sm:$0xff]  ;;  %v17755_v5 = vcombine.high %v146_v9, %v158_v16 }
 0x2c8   :  { %8065 = vmatpush1.bf16.msra.mxu1 %v17850_v52  ;;  %8023 = vmatprep.subr.bf16.mxu0 %v18593_v17  ;;  %v18544_v52 = vcombine.low %v937_v42, %v949_v48  ;;  %v17778_v17 = vcombine.low %v170_v1, %v182_v28  ;;  %v18520_v33 = vcombine.low %v913_v57, %v925_v32  ;;  %v110_v42 = vld [vmem:[#allocation5 + $0x98] sm:$0xff] }
 0x2c9   :  { %v22305_v8 = vadd.f32 %v7756_v0, %v7714_v39  ;;  %8066 = vmatprep.subr.bf16.mxu1 %v17827_v21  ;;  %v18521_v21 = vcombine.high %v913_v57, %v925_v32  ;;  %v889_v39 = vld [vmem:[#allocation5 + $0x18f0] sm:$0xff]  ;;  %v458_v57 = vld [vmem:[#allocation5 + $0xb78] sm:$0xff] }
 0x2ca   :  { %v18497_v0 = vcombine.high %v889_v39, %v901_v55  ;;  %v18496_v28 = vcombine.low %v889_v39, %v901_v55  ;;  %v470_v32 = vld [vmem:[#allocation5 + $0xbd8] sm:$0xff] }
 0x2cb   :  { %8024 = vmatpush1.bf16.msra.mxu0 %v18592_v12  ;;  %v134_v12 = vld [vmem:[#allocation5 + $0x158] sm:$0xff] }
 0x2cc   :  { %8067 = vmatpush1.bf16.msra.mxu1 %v17826_v40  ;;  %8025 = vmatprep.subr.bf16.mxu0 %v18569_v51  ;;  %v17731_v40 = vcombine.high %v122_v31, %v134_v12  ;;  %v877_v51 = vld [vmem:[#allocation5 + $0x1890] sm:$0xff]  ;;  %v17730_v48 = vcombine.low %v122_v31, %v134_v12  ;;  %v434_v39 = vld [vmem:[#allocation5 + $0xab8] sm:$0xff]  ;;  %v18066_v12 = vcombine.low %v458_v57, %v470_v32 }
 0x2cd   :  { %8068 = vmatprep.subr.bf16.mxu1 %v17803_v24  ;;  %v98_v24 = vld [vmem:[#allocation5 + $0x38] sm:$0xff] }
 0x2ce   :  { %v17706_v16 = vcombine.low %v98_v24, %v110_v42  ;;  %v446_v55 = vld [vmem:[#allocation5 + $0xb18] sm:$0xff] }
 0x2cf   :  { %8026 = vmatpush1.bf16.msra.mxu0 %v18568_v23  ;;  %v865_v23 = vld [vmem:[#allocation5 + $0x1830] sm:$0xff] }
 0x2d0   :  { %8069 = vmatpush1.bf16.msra.mxu1 %v17802_v54  ;;  %8027 = vmatprep.subr.bf16.mxu0 %v18545_v43  ;;  %v18473_v1 = vcombine.high %v865_v23, %v877_v51  ;;  %v17707_v54 = vcombine.high %v98_v24, %v110_v42  ;;  %v1225_v43 = vld [vmem:[#allocation5 + $0x2370] sm:$0xff]  ;;  %v18472_v9 = vcombine.low %v865_v23, %v877_v51  ;;  %v410_v23 = vld [vmem:[#allocation5 + $0x9f8] sm:$0xff] }
 0x2d1   :  { %8070 = vmatprep.subr.bf16.mxu1 %v17779_v50  ;;  %v1237_v50 = vld [vmem:[#allocation5 + $0x23d0] sm:$0xff]  ;;  %v422_v51 = vld [vmem:[#allocation5 + $0xa58] sm:$0xff]  ;;  %v18042_v42 = vcombine.low %v434_v39, %v446_v55 }
 0x2d2   :  { %v18832_v31 = vcombine.low %v1225_v43, %v1237_v50 }
 0x2d3   :  { %8028 = vmatpush1.bf16.msra.mxu0 %v18544_v52  ;;  %v18833_v52 = vcombine.high %v1225_v43, %v1237_v50  ;;  %v386_v43 = vld [vmem:[#allocation5 + $0x938] sm:$0xff] }
 0x2d4   :  { %8071 = vmatpush1.bf16.msra.mxu1 %v17778_v17  ;;  %8029 = vmatprep.subr.bf16.mxu0 %v18521_v21  ;;  %v18067_v17 = vcombine.high %v458_v57, %v470_v32  ;;  %v1201_v21 = vld [vmem:[#allocation5 + $0x22b0] sm:$0xff]  ;;  %v398_v50 = vld [vmem:[#allocation5 + $0x998] sm:$0xff]  ;;  %v18018_v32 = vcombine.low %v410_v23, %v422_v51 }
 0x2d5   :  { %8072 = vmatprep.subr.bf16.mxu1 %v17755_v5  ;;  %v1213_v5 = vld [vmem:[#allocation5 + $0x2310] sm:$0xff] }
 0x2d6   :  { %v18808_v24 = vcombine.low %v1201_v21, %v1213_v5 }
 0x2d7   :  { %8030 = vmatpush1.bf16.msra.mxu0 %v18520_v33  ;;  %v18809_v33 = vcombine.high %v1201_v21, %v1213_v5  ;;  %v362_v21 = vld [vmem:[#allocation5 + $0x878] sm:$0xff] }
 0x2d8   :  { %8073 = vmatpush1.bf16.msra.mxu1 %v17754_v47  ;;  %8031 = vmatprep.subr.bf16.mxu0 %v18497_v0  ;;  %v18043_v47 = vcombine.high %v434_v39, %v446_v55  ;;  %v1177_v0 = vld [vmem:[#allocation5 + $0x21f0] sm:$0xff]  ;;  %v374_v5 = vld [vmem:[#allocation5 + $0x8d8] sm:$0xff]  ;;  %v17994_v55 = vcombine.low %v386_v43, %v398_v50 }
 0x2d9   :  { %8074 = vmatprep.subr.bf16.mxu1 %v17731_v40  ;;  %v1189_v40 = vld [vmem:[#allocation5 + $0x2250] sm:$0xff] }
 0x2da   :  { %v18784_v57 = vcombine.low %v1177_v0, %v1189_v40 }
 0x2db   :  { %8032 = vmatpush1.bf16.msra.mxu0 %v18496_v28  ;;  %v18785_v28 = vcombine.high %v1177_v0, %v1189_v40  ;;  %v338_v0 = vld [vmem:[#allocation5 + $0x7b8] sm:$0xff] }
 0x2dc   :  { %8075 = vmatpush1.bf16.msra.mxu1 %v17730_v48  ;;  %8033 = vmatprep.subr.bf16.mxu0 %v18473_v1  ;;  %v18019_v48 = vcombine.high %v410_v23, %v422_v51  ;;  %v1153_v1 = vld [vmem:[#allocation5 + $0x2130] sm:$0xff]  ;;  %v350_v40 = vld [vmem:[#allocation5 + $0x818] sm:$0xff]  ;;  %v17970_v51 = vcombine.low %v362_v21, %v374_v5 }
 0x2dd   :  { %8076 = vmatprep.subr.bf16.mxu1 %v17707_v54  ;;  %v1165_v54 = vld [vmem:[#allocation5 + $0x2190] sm:$0xff] }
 0x2de   :  { %v18760_v39 = vcombine.low %v1153_v1, %v1165_v54 }
 0x2df   :  { %8034 = vmatpush1.bf16.msra.mxu0 %v18472_v9  ;;  %v18761_v9 = vcombine.high %v1153_v1, %v1165_v54  ;;  %v314_v1 = vld [vmem:[#allocation5 + $0x6f8] sm:$0xff] }
 0x2e0   :  { %8077 = vmatpush1.bf16.msra.mxu1 %v17706_v16  ;;  %8035 = vmatprep.subr.bf16.mxu0 %v18833_v52  ;;  %v17995_v16 = vcombine.high %v386_v43, %v398_v50  ;;  %v1129_v52 = vld [vmem:[#allocation5 + $0x2070] sm:$0xff]  ;;  %v326_v54 = vld [vmem:[#allocation5 + $0x758] sm:$0xff]  ;;  %v17946_v50 = vcombine.low %v338_v0, %v350_v40 }
 0x2e1   :  { %8078 = vmatprep.subr.bf16.mxu1 %v18067_v17  ;;  %v1141_v17 = vld [vmem:[#allocation5 + $0x20d0] sm:$0xff] }
 0x2e2   :  { %v18736_v23 = vcombine.low %v1129_v52, %v1141_v17 }
 0x2e3   :  { %8036 = vmatpush2.bf16.msra.mxu0 %v18832_v31  ;;  %v18737_v31 = vcombine.high %v1129_v52, %v1141_v17  ;;  %v290_v52 = vld [vmem:[#allocation5 + $0x638] sm:$0xff] }
 0x2e4   :  { %8079 = vmatpush2.bf16.msra.mxu1 %v18066_v12  ;;  %8037 = vmatprep.subr.bf16.mxu0 %v18809_v33  ;;  %v17971_v12 = vcombine.high %v362_v21, %v374_v5  ;;  %v1105_v33 = vld [vmem:[#allocation5 + $0x1fb0] sm:$0xff]  ;;  %v302_v17 = vld [vmem:[#allocation5 + $0x698] sm:$0xff]  ;;  %v17922_v5 = vcombine.low %v314_v1, %v326_v54 }
 0x2e5   :  { %8080 = vmatprep.subr.bf16.mxu1 %v18043_v47  ;;  %v1117_v47 = vld [vmem:[#allocation5 + $0x2010] sm:$0xff] }
 0x2e6   :  { %v18712_v43 = vcombine.low %v1105_v33, %v1117_v47 }
 0x2e7   :  { %8038 = vmatpush2.bf16.msra.mxu0 %v18808_v24  ;;  %v18713_v24 = vcombine.high %v1105_v33, %v1117_v47  ;;  %v1034_v33 = vld [vmem:[#allocation5 + $0x1d78] sm:$0xff] }
 0x2e8   :  { %8081 = vmatpush2.bf16.msra.mxu1 %v18042_v42  ;;  %8039 = vmatprep.subr.bf16.mxu0 %v18785_v28  ;;  %v17947_v42 = vcombine.high %v338_v0, %v350_v40  ;;  %v1081_v28 = vld [vmem:[#allocation5 + $0x1ef0] sm:$0xff]  ;;  %v1046_v47 = vld [vmem:[#allocation5 + $0x1dd8] sm:$0xff]  ;;  %v17898_v40 = vcombine.low %v290_v52, %v302_v17 }
 0x2e9   :  { %8082 = vmatprep.subr.bf16.mxu1 %v18019_v48  ;;  %v1093_v48 = vld [vmem:[#allocation5 + $0x1f50] sm:$0xff] }
 0x2ea   :  { %v18688_v21 = vcombine.low %v1081_v28, %v1093_v48 }
 0x2eb   :  { %8040 = vmatpush2.bf16.msra.mxu0 %v18784_v57  ;;  %v18689_v57 = vcombine.high %v1081_v28, %v1093_v48  ;;  %v1010_v28 = vld [vmem:[#allocation5 + $0x1cb8] sm:$0xff] }
 0x2ec   :  { %8083 = vmatpush2.bf16.msra.mxu1 %v18018_v32  ;;  %8041 = vmatprep.subr.bf16.mxu0 %v18761_v9  ;;  %v17923_v32 = vcombine.high %v314_v1, %v326_v54  ;;  %v1057_v9 = vld [vmem:[#allocation5 + $0x1e30] sm:$0xff]  ;;  %v1022_v48 = vld [vmem:[#allocation5 + $0x1d18] sm:$0xff]  ;;  %v22307_v54 = vpop.f32.mrf.mxu0 }
 0x2ed   :  { %8084 = vmatprep.subr.bf16.mxu1 %v17995_v16  ;;  %v1069_v16 = vld [vmem:[#allocation5 + $0x1e90] sm:$0xff]  ;;  %23189 = vst [vmem:[#allocation24_spill] sm:$0xff] %v22307_v54  ;;  %v546_v54 = vld [vmem:[#allocation5 + $0xe38] sm:$0xff] }
 0x2ee   :  { %v18664_v0 = vcombine.low %v1057_v9, %v1069_v16 }
 0x2ef   :  { %8042 = vmatpush2.bf16.msra.mxu0 %v18760_v39  ;;  %v18665_v39 = vcombine.high %v1057_v9, %v1069_v16  ;;  %v614_v9 = vld [vmem:[#allocation5 + $0x1058] sm:$0xff] }
 0x2f0   :  { %8085 = vmatpush2.bf16.msra.mxu1 %v17994_v55  ;;  %8043 = vmatprep.subr.bf16.mxu0 %v18737_v31  ;;  %v17899_v55 = vcombine.high %v290_v52, %v302_v17  ;;  %v650_v31 = vld [vmem:[#allocation5 + $0x1178] sm:$0xff] }
 0x2f1   :  { %8086 = vmatprep.subr.bf16.mxu1 %v17971_v12  ;;  %v662_v12 = vld [vmem:[#allocation5 + $0x11d8] sm:$0xff] }
 0x2f2   :  { %v18258_v1 = vcombine.low %v650_v31, %v662_v12  ;;  %v22309_v52 = vld [vmem:[#allocation2 + $0x10] ss:$24 sps:$4 sm:$0xff]  }
 0x2f3   :  { %8044 = vmatpush2.bf16.msra.mxu0 %v18736_v23  ;;  %v18259_v23 = vcombine.high %v650_v31, %v662_v12  ;;  %v986_v17 = vld [vmem:[#allocation5 + $0x1bf8] sm:$0xff]  ;;  %v18618_v31 = vcombine.low %v1010_v28, %v1022_v48 }
 0x2f4   :  { %8087 = vmatpush2.bf16.msra.mxu1 %v17970_v51  ;;  %8045 = vmatprep.subr.bf16.mxu0 %v18713_v24  ;;  %v18643_v51 = vcombine.high %v1034_v33, %v1046_v47  ;;  %v626_v24 = vld [vmem:[#allocation5 + $0x10b8] sm:$0xff] }
 0x2f5   :  { %8088 = vmatprep.subr.bf16.mxu1 %v17947_v42  ;;  %v638_v42 = vld [vmem:[#allocation5 + $0x1118] sm:$0xff] }
 0x2f7   :  { %8046 = vmatpush2.bf16.msra.mxu0 %v18712_v43  ;;  %v18642_v43 = vcombine.low %v1034_v33, %v1046_v47 }
 0x2f8   :  { %8089 = vmatpush2.bf16.msra.mxu1 %v17946_v50  ;;  %8047 = vmatprep.subr.bf16.mxu0 %v18689_v57  ;;  %v18235_v50 = vcombine.high %v626_v24, %v638_v42  ;;  %v18619_v57 = vcombine.high %v1010_v28, %v1022_v48 }
 0x2f9   :  { %8090 = vmatprep.subr.bf16.mxu1 %v17923_v32  ;;  %v602_v32 = vld [vmem:[#allocation5 + $0xff8] sm:$0xff] }
 0x2fa   :  { %v18211_v12 = vcombine.high %v602_v32, %v614_v9  ;;  %v18210_v28 = vcombine.low %v602_v32, %v614_v9 }
 0x2fb   :  { %8048 = vmatpush2.bf16.msra.mxu0 %v18688_v21  ;;  %v998_v21 = vld [vmem:[#allocation5 + $0x1c58] sm:$0xff] }
 0x2fc   :  { %8091 = vmatpush2.bf16.msra.mxu1 %v17922_v5  ;;  %8049 = vmatprep.subr.bf16.mxu0 %v18665_v39  ;;  %v18234_v39 = vcombine.low %v626_v24, %v638_v42  ;;  %v18595_v47 = vcombine.high %v986_v17, %v998_v21  ;;  %v18594_v48 = vcombine.low %v986_v17, %v998_v21 }
 0x2fd   :  { %8092 = vmatprep.subr.bf16.mxu1 %v17899_v55 }
 0x2ff   :  { %8050 = vmatpush2.bf16.msra.mxu0 %v18664_v0  ;;  %v578_v0 = vld [vmem:[#allocation5 + $0xf38] sm:$0xff] }
 0x300   :  { %8093 = vmatpush2.bf16.msra.mxu1 %v17898_v40  ;;  %8105 = vmatprep.subr.bf16.mxu0 %v18259_v23  ;;  %v590_v40 = vld [vmem:[#allocation5 + $0xf98] sm:$0xff] }
 0x301   :  { %8148 = vmatprep.subr.bf16.mxu1 %v18643_v51  ;;  %v22320_v23 = vld [vmem:[#allocation2 + $0xc] ss:$24 sps:$4 sm:$0xff]   ;;  %v18186_v32 = vcombine.low %v578_v0, %v590_v40 }
 0x302   :  { %v7795_v16 = vpop.f32.mrf.mxu0  ;;  %8052 = vmatmul.mubr.bf16.vlgmr.msra.gmra.mxu0 %v22309_v52  ;;  %v974_v51 = vld [vmem:[#allocation5 + $0x1b98] sm:$0xff] }
 0x303   :  { %v22313_v5 = vadd.f32 %v7795_v16, %v22297_v35  ;;  %8095 = vmatmul.mubr.bf16.vlgmr.msra.gmra.mxu1 %v22291_v36  ;;  %8106 = vmatpush1.bf16.msra.mxu0 %v18258_v1  ;;  %v962_v35 = vld [vmem:[#allocation5 + $0x1b38] sm:$0xff]  ;;  %v18187_v1 = vcombine.high %v578_v0, %v590_v40 }
 0x304   :  { %8149 = vmatpush1.bf16.msra.mxu1 %v18642_v43  ;;  %v22316_v55 = vpop.f32.mrf.mxu0  ;;  %8107 = vmatprep.subr.bf16.mxu0 %v18235_v50  ;;  %v554_v16 = vld [vmem:[#allocation5 + $0xe78] sm:$0xff]  ;;  %v18570_v9 = vcombine.low %v962_v35, %v974_v51 }
 0x305   :  { %23190 = vst [vmem:[#allocation25_spill] sm:$0xff] %v22316_v55  ;;  %v8763_v33 = vmul.f32 %v22313_v5, %v22313_v5  ;;  %8150 = vmatprep.subr.bf16.mxu1 %v18619_v57  ;;  %8137 = vmatprep.mubr.bf16.mxu0 %v22320_v23  ;;  %v18571_v57 = vcombine.high %v962_v35, %v974_v51  ;;  %v566_v55 = vld [vmem:[#allocation5 + $0xed8] sm:$0xff] }
 0x306   :  { %v7799_v36 = vpop.f32.mrf.mxu0  ;;  %8180 = vmatprep.mubr.bf16.mxu1 %v22301_v14  ;;  %v938_v14 = vld [vmem:[#allocation5 + $0x1a78] sm:$0xff]  ;;  %v18163_v17 = vcombine.high %v554_v16, %v566_v55 }
 0x307   :  { %v8811_v24 = vmul.f32 %v8763_v33, %v22313_v5  ;;  %v22326_v42 = vadd.f32 %v7799_v36, %v22305_v8  ;;  %8108 = vmatpush1.bf16.msra.mxu0 %v18234_v39  ;;  %v914_v36 = vld [vmem:[#allocation5 + $0x19b8] sm:$0xff]  ;;  %v18546_v0 = vcombine.low %v938_v14, %v950_v11 }
 0x308   :  { %8151 = vmatpush1.bf16.msra.mxu1 %v18618_v31  ;;  %8109 = vmatprep.subr.bf16.mxu0 %v18211_v12  ;;  %v18547_v31 = vcombine.high %v938_v14, %v950_v11  ;;  %v530_v12 = vld [vmem:[#allocation5 + $0xdb8] sm:$0xff] }
 0x309   :  { %v8859_v43 = vmul.f32 0.044715, %v8811_v24  ;;  %v8787_v50 = vmul.f32 %v22326_v42, %v22326_v42  ;;  %8152 = vmatprep.subr.bf16.mxu1 %v18595_v47  ;;  %v542_v47 = vld [vmem:[#allocation5 + $0xe18] sm:$0xff] }
 0x30a   :  { %v926_v24 = vld [vmem:[#allocation5 + $0x1a18] sm:$0xff]  ;;  %v18139_v40 = vcombine.high %v530_v12, %v542_v47 }
 0x30b   :  { %v8907_v33 = vadd.f32 %v8859_v43, %v22313_v5  ;;  %v8835_v8 = vmul.f32 %v8787_v50, %v22326_v42  ;;  %8110 = vmatpush1.bf16.msra.mxu0 %v18210_v28  ;;  %v18162_v43 = vcombine.low %v554_v16, %v566_v55  ;;  %v18523_v35 = vcombine.high %v914_v36, %v926_v24  ;;  %v506_v51 = vld [vmem:[#allocation5 + $0xcf8] sm:$0xff] }
 0x30c   :  { %8153 = vmatpush1.bf16.msra.mxu1 %v18594_v48  ;;  %8111 = vmatprep.subr.bf16.mxu0 %v18187_v1  ;;  %v518_v48 = vld [vmem:[#allocation5 + $0xd58] sm:$0xff] }
 0x30d   :  { %v8955_v21 = vmul.f32 0.7978845, %v8907_v33  ;;  %v8883_v39 = vmul.f32 0.044715, %v8835_v8  ;;  %8154 = vmatprep.subr.bf16.mxu1 %v18571_v57  ;;  %v890_v1 = vld [vmem:[#allocation5 + $0x18f8] sm:$0xff]  ;;  %v18138_v57 = vcombine.low %v530_v12, %v542_v47  ;;  %v18522_v33 = vcombine.low %v914_v36, %v926_v24 }
 0x30e   :  { %v902_v50 = vld [vmem:[#allocation5 + $0x1958] sm:$0xff]  ;;  %v18115_v8 = vcombine.high %v506_v51, %v518_v48 }
 0x30f   :  { %21761 = vtanh.f32 %v8955_v21  ;;  %v8931_v61 = vadd.f32 %v8883_v39, %v22326_v42  ;;  %8112 = vmatpush1.bf16.msra.mxu0 %v18186_v32  ;;  %v18499_v55 = vcombine.high %v890_v1, %v902_v50  ;;  %v482_v16 = vld [vmem:[#allocation5 + $0xc38] sm:$0xff] }
 0x310   :  { %8155 = vmatpush1.bf16.msra.mxu1 %v18570_v9  ;;  %8113 = vmatprep.subr.bf16.mxu0 %v18163_v17  ;;  %v494_v32 = vld [vmem:[#allocation5 + $0xc98] sm:$0xff]  ;;  %v18498_v9 = vcombine.low %v890_v1, %v902_v50 }
 0x311   :  { %v8979_v28 = vmul.f32 0.7978845, %v8931_v61  ;;  %8156 = vmatprep.subr.bf16.mxu1 %v18547_v31  ;;  %v866_v11 = vld [vmem:[#allocation5 + $0x1838] sm:$0xff]  ;;  %v18114_v61 = vcombine.low %v506_v51, %v518_v48  ;;  %v18091_v17 = vcombine.high %v482_v16, %v494_v32  ;;  %v18090_v36 = vcombine.low %v482_v16, %v494_v32 }
 0x312   :  { %v878_v14 = vld [vmem:[#allocation5 + $0x1898] sm:$0xff]  ;;  %v8739_v16 = vmul.f32 0.5, %v22326_v42 }
 0x313   :  { %21763 = vtanh.f32 %v8979_v28  ;;  %8114 = vmatpush1.bf16.msra.mxu0 %v18162_v43  ;;  %v18475_v21 = vcombine.high %v866_v11, %v878_v14  ;;  %v842_v39 = vld [vmem:[#allocation5 + $0x1778] sm:$0xff]  ;;  %v18474_v43 = vcombine.low %v866_v11, %v878_v14 }
 0x314   :  { %8157 = vmatpush1.bf16.msra.mxu1 %v18546_v0  ;;  %8115 = vmatprep.subr.bf16.mxu0 %v18139_v40  ;;  %v854_v31 = vld [vmem:[#allocation5 + $0x17d8] sm:$0xff] }
 0x315   :  { %8158 = vmatprep.subr.bf16.mxu1 %v18523_v35  ;;  %v1226_v12 = vld [vmem:[#allocation5 + $0x2378] sm:$0xff]  ;;  %v18451_v0 = vcombine.high %v842_v39, %v854_v31  ;;  %v18450_v1 = vcombine.low %v842_v39, %v854_v31 }
 0x316   :  { %v1238_v47 = vld [vmem:[#allocation5 + $0x23d8] sm:$0xff] }
 0x317   :  { %8116 = vmatpush1.bf16.msra.mxu0 %v18138_v57  ;;  %v18835_v40 = vcombine.high %v1226_v12, %v1238_v47  ;;  %v818_v28 = vld [vmem:[#allocation5 + $0x16b8] sm:$0xff] }
 0x318   :  { %8159 = vmatpush1.bf16.msra.mxu1 %v18522_v33  ;;  %8117 = vmatprep.subr.bf16.mxu0 %v18115_v8  ;;  %v830_v35 = vld [vmem:[#allocation5 + $0x1718] sm:$0xff]  ;;  %v18834_v33 = vcombine.low %v1226_v12, %v1238_v47 }
 0x319   :  { %8160 = vmatprep.subr.bf16.mxu1 %v18499_v55  ;;  %v1202_v51 = vld [vmem:[#allocation5 + $0x22b8] sm:$0xff]  ;;  %v18427_v8 = vcombine.high %v818_v28, %v830_v35  ;;  %v8715_v55 = vmul.f32 0.5, %v22313_v5 }
 0x31a   :  { %v1214_v48 = vld [vmem:[#allocation5 + $0x2318] sm:$0xff] }
 0x31b   :  { %8118 = vmatpush1.bf16.msra.mxu0 %v18114_v61  ;;  %v18811_v32 = vcombine.high %v1202_v51, %v1214_v48  ;;  %v794_v11 = vld [vmem:[#allocation5 + $0x15f8] sm:$0xff] }
 0x31c   :  { %v21762_v24 = vpop.eup %21761  ;;  %8161 = vmatpush1.bf16.msra.mxu1 %v18498_v9  ;;  %8119 = vmatprep.subr.bf16.mxu0 %v18091_v17  ;;  %v806_v14 = vld [vmem:[#allocation5 + $0x1658] sm:$0xff] }
 0x31d   :  { %8162 = vmatprep.subr.bf16.mxu1 %v18475_v21  ;;  %v9051_v50 = vadd.f32 1.0, %v21762_v24  ;;  %v1178_v9 = vld [vmem:[#allocation5 + $0x21f8] sm:$0xff]  ;;  %v18426_v21 = vcombine.low %v818_v28, %v830_v35  ;;  %v18403_v12 = vcombine.high %v794_v11, %v806_v14 }
 0x31e   :  { %v1190_v17 = vld [vmem:[#allocation5 + $0x2258] sm:$0xff] }
 0x31f   :  { %8120 = vmatpush1.bf16.msra.mxu0 %v18090_v36  ;;  %v9099_v39 = vmul.f32 %v9051_v50, %v8715_v55  ;;  %v18810_v36 = vcombine.low %v1202_v51, %v1214_v48  ;;  %v18787_v47 = vcombine.high %v1178_v9, %v1190_v17  ;;  %v770_v5 = vld [vmem:[#allocation5 + $0x1538] sm:$0xff] }
 0x320   :  { %v21764_v57 = vpop.eup %21763  ;;  %8163 = vmatpush1.bf16.msra.mxu1 %v18474_v43  ;;  %8121 = vmatprep.subr.bf16.mxu0 %v18451_v0  ;;  %v782_v24 = vld [vmem:[#allocation5 + $0x1598] sm:$0xff] }
 0x321   :  { %8164 = vmatprep.subr.bf16.mxu1 %v18835_v40  ;;  %v9075_v61 = vadd.f32 1.0, %v21764_v57  ;;  %v1154_v43 = vld [vmem:[#allocation5 + $0x2138] sm:$0xff]  ;;  %v18402_v40 = vcombine.low %v794_v11, %v806_v14  ;;  %v18379_v28 = vcombine.high %v770_v5, %v782_v24 }
 0x322   :  { %v1166_v0 = vld [vmem:[#allocation5 + $0x2198] sm:$0xff] }
 0x323   :  { %8122 = vmatpush2.bf16.msra.mxu0 %v18450_v1  ;;  %v9123_v31 = vmul.f32 %v9075_v61, %v8739_v16  ;;  %v18786_v1 = vcombine.low %v1178_v9, %v1190_v17  ;;  %v18763_v35 = vcombine.high %v1154_v43, %v1166_v0  ;;  %v746_v50 = vld [vmem:[#allocation5 + $0x1478] sm:$0xff] }
 0x324   :  { %8165 = vmatpush2.bf16.msra.mxu1 %v18834_v33  ;;  %8123 = vmatprep.subr.bf16.mxu0 %v18427_v8  ;;  %v758_v57 = vld [vmem:[#allocation5 + $0x14d8] sm:$0xff]  ;;  %v18378_v33 = vcombine.low %v770_v5, %v782_v24  ;;  %v18762_v8 = vcombine.low %v1154_v43, %v1166_v0  ;;  %v22337_v5 = vpop.f32.mrf.mxu1 }
 0x325   :  { %8166 = vmatprep.subr.bf16.mxu1 %v18811_v32  ;;  %v22335_v42 = vpack.c.bf16 %v9123_v31, %v9099_v39  ;;  %v1130_v51 = vld [vmem:[#allocation5 + $0x2078] sm:$0xff]  ;;  %v18355_v55 = vcombine.high %v746_v50, %v758_v57  ;;  %v18354_v9 = vcombine.low %v746_v50, %v758_v57  ;;  %23192 = vst [vmem:[#allocation27_spill] sm:$0xff] %v22337_v5  ;;  %v195_v5 = vld [vmem:[#allocation5 + $0x340] sm:$0xff] }
 0x326   :  { %v1142_v48 = vld [vmem:[#allocation5 + $0x20d8] sm:$0xff] }
 0x327   :  { %23191 = vst [vmem:[#allocation26_spill] sm:$0xff] %v22335_v42  ;;  %8124 = vmatpush2.bf16.msra.mxu0 %v18426_v21  ;;  %v18739_v16 = vcombine.high %v1130_v51, %v1142_v48  ;;  %v722_v32 = vld [vmem:[#allocation5 + $0x13b8] sm:$0xff]  ;;  %v18738_v17 = vcombine.low %v1130_v51, %v1142_v48 }
 0x328   :  { %8167 = vmatpush2.bf16.msra.mxu1 %v18810_v36  ;;  %8125 = vmatprep.subr.bf16.mxu0 %v18403_v12  ;;  %v734_v11 = vld [vmem:[#allocation5 + $0x1418] sm:$0xff] }
 0x329   :  { %8168 = vmatprep.subr.bf16.mxu1 %v18787_v47  ;;  %v1106_v14 = vld [vmem:[#allocation5 + $0x1fb8] sm:$0xff]  ;;  %v18331_v21 = vcombine.high %v722_v32, %v734_v11  ;;  %v18330_v24 = vcombine.low %v722_v32, %v734_v11  ;;  %v279_v32 = vld [vmem:[#allocation5 + $0x5e0] sm:$0xff] }
 0x32a   :  { %v1118_v61 = vld [vmem:[#allocation5 + $0x2018] sm:$0xff]  ;;  %v651_v11 = vld [vmem:[#allocation5 + $0x1180] sm:$0xff] }
 0x32b   :  { %8126 = vmatpush2.bf16.msra.mxu0 %v18402_v40  ;;  %v18715_v39 = vcombine.high %v1106_v14, %v1118_v61  ;;  %v698_v31 = vld [vmem:[#allocation5 + $0x12f8] sm:$0xff]  ;;  %v18714_v43 = vcombine.low %v1106_v14, %v1118_v61  ;;  %v7838_v40 = vpop.f32.mrf.mxu1  ;;  %v663_v14 = vld [vmem:[#allocation5 + $0x11e0] sm:$0xff] }
 0x32c   :  { %8169 = vmatpush2.bf16.msra.mxu1 %v18786_v1  ;;  %8127 = vmatprep.subr.bf16.mxu0 %v18379_v28  ;;  %v710_v36 = vld [vmem:[#allocation5 + $0x1358] sm:$0xff] }
 0x32d   :  { %8170 = vmatprep.subr.bf16.mxu1 %v18763_v35  ;;  %v1082_v12 = vld [vmem:[#allocation5 + $0x1ef8] sm:$0xff]  ;;  %v18307_v0 = vcombine.high %v698_v31, %v710_v36  ;;  %v18306_v51 = vcombine.low %v698_v31, %v710_v36  ;;  %v18261_v31 = vcombine.high %v651_v11, %v663_v14  ;;  %v243_v36 = vld [vmem:[#allocation5 + $0x4c0] sm:$0xff] }
 0x32e   :  { %v1094_v47 = vld [vmem:[#allocation5 + $0x1f58] sm:$0xff] }
 0x32f   :  { %8128 = vmatpush2.bf16.msra.mxu0 %v18378_v33  ;;  %v18691_v1 = vcombine.high %v1082_v12, %v1094_v47  ;;  %v674_v28 = vld [vmem:[#allocation5 + $0x1238] sm:$0xff]  ;;  %v18690_v48 = vcombine.low %v1082_v12, %v1094_v47  ;;  %v255_v12 = vld [vmem:[#allocation5 + $0x520] sm:$0xff] }
 0x330   :  { %8171 = vmatpush2.bf16.msra.mxu1 %v18762_v8  ;;  %8129 = vmatprep.subr.bf16.mxu0 %v18355_v55  ;;  %v686_v35 = vld [vmem:[#allocation5 + $0x1298] sm:$0xff]  ;;  %v22339_v8 = vpop.f32.mrf.mxu1  ;;  %v627_v47 = vld [vmem:[#allocation5 + $0x10c0] sm:$0xff] }
 0x331   :  { %8172 = vmatprep.subr.bf16.mxu1 %v18739_v16  ;;  %v1058_v50 = vld [vmem:[#allocation5 + $0x1e38] sm:$0xff]  ;;  %v18283_v33 = vcombine.high %v674_v28, %v686_v35  ;;  %23193 = vst [vmem:[#allocation28_spill] sm:$0xff] %v22339_v8  ;;  %v267_v16 = vld [vmem:[#allocation5 + $0x580] sm:$0xff]  ;;  %v18282_v61 = vcombine.low %v674_v28, %v686_v35  ;;  %v17853_v28 = vcombine.high %v243_v36, %v255_v12 }
 0x332   :  { %v1070_v57 = vld [vmem:[#allocation5 + $0x1e98] sm:$0xff] }
 0x333   :  { %8130 = vmatpush2.bf16.msra.mxu0 %v18354_v9  ;;  %v18667_v55 = vcombine.high %v1058_v50, %v1070_v57  ;;  %v18666_v9 = vcombine.low %v1058_v50, %v1070_v57  ;;  %v219_v57 = vld [vmem:[#allocation5 + $0x400] sm:$0xff] }
 0x334   :  { %8173 = vmatpush2.bf16.msra.mxu1 %v18738_v17  ;;  %8131 = vmatprep.subr.bf16.mxu0 %v18331_v21  ;;  %v17877_v17 = vcombine.high %v267_v16, %v279_v32  ;;  %v1292_v21 = vrot.slane %v22283_v45, %v22148_v3 }
 0x335   :  { %8174 = vmatprep.subr.bf16.mxu1 %v18715_v39  ;;  %v7842_v39 = vpop.f32.mrf.mxu1 }
 0x336   :  { %v7839_v35 = vadd.f32 %v7838_v40, %v1292_v21 }
 0x337   :  { %8132 = vmatpush2.bf16.msra.mxu0 %v18330_v24  ;;  %v639_v24 = vld [vmem:[#allocation5 + $0x1120] sm:$0xff]  ;;  %v22345_v50 = vpop.f32.mrf.mxu1 }
 0x338   :  { %8175 = vmatpush2.bf16.msra.mxu1 %v18714_v43  ;;  %8133 = vmatprep.subr.bf16.mxu0 %v18307_v0  ;;  %v17876_v43 = vcombine.low %v267_v16, %v279_v32  ;;  %v22343_v0 = vpop.f32.mrf.mxu0  ;;  %23195 = vst [vmem:[#allocation30_spill] sm:$0xff] %v22345_v50  ;;  %v18237_v45 = vcombine.high %v627_v47, %v639_v24  ;;  %v615_v16 = vld [vmem:[#allocation5 + $0x1060] sm:$0xff] }
 0x339   :  { %8176 = vmatprep.subr.bf16.mxu1 %v18691_v1  ;;  %23194 = vst [vmem:[#allocation29_spill] sm:$0xff] %v22343_v0  ;;  %v18260_v1 = vcombine.low %v651_v11, %v663_v14  ;;  %v17852_v11 = vcombine.low %v243_v36, %v255_v12  ;;  %v18236_v14 = vcombine.low %v627_v47, %v639_v24  ;;  %v579_v36 = vld [vmem:[#allocation5 + $0xf40] sm:$0xff] }
 0x33a   :  { %v591_v12 = vld [vmem:[#allocation5 + $0xfa0] sm:$0xff] }
 0x33b   :  { %8134 = vmatpush2.bf16.msra.mxu0 %v18306_v51  ;;  %v231_v51 = vld [vmem:[#allocation5 + $0x460] sm:$0xff] }
 0x33c   :  { %8177 = vmatpush2.bf16.msra.mxu1 %v18690_v48  ;;  %8135 = vmatprep.subr.bf16.mxu0 %v18283_v33  ;;  %v22347_v33 = vld [vmem:[#allocation2 + $0x8] ss:$24 sps:$4 sm:$0xff]   ;;  %v17828_v47 = vcombine.low %v219_v57, %v231_v51 }
 0x33d   :  { %8178 = vmatprep.subr.bf16.mxu1 %v18667_v55  ;;  %v603_v55 = vld [vmem:[#allocation5 + $0x1000] sm:$0xff] }
 0x33e   :  { %v18213_v0 = vcombine.high %v603_v55, %v615_v16 }
 0x33f   :  { %8136 = vmatpush2.bf16.msra.mxu0 %v18282_v61 }
 0x340   :  { %8179 = vmatpush2.bf16.msra.mxu1 %v18666_v9  ;;  %8191 = vmatprep.subr.bf16.mxu0 %v17877_v17  ;;  %v17829_v9 = vcombine.high %v219_v57, %v231_v51  ;;  %v7843_v17 = vadd.f32 %v7842_v39, %v1292_v21  ;;  %v18188_v51 = vcombine.low %v579_v36, %v591_v12 }
 0x341   :  { %8234 = vmatprep.subr.bf16.mxu1 %v18261_v31 }
 0x342   :  { %v7881_v48 = vpop.f32.mrf.mxu0  ;;  %8138 = vmatmul.mubr.bf16.vlgmr.msra.gmra.mxu0 %v22347_v33 }
 0x343   :  { %v7882_v32 = vadd.f32 %v7881_v48, %v7839_v35  ;;  %v7924_v61 = vpop.f32.mrf.mxu1  ;;  %8181 = vmatmul.mubr.bf16.vlgmr.msra.gmra.mxu1 %v22309_v52  ;;  %8192 = vmatpush1.bf16.msra.mxu0 %v17876_v43  ;;  %v207_v35 = vld [vmem:[#allocation5 + $0x3a0] sm:$0xff]  ;;  %v22357_v48 = vld [vmem:[#allocation2 + $0x4] ss:$24 sps:$4 sm:$0xff]   ;;  %v18212_v43 = vcombine.low %v603_v55, %v615_v16 }
 0x344   :  { %8235 = vmatpush1.bf16.msra.mxu1 %v18260_v1  ;;  %v22351_v40 = vpop.f32.mrf.mxu0  ;;  %8193 = vmatprep.subr.bf16.mxu0 %v17853_v28  ;;  %v17805_v1 = vcombine.high %v195_v5, %v207_v35  ;;  %v17804_v57 = vcombine.low %v195_v5, %v207_v35 }
 0x345   :  { %23196 = vst [vmem:[#allocation31_spill] sm:$0xff] %v22351_v40  ;;  %v22353_v31 = vadd.f32 %v7924_v61, %v7882_v32  ;;  %v22355_v42 = vpop.f32.mrf.mxu1  ;;  %8236 = vmatprep.subr.bf16.mxu1 %v18237_v45  ;;  %8223 = vmatprep.mubr.bf16.mxu0 %v22357_v48  ;;  %v18189_v32 = vcombine.high %v579_v36, %v591_v12  ;;  %v171_v61 = vld [vmem:[#allocation5 + $0x280] sm:$0xff] }
 0x346   :  { %23197 = vst [vmem:[#allocation32_spill] sm:$0xff] %v22355_v42  ;;  %v7885_v52 = vpop.f32.mrf.mxu0  ;;  %8266 = vmatprep.mubr.bf16.mxu1 %v22320_v23  ;;  %v183_v42 = vld [vmem:[#allocation5 + $0x2e0] sm:$0xff] }
 0x347   :  { %v8765_v21 = vmul.f32 %v22353_v31, %v22353_v31  ;;  %v7886_v39 = vadd.f32 %v7885_v52, %v7843_v17  ;;  %8194 = vmatpush1.bf16.msra.mxu0 %v17852_v11  ;;  %v7928_v24 = vpop.f32.mrf.mxu1  ;;  %v555_v23 = vld [vmem:[#allocation5 + $0xe80] sm:$0xff]  ;;  %v17781_v55 = vcombine.high %v171_v61, %v183_v42 }
 0x348   :  { %8237 = vmatpush1.bf16.msra.mxu1 %v18236_v14  ;;  %8195 = vmatprep.subr.bf16.mxu0 %v17829_v9  ;;  %v567_v40 = vld [vmem:[#allocation5 + $0xee0] sm:$0xff] }
 0x349   :  { %v8813_v28 = vmul.f32 %v8765_v21, %v22353_v31  ;;  %v22364_v45 = vadd.f32 %v7928_v24, %v7886_v39  ;;  %8238 = vmatprep.subr.bf16.mxu1 %v18213_v0  ;;  %v18165_v0 = vcombine.high %v555_v23, %v567_v40  ;;  %v147_v9 = vld [vmem:[#allocation5 + $0x1c0] sm:$0xff]  ;;  %v18164_v5 = vcombine.low %v555_v23, %v567_v40 }
 0x34a   :  { %v159_v17 = vld [vmem:[#allocation5 + $0x220] sm:$0xff] }
 0x34b   :  { %v8861_v8 = vmul.f32 0.044715, %v8813_v28  ;;  %v8789_v11 = vmul.f32 %v22364_v45, %v22364_v45  ;;  %8196 = vmatpush1.bf16.msra.mxu0 %v17828_v47  ;;  %v531_v52 = vld [vmem:[#allocation5 + $0xdc0] sm:$0xff]  ;;  %v17780_v28 = vcombine.low %v171_v61, %v183_v42  ;;  %v17757_v35 = vcombine.high %v147_v9, %v159_v17 }
 0x34c   :  { %8239 = vmatpush1.bf16.msra.mxu1 %v18212_v43  ;;  %8197 = vmatprep.subr.bf16.mxu0 %v17805_v1  ;;  %v543_v21 = vld [vmem:[#allocation5 + $0xe20] sm:$0xff] }
 0x34d   :  { %v8909_v16 = vadd.f32 %v8861_v8, %v22353_v31  ;;  %v8837_v14 = vmul.f32 %v8789_v11, %v22364_v45  ;;  %8240 = vmatprep.subr.bf16.mxu1 %v18189_v32  ;;  %v18141_v8 = vcombine.high %v531_v52, %v543_v21  ;;  %v123_v12 = vld [vmem:[#allocation5 + $0x100] sm:$0xff]  ;;  %v17756_v11 = vcombine.low %v147_v9, %v159_v17 }
 0x34e   :  { %v135_v47 = vld [vmem:[#allocation5 + $0x160] sm:$0xff] }
 0x34f   :  { %v8957_v39 = vmul.f32 0.7978845, %v8909_v16  ;;  %v8885_v24 = vmul.f32 0.044715, %v8837_v14  ;;  %8198 = vmatpush1.bf16.msra.mxu0 %v17804_v57  ;;  %v507_v43 = vld [vmem:[#allocation5 + $0xd00] sm:$0xff]  ;;  %v18140_v57 = vcombine.low %v531_v52, %v543_v21  ;;  %v17733_v42 = vcombine.high %v123_v12, %v135_v47 }
 0x350   :  { %8241 = vmatpush1.bf16.msra.mxu1 %v18188_v51  ;;  %8199 = vmatprep.subr.bf16.mxu0 %v17781_v55  ;;  %v519_v1 = vld [vmem:[#allocation5 + $0xd60] sm:$0xff]  ;;  %v17732_v16 = vcombine.low %v123_v12, %v135_v47 }
 0x351   :  { %21765 = vtanh.f32 %v8957_v39  ;;  %v8933_v36 = vadd.f32 %v8885_v24, %v22364_v45  ;;  %8242 = vmatprep.subr.bf16.mxu1 %v18165_v0  ;;  %v18117_v40 = vcombine.high %v507_v43, %v519_v1  ;;  %v99_v61 = vld [vmem:[#allocation5 + $0x40] sm:$0xff]  ;;  %v18116_v14 = vcombine.low %v507_v43, %v519_v1 }
 0x352   :  { %v111_v23 = vld [vmem:[#allocation5 + $0xa0] sm:$0xff] }
 0x353   :  { %v8981_v32 = vmul.f32 0.7978845, %v8933_v36  ;;  %8200 = vmatpush1.bf16.msra.mxu0 %v17780_v28  ;;  %v483_v51 = vld [vmem:[#allocation5 + $0xc40] sm:$0xff]  ;;  %v17709_v0 = vcombine.high %v99_v61, %v111_v23  ;;  %v17708_v21 = vcombine.low %v99_v61, %v111_v23 }
 0x354   :  { %8243 = vmatpush1.bf16.msra.mxu1 %v18164_v5  ;;  %8201 = vmatprep.subr.bf16.mxu0 %v17757_v35  ;;  %v495_v55 = vld [vmem:[#allocation5 + $0xca0] sm:$0xff] }
 0x355   :  { %21767 = vtanh.f32 %v8981_v32  ;;  %8244 = vmatprep.subr.bf16.mxu1 %v18141_v8  ;;  %v18093_v39 = vcombine.high %v483_v51, %v495_v55  ;;  %v459_v9 = vld [vmem:[#allocation5 + $0xb80] sm:$0xff]  ;;  %v18092_v28 = vcombine.low %v483_v51, %v495_v55 }
 0x356   :  { %v471_v17 = vld [vmem:[#allocation5 + $0xbe0] sm:$0xff] }
 0x357   :  { %8202 = vmatpush1.bf16.msra.mxu0 %v17756_v11  ;;  %v843_v24 = vld [vmem:[#allocation5 + $0x1780] sm:$0xff]  ;;  %v18069_v5 = vcombine.high %v459_v9, %v471_v17  ;;  %v18068_v1 = vcombine.low %v459_v9, %v471_v17 }
 0x358   :  { %8245 = vmatpush1.bf16.msra.mxu1 %v18140_v57  ;;  %8203 = vmatprep.subr.bf16.mxu0 %v17733_v42  ;;  %v855_v52 = vld [vmem:[#allocation5 + $0x17e0] sm:$0xff] }
 0x359   :  { %8246 = vmatprep.subr.bf16.mxu1 %v18117_v40  ;;  %v18453_v35 = vcombine.high %v843_v24, %v855_v52  ;;  %v435_v36 = vld [vmem:[#allocation5 + $0xac0] sm:$0xff]  ;;  %v18452_v32 = vcombine.low %v843_v24, %v855_v52 }
 0x35a   :  { %v447_v8 = vld [vmem:[#allocation5 + $0xb20] sm:$0xff] }
 0x35b   :  { %8204 = vmatpush1.bf16.msra.mxu0 %v17732_v16  ;;  %v819_v47 = vld [vmem:[#allocation5 + $0x16c0] sm:$0xff]  ;;  %v18045_v11 = vcombine.high %v435_v36, %v447_v8  ;;  %v8717_v16 = vmul.f32 0.5, %v22353_v31 }
 0x35c   :  { %8247 = vmatpush1.bf16.msra.mxu1 %v18116_v14  ;;  %8205 = vmatprep.subr.bf16.mxu0 %v17709_v0  ;;  %v831_v43 = vld [vmem:[#allocation5 + $0x1720] sm:$0xff]  ;;  %v8741_v14 = vmul.f32 0.5, %v22364_v45  ;;  %v18044_v0 = vcombine.low %v435_v36, %v447_v8 }
 0x35d   :  { %8248 = vmatprep.subr.bf16.mxu1 %v18093_v39  ;;  %v18429_v57 = vcombine.high %v819_v47, %v831_v43  ;;  %v411_v42 = vld [vmem:[#allocation5 + $0xa00] sm:$0xff]  ;;  %v18428_v9 = vcombine.low %v819_v47, %v831_v43 }
 0x35e   :  { %v21766_v12 = vpop.eup %21765  ;;  %v423_v40 = vld [vmem:[#allocation5 + $0xa60] sm:$0xff] }
 0x35f   :  { %8206 = vmatpush1.bf16.msra.mxu0 %v17708_v21  ;;  %v9053_v61 = vadd.f32 1.0, %v21766_v12  ;;  %v795_v51 = vld [vmem:[#allocation5 + $0x1600] sm:$0xff]  ;;  %v18021_v17 = vcombine.high %v411_v42, %v423_v40  ;;  %v18020_v50 = vcombine.low %v411_v42, %v423_v40 }
 0x360   :  { %8249 = vmatpush1.bf16.msra.mxu1 %v18092_v28  ;;  %8207 = vmatprep.subr.bf16.mxu0 %v18069_v5  ;;  %v807_v55 = vld [vmem:[#allocation5 + $0x1660] sm:$0xff] }
 0x361   :  { %8250 = vmatprep.subr.bf16.mxu1 %v18453_v35  ;;  %v18405_v24 = vcombine.high %v795_v51, %v807_v55  ;;  %v387_v52 = vld [vmem:[#allocation5 + $0x940] sm:$0xff]  ;;  %v9101_v28 = vmul.f32 %v9053_v61, %v8717_v16  ;;  %v18404_v45 = vcombine.low %v795_v51, %v807_v55 }
 0x362   :  { %v21768_v23 = vpop.eup %21767  ;;  %v399_v21 = vld [vmem:[#allocation5 + $0x9a0] sm:$0xff] }
 0x363   :  { %8208 = vmatpush2.bf16.msra.mxu0 %v18068_v1  ;;  %v9077_v39 = vadd.f32 1.0, %v21768_v23  ;;  %v771_v35 = vld [vmem:[#allocation5 + $0x1540] sm:$0xff]  ;;  %v17997_v36 = vcombine.high %v387_v52, %v399_v21 }
 0x364   :  { %8251 = vmatpush2.bf16.msra.mxu1 %v18452_v32  ;;  %8209 = vmatprep.subr.bf16.mxu0 %v18045_v11  ;;  %v783_v12 = vld [vmem:[#allocation5 + $0x15a0] sm:$0xff]  ;;  %v17996_v11 = vcombine.low %v387_v52, %v399_v21 }
 0x365   :  { %8252 = vmatprep.subr.bf16.mxu1 %v18429_v57  ;;  %v9125_v5 = vmul.f32 %v9077_v39, %v8741_v14  ;;  %v18381_v8 = vcombine.high %v771_v35, %v783_v12  ;;  %v363_v47 = vld [vmem:[#allocation5 + $0x880] sm:$0xff]  ;;  %v18380_v57 = vcombine.low %v771_v35, %v783_v12 }
 0x366   :  { %v375_v43 = vld [vmem:[#allocation5 + $0x8e0] sm:$0xff] }
 0x367   :  { %8210 = vmatpush2.bf16.msra.mxu0 %v18044_v0  ;;  %v22373_v31 = vpack.c.bf16 %v9125_v5, %v9101_v28  ;;  %v747_v1 = vld [vmem:[#allocation5 + $0x1480] sm:$0xff]  ;;  %v17973_v61 = vcombine.high %v363_v47, %v375_v43  ;;  %v17972_v51 = vcombine.low %v363_v47, %v375_v43 }
 0x368   :  { %8253 = vmatpush2.bf16.msra.mxu1 %v18428_v9  ;;  %8211 = vmatprep.subr.bf16.mxu0 %v18021_v17  ;;  %v759_v32 = vld [vmem:[#allocation5 + $0x14e0] sm:$0xff] }
 0x369   :  { %23198 = vst [vmem:[#allocation33_spill] sm:$0xff] %v22373_v31  ;;  %8254 = vmatprep.subr.bf16.mxu1 %v18405_v24  ;;  %v18357_v42 = vcombine.high %v747_v1, %v759_v32  ;;  %v339_v40 = vld [vmem:[#allocation5 + $0x7c0] sm:$0xff]  ;;  %v18356_v55 = vcombine.low %v747_v1, %v759_v32 }
 0x36a   :  { %v351_v23 = vld [vmem:[#allocation5 + $0x820] sm:$0xff] }
 0x36b   :  { %8212 = vmatpush2.bf16.msra.mxu0 %v18020_v50  ;;  %v723_v16 = vld [vmem:[#allocation5 + $0x13c0] sm:$0xff]  ;;  %v17949_v0 = vcombine.high %v339_v40, %v351_v23  ;;  %v17948_v52 = vcombine.low %v339_v40, %v351_v23 }
 0x36c   :  { %8255 = vmatpush2.bf16.msra.mxu1 %v18404_v45  ;;  %8213 = vmatprep.subr.bf16.mxu0 %v17997_v36  ;;  %v735_v14 = vld [vmem:[#allocation5 + $0x1420] sm:$0xff] }
 0x36d   :  { %8256 = vmatprep.subr.bf16.mxu1 %v18381_v8  ;;  %v18333_v39 = vcombine.high %v723_v16, %v735_v14  ;;  %v315_v50 = vld [vmem:[#allocation5 + $0x700] sm:$0xff]  ;;  %v18332_v21 = vcombine.low %v723_v16, %v735_v14 }
 0x36e   :  { %v327_v9 = vld [vmem:[#allocation5 + $0x760] sm:$0xff] }
 0x36f   :  { %8214 = vmatpush2.bf16.msra.mxu0 %v17996_v11  ;;  %v699_v17 = vld [vmem:[#allocation5 + $0x1300] sm:$0xff]  ;;  %v17925_v28 = vcombine.high %v315_v50, %v327_v9  ;;  %v17924_v8 = vcombine.low %v315_v50, %v327_v9 }
 0x370   :  { %8257 = vmatpush2.bf16.msra.mxu1 %v18380_v57  ;;  %8215 = vmatprep.subr.bf16.mxu0 %v17973_v61  ;;  %v711_v24 = vld [vmem:[#allocation5 + $0x1360] sm:$0xff]  ;;  %v268_v57 = vld [vmem:[#allocation5 + $0x588] sm:$0xff] }
 0x371   :  { %8258 = vmatprep.subr.bf16.mxu1 %v18357_v42  ;;  %v18309_v5 = vcombine.high %v699_v17, %v711_v24  ;;  %v291_v35 = vld [vmem:[#allocation5 + $0x640] sm:$0xff]  ;;  %v18308_v47 = vcombine.low %v699_v17, %v711_v24  ;;  %v280_v61 = vld [vmem:[#allocation5 + $0x5e8] sm:$0xff]  ;;  %v22379_v17 = vpop.f32.mrf.mxu0 }
 0x372   :  { %v303_v12 = vld [vmem:[#allocation5 + $0x6a0] sm:$0xff]  ;;  %v17879_v16 = vcombine.high %v268_v57, %v280_v61  ;;  %23199 = vst [vmem:[#allocation34_spill] sm:$0xff] %v22379_v17  ;;  %v17878_v24 = vcombine.low %v268_v57, %v280_v61 }
 0x373   :  { %8216 = vmatpush2.bf16.msra.mxu0 %v17972_v51  ;;  %v675_v45 = vld [vmem:[#allocation5 + $0x1240] sm:$0xff]  ;;  %v17901_v43 = vcombine.high %v291_v35, %v303_v12  ;;  %v17900_v42 = vcombine.low %v291_v35, %v303_v12 }
 0x374   :  { %8259 = vmatpush2.bf16.msra.mxu1 %v18356_v55  ;;  %8217 = vmatprep.subr.bf16.mxu0 %v17949_v0  ;;  %v687_v36 = vld [vmem:[#allocation5 + $0x12a0] sm:$0xff]  ;;  %v244_v55 = vld [vmem:[#allocation5 + $0x4c8] sm:$0xff] }
 0x375   :  { %8260 = vmatprep.subr.bf16.mxu1 %v18333_v39  ;;  %v18285_v1 = vcombine.high %v675_v45, %v687_v36  ;;  %v1035_v32 = vld [vmem:[#allocation5 + $0x1d80] sm:$0xff]  ;;  %v18284_v40 = vcombine.low %v675_v45, %v687_v36  ;;  %v256_v0 = vld [vmem:[#allocation5 + $0x528] sm:$0xff] }
 0x376   :  { %v1047_v11 = vld [vmem:[#allocation5 + $0x1de0] sm:$0xff]  ;;  %v22375_v39 = vld [vmem:[#allocation7 + $0x8] sm:$0xff] }
 0x377   :  { %8218 = vmatpush2.bf16.msra.mxu0 %v17948_v52  ;;  %v18645_v23 = vcombine.high %v1035_v32, %v1047_v11  ;;  %v1011_v14 = vld [vmem:[#allocation5 + $0x1cc0] sm:$0xff]  ;;  %v1300_v50 = vrot.slane %v22375_v39, %v22189_v4  ;;  %v18644_v9 = vcombine.low %v1035_v32, %v1047_v11  ;;  %v22383_v45 = vld [vmem:[#allocation2] ss:$24 sps:$4 sm:$0xff]   ;;  %v17854_v11 = vcombine.low %v244_v55, %v256_v0 }
 0x378   :  { %8261 = vmatpush2.bf16.msra.mxu1 %v18332_v21  ;;  %8219 = vmatprep.subr.bf16.mxu0 %v17925_v28  ;;  %v1023_v51 = vld [vmem:[#allocation5 + $0x1d20] sm:$0xff]  ;;  %v22381_v21 = vpop.f32.mrf.mxu1  ;;  %v17855_v28 = vcombine.high %v244_v55, %v256_v0  ;;  %v220_v36 = vld [vmem:[#allocation5 + $0x408] sm:$0xff] }
 0x379   :  { %8262 = vmatprep.subr.bf16.mxu1 %v18309_v5  ;;  %v18621_v52 = vcombine.high %v1011_v14, %v1023_v51  ;;  %23200 = vst [vmem:[#allocation35_spill] sm:$0xff] %v22381_v21  ;;  %v987_v5 = vld [vmem:[#allocation5 + $0x1c00] sm:$0xff] }
 0x37a   :  { %v999_v35 = vld [vmem:[#allocation5 + $0x1c60] sm:$0xff] }
 0x37b   :  { %8220 = vmatpush2.bf16.msra.mxu0 %v17924_v8  ;;  %v232_v8 = vld [vmem:[#allocation5 + $0x468] sm:$0xff]  ;;  %v18597_v57 = vcombine.high %v987_v5, %v999_v35  ;;  %v18596_v55 = vcombine.low %v987_v5, %v999_v35  ;;  %v951_v31 = vld [vmem:[#allocation5 + $0x1ae0] sm:$0xff] }
 0x37c   :  { %8263 = vmatpush2.bf16.msra.mxu1 %v18308_v47  ;;  %8221 = vmatprep.subr.bf16.mxu0 %v17901_v43  ;;  %v915_v35 = vld [vmem:[#allocation5 + $0x19c0] sm:$0xff] }
 0x37d   :  { %8264 = vmatprep.subr.bf16.mxu1 %v18285_v1  ;;  %v18620_v1 = vcombine.low %v1011_v14, %v1023_v51  ;;  %v196_v14 = vld [vmem:[#allocation5 + $0x348] sm:$0xff] }
 0x37e   :  { %v208_v51 = vld [vmem:[#allocation5 + $0x3a8] sm:$0xff] }
 0x37f   :  { %8222 = vmatpush2.bf16.msra.mxu0 %v17900_v42 }
 0x380   :  { %8265 = vmatpush2.bf16.msra.mxu1 %v18284_v40  ;;  %8277 = vmatprep.subr.bf16.mxu0 %v18645_v23  ;;  %v17831_v40 = vcombine.high %v220_v36, %v232_v8  ;;  %v963_v23 = vld [vmem:[#allocation5 + $0x1b40] sm:$0xff] }
 0x381   :  { %8320 = vmatprep.subr.bf16.mxu1 %v17879_v16  ;;  %v975_v16 = vld [vmem:[#allocation5 + $0x1ba0] sm:$0xff] }
 0x382   :  { %v7967_v12 = vpop.f32.mrf.mxu0  ;;  %8224 = vmatmul.mubr.bf16.vlgmr.msra.gmra.mxu0 %v22383_v45  ;;  %v18572_v21 = vcombine.low %v963_v23, %v975_v16 }
 0x383   :  { %v7968_v47 = vadd.f32 %v7967_v12, %v1300_v50  ;;  %v8010_v43 = vpop.f32.mrf.mxu1  ;;  %8267 = vmatmul.mubr.bf16.vlgmr.msra.gmra.mxu1 %v22347_v33  ;;  %8278 = vmatpush1.bf16.msra.mxu0 %v18644_v9  ;;  %v22393_v12 = vld [vmem:[#allocation2 + $0x14] ss:$24 sps:$4 sm:$0xff]  }
 0x384   :  { %8321 = vmatpush1.bf16.msra.mxu1 %v17878_v24  ;;  %v22387_v32 = vpop.f32.mrf.mxu0  ;;  %8279 = vmatprep.subr.bf16.mxu0 %v18621_v52  ;;  %v17830_v24 = vcombine.low %v220_v36, %v232_v8  ;;  %v18573_v52 = vcombine.high %v963_v23, %v975_v16  ;;  %v148_v36 = vld [vmem:[#allocation5 + $0x1c8] sm:$0xff]  ;;  %v903_v23 = vld [vmem:[#allocation5 + $0x1960] sm:$0xff] }
 0x385   :  { %23201 = vst [vmem:[#allocation36_spill] sm:$0xff] %v22387_v32  ;;  %v22389_v61 = vadd.f32 %v8010_v43, %v7968_v47  ;;  %v22391_v42 = vpop.f32.mrf.mxu1  ;;  %8322 = vmatprep.subr.bf16.mxu1 %v17855_v28  ;;  %8309 = vmatprep.mubr.bf16.mxu0 %v22393_v12  ;;  %v17807_v47 = vcombine.high %v196_v14, %v208_v51  ;;  %v939_v43 = vld [vmem:[#allocation5 + $0x1a80] sm:$0xff]  ;;  %v184_v32 = vld [vmem:[#allocation5 + $0x2e8] sm:$0xff] }
 0x386   :  { %23202 = vst [vmem:[#allocation37_spill] sm:$0xff] %v22391_v42  ;;  %v7971_v33 = vpop.f32.mrf.mxu0  ;;  %8352 = vmatprep.mubr.bf16.mxu1 %v22357_v48  ;;  %v172_v42 = vld [vmem:[#allocation5 + $0x288] sm:$0xff]  ;;  %v17806_v48 = vcombine.low %v196_v14, %v208_v51 }
 0x387   :  { %v7972_v9 = vadd.f32 %v7971_v33, %v1300_v50  ;;  %8280 = vmatpush1.bf16.msra.mxu0 %v18620_v1  ;;  %v8014_v0 = vpop.f32.mrf.mxu1  ;;  %v18549_v50 = vcombine.high %v939_v43, %v951_v31  ;;  %v17783_v5 = vcombine.high %v172_v42, %v184_v32  ;;  %v927_v1 = vld [vmem:[#allocation5 + $0x1a20] sm:$0xff]  ;;  %v160_v8 = vld [vmem:[#allocation5 + $0x228] sm:$0xff] }
 0x388   :  { %8323 = vmatpush1.bf16.msra.mxu1 %v17854_v11  ;;  %8281 = vmatprep.subr.bf16.mxu0 %v18597_v57  ;;  %v18548_v11 = vcombine.low %v939_v43, %v951_v31  ;;  %v17782_v57 = vcombine.low %v172_v42, %v184_v32  ;;  %v17759_v33 = vcombine.high %v148_v36, %v160_v8  ;;  %v124_v16 = vld [vmem:[#allocation5 + $0x108] sm:$0xff]  ;;  %v879_v31 = vld [vmem:[#allocation5 + $0x18a0] sm:$0xff] }
 0x389   :  { %v22397_v28 = vadd.f32 %v8014_v0, %v7972_v9  ;;  %8324 = vmatprep.subr.bf16.mxu1 %v17831_v40  ;;  %v18525_v40 = vcombine.high %v915_v35, %v927_v1  ;;  %v891_v9 = vld [vmem:[#allocation5 + $0x1900] sm:$0xff]  ;;  %v18524_v14 = vcombine.low %v915_v35, %v927_v1  ;;  %v17758_v51 = vcombine.low %v148_v36, %v160_v8  ;;  %v460_v35 = vld [vmem:[#allocation5 + $0xb88] sm:$0xff] }
 0x38a   :  { %v18501_v0 = vcombine.high %v891_v9, %v903_v23  ;;  %v18500_v32 = vcombine.low %v891_v9, %v903_v23  ;;  %v472_v1 = vld [vmem:[#allocation5 + $0xbe8] sm:$0xff] }
 0x38b   :  { %8282 = vmatpush1.bf16.msra.mxu0 %v18596_v55  ;;  %v136_v55 = vld [vmem:[#allocation5 + $0x168] sm:$0xff] }
 0x38c   :  { %8325 = vmatpush1.bf16.msra.mxu1 %v17830_v24  ;;  %8283 = vmatprep.subr.bf16.mxu0 %v18573_v52  ;;  %v17735_v24 = vcombine.high %v124_v16, %v136_v55  ;;  %v100_v52 = vld [vmem:[#allocation5 + $0x48] sm:$0xff]  ;;  %v17734_v42 = vcombine.low %v124_v16, %v136_v55  ;;  %v18070_v55 = vcombine.low %v460_v35, %v472_v1 }
 0x38d   :  { %8326 = vmatprep.subr.bf16.mxu1 %v17807_v47  ;;  %v112_v47 = vld [vmem:[#allocation5 + $0xa8] sm:$0xff] }
 0x38e   :  { %v17710_v8 = vcombine.low %v100_v52, %v112_v47  ;;  %v436_v9 = vld [vmem:[#allocation5 + $0xac8] sm:$0xff] }
 0x38f   :  { %8284 = vmatpush1.bf16.msra.mxu0 %v18572_v21  ;;  %v867_v21 = vld [vmem:[#allocation5 + $0x1840] sm:$0xff]  ;;  %v448_v23 = vld [vmem:[#allocation5 + $0xb28] sm:$0xff] }
 0x390   :  { %8327 = vmatpush1.bf16.msra.mxu1 %v17806_v48  ;;  %8285 = vmatprep.subr.bf16.mxu0 %v18549_v50  ;;  %v18477_v43 = vcombine.high %v867_v21, %v879_v31  ;;  %v17711_v48 = vcombine.high %v100_v52, %v112_v47  ;;  %v1227_v50 = vld [vmem:[#allocation5 + $0x2380] sm:$0xff]  ;;  %v18476_v36 = vcombine.low %v867_v21, %v879_v31  ;;  %v412_v21 = vld [vmem:[#allocation5 + $0xa08] sm:$0xff] }
 0x391   :  { %8328 = vmatprep.subr.bf16.mxu1 %v17783_v5  ;;  %v1239_v5 = vld [vmem:[#allocation5 + $0x23e0] sm:$0xff]  ;;  %v424_v31 = vld [vmem:[#allocation5 + $0xa68] sm:$0xff]  ;;  %v18046_v47 = vcombine.low %v436_v9, %v448_v23 }
 0x392   :  { %v18836_v16 = vcombine.low %v1227_v50, %v1239_v5 }
 0x393   :  { %8286 = vmatpush1.bf16.msra.mxu0 %v18548_v11  ;;  %v18837_v11 = vcombine.high %v1227_v50, %v1239_v5  ;;  %v388_v50 = vld [vmem:[#allocation5 + $0x948] sm:$0xff] }
 0x394   :  { %8329 = vmatpush1.bf16.msra.mxu1 %v17782_v57  ;;  %8287 = vmatprep.subr.bf16.mxu0 %v18525_v40  ;;  %v18071_v57 = vcombine.high %v460_v35, %v472_v1  ;;  %v1203_v40 = vld [vmem:[#allocation5 + $0x22c0] sm:$0xff]  ;;  %v400_v5 = vld [vmem:[#allocation5 + $0x9a8] sm:$0xff]  ;;  %v18022_v1 = vcombine.low %v412_v21, %v424_v31 }
 0x395   :  { %8330 = vmatprep.subr.bf16.mxu1 %v17759_v33  ;;  %v1215_v33 = vld [vmem:[#allocation5 + $0x2320] sm:$0xff] }
 0x396   :  { %v18812_v52 = vcombine.low %v1203_v40, %v1215_v33 }
 0x397   :  { %8288 = vmatpush1.bf16.msra.mxu0 %v18524_v14  ;;  %v18813_v14 = vcombine.high %v1203_v40, %v1215_v33  ;;  %v364_v40 = vld [vmem:[#allocation5 + $0x888] sm:$0xff] }
 0x398   :  { %8331 = vmatpush1.bf16.msra.mxu1 %v17758_v51  ;;  %8289 = vmatprep.subr.bf16.mxu0 %v18501_v0  ;;  %v18047_v51 = vcombine.high %v436_v9, %v448_v23  ;;  %v1179_v0 = vld [vmem:[#allocation5 + $0x2200] sm:$0xff]  ;;  %v376_v33 = vld [vmem:[#allocation5 + $0x8e8] sm:$0xff]  ;;  %v17998_v23 = vcombine.low %v388_v50, %v400_v5 }
 0x399   :  { %8332 = vmatprep.subr.bf16.mxu1 %v17735_v24  ;;  %v1191_v24 = vld [vmem:[#allocation5 + $0x2260] sm:$0xff] }
 0x39a   :  { %v18788_v35 = vcombine.low %v1179_v0, %v1191_v24 }
 0x39b   :  { %8290 = vmatpush1.bf16.msra.mxu0 %v18500_v32  ;;  %v18789_v32 = vcombine.high %v1179_v0, %v1191_v24  ;;  %v340_v0 = vld [vmem:[#allocation5 + $0x7c8] sm:$0xff] }
 0x39c   :  { %8333 = vmatpush1.bf16.msra.mxu1 %v17734_v42  ;;  %8291 = vmatprep.subr.bf16.mxu0 %v18477_v43  ;;  %v18023_v42 = vcombine.high %v412_v21, %v424_v31  ;;  %v1155_v43 = vld [vmem:[#allocation5 + $0x2140] sm:$0xff]  ;;  %v352_v24 = vld [vmem:[#allocation5 + $0x828] sm:$0xff]  ;;  %v17974_v31 = vcombine.low %v364_v40, %v376_v33 }
 0x39d   :  { %8334 = vmatprep.subr.bf16.mxu1 %v17711_v48  ;;  %v1167_v48 = vld [vmem:[#allocation5 + $0x21a0] sm:$0xff] }
 0x39e   :  { %v18764_v9 = vcombine.low %v1155_v43, %v1167_v48 }
 0x39f   :  { %8292 = vmatpush1.bf16.msra.mxu0 %v18476_v36  ;;  %v18765_v36 = vcombine.high %v1155_v43, %v1167_v48  ;;  %v316_v43 = vld [vmem:[#allocation5 + $0x708] sm:$0xff] }
 0x3a0   :  { %8335 = vmatpush1.bf16.msra.mxu1 %v17710_v8  ;;  %8293 = vmatprep.subr.bf16.mxu0 %v18837_v11  ;;  %v17999_v8 = vcombine.high %v388_v50, %v400_v5  ;;  %v1131_v11 = vld [vmem:[#allocation5 + $0x2080] sm:$0xff]  ;;  %v328_v48 = vld [vmem:[#allocation5 + $0x768] sm:$0xff]  ;;  %v17950_v5 = vcombine.low %v340_v0, %v352_v24 }
 0x3a1   :  { %8336 = vmatprep.subr.bf16.mxu1 %v18071_v57  ;;  %v1143_v57 = vld [vmem:[#allocation5 + $0x20e0] sm:$0xff] }
 0x3a2   :  { %v18740_v21 = vcombine.low %v1131_v11, %v1143_v57 }
 0x3a3   :  { %8294 = vmatpush2.bf16.msra.mxu0 %v18836_v16  ;;  %v18741_v16 = vcombine.high %v1131_v11, %v1143_v57  ;;  %v292_v11 = vld [vmem:[#allocation5 + $0x648] sm:$0xff] }
 0x3a4   :  { %8337 = vmatpush2.bf16.msra.mxu1 %v18070_v55  ;;  %8295 = vmatprep.subr.bf16.mxu0 %v18813_v14  ;;  %v17975_v55 = vcombine.high %v364_v40, %v376_v33  ;;  %v1107_v14 = vld [vmem:[#allocation5 + $0x1fc0] sm:$0xff]  ;;  %v304_v57 = vld [vmem:[#allocation5 + $0x6a8] sm:$0xff]  ;;  %v17926_v33 = vcombine.low %v316_v43, %v328_v48 }
 0x3a5   :  { %8338 = vmatprep.subr.bf16.mxu1 %v18047_v51  ;;  %v1119_v51 = vld [vmem:[#allocation5 + $0x2020] sm:$0xff] }
 0x3a6   :  { %v18716_v50 = vcombine.low %v1107_v14, %v1119_v51 }
 0x3a7   :  { %8296 = vmatpush2.bf16.msra.mxu0 %v18812_v52  ;;  %v18717_v52 = vcombine.high %v1107_v14, %v1119_v51  ;;  %v1036_v14 = vld [vmem:[#allocation5 + $0x1d88] sm:$0xff] }
 0x3a8   :  { %8339 = vmatpush2.bf16.msra.mxu1 %v18046_v47  ;;  %8297 = vmatprep.subr.bf16.mxu0 %v18789_v32  ;;  %v17951_v47 = vcombine.high %v340_v0, %v352_v24  ;;  %v1083_v32 = vld [vmem:[#allocation5 + $0x1f00] sm:$0xff]  ;;  %v1048_v51 = vld [vmem:[#allocation5 + $0x1de8] sm:$0xff]  ;;  %v17902_v24 = vcombine.low %v292_v11, %v304_v57 }
 0x3a9   :  { %8340 = vmatprep.subr.bf16.mxu1 %v18023_v42  ;;  %v1095_v42 = vld [vmem:[#allocation5 + $0x1f60] sm:$0xff] }
 0x3aa   :  { %v18692_v40 = vcombine.low %v1083_v32, %v1095_v42 }
 0x3ab   :  { %8298 = vmatpush2.bf16.msra.mxu0 %v18788_v35  ;;  %v18693_v35 = vcombine.high %v1083_v32, %v1095_v42  ;;  %v1012_v32 = vld [vmem:[#allocation5 + $0x1cc8] sm:$0xff] }
 0x3ac   :  { %8341 = vmatpush2.bf16.msra.mxu1 %v18022_v1  ;;  %8299 = vmatprep.subr.bf16.mxu0 %v18765_v36  ;;  %v17927_v1 = vcombine.high %v316_v43, %v328_v48  ;;  %v1059_v36 = vld [vmem:[#allocation5 + $0x1e40] sm:$0xff]  ;;  %v1024_v42 = vld [vmem:[#allocation5 + $0x1d28] sm:$0xff]  ;;  %v22399_v48 = vpop.f32.mrf.mxu0 }
 0x3ad   :  { %8342 = vmatprep.subr.bf16.mxu1 %v17999_v8  ;;  %v1071_v8 = vld [vmem:[#allocation5 + $0x1ea0] sm:$0xff]  ;;  %23203 = vst [vmem:[#allocation38_spill] sm:$0xff] %v22399_v48  ;;  %v952_v48 = vld [vmem:[#allocation5 + $0x1ae8] sm:$0xff] }
 0x3ae   :  { %v18668_v0 = vcombine.low %v1059_v36, %v1071_v8 }
 0x3af   :  { %8300 = vmatpush2.bf16.msra.mxu0 %v18764_v9  ;;  %v18669_v9 = vcombine.high %v1059_v36, %v1071_v8  ;;  %v616_v36 = vld [vmem:[#allocation5 + $0x1068] sm:$0xff] }
 0x3b0   :  { %8343 = vmatpush2.bf16.msra.mxu1 %v17998_v23  ;;  %8301 = vmatprep.subr.bf16.mxu0 %v18741_v16  ;;  %v17903_v23 = vcombine.high %v292_v11, %v304_v57  ;;  %v652_v16 = vld [vmem:[#allocation5 + $0x1188] sm:$0xff]  ;;  %v22401_v11 = vld [vmem:[#allocation2 + $0x10] ss:$24 sps:$4 sm:$0xff]  }
 0x3b1   :  { %8344 = vmatprep.subr.bf16.mxu1 %v17975_v55  ;;  %v664_v55 = vld [vmem:[#allocation5 + $0x11e8] sm:$0xff] }
 0x3b2   :  { %v18262_v43 = vcombine.low %v652_v16, %v664_v55  ;;  %v988_v57 = vld [vmem:[#allocation5 + $0x1c08] sm:$0xff] }
 0x3b3   :  { %8302 = vmatpush2.bf16.msra.mxu0 %v18740_v21  ;;  %v18263_v21 = vcombine.high %v652_v16, %v664_v55  ;;  %v18622_v16 = vcombine.low %v1012_v32, %v1024_v42 }
 0x3b4   :  { %8345 = vmatpush2.bf16.msra.mxu1 %v17974_v31  ;;  %8303 = vmatprep.subr.bf16.mxu0 %v18717_v52  ;;  %v18647_v31 = vcombine.high %v1036_v14, %v1048_v51  ;;  %v628_v52 = vld [vmem:[#allocation5 + $0x10c8] sm:$0xff] }
 0x3b5   :  { %8346 = vmatprep.subr.bf16.mxu1 %v17951_v47  ;;  %v640_v47 = vld [vmem:[#allocation5 + $0x1128] sm:$0xff] }
 0x3b7   :  { %8304 = vmatpush2.bf16.msra.mxu0 %v18716_v50  ;;  %v18646_v50 = vcombine.low %v1036_v14, %v1048_v51 }
 0x3b8   :  { %8347 = vmatpush2.bf16.msra.mxu1 %v17950_v5  ;;  %8305 = vmatprep.subr.bf16.mxu0 %v18693_v35  ;;  %v18239_v5 = vcombine.high %v628_v52, %v640_v47  ;;  %v18623_v35 = vcombine.high %v1012_v32, %v1024_v42 }
 0x3b9   :  { %8348 = vmatprep.subr.bf16.mxu1 %v17927_v1  ;;  %v604_v1 = vld [vmem:[#allocation5 + $0x1008] sm:$0xff] }
 0x3ba   :  { %v18215_v55 = vcombine.high %v604_v1, %v616_v36  ;;  %v18214_v32 = vcombine.low %v604_v1, %v616_v36 }
 0x3bb   :  { %8306 = vmatpush2.bf16.msra.mxu0 %v18692_v40  ;;  %v1000_v40 = vld [vmem:[#allocation5 + $0x1c68] sm:$0xff] }
 0x3bc   :  { %8349 = vmatpush2.bf16.msra.mxu1 %v17926_v33  ;;  %8307 = vmatprep.subr.bf16.mxu0 %v18669_v9  ;;  %v18238_v9 = vcombine.low %v628_v52, %v640_v47  ;;  %v18599_v51 = vcombine.high %v988_v57, %v1000_v40  ;;  %v18598_v42 = vcombine.low %v988_v57, %v1000_v40 }
 0x3bd   :  { %8350 = vmatprep.subr.bf16.mxu1 %v17903_v23 }
 0x3bf   :  { %8308 = vmatpush2.bf16.msra.mxu0 %v18668_v0  ;;  %v580_v0 = vld [vmem:[#allocation5 + $0xf48] sm:$0xff] }
 0x3c0   :  { %8351 = vmatpush2.bf16.msra.mxu1 %v17902_v24  ;;  %8363 = vmatprep.subr.bf16.mxu0 %v18263_v21  ;;  %v592_v24 = vld [vmem:[#allocation5 + $0xfa8] sm:$0xff]  ;;  %v22412_v21 = vld [vmem:[#allocation2 + $0xc] ss:$24 sps:$4 sm:$0xff]  }
 0x3c1   :  { %8406 = vmatprep.subr.bf16.mxu1 %v18647_v31  ;;  %v976_v31 = vld [vmem:[#allocation5 + $0x1ba8] sm:$0xff]  ;;  %v18190_v1 = vcombine.low %v580_v0, %v592_v24 }
 0x3c2   :  { %v8053_v8 = vpop.f32.mrf.mxu0  ;;  %8310 = vmatmul.mubr.bf16.vlgmr.msra.gmra.mxu0 %v22401_v11 }
 0x3c3   :  { %v22405_v33 = vadd.f32 %v8053_v8, %v22389_v61  ;;  %8353 = vmatmul.mubr.bf16.vlgmr.msra.gmra.mxu1 %v22383_v45  ;;  %8364 = vmatpush1.bf16.msra.mxu0 %v18262_v43  ;;  %v964_v61 = vld [vmem:[#allocation5 + $0x1b48] sm:$0xff]  ;;  %v18191_v43 = vcombine.high %v580_v0, %v592_v24 }
 0x3c4   :  { %8407 = vmatpush1.bf16.msra.mxu1 %v18646_v50  ;;  %v22408_v23 = vpop.f32.mrf.mxu0  ;;  %8365 = vmatprep.subr.bf16.mxu0 %v18239_v5  ;;  %v556_v8 = vld [vmem:[#allocation5 + $0xe88] sm:$0xff]  ;;  %v18574_v36 = vcombine.low %v964_v61, %v976_v31 }
 0x3c5   :  { %23204 = vst [vmem:[#allocation39_spill] sm:$0xff] %v22408_v23  ;;  %v8767_v14 = vmul.f32 %v22405_v33, %v22405_v33  ;;  %8408 = vmatprep.subr.bf16.mxu1 %v18623_v35  ;;  %8395 = vmatprep.mubr.bf16.mxu0 %v22412_v21  ;;  %v18575_v35 = vcombine.high %v964_v61, %v976_v31  ;;  %v568_v23 = vld [vmem:[#allocation5 + $0xee8] sm:$0xff] }
 0x3c6   :  { %v8057_v45 = vpop.f32.mrf.mxu0  ;;  %8438 = vmatprep.mubr.bf16.mxu1 %v22393_v12  ;;  %v940_v12 = vld [vmem:[#allocation5 + $0x1a88] sm:$0xff]  ;;  %v18167_v57 = vcombine.high %v556_v8, %v568_v23 }
 0x3c7   :  { %v8815_v52 = vmul.f32 %v8767_v14, %v22405_v33  ;;  %v22418_v47 = vadd.f32 %v8057_v45, %v22397_v28  ;;  %8366 = vmatpush1.bf16.msra.mxu0 %v18238_v9  ;;  %v916_v45 = vld [vmem:[#allocation5 + $0x19c8] sm:$0xff]  ;;  %v18550_v0 = vcombine.low %v940_v12, %v952_v48 }
 0x3c8   :  { %8409 = vmatpush1.bf16.msra.mxu1 %v18622_v16  ;;  %8367 = vmatprep.subr.bf16.mxu0 %v18215_v55  ;;  %v18551_v16 = vcombine.high %v940_v12, %v952_v48  ;;  %v532_v55 = vld [vmem:[#allocation5 + $0xdc8] sm:$0xff] }
 0x3c9   :  { %v8863_v50 = vmul.f32 0.044715, %v8815_v52  ;;  %v8791_v5 = vmul.f32 %v22418_v47, %v22418_v47  ;;  %8410 = vmatprep.subr.bf16.mxu1 %v18599_v51  ;;  %v544_v51 = vld [vmem:[#allocation5 + $0xe28] sm:$0xff] }
 0x3ca   :  { %v928_v52 = vld [vmem:[#allocation5 + $0x1a28] sm:$0xff]  ;;  %v18143_v24 = vcombine.high %v532_v55, %v544_v51 }
 0x3cb   :  { %v8911_v14 = vadd.f32 %v8863_v50, %v22405_v33  ;;  %v8839_v28 = vmul.f32 %v8791_v5, %v22418_v47  ;;  %8368 = vmatpush1.bf16.msra.mxu0 %v18214_v32  ;;  %v18166_v50 = vcombine.low %v556_v8, %v568_v23  ;;  %v18527_v61 = vcombine.high %v916_v45, %v928_v52  ;;  %v508_v31 = vld [vmem:[#allocation5 + $0xd08] sm:$0xff] }
 0x3cc   :  { %8411 = vmatpush1.bf16.msra.mxu1 %v18598_v42  ;;  %8369 = vmatprep.subr.bf16.mxu0 %v18191_v43  ;;  %v520_v42 = vld [vmem:[#allocation5 + $0xd68] sm:$0xff] }
 0x3cd   :  { %v8959_v40 = vmul.f32 0.7978845, %v8911_v14  ;;  %v8887_v9 = vmul.f32 0.044715, %v8839_v28  ;;  %8412 = vmatprep.subr.bf16.mxu1 %v18575_v35  ;;  %v892_v43 = vld [vmem:[#allocation5 + $0x1908] sm:$0xff]  ;;  %v18142_v35 = vcombine.low %v532_v55, %v544_v51  ;;  %v18526_v14 = vcombine.low %v916_v45, %v928_v52 }
 0x3ce   :  { %v904_v5 = vld [vmem:[#allocation5 + $0x1968] sm:$0xff]  ;;  %v18119_v28 = vcombine.high %v508_v31, %v520_v42 }
 0x3cf   :  { %21769 = vtanh.f32 %v8959_v40  ;;  %v8935_v17 = vadd.f32 %v8887_v9, %v22418_v47  ;;  %8370 = vmatpush1.bf16.msra.mxu0 %v18190_v1  ;;  %v18503_v23 = vcombine.high %v892_v43, %v904_v5  ;;  %v484_v8 = vld [vmem:[#allocation5 + $0xc48] sm:$0xff] }
 0x3d0   :  { %8413 = vmatpush1.bf16.msra.mxu1 %v18574_v36  ;;  %8371 = vmatprep.subr.bf16.mxu0 %v18167_v57  ;;  %v496_v1 = vld [vmem:[#allocation5 + $0xca8] sm:$0xff]  ;;  %v18502_v36 = vcombine.low %v892_v43, %v904_v5 }
 0x3d1   :  { %v8983_v32 = vmul.f32 0.7978845, %v8935_v17  ;;  %8414 = vmatprep.subr.bf16.mxu1 %v18551_v16  ;;  %v868_v48 = vld [vmem:[#allocation5 + $0x1848] sm:$0xff]  ;;  %v18118_v17 = vcombine.low %v508_v31, %v520_v42  ;;  %v18095_v57 = vcombine.high %v484_v8, %v496_v1  ;;  %v18094_v45 = vcombine.low %v484_v8, %v496_v1 }
 0x3d2   :  { %v880_v12 = vld [vmem:[#allocation5 + $0x18a8] sm:$0xff]  ;;  %v8743_v8 = vmul.f32 0.5, %v22418_v47 }
 0x3d3   :  { %21771 = vtanh.f32 %v8983_v32  ;;  %8372 = vmatpush1.bf16.msra.mxu0 %v18166_v50  ;;  %v18479_v40 = vcombine.high %v868_v48, %v880_v12  ;;  %v844_v9 = vld [vmem:[#allocation5 + $0x1788] sm:$0xff]  ;;  %v18478_v50 = vcombine.low %v868_v48, %v880_v12 }
 0x3d4   :  { %8415 = vmatpush1.bf16.msra.mxu1 %v18550_v0  ;;  %8373 = vmatprep.subr.bf16.mxu0 %v18143_v24  ;;  %v856_v16 = vld [vmem:[#allocation5 + $0x17e8] sm:$0xff] }
 0x3d5   :  { %8416 = vmatprep.subr.bf16.mxu1 %v18527_v61  ;;  %v1228_v55 = vld [vmem:[#allocation5 + $0x2388] sm:$0xff]  ;;  %v18455_v0 = vcombine.high %v844_v9, %v856_v16  ;;  %v18454_v43 = vcombine.low %v844_v9, %v856_v16 }
 0x3d6   :  { %v1240_v51 = vld [vmem:[#allocation5 + $0x23e8] sm:$0xff] }
 0x3d7   :  { %8374 = vmatpush1.bf16.msra.mxu0 %v18142_v35  ;;  %v18839_v24 = vcombine.high %v1228_v55, %v1240_v51  ;;  %v820_v32 = vld [vmem:[#allocation5 + $0x16c8] sm:$0xff] }
 0x3d8   :  { %8417 = vmatpush1.bf16.msra.mxu1 %v18526_v14  ;;  %8375 = vmatprep.subr.bf16.mxu0 %v18119_v28  ;;  %v832_v61 = vld [vmem:[#allocation5 + $0x1728] sm:$0xff]  ;;  %v18838_v14 = vcombine.low %v1228_v55, %v1240_v51 }
 0x3d9   :  { %8418 = vmatprep.subr.bf16.mxu1 %v18503_v23  ;;  %v1204_v31 = vld [vmem:[#allocation5 + $0x22c8] sm:$0xff]  ;;  %v18431_v28 = vcombine.high %v820_v32, %v832_v61  ;;  %v8719_v23 = vmul.f32 0.5, %v22405_v33 }
 0x3da   :  { %v1216_v42 = vld [vmem:[#allocation5 + $0x2328] sm:$0xff] }
 0x3db   :  { %8376 = vmatpush1.bf16.msra.mxu0 %v18118_v17  ;;  %v18815_v1 = vcombine.high %v1204_v31, %v1216_v42  ;;  %v796_v48 = vld [vmem:[#allocation5 + $0x1608] sm:$0xff] }
 0x3dc   :  { %v21770_v52 = vpop.eup %21769  ;;  %8419 = vmatpush1.bf16.msra.mxu1 %v18502_v36  ;;  %8377 = vmatprep.subr.bf16.mxu0 %v18095_v57  ;;  %v808_v12 = vld [vmem:[#allocation5 + $0x1668] sm:$0xff] }
 0x3dd   :  { %8420 = vmatprep.subr.bf16.mxu1 %v18479_v40  ;;  %v9055_v5 = vadd.f32 1.0, %v21770_v52  ;;  %v1180_v36 = vld [vmem:[#allocation5 + $0x2208] sm:$0xff]  ;;  %v18430_v40 = vcombine.low %v820_v32, %v832_v61  ;;  %v18407_v55 = vcombine.high %v796_v48, %v808_v12 }
 0x3de   :  { %v1192_v57 = vld [vmem:[#allocation5 + $0x2268] sm:$0xff] }
 0x3df   :  { %8378 = vmatpush1.bf16.msra.mxu0 %v18094_v45  ;;  %v9103_v9 = vmul.f32 %v9055_v5, %v8719_v23  ;;  %v18814_v45 = vcombine.low %v1204_v31, %v1216_v42  ;;  %v18791_v51 = vcombine.high %v1180_v36, %v1192_v57  ;;  %v772_v33 = vld [vmem:[#allocation5 + $0x1548] sm:$0xff] }
 0x3e0   :  { %v21772_v35 = vpop.eup %21771  ;;  %8421 = vmatpush1.bf16.msra.mxu1 %v18478_v50  ;;  %8379 = vmatprep.subr.bf16.mxu0 %v18455_v0  ;;  %v784_v52 = vld [vmem:[#allocation5 + $0x15a8] sm:$0xff] }
 0x3e1   :  { %8422 = vmatprep.subr.bf16.mxu1 %v18839_v24  ;;  %v9079_v17 = vadd.f32 1.0, %v21772_v35  ;;  %v1156_v50 = vld [vmem:[#allocation5 + $0x2148] sm:$0xff]  ;;  %v18406_v24 = vcombine.low %v796_v48, %v808_v12  ;;  %v18383_v32 = vcombine.high %v772_v33, %v784_v52 }
 0x3e2   :  { %v1168_v0 = vld [vmem:[#allocation5 + $0x21a8] sm:$0xff] }
 0x3e3   :  { %8380 = vmatpush2.bf16.msra.mxu0 %v18454_v43  ;;  %v9127_v16 = vmul.f32 %v9079_v17, %v8743_v8  ;;  %v18790_v43 = vcombine.low %v1180_v36, %v1192_v57  ;;  %v18767_v61 = vcombine.high %v1156_v50, %v1168_v0  ;;  %v748_v5 = vld [vmem:[#allocation5 + $0x1488] sm:$0xff] }
 0x3e4   :  { %8423 = vmatpush2.bf16.msra.mxu1 %v18838_v14  ;;  %8381 = vmatprep.subr.bf16.mxu0 %v18431_v28  ;;  %v760_v35 = vld [vmem:[#allocation5 + $0x14e8] sm:$0xff]  ;;  %v18382_v14 = vcombine.low %v772_v33, %v784_v52  ;;  %v18766_v28 = vcombine.low %v1156_v50, %v1168_v0  ;;  %v22429_v33 = vpop.f32.mrf.mxu1 }
 0x3e5   :  { %8424 = vmatprep.subr.bf16.mxu1 %v18815_v1  ;;  %v22427_v47 = vpack.c.bf16 %v9127_v16, %v9103_v9  ;;  %v1132_v31 = vld [vmem:[#allocation5 + $0x2088] sm:$0xff]  ;;  %v18359_v23 = vcombine.high %v748_v5, %v760_v35  ;;  %v18358_v36 = vcombine.low %v748_v5, %v760_v35  ;;  %23206 = vst [vmem:[#allocation41_spill] sm:$0xff] %v22429_v33 }
 0x3e6   :  { %v1144_v42 = vld [vmem:[#allocation5 + $0x20e8] sm:$0xff] }
 0x3e7   :  { %23205 = vst [vmem:[#allocation40_spill] sm:$0xff] %v22427_v47  ;;  %8382 = vmatpush2.bf16.msra.mxu0 %v18430_v40  ;;  %v18743_v8 = vcombine.high %v1132_v31, %v1144_v42  ;;  %v724_v1 = vld [vmem:[#allocation5 + $0x13c8] sm:$0xff]  ;;  %v18742_v57 = vcombine.low %v1132_v31, %v1144_v42 }
 0x3e8   :  { %8425 = vmatpush2.bf16.msra.mxu1 %v18814_v45  ;;  %8383 = vmatprep.subr.bf16.mxu0 %v18407_v55  ;;  %v736_v48 = vld [vmem:[#allocation5 + $0x1428] sm:$0xff] }
 0x3e9   :  { %8426 = vmatprep.subr.bf16.mxu1 %v18791_v51  ;;  %v1108_v12 = vld [vmem:[#allocation5 + $0x1fc8] sm:$0xff]  ;;  %v18335_v40 = vcombine.high %v724_v1, %v736_v48  ;;  %v18334_v52 = vcombine.low %v724_v1, %v736_v48  ;;  %v281_v1 = vld [vmem:[#allocation5 + $0x5f0] sm:$0xff] }
 0x3ea   :  { %v1120_v17 = vld [vmem:[#allocation5 + $0x2028] sm:$0xff]  ;;  %v653_v48 = vld [vmem:[#allocation5 + $0x1190] sm:$0xff] }
 0x3eb   :  { %8384 = vmatpush2.bf16.msra.mxu0 %v18406_v24  ;;  %v18719_v9 = vcombine.high %v1108_v12, %v1120_v17  ;;  %v700_v16 = vld [vmem:[#allocation5 + $0x1308] sm:$0xff]  ;;  %v18718_v50 = vcombine.low %v1108_v12, %v1120_v17  ;;  %v8096_v24 = vpop.f32.mrf.mxu1  ;;  %v665_v12 = vld [vmem:[#allocation5 + $0x11f0] sm:$0xff] }
 0x3ec   :  { %8427 = vmatpush2.bf16.msra.mxu1 %v18790_v43  ;;  %8385 = vmatprep.subr.bf16.mxu0 %v18383_v32  ;;  %v712_v45 = vld [vmem:[#allocation5 + $0x1368] sm:$0xff] }
 0x3ed   :  { %8428 = vmatprep.subr.bf16.mxu1 %v18767_v61  ;;  %v1084_v55 = vld [vmem:[#allocation5 + $0x1f08] sm:$0xff]  ;;  %v18311_v0 = vcombine.high %v700_v16, %v712_v45  ;;  %v18310_v31 = vcombine.low %v700_v16, %v712_v45  ;;  %v18265_v16 = vcombine.high %v653_v48, %v665_v12  ;;  %v245_v45 = vld [vmem:[#allocation5 + $0x4d0] sm:$0xff] }
 0x3ee   :  { %v1096_v51 = vld [vmem:[#allocation5 + $0x1f68] sm:$0xff] }
 0x3ef   :  { %8386 = vmatpush2.bf16.msra.mxu0 %v18382_v14  ;;  %v18695_v43 = vcombine.high %v1084_v55, %v1096_v51  ;;  %v676_v32 = vld [vmem:[#allocation5 + $0x1248] sm:$0xff]  ;;  %v18694_v42 = vcombine.low %v1084_v55, %v1096_v51  ;;  %v257_v55 = vld [vmem:[#allocation5 + $0x530] sm:$0xff] }
 0x3f0   :  { %8429 = vmatpush2.bf16.msra.mxu1 %v18766_v28  ;;  %8387 = vmatprep.subr.bf16.mxu0 %v18359_v23  ;;  %v688_v61 = vld [vmem:[#allocation5 + $0x12a8] sm:$0xff]  ;;  %v22431_v28 = vpop.f32.mrf.mxu1  ;;  %v629_v51 = vld [vmem:[#allocation5 + $0x10d0] sm:$0xff] }
 0x3f1   :  { %8430 = vmatprep.subr.bf16.mxu1 %v18743_v8  ;;  %v1060_v5 = vld [vmem:[#allocation5 + $0x1e48] sm:$0xff]  ;;  %v18287_v14 = vcombine.high %v676_v32, %v688_v61  ;;  %23207 = vst [vmem:[#allocation42_spill] sm:$0xff] %v22431_v28  ;;  %v269_v8 = vld [vmem:[#allocation5 + $0x590] sm:$0xff]  ;;  %v18286_v17 = vcombine.low %v676_v32, %v688_v61  ;;  %v17857_v32 = vcombine.high %v245_v45, %v257_v55 }
 0x3f2   :  { %v1072_v35 = vld [vmem:[#allocation5 + $0x1ea8] sm:$0xff] }
 0x3f3   :  { %8388 = vmatpush2.bf16.msra.mxu0 %v18358_v36  ;;  %v18671_v23 = vcombine.high %v1060_v5, %v1072_v35  ;;  %v18670_v36 = vcombine.low %v1060_v5, %v1072_v35  ;;  %v221_v35 = vld [vmem:[#allocation5 + $0x410] sm:$0xff] }
 0x3f4   :  { %8431 = vmatpush2.bf16.msra.mxu1 %v18742_v57  ;;  %8389 = vmatprep.subr.bf16.mxu0 %v18335_v40  ;;  %v17881_v57 = vcombine.high %v269_v8, %v281_v1  ;;  %v1308_v40 = vrot.slane %v22375_v39, %v22246_v25 }
 0x3f5   :  { %8432 = vmatprep.subr.bf16.mxu1 %v18719_v9  ;;  %v8100_v9 = vpop.f32.mrf.mxu1 }
 0x3f6   :  { %v8097_v61 = vadd.f32 %v8096_v24, %v1308_v40 }
 0x3f7   :  { %8390 = vmatpush2.bf16.msra.mxu0 %v18334_v52  ;;  %v641_v52 = vld [vmem:[#allocation5 + $0x1130] sm:$0xff]  ;;  %v22437_v5 = vpop.f32.mrf.mxu1 }
 0x3f8   :  { %8433 = vmatpush2.bf16.msra.mxu1 %v18718_v50  ;;  %8391 = vmatprep.subr.bf16.mxu0 %v18311_v0  ;;  %v17880_v50 = vcombine.low %v269_v8, %v281_v1  ;;  %v22435_v0 = vpop.f32.mrf.mxu0  ;;  %23209 = vst [vmem:[#allocation44_spill] sm:$0xff] %v22437_v5  ;;  %v18241_v39 = vcombine.high %v629_v51, %v641_v52  ;;  %v617_v8 = vld [vmem:[#allocation5 + $0x1070] sm:$0xff]  ;;  %v534_v5 = vld [vmem:[#allocation5 + $0xdd8] sm:$0xff] }
 0x3f9   :  { %8434 = vmatprep.subr.bf16.mxu1 %v18695_v43  ;;  %23208 = vst [vmem:[#allocation43_spill] sm:$0xff] %v22435_v0  ;;  %v18264_v43 = vcombine.low %v653_v48, %v665_v12  ;;  %v17856_v48 = vcombine.low %v245_v45, %v257_v55  ;;  %v18240_v12 = vcombine.low %v629_v51, %v641_v52  ;;  %v197_v0 = vld [vmem:[#allocation5 + $0x350] sm:$0xff] }
 0x3fa   :  { %v581_v45 = vld [vmem:[#allocation5 + $0xf50] sm:$0xff] }
 0x3fb   :  { %8392 = vmatpush2.bf16.msra.mxu0 %v18310_v31  ;;  %v233_v31 = vld [vmem:[#allocation5 + $0x470] sm:$0xff] }
 0x3fc   :  { %8435 = vmatpush2.bf16.msra.mxu1 %v18694_v42  ;;  %8393 = vmatprep.subr.bf16.mxu0 %v18287_v14  ;;  %v22439_v14 = vld [vmem:[#allocation2 + $0x8] ss:$24 sps:$4 sm:$0xff]   ;;  %v17832_v51 = vcombine.low %v221_v35, %v233_v31 }
 0x3fd   :  { %8436 = vmatprep.subr.bf16.mxu1 %v18671_v23  ;;  %v605_v23 = vld [vmem:[#allocation5 + $0x1010] sm:$0xff] }
 0x3fe   :  { %v18217_v25 = vcombine.high %v605_v23, %v617_v8  ;;  %v593_v55 = vld [vmem:[#allocation5 + $0xfb0] sm:$0xff] }
 0x3ff   :  { %8394 = vmatpush2.bf16.msra.mxu0 %v18286_v17 }
 0x400   :  { %8437 = vmatpush2.bf16.msra.mxu1 %v18670_v36  ;;  %8449 = vmatprep.subr.bf16.mxu0 %v17881_v57  ;;  %v17833_v36 = vcombine.high %v221_v35, %v233_v31  ;;  %v8101_v57 = vadd.f32 %v8100_v9, %v1308_v40  ;;  %v18192_v31 = vcombine.low %v581_v45, %v593_v55 }
 0x401   :  { %8492 = vmatprep.subr.bf16.mxu1 %v18265_v16 }
 0x402   :  { %v8139_v42 = vpop.f32.mrf.mxu0  ;;  %8396 = vmatmul.mubr.bf16.vlgmr.msra.gmra.mxu0 %v22439_v14 }
 0x403   :  { %v8140_v1 = vadd.f32 %v8139_v42, %v8097_v61  ;;  %v8182_v17 = vpop.f32.mrf.mxu1  ;;  %8439 = vmatmul.mubr.bf16.vlgmr.msra.gmra.mxu1 %v22401_v11  ;;  %8450 = vmatpush1.bf16.msra.mxu0 %v17880_v50  ;;  %v209_v61 = vld [vmem:[#allocation5 + $0x3b0] sm:$0xff]  ;;  %v18216_v50 = vcombine.low %v605_v23, %v617_v8 }
 0x404   :  { %8493 = vmatpush1.bf16.msra.mxu1 %v18264_v43  ;;  %v22443_v24 = vpop.f32.mrf.mxu0  ;;  %8451 = vmatprep.subr.bf16.mxu0 %v17857_v32  ;;  %v22449_v42 = vld [vmem:[#allocation2 + $0x4] ss:$24 sps:$4 sm:$0xff]   ;;  %v17809_v43 = vcombine.high %v197_v0, %v209_v61  ;;  %v17808_v35 = vcombine.low %v197_v0, %v209_v61 }
 0x405   :  { %23210 = vst [vmem:[#allocation45_spill] sm:$0xff] %v22443_v24  ;;  %v22445_v16 = vadd.f32 %v8182_v17, %v8140_v1  ;;  %v22447_v47 = vpop.f32.mrf.mxu1  ;;  %8494 = vmatprep.subr.bf16.mxu1 %v18241_v39  ;;  %8481 = vmatprep.mubr.bf16.mxu0 %v22449_v42  ;;  %v18193_v1 = vcombine.high %v581_v45, %v593_v55  ;;  %v173_v17 = vld [vmem:[#allocation5 + $0x290] sm:$0xff] }
 0x406   :  { %23211 = vst [vmem:[#allocation46_spill] sm:$0xff] %v22447_v47  ;;  %v8143_v11 = vpop.f32.mrf.mxu0  ;;  %8524 = vmatprep.mubr.bf16.mxu1 %v22412_v21  ;;  %v185_v47 = vld [vmem:[#allocation5 + $0x2f0] sm:$0xff] }
 0x407   :  { %v8769_v40 = vmul.f32 %v22445_v16, %v22445_v16  ;;  %v8144_v9 = vadd.f32 %v8143_v11, %v8101_v57  ;;  %8452 = vmatpush1.bf16.msra.mxu0 %v17856_v48  ;;  %v8186_v52 = vpop.f32.mrf.mxu1  ;;  %v557_v21 = vld [vmem:[#allocation5 + $0xe90] sm:$0xff]  ;;  %v17785_v23 = vcombine.high %v173_v17, %v185_v47 }
 0x408   :  { %8495 = vmatpush1.bf16.msra.mxu1 %v18240_v12  ;;  %8453 = vmatprep.subr.bf16.mxu0 %v17833_v36  ;;  %v569_v24 = vld [vmem:[#allocation5 + $0xef0] sm:$0xff] }
 0x409   :  { %v8817_v32 = vmul.f32 %v8769_v40, %v22445_v16  ;;  %v22456_v39 = vadd.f32 %v8186_v52, %v8144_v9  ;;  %8496 = vmatprep.subr.bf16.mxu1 %v18217_v25  ;;  %v18169_v25 = vcombine.high %v557_v21, %v569_v24  ;;  %v149_v36 = vld [vmem:[#allocation5 + $0x1d0] sm:$0xff]  ;;  %v18168_v0 = vcombine.low %v557_v21, %v569_v24 }
 0x40a   :  { %v161_v57 = vld [vmem:[#allocation5 + $0x230] sm:$0xff] }
 0x40b   :  { %v8865_v33 = vmul.f32 0.044715, %v8817_v32  ;;  %v8793_v48 = vmul.f32 %v22456_v39, %v22456_v39  ;;  %8454 = vmatpush1.bf16.msra.mxu0 %v17832_v51  ;;  %v533_v11 = vld [vmem:[#allocation5 + $0xdd0] sm:$0xff]  ;;  %v17784_v32 = vcombine.low %v173_v17, %v185_v47  ;;  %v17761_v61 = vcombine.high %v149_v36, %v161_v57 }
 0x40c   :  { %8497 = vmatpush1.bf16.msra.mxu1 %v18216_v50  ;;  %8455 = vmatprep.subr.bf16.mxu0 %v17809_v43  ;;  %v545_v40 = vld [vmem:[#allocation5 + $0xe30] sm:$0xff] }
 0x40d   :  { %v8913_v8 = vadd.f32 %v8865_v33, %v22445_v16  ;;  %v8841_v12 = vmul.f32 %v8793_v48, %v22456_v39  ;;  %8498 = vmatprep.subr.bf16.mxu1 %v18193_v1  ;;  %v18145_v33 = vcombine.high %v533_v11, %v545_v40  ;;  %v125_v55 = vld [vmem:[#allocation5 + $0x110] sm:$0xff]  ;;  %v17760_v48 = vcombine.low %v149_v36, %v161_v57 }
 0x40e   :  { %v137_v51 = vld [vmem:[#allocation5 + $0x170] sm:$0xff] }
 0x40f   :  { %v8961_v9 = vmul.f32 0.7978845, %v8913_v8  ;;  %v8889_v52 = vmul.f32 0.044715, %v8841_v12  ;;  %8456 = vmatpush1.bf16.msra.mxu0 %v17808_v35  ;;  %v509_v50 = vld [vmem:[#allocation5 + $0xd10] sm:$0xff]  ;;  %v18144_v35 = vcombine.low %v533_v11, %v545_v40  ;;  %v17737_v47 = vcombine.high %v125_v55, %v137_v51 }
 0x410   :  { %8499 = vmatpush1.bf16.msra.mxu1 %v18192_v31  ;;  %8457 = vmatprep.subr.bf16.mxu0 %v17785_v23  ;;  %v521_v43 = vld [vmem:[#allocation5 + $0xd70] sm:$0xff]  ;;  %v17736_v8 = vcombine.low %v125_v55, %v137_v51 }
 0x411   :  { %21773 = vtanh.f32 %v8961_v9  ;;  %v8937_v45 = vadd.f32 %v8889_v52, %v22456_v39  ;;  %8500 = vmatprep.subr.bf16.mxu1 %v18169_v25  ;;  %v18121_v24 = vcombine.high %v509_v50, %v521_v43  ;;  %v101_v17 = vld [vmem:[#allocation5 + $0x50] sm:$0xff]  ;;  %v18120_v12 = vcombine.low %v509_v50, %v521_v43 }
 0x412   :  { %v113_v21 = vld [vmem:[#allocation5 + $0xb0] sm:$0xff] }
 0x413   :  { %v8985_v1 = vmul.f32 0.7978845, %v8937_v45  ;;  %8458 = vmatpush1.bf16.msra.mxu0 %v17784_v32  ;;  %v485_v31 = vld [vmem:[#allocation5 + $0xc50] sm:$0xff]  ;;  %v17713_v25 = vcombine.high %v101_v17, %v113_v21  ;;  %v17712_v40 = vcombine.low %v101_v17, %v113_v21 }
 0x414   :  { %8501 = vmatpush1.bf16.msra.mxu1 %v18168_v0  ;;  %8459 = vmatprep.subr.bf16.mxu0 %v17761_v61  ;;  %v497_v23 = vld [vmem:[#allocation5 + $0xcb0] sm:$0xff] }
 0x415   :  { %21775 = vtanh.f32 %v8985_v1  ;;  %8502 = vmatprep.subr.bf16.mxu1 %v18145_v33  ;;  %v18097_v9 = vcombine.high %v485_v31, %v497_v23  ;;  %v461_v36 = vld [vmem:[#allocation5 + $0xb90] sm:$0xff]  ;;  %v18096_v32 = vcombine.low %v485_v31, %v497_v23 }
 0x416   :  { %v473_v57 = vld [vmem:[#allocation5 + $0xbf0] sm:$0xff] }
 0x417   :  { %8460 = vmatpush1.bf16.msra.mxu0 %v17760_v48  ;;  %v845_v52 = vld [vmem:[#allocation5 + $0x1790] sm:$0xff]  ;;  %v18073_v0 = vcombine.high %v461_v36, %v473_v57  ;;  %v18072_v43 = vcombine.low %v461_v36, %v473_v57 }
 0x418   :  { %8503 = vmatpush1.bf16.msra.mxu1 %v18144_v35  ;;  %8461 = vmatprep.subr.bf16.mxu0 %v17737_v47  ;;  %v857_v11 = vld [vmem:[#allocation5 + $0x17f0] sm:$0xff] }
 0x419   :  { %8504 = vmatprep.subr.bf16.mxu1 %v18121_v24  ;;  %v18457_v61 = vcombine.high %v845_v52, %v857_v11  ;;  %v437_v45 = vld [vmem:[#allocation5 + $0xad0] sm:$0xff]  ;;  %v18456_v1 = vcombine.low %v845_v52, %v857_v11 }
 0x41a   :  { %v449_v33 = vld [vmem:[#allocation5 + $0xb30] sm:$0xff] }
 0x41b   :  { %8462 = vmatpush1.bf16.msra.mxu0 %v17736_v8  ;;  %v821_v51 = vld [vmem:[#allocation5 + $0x16d0] sm:$0xff]  ;;  %v18049_v48 = vcombine.high %v437_v45, %v449_v33  ;;  %v8721_v8 = vmul.f32 0.5, %v22445_v16 }
 0x41c   :  { %8505 = vmatpush1.bf16.msra.mxu1 %v18120_v12  ;;  %8463 = vmatprep.subr.bf16.mxu0 %v17713_v25  ;;  %v833_v50 = vld [vmem:[#allocation5 + $0x1730] sm:$0xff]  ;;  %v8745_v12 = vmul.f32 0.5, %v22456_v39  ;;  %v18048_v25 = vcombine.low %v437_v45, %v449_v33 }
 0x41d   :  { %8506 = vmatprep.subr.bf16.mxu1 %v18097_v9  ;;  %v18433_v35 = vcombine.high %v821_v51, %v833_v50  ;;  %v413_v47 = vld [vmem:[#allocation5 + $0xa10] sm:$0xff]  ;;  %v18432_v36 = vcombine.low %v821_v51, %v833_v50 }
 0x41e   :  { %v21774_v55 = vpop.eup %21773  ;;  %v425_v24 = vld [vmem:[#allocation5 + $0xa70] sm:$0xff] }
 0x41f   :  { %8464 = vmatpush1.bf16.msra.mxu0 %v17712_v40  ;;  %v9057_v17 = vadd.f32 1.0, %v21774_v55  ;;  %v797_v31 = vld [vmem:[#allocation5 + $0x1610] sm:$0xff]  ;;  %v18025_v57 = vcombine.high %v413_v47, %v425_v24  ;;  %v18024_v28 = vcombine.low %v413_v47, %v425_v24 }
 0x420   :  { %8507 = vmatpush1.bf16.msra.mxu1 %v18096_v32  ;;  %8465 = vmatprep.subr.bf16.mxu0 %v18073_v0  ;;  %v809_v23 = vld [vmem:[#allocation5 + $0x1670] sm:$0xff] }
 0x421   :  { %8508 = vmatprep.subr.bf16.mxu1 %v18457_v61  ;;  %v18409_v52 = vcombine.high %v797_v31, %v809_v23  ;;  %v389_v11 = vld [vmem:[#allocation5 + $0x950] sm:$0xff]  ;;  %v9105_v32 = vmul.f32 %v9057_v17, %v8721_v8  ;;  %v18408_v39 = vcombine.low %v797_v31, %v809_v23 }
 0x422   :  { %v21776_v21 = vpop.eup %21775  ;;  %v401_v40 = vld [vmem:[#allocation5 + $0x9b0] sm:$0xff] }
 0x423   :  { %8466 = vmatpush2.bf16.msra.mxu0 %v18072_v43  ;;  %v9081_v9 = vadd.f32 1.0, %v21776_v21  ;;  %v773_v61 = vld [vmem:[#allocation5 + $0x1550] sm:$0xff]  ;;  %v18001_v45 = vcombine.high %v389_v11, %v401_v40 }
 0x424   :  { %8509 = vmatpush2.bf16.msra.mxu1 %v18456_v1  ;;  %8467 = vmatprep.subr.bf16.mxu0 %v18049_v48  ;;  %v785_v55 = vld [vmem:[#allocation5 + $0x15b0] sm:$0xff]  ;;  %v18000_v48 = vcombine.low %v389_v11, %v401_v40 }
 0x425   :  { %8510 = vmatprep.subr.bf16.mxu1 %v18433_v35  ;;  %v9129_v0 = vmul.f32 %v9081_v9, %v8745_v12  ;;  %v18385_v33 = vcombine.high %v773_v61, %v785_v55  ;;  %v365_v51 = vld [vmem:[#allocation5 + $0x890] sm:$0xff]  ;;  %v18384_v35 = vcombine.low %v773_v61, %v785_v55 }
 0x426   :  { %v377_v50 = vld [vmem:[#allocation5 + $0x8f0] sm:$0xff] }
 0x427   :  { %8468 = vmatpush2.bf16.msra.mxu0 %v18048_v25  ;;  %v22465_v16 = vpack.c.bf16 %v9129_v0, %v9105_v32  ;;  %v749_v43 = vld [vmem:[#allocation5 + $0x1490] sm:$0xff]  ;;  %v17977_v17 = vcombine.high %v365_v51, %v377_v50  ;;  %v17976_v31 = vcombine.low %v365_v51, %v377_v50 }
 0x428   :  { %8511 = vmatpush2.bf16.msra.mxu1 %v18432_v36  ;;  %8469 = vmatprep.subr.bf16.mxu0 %v18025_v57  ;;  %v761_v1 = vld [vmem:[#allocation5 + $0x14f0] sm:$0xff] }
 0x429   :  { %23212 = vst [vmem:[#allocation47_spill] sm:$0xff] %v22465_v16  ;;  %8512 = vmatprep.subr.bf16.mxu1 %v18409_v52  ;;  %v18361_v47 = vcombine.high %v749_v43, %v761_v1  ;;  %v341_v24 = vld [vmem:[#allocation5 + $0x7d0] sm:$0xff]  ;;  %v18360_v23 = vcombine.low %v749_v43, %v761_v1  ;;  %v174_v16 = vld [vmem:[#allocation5 + $0x298] sm:$0xff] }
 0x42a   :  { %v353_v21 = vld [vmem:[#allocation5 + $0x830] sm:$0xff] }
 0x42b   :  { %8470 = vmatpush2.bf16.msra.mxu0 %v18024_v28  ;;  %v725_v8 = vld [vmem:[#allocation5 + $0x13d0] sm:$0xff]  ;;  %v17953_v25 = vcombine.high %v341_v24, %v353_v21  ;;  %v17952_v11 = vcombine.low %v341_v24, %v353_v21 }
 0x42c   :  { %8513 = vmatpush2.bf16.msra.mxu1 %v18408_v39  ;;  %8471 = vmatprep.subr.bf16.mxu0 %v18001_v45  ;;  %v737_v12 = vld [vmem:[#allocation5 + $0x1430] sm:$0xff] }
 0x42d   :  { %8514 = vmatprep.subr.bf16.mxu1 %v18385_v33  ;;  %v18337_v9 = vcombine.high %v725_v8, %v737_v12  ;;  %v317_v28 = vld [vmem:[#allocation5 + $0x710] sm:$0xff]  ;;  %v18336_v40 = vcombine.low %v725_v8, %v737_v12 }
 0x42e   :  { %v329_v36 = vld [vmem:[#allocation5 + $0x770] sm:$0xff] }
 0x42f   :  { %8472 = vmatpush2.bf16.msra.mxu0 %v18000_v48  ;;  %v701_v57 = vld [vmem:[#allocation5 + $0x1310] sm:$0xff]  ;;  %v17929_v32 = vcombine.high %v317_v28, %v329_v36  ;;  %v17928_v33 = vcombine.low %v317_v28, %v329_v36 }
 0x430   :  { %8515 = vmatpush2.bf16.msra.mxu1 %v18384_v35  ;;  %8473 = vmatprep.subr.bf16.mxu0 %v17977_v17  ;;  %v713_v52 = vld [vmem:[#allocation5 + $0x1370] sm:$0xff]  ;;  %v270_v35 = vld [vmem:[#allocation5 + $0x598] sm:$0xff] }
 0x431   :  { %8516 = vmatprep.subr.bf16.mxu1 %v18361_v47  ;;  %v18313_v0 = vcombine.high %v701_v57, %v713_v52  ;;  %v293_v61 = vld [vmem:[#allocation5 + $0x650] sm:$0xff]  ;;  %v18312_v51 = vcombine.low %v701_v57, %v713_v52  ;;  %v282_v17 = vld [vmem:[#allocation5 + $0x5f8] sm:$0xff]  ;;  %v22471_v57 = vpop.f32.mrf.mxu0 }
 0x432   :  { %v305_v55 = vld [vmem:[#allocation5 + $0x6b0] sm:$0xff]  ;;  %v17883_v12 = vcombine.high %v270_v35, %v282_v17  ;;  %23213 = vst [vmem:[#allocation48_spill] sm:$0xff] %v22471_v57  ;;  %v17882_v52 = vcombine.low %v270_v35, %v282_v17 }
 0x433   :  { %8474 = vmatpush2.bf16.msra.mxu0 %v17976_v31  ;;  %v677_v39 = vld [vmem:[#allocation5 + $0x1250] sm:$0xff]  ;;  %v17905_v50 = vcombine.high %v293_v61, %v305_v55  ;;  %v17904_v47 = vcombine.low %v293_v61, %v305_v55 }
 0x434   :  { %8517 = vmatpush2.bf16.msra.mxu1 %v18360_v23  ;;  %8475 = vmatprep.subr.bf16.mxu0 %v17953_v25  ;;  %v689_v45 = vld [vmem:[#allocation5 + $0x12b0] sm:$0xff]  ;;  %v246_v25 = vld [vmem:[#allocation5 + $0x4d8] sm:$0xff] }
 0x435   :  { %8518 = vmatprep.subr.bf16.mxu1 %v18337_v9  ;;  %v18289_v43 = vcombine.high %v677_v39, %v689_v45  ;;  %v1037_v1 = vld [vmem:[#allocation5 + $0x1d90] sm:$0xff]  ;;  %v18288_v24 = vcombine.low %v677_v39, %v689_v45  ;;  %v258_v9 = vld [vmem:[#allocation5 + $0x538] sm:$0xff] }
 0x436   :  { %v1049_v48 = vld [vmem:[#allocation5 + $0x1df0] sm:$0xff]  ;;  %v222_v45 = vld [vmem:[#allocation5 + $0x418] sm:$0xff] }
 0x437   :  { %8476 = vmatpush2.bf16.msra.mxu0 %v17952_v11  ;;  %v22467_v21 = vld [vmem:[#allocation7 + $0x10] sm:$0xff]  ;;  %v18649_v8 = vcombine.high %v1037_v1, %v1049_v48  ;;  %v18648_v36 = vcombine.low %v1037_v1, %v1049_v48  ;;  %v17858_v48 = vcombine.low %v246_v25, %v258_v9 }
 0x438   :  { %8519 = vmatpush2.bf16.msra.mxu1 %v18336_v40  ;;  %8477 = vmatprep.subr.bf16.mxu0 %v17929_v32  ;;  %v1013_v31 = vld [vmem:[#allocation5 + $0x1cd0] sm:$0xff]  ;;  %v1316_v28 = vrot.slane %v22467_v21, %v22096_v27  ;;  %v22473_v40 = vpop.f32.mrf.mxu1  ;;  %v17859_v32 = vcombine.high %v246_v25, %v258_v9 }
 0x439   :  { %8520 = vmatprep.subr.bf16.mxu1 %v18313_v0  ;;  %v1025_v23 = vld [vmem:[#allocation5 + $0x1d30] sm:$0xff]  ;;  %23214 = vst [vmem:[#allocation49_spill] sm:$0xff] %v22473_v40 }
 0x43a   :  { %v18625_v11 = vcombine.high %v1013_v31, %v1025_v23  ;;  %v989_v0 = vld [vmem:[#allocation5 + $0x1c10] sm:$0xff] }
 0x43b   :  { %8478 = vmatpush2.bf16.msra.mxu0 %v17928_v33  ;;  %v1001_v61 = vld [vmem:[#allocation5 + $0x1c70] sm:$0xff]  ;;  %v234_v33 = vld [vmem:[#allocation5 + $0x478] sm:$0xff] }
 0x43c   :  { %8521 = vmatpush2.bf16.msra.mxu1 %v18312_v51  ;;  %8479 = vmatprep.subr.bf16.mxu0 %v17905_v50  ;;  %v22475_v39 = vld [vmem:[#allocation2] ss:$24 sps:$4 sm:$0xff]   ;;  %v18601_v35 = vcombine.high %v989_v0, %v1001_v61  ;;  %v18600_v25 = vcombine.low %v989_v0, %v1001_v61 }
 0x43d   :  { %8522 = vmatprep.subr.bf16.mxu1 %v18289_v43  ;;  %v18624_v43 = vcombine.low %v1013_v31, %v1025_v23  ;;  %v198_v31 = vld [vmem:[#allocation5 + $0x358] sm:$0xff]  ;;  %v953_v27 = vld [vmem:[#allocation5 + $0x1af0] sm:$0xff] }
 0x43e   :  { %v210_v23 = vld [vmem:[#allocation5 + $0x3b8] sm:$0xff]  ;;  %v917_v61 = vld [vmem:[#allocation5 + $0x19d0] sm:$0xff] }
 0x43f   :  { %8480 = vmatpush2.bf16.msra.mxu0 %v17904_v47 }
 0x440   :  { %8523 = vmatpush2.bf16.msra.mxu1 %v18288_v24  ;;  %8535 = vmatprep.subr.bf16.mxu0 %v18649_v8  ;;  %v17835_v24 = vcombine.high %v222_v45, %v234_v33  ;;  %v965_v8 = vld [vmem:[#allocation5 + $0x1b50] sm:$0xff] }
 0x441   :  { %8578 = vmatprep.subr.bf16.mxu1 %v17883_v12  ;;  %v977_v12 = vld [vmem:[#allocation5 + $0x1bb0] sm:$0xff] }
 0x442   :  { %v8225_v55 = vpop.f32.mrf.mxu0  ;;  %8482 = vmatmul.mubr.bf16.vlgmr.msra.gmra.mxu0 %v22475_v39 }
 0x443   :  { %v8226_v51 = vadd.f32 %v8225_v55, %v1316_v28  ;;  %v8268_v50 = vpop.f32.mrf.mxu1  ;;  %8525 = vmatmul.mubr.bf16.vlgmr.msra.gmra.mxu1 %v22439_v14  ;;  %8536 = vmatpush1.bf16.msra.mxu0 %v18648_v36  ;;  %v22485_v55 = vld [vmem:[#allocation2 + $0x14] ss:$24 sps:$4 sm:$0xff]  }
 0x444   :  { %8579 = vmatpush1.bf16.msra.mxu1 %v17882_v52  ;;  %v22479_v1 = vpop.f32.mrf.mxu0  ;;  %8537 = vmatprep.subr.bf16.mxu0 %v18625_v11  ;;  %v17834_v52 = vcombine.low %v222_v45, %v234_v33  ;;  %v18577_v11 = vcombine.high %v965_v8, %v977_v12  ;;  %v150_v45 = vld [vmem:[#allocation5 + $0x1d8] sm:$0xff] }
 0x445   :  { %23215 = vst [vmem:[#allocation50_spill] sm:$0xff] %v22479_v1  ;;  %v22481_v17 = vadd.f32 %v8268_v50, %v8226_v51  ;;  %v22483_v47 = vpop.f32.mrf.mxu1  ;;  %8580 = vmatprep.subr.bf16.mxu1 %v17859_v32  ;;  %8567 = vmatprep.mubr.bf16.mxu0 %v22485_v55  ;;  %v17811_v51 = vcombine.high %v198_v31, %v210_v23  ;;  %v941_v50 = vld [vmem:[#allocation5 + $0x1a90] sm:$0xff]  ;;  %v162_v33 = vld [vmem:[#allocation5 + $0x238] sm:$0xff] }
 0x446   :  { %23216 = vst [vmem:[#allocation51_spill] sm:$0xff] %v22483_v47  ;;  %v8229_v14 = vpop.f32.mrf.mxu0  ;;  %8610 = vmatprep.mubr.bf16.mxu1 %v22449_v42  ;;  %v186_v47 = vld [vmem:[#allocation5 + $0x2f8] sm:$0xff]  ;;  %v18576_v1 = vcombine.low %v965_v8, %v977_v12  ;;  %v17810_v42 = vcombine.low %v198_v31, %v210_v23  ;;  %v905_v8 = vld [vmem:[#allocation5 + $0x1970] sm:$0xff]  ;;  %v17762_v23 = vcombine.low %v150_v45, %v162_v33 }
 0x447   :  { %v8230_v36 = vadd.f32 %v8229_v14, %v1316_v28  ;;  %8538 = vmatpush1.bf16.msra.mxu0 %v18624_v43  ;;  %v8272_v9 = vpop.f32.mrf.mxu1  ;;  %v18553_v28 = vcombine.high %v941_v50, %v953_v27  ;;  %v17787_v0 = vcombine.high %v174_v16, %v186_v47  ;;  %v929_v43 = vld [vmem:[#allocation5 + $0x1a30] sm:$0xff]  ;;  %v17763_v14 = vcombine.high %v150_v45, %v162_v33  ;;  %v126_v12 = vld [vmem:[#allocation5 + $0x118] sm:$0xff] }
 0x448   :  { %8581 = vmatpush1.bf16.msra.mxu1 %v17858_v48  ;;  %8539 = vmatprep.subr.bf16.mxu0 %v18601_v35  ;;  %v18552_v48 = vcombine.low %v941_v50, %v953_v27  ;;  %v17786_v35 = vcombine.low %v174_v16, %v186_v47  ;;  %v18528_v31 = vcombine.low %v917_v61, %v929_v43  ;;  %v881_v27 = vld [vmem:[#allocation5 + $0x18b0] sm:$0xff] }
 0x449   :  { %v22489_v32 = vadd.f32 %v8272_v9, %v8230_v36  ;;  %8582 = vmatprep.subr.bf16.mxu1 %v17835_v24  ;;  %v18529_v24 = vcombine.high %v917_v61, %v929_v43  ;;  %v893_v36 = vld [vmem:[#allocation5 + $0x1910] sm:$0xff]  ;;  %v462_v61 = vld [vmem:[#allocation5 + $0xb98] sm:$0xff] }
 0x44a   :  { %v18505_v9 = vcombine.high %v893_v36, %v905_v8  ;;  %v18504_v16 = vcombine.low %v893_v36, %v905_v8  ;;  %v474_v43 = vld [vmem:[#allocation5 + $0xbf8] sm:$0xff] }
 0x44b   :  { %8540 = vmatpush1.bf16.msra.mxu0 %v18600_v25  ;;  %v138_v25 = vld [vmem:[#allocation5 + $0x178] sm:$0xff] }
 0x44c   :  { %8583 = vmatpush1.bf16.msra.mxu1 %v17834_v52  ;;  %8541 = vmatprep.subr.bf16.mxu0 %v18577_v11  ;;  %v17739_v52 = vcombine.high %v126_v12, %v138_v25  ;;  %v102_v11 = vld [vmem:[#allocation5 + $0x58] sm:$0xff]  ;;  %v17738_v47 = vcombine.low %v126_v12, %v138_v25  ;;  %v18074_v25 = vcombine.low %v462_v61, %v474_v43 }
 0x44d   :  { %8584 = vmatprep.subr.bf16.mxu1 %v17811_v51  ;;  %v114_v51 = vld [vmem:[#allocation5 + $0xb8] sm:$0xff] }
 0x44e   :  { %v17714_v33 = vcombine.low %v102_v11, %v114_v51  ;;  %v438_v36 = vld [vmem:[#allocation5 + $0xad8] sm:$0xff] }
 0x44f   :  { %8542 = vmatpush1.bf16.msra.mxu0 %v18576_v1  ;;  %v869_v1 = vld [vmem:[#allocation5 + $0x1850] sm:$0xff]  ;;  %v450_v8 = vld [vmem:[#allocation5 + $0xb38] sm:$0xff] }
 0x450   :  { %8585 = vmatpush1.bf16.msra.mxu1 %v17810_v42  ;;  %8543 = vmatprep.subr.bf16.mxu0 %v18553_v28  ;;  %v18481_v50 = vcombine.high %v869_v1, %v881_v27  ;;  %v17715_v42 = vcombine.high %v102_v11, %v114_v51  ;;  %v1229_v28 = vld [vmem:[#allocation5 + $0x2390] sm:$0xff]  ;;  %v18480_v45 = vcombine.low %v869_v1, %v881_v27  ;;  %v414_v1 = vld [vmem:[#allocation5 + $0xa18] sm:$0xff] }
 0x451   :  { %8586 = vmatprep.subr.bf16.mxu1 %v17787_v0  ;;  %v1241_v0 = vld [vmem:[#allocation5 + $0x23f0] sm:$0xff]  ;;  %v426_v27 = vld [vmem:[#allocation5 + $0xa78] sm:$0xff]  ;;  %v18050_v51 = vcombine.low %v438_v36, %v450_v8 }
 0x452   :  { %v18840_v12 = vcombine.low %v1229_v28, %v1241_v0 }
 0x453   :  { %8544 = vmatpush1.bf16.msra.mxu0 %v18552_v48  ;;  %v18841_v48 = vcombine.high %v1229_v28, %v1241_v0  ;;  %v390_v28 = vld [vmem:[#allocation5 + $0x958] sm:$0xff] }
 0x454   :  { %8587 = vmatpush1.bf16.msra.mxu1 %v17786_v35  ;;  %8545 = vmatprep.subr.bf16.mxu0 %v18529_v24  ;;  %v18075_v35 = vcombine.high %v462_v61, %v474_v43  ;;  %v1205_v24 = vld [vmem:[#allocation5 + $0x22d0] sm:$0xff]  ;;  %v402_v0 = vld [vmem:[#allocation5 + $0x9b8] sm:$0xff]  ;;  %v18026_v43 = vcombine.low %v414_v1, %v426_v27 }
 0x455   :  { %8588 = vmatprep.subr.bf16.mxu1 %v17763_v14  ;;  %v1217_v14 = vld [vmem:[#allocation5 + $0x2330] sm:$0xff] }
 0x456   :  { %v18816_v11 = vcombine.low %v1205_v24, %v1217_v14 }
 0x457   :  { %8546 = vmatpush1.bf16.msra.mxu0 %v18528_v31  ;;  %v18817_v31 = vcombine.high %v1205_v24, %v1217_v14  ;;  %v366_v24 = vld [vmem:[#allocation5 + $0x898] sm:$0xff] }
 0x458   :  { %8589 = vmatpush1.bf16.msra.mxu1 %v17762_v23  ;;  %8547 = vmatprep.subr.bf16.mxu0 %v18505_v9  ;;  %v18051_v23 = vcombine.high %v438_v36, %v450_v8  ;;  %v1181_v9 = vld [vmem:[#allocation5 + $0x2210] sm:$0xff]  ;;  %v378_v14 = vld [vmem:[#allocation5 + $0x8f8] sm:$0xff]  ;;  %v18002_v8 = vcombine.low %v390_v28, %v402_v0 }
 0x459   :  { %8590 = vmatprep.subr.bf16.mxu1 %v17739_v52  ;;  %v1193_v52 = vld [vmem:[#allocation5 + $0x2270] sm:$0xff] }
 0x45a   :  { %v18792_v61 = vcombine.low %v1181_v9, %v1193_v52 }
 0x45b   :  { %8548 = vmatpush1.bf16.msra.mxu0 %v18504_v16  ;;  %v18793_v16 = vcombine.high %v1181_v9, %v1193_v52  ;;  %v342_v9 = vld [vmem:[#allocation5 + $0x7d8] sm:$0xff] }
 0x45c   :  { %8591 = vmatpush1.bf16.msra.mxu1 %v17738_v47  ;;  %8549 = vmatprep.subr.bf16.mxu0 %v18481_v50  ;;  %v18027_v47 = vcombine.high %v414_v1, %v426_v27  ;;  %v1157_v50 = vld [vmem:[#allocation5 + $0x2150] sm:$0xff]  ;;  %v354_v52 = vld [vmem:[#allocation5 + $0x838] sm:$0xff]  ;;  %v17978_v27 = vcombine.low %v366_v24, %v378_v14 }
 0x45d   :  { %8592 = vmatprep.subr.bf16.mxu1 %v17715_v42  ;;  %v1169_v42 = vld [vmem:[#allocation5 + $0x21b0] sm:$0xff] }
 0x45e   :  { %v18768_v36 = vcombine.low %v1157_v50, %v1169_v42 }
 0x45f   :  { %8550 = vmatpush1.bf16.msra.mxu0 %v18480_v45  ;;  %v18769_v45 = vcombine.high %v1157_v50, %v1169_v42  ;;  %v318_v50 = vld [vmem:[#allocation5 + $0x718] sm:$0xff] }
 0x460   :  { %8593 = vmatpush1.bf16.msra.mxu1 %v17714_v33  ;;  %8551 = vmatprep.subr.bf16.mxu0 %v18841_v48  ;;  %v18003_v33 = vcombine.high %v390_v28, %v402_v0  ;;  %v1133_v48 = vld [vmem:[#allocation5 + $0x2090] sm:$0xff]  ;;  %v330_v42 = vld [vmem:[#allocation5 + $0x778] sm:$0xff]  ;;  %v17954_v0 = vcombine.low %v342_v9, %v354_v52 }
 0x461   :  { %8594 = vmatprep.subr.bf16.mxu1 %v18075_v35  ;;  %v1145_v35 = vld [vmem:[#allocation5 + $0x20f0] sm:$0xff] }
 0x462   :  { %v18744_v1 = vcombine.low %v1133_v48, %v1145_v35 }
 0x463   :  { %8552 = vmatpush2.bf16.msra.mxu0 %v18840_v12  ;;  %v18745_v12 = vcombine.high %v1133_v48, %v1145_v35  ;;  %v294_v48 = vld [vmem:[#allocation5 + $0x658] sm:$0xff] }
 0x464   :  { %8595 = vmatpush2.bf16.msra.mxu1 %v18074_v25  ;;  %8553 = vmatprep.subr.bf16.mxu0 %v18817_v31  ;;  %v17979_v25 = vcombine.high %v366_v24, %v378_v14  ;;  %v1109_v31 = vld [vmem:[#allocation5 + $0x1fd0] sm:$0xff]  ;;  %v306_v35 = vld [vmem:[#allocation5 + $0x6b8] sm:$0xff]  ;;  %v17930_v14 = vcombine.low %v318_v50, %v330_v42 }
 0x465   :  { %8596 = vmatprep.subr.bf16.mxu1 %v18051_v23  ;;  %v1121_v23 = vld [vmem:[#allocation5 + $0x2030] sm:$0xff] }
 0x466   :  { %v18720_v28 = vcombine.low %v1109_v31, %v1121_v23 }
 0x467   :  { %8554 = vmatpush2.bf16.msra.mxu0 %v18816_v11  ;;  %v18721_v11 = vcombine.high %v1109_v31, %v1121_v23  ;;  %v1038_v31 = vld [vmem:[#allocation5 + $0x1d98] sm:$0xff] }
 0x468   :  { %8597 = vmatpush2.bf16.msra.mxu1 %v18050_v51  ;;  %8555 = vmatprep.subr.bf16.mxu0 %v18793_v16  ;;  %v17955_v51 = vcombine.high %v342_v9, %v354_v52  ;;  %v1085_v16 = vld [vmem:[#allocation5 + $0x1f10] sm:$0xff]  ;;  %v1050_v23 = vld [vmem:[#allocation5 + $0x1df8] sm:$0xff]  ;;  %v17906_v52 = vcombine.low %v294_v48, %v306_v35 }
 0x469   :  { %8598 = vmatprep.subr.bf16.mxu1 %v18027_v47  ;;  %v1097_v47 = vld [vmem:[#allocation5 + $0x1f70] sm:$0xff] }
 0x46a   :  { %v18696_v24 = vcombine.low %v1085_v16, %v1097_v47 }
 0x46b   :  { %8556 = vmatpush2.bf16.msra.mxu0 %v18792_v61  ;;  %v18697_v61 = vcombine.high %v1085_v16, %v1097_v47  ;;  %v1014_v16 = vld [vmem:[#allocation5 + $0x1cd8] sm:$0xff] }
 0x46c   :  { %8599 = vmatpush2.bf16.msra.mxu1 %v18026_v43  ;;  %8557 = vmatprep.subr.bf16.mxu0 %v18769_v45  ;;  %v17931_v43 = vcombine.high %v318_v50, %v330_v42  ;;  %v1061_v45 = vld [vmem:[#allocation5 + $0x1e50] sm:$0xff]  ;;  %v1026_v47 = vld [vmem:[#allocation5 + $0x1d38] sm:$0xff]  ;;  %v22491_v42 = vpop.f32.mrf.mxu0 }
 0x46d   :  { %8600 = vmatprep.subr.bf16.mxu1 %v18003_v33  ;;  %v1073_v33 = vld [vmem:[#allocation5 + $0x1eb0] sm:$0xff]  ;;  %23217 = vst [vmem:[#allocation52_spill] sm:$0xff] %v22491_v42 }
 0x46e   :  { %v18672_v9 = vcombine.low %v1061_v45, %v1073_v33 }
 0x46f   :  { %8558 = vmatpush2.bf16.msra.mxu0 %v18768_v36  ;;  %v18673_v36 = vcombine.high %v1061_v45, %v1073_v33  ;;  %v618_v45 = vld [vmem:[#allocation5 + $0x1078] sm:$0xff] }
 0x470   :  { %8601 = vmatpush2.bf16.msra.mxu1 %v18002_v8  ;;  %8559 = vmatprep.subr.bf16.mxu0 %v18745_v12  ;;  %v17907_v8 = vcombine.high %v294_v48, %v306_v35  ;;  %v654_v12 = vld [vmem:[#allocation5 + $0x1198] sm:$0xff] }
 0x471   :  { %8602 = vmatprep.subr.bf16.mxu1 %v17979_v25  ;;  %v666_v25 = vld [vmem:[#allocation5 + $0x11f8] sm:$0xff] }
 0x472   :  { %v18266_v50 = vcombine.low %v654_v12, %v666_v25  ;;  %v22493_v48 = vld [vmem:[#allocation2 + $0x10] ss:$24 sps:$4 sm:$0xff]  }
 0x473   :  { %8560 = vmatpush2.bf16.msra.mxu0 %v18744_v1  ;;  %v18267_v1 = vcombine.high %v654_v12, %v666_v25  ;;  %v990_v35 = vld [vmem:[#allocation5 + $0x1c18] sm:$0xff]  ;;  %v18626_v25 = vcombine.low %v1014_v16, %v1026_v47 }
 0x474   :  { %8603 = vmatpush2.bf16.msra.mxu1 %v17978_v27  ;;  %8561 = vmatprep.subr.bf16.mxu0 %v18721_v11  ;;  %v18651_v27 = vcombine.high %v1038_v31, %v1050_v23  ;;  %v630_v11 = vld [vmem:[#allocation5 + $0x10d8] sm:$0xff] }
 0x475   :  { %8604 = vmatprep.subr.bf16.mxu1 %v17955_v51  ;;  %v642_v51 = vld [vmem:[#allocation5 + $0x1138] sm:$0xff] }
 0x477   :  { %8562 = vmatpush2.bf16.msra.mxu0 %v18720_v28  ;;  %v18650_v28 = vcombine.low %v1038_v31, %v1050_v23 }
 0x478   :  { %8605 = vmatpush2.bf16.msra.mxu1 %v17954_v0  ;;  %8563 = vmatprep.subr.bf16.mxu0 %v18697_v61  ;;  %v18243_v0 = vcombine.high %v630_v11, %v642_v51  ;;  %v18627_v61 = vcombine.high %v1014_v16, %v1026_v47 }
 0x479   :  { %8606 = vmatprep.subr.bf16.mxu1 %v17931_v43  ;;  %v606_v43 = vld [vmem:[#allocation5 + $0x1018] sm:$0xff] }
 0x47a   :  { %v18219_v31 = vcombine.high %v606_v43, %v618_v45 }
 0x47b   :  { %8564 = vmatpush2.bf16.msra.mxu0 %v18696_v24  ;;  %v1002_v24 = vld [vmem:[#allocation5 + $0x1c78] sm:$0xff] }
 0x47c   :  { %8607 = vmatpush2.bf16.msra.mxu1 %v17930_v14  ;;  %8565 = vmatprep.subr.bf16.mxu0 %v18673_v36  ;;  %v18242_v36 = vcombine.low %v630_v11, %v642_v51  ;;  %v966_v11 = vld [vmem:[#allocation5 + $0x1b58] sm:$0xff] }
 0x47d   :  { %8608 = vmatprep.subr.bf16.mxu1 %v17907_v8  ;;  %v22501_v8 = vsub.s32 1, %v22093_v15  ;;  %v978_v51 = vld [vmem:[#allocation5 + $0x1bb8] sm:$0xff] }
 0x47f   :  { %8566 = vmatpush2.bf16.msra.mxu0 %v18672_v9  ;;  %v18603_v9 = vcombine.high %v990_v35, %v1002_v24 }
 0x480   :  { %8609 = vmatpush2.bf16.msra.mxu1 %v17906_v52  ;;  %8621 = vmatprep.subr.bf16.mxu0 %v18267_v1  ;;  %v594_v52 = vld [vmem:[#allocation5 + $0xfb8] sm:$0xff] }
 0x481   :  { %8664 = vmatprep.subr.bf16.mxu1 %v18651_v27  ;;  %v21874_v1 = vld [vmem:[#allocation2 + $0xc] ss:$24 sps:$4 sm:$0xff]  }
 0x482   :  { %v8311_v33 = vpop.f32.mrf.mxu0  ;;  %8568 = vmatmul.mubr.bf16.vlgmr.msra.gmra.mxu0 %v22493_v48 }
 0x483   :  { %v22497_v14 = vadd.f32 %v8311_v33, %v22481_v17  ;;  %8611 = vmatmul.mubr.bf16.vlgmr.msra.gmra.mxu1 %v22475_v39  ;;  %8622 = vmatpush1.bf16.msra.mxu0 %v18266_v50  ;;  %v582_v17 = vld [vmem:[#allocation5 + $0xf58] sm:$0xff]  ;;  %v22508_v39 = vsub.s32 3, %v22093_v15  ;;  %v18218_v50 = vcombine.low %v606_v43, %v618_v45 }
 0x484   :  { %8665 = vmatpush1.bf16.msra.mxu1 %v18650_v28  ;;  %v22503_v12 = vpop.f32.mrf.mxu0  ;;  %8623 = vmatprep.subr.bf16.mxu0 %v18243_v0  ;;  %v22515_v28 = vld [vmem:[#allocation7] sm:$0xff]  ;;  %v18195_v33 = vcombine.high %v582_v17, %v594_v52  ;;  %v942_v45 = vld [vmem:[#allocation5 + $0x1a98] sm:$0xff] }
 0x485   :  { %23218 = vst [vmem:[#allocation53_spill] sm:$0xff] %v22503_v12  ;;  %v8771_v23 = vmul.f32 %v22497_v14, %v22497_v14  ;;  %8666 = vmatprep.subr.bf16.mxu1 %v18627_v61  ;;  %8653 = vmatprep.mubr.bf16.mxu0 %v21874_v1  ;;  %23219 = vst [vmem:[#allocation54_spill] sm:$0xff] %v22508_v39  ;;  %v1256_v0 = vrot.slane %v22515_v28, %v22501_v8  ;;  %v558_v12 = vld [vmem:[#allocation5 + $0xe98] sm:$0xff] }
 0x486   :  { %v8315_v27 = vpop.f32.mrf.mxu0  ;;  %8696 = vmatprep.mubr.bf16.mxu1 %v22485_v55  ;;  %v18602_v61 = vcombine.low %v990_v35, %v1002_v24  ;;  %v1264_v43 = vrot.slane %v22515_v28, %v22508_v39  ;;  %v18194_v24 = vcombine.low %v582_v17, %v594_v52  ;;  %v930_v17 = vld [vmem:[#allocation5 + $0x1a38] sm:$0xff] }
 0x487   :  { %v8819_v16 = vmul.f32 %v8771_v23, %v22497_v14  ;;  %v22513_v47 = vadd.f32 %v8315_v27, %v22489_v32  ;;  %8624 = vmatpush1.bf16.msra.mxu0 %v18242_v36  ;;  %v18579_v23 = vcombine.high %v966_v11, %v978_v51  ;;  %v570_v32 = vld [vmem:[#allocation5 + $0xef8] sm:$0xff]  ;;  %v7200_v36 = vadd.f32 %v22115_v62, %v1256_v0 }
 0x488   :  { %8667 = vmatpush1.bf16.msra.mxu1 %v18626_v25  ;;  %8625 = vmatprep.subr.bf16.mxu0 %v18219_v31  ;;  %v954_v27 = vld [vmem:[#allocation5 + $0x1af8] sm:$0xff]  ;;  %v7196_v31 = vadd.f32 %v22103_v59, %v1256_v0  ;;  %v7329_v42 = vadd.f32 %v22158_v60, %v1264_v43  ;;  %v18147_v0 = vcombine.high %v534_v5, %v546_v54 }
 0x489   :  { %v8867_v1 = vmul.f32 0.044715, %v8819_v16  ;;  %v8795_v55 = vmul.f32 %v22513_v47, %v22513_v47  ;;  %8668 = vmatprep.subr.bf16.mxu1 %v18603_v9  ;;  %v18578_v9 = vcombine.low %v966_v11, %v978_v51  ;;  %v18171_v16 = vcombine.high %v558_v12, %v570_v32 }
 0x48a   :  { %v18555_v57 = vcombine.high %v942_v45, %v954_v27  ;;  %v7372_v59 = vadd.f32 %v22193_v56, %v7329_v42  ;;  %v18170_v11 = vcombine.low %v558_v12, %v570_v32  ;;  %v18554_v51 = vcombine.low %v942_v45, %v954_v27  ;;  %v894_v42 = vld [vmem:[#allocation5 + $0x1918] sm:$0xff] }
 0x48b   :  { %v8915_v25 = vadd.f32 %v8867_v1, %v22497_v14  ;;  %v8843_v35 = vmul.f32 %v8795_v55, %v22513_v47  ;;  %8626 = vmatpush1.bf16.msra.mxu0 %v18218_v50  ;;  %v7243_v1 = vadd.f32 %v22145_v19, %v7200_v36  ;;  %v7325_v55 = vadd.f32 %v22150_v37, %v1264_v43  ;;  %v918_v50 = vld [vmem:[#allocation5 + $0x19d8] sm:$0xff] }
 0x48c   :  { %8669 = vmatpush1.bf16.msra.mxu1 %v18602_v61  ;;  %8627 = vmatprep.subr.bf16.mxu0 %v18195_v33  ;;  %v7239_v61 = vadd.f32 %v22107_v53, %v7196_v31  ;;  %v18531_v37 = vcombine.high %v918_v50, %v930_v17  ;;  %v510_v33 = vld [vmem:[#allocation5 + $0xd18] sm:$0xff]  ;;  %v18146_v32 = vcombine.low %v534_v5, %v546_v54 }
 0x48d   :  { %v8963_v62 = vmul.f32 0.7978845, %v8915_v25  ;;  %v8891_v40 = vmul.f32 0.044715, %v8843_v35  ;;  %8670 = vmatprep.subr.bf16.mxu1 %v18579_v23  ;;  %v7368_v60 = vadd.f32 %v22164_v6, %v7325_v55  ;;  %v522_v23 = vld [vmem:[#allocation5 + $0xd78] sm:$0xff]  ;;  %v22535_v56 = vadd.f32 %v22156_v49, %v7243_v1 }
 0x48e   :  { %v22538_v12 = vadd.f32 %v22124_v10, %v7239_v61  ;;  %v22541_v6 = vadd.f32 %v22195_v30, %v7372_v59  ;;  %v18123_v36 = vcombine.high %v510_v33, %v522_v23  ;;  %v486_v43 = vld [vmem:[#allocation5 + $0xc58] sm:$0xff]  ;;  %v18122_v54 = vcombine.low %v510_v33, %v522_v23 }
 0x48f   :  { %21777 = vtanh.f32 %v8963_v62  ;;  %v8939_v52 = vadd.f32 %v8891_v40, %v22513_v47  ;;  %8628 = vmatpush1.bf16.msra.mxu0 %v18194_v24  ;;  %v906_v40 = vld [vmem:[#allocation5 + $0x1978] sm:$0xff]  ;;  %v22544_v53 = vadd.f32 %v22168_v20, %v7368_v60  ;;  %v8780_v10 = vmul.f32 %v22535_v56, %v22535_v56 }
 0x490   :  { %8671 = vmatpush1.bf16.msra.mxu1 %v18578_v9  ;;  %8629 = vmatprep.subr.bf16.mxu0 %v18171_v16  ;;  %v18507_v49 = vcombine.high %v894_v42, %v906_v40  ;;  %v498_v45 = vld [vmem:[#allocation5 + $0xcb8] sm:$0xff]  ;;  %v8756_v25 = vmul.f32 %v22538_v12, %v22538_v12  ;;  %v8782_v20 = vmul.f32 %v22541_v6, %v22541_v6 }
 0x491   :  { %v8987_v19 = vmul.f32 0.7978845, %v8939_v52  ;;  %8672 = vmatprep.subr.bf16.mxu1 %v18555_v57  ;;  %v18530_v57 = vcombine.low %v918_v50, %v930_v17  ;;  %v870_v27 = vld [vmem:[#allocation5 + $0x1858] sm:$0xff]  ;;  %v8758_v5 = vmul.f32 %v22544_v53, %v22544_v53  ;;  %v18506_v35 = vcombine.low %v894_v42, %v906_v40 }
 0x492   :  { %v882_v30 = vld [vmem:[#allocation5 + $0x18b8] sm:$0xff]  ;;  %v18099_v24 = vcombine.high %v486_v43, %v498_v45  ;;  %v8828_v62 = vmul.f32 %v8780_v10, %v22535_v56  ;;  %v8804_v50 = vmul.f32 %v8756_v25, %v22538_v12  ;;  %v8830_v17 = vmul.f32 %v8782_v20, %v22541_v6 }
 0x493   :  { %21779 = vtanh.f32 %v8987_v19  ;;  %8630 = vmatpush1.bf16.msra.mxu0 %v18170_v11  ;;  %v18483_v31 = vcombine.high %v870_v27, %v882_v30  ;;  %v846_v9 = vld [vmem:[#allocation5 + $0x1798] sm:$0xff]  ;;  %v18098_v59 = vcombine.low %v486_v43, %v498_v45  ;;  %v8806_v11 = vmul.f32 %v8758_v5, %v22544_v53 }
 0x494   :  { %8673 = vmatpush1.bf16.msra.mxu1 %v18554_v51  ;;  %8631 = vmatprep.subr.bf16.mxu0 %v18147_v0  ;;  %v858_v16 = vld [vmem:[#allocation5 + $0x17f8] sm:$0xff]  ;;  %v18482_v60 = vcombine.low %v870_v27, %v882_v30  ;;  %v8878_v42 = vmul.f32 0.044715, %v8830_v17  ;;  %v8723_v10 = vmul.f32 0.5, %v22497_v14  ;;  %v8747_v27 = vmul.f32 0.5, %v22513_v47 }
 0x495   :  { %8674 = vmatprep.subr.bf16.mxu1 %v18531_v37  ;;  %v1230_v1 = vld [vmem:[#allocation5 + $0x2398] sm:$0xff]  ;;  %v18459_v51 = vcombine.high %v846_v9, %v858_v16  ;;  %v8876_v37 = vmul.f32 0.044715, %v8828_v62  ;;  %v18458_v40 = vcombine.low %v846_v9, %v858_v16 }
 0x496   :  { %v1242_v55 = vld [vmem:[#allocation5 + $0x23f8] sm:$0xff] }
 0x497   :  { %8632 = vmatpush1.bf16.msra.mxu0 %v18146_v32  ;;  %v18843_v0 = vcombine.high %v1230_v1, %v1242_v55  ;;  %v822_v61 = vld [vmem:[#allocation5 + $0x16d8] sm:$0xff]  ;;  %v18842_v43 = vcombine.low %v1230_v1, %v1242_v55  ;;  %v8924_v5 = vadd.f32 %v8876_v37, %v22535_v56 }
 0x498   :  { %8675 = vmatpush1.bf16.msra.mxu1 %v18530_v57  ;;  %8633 = vmatprep.subr.bf16.mxu0 %v18123_v36  ;;  %v834_v19 = vld [vmem:[#allocation5 + $0x1738] sm:$0xff]  ;;  %v8852_v36 = vmul.f32 0.044715, %v8804_v50 }
 0x499   :  { %8676 = vmatprep.subr.bf16.mxu1 %v18507_v49  ;;  %v1206_v33 = vld [vmem:[#allocation5 + $0x22d8] sm:$0xff]  ;;  %v8854_v49 = vmul.f32 0.044715, %v8806_v11  ;;  %v18435_v45 = vcombine.high %v822_v61, %v834_v19  ;;  %v18434_v9 = vcombine.low %v822_v61, %v834_v19  ;;  %v8972_v11 = vmul.f32 0.7978845, %v8924_v5 }
 0x49a   :  { %v1218_v23 = vld [vmem:[#allocation5 + $0x2338] sm:$0xff]  ;;  %v8900_v1 = vadd.f32 %v8852_v36, %v22538_v12 }
 0x49b   :  { %8634 = vmatpush1.bf16.msra.mxu0 %v18122_v54  ;;  %v18819_v30 = vcombine.high %v1206_v33, %v1218_v23  ;;  %v798_v25 = vld [vmem:[#allocation5 + $0x1618] sm:$0xff]  ;;  %v18818_v14 = vcombine.low %v1206_v33, %v1218_v23  ;;  %v8902_v55 = vadd.f32 %v8854_v49, %v22544_v53  ;;  %21781 = vtanh.f32 %v8972_v11 }
 0x49c   :  { %v21778_v52 = vpop.eup %21777  ;;  %8677 = vmatpush1.bf16.msra.mxu1 %v18506_v35  ;;  %8635 = vmatprep.subr.bf16.mxu0 %v18099_v24  ;;  %v810_v20 = vld [vmem:[#allocation5 + $0x1678] sm:$0xff]  ;;  %v8948_v19 = vmul.f32 0.7978845, %v8900_v1  ;;  %v22566_v1 = vpop.f32.mrf.mxu1 }
 0x49d   :  { %8678 = vmatprep.subr.bf16.mxu1 %v18483_v31  ;;  %v9059_v32 = vadd.f32 1.0, %v21778_v52  ;;  %v1182_v35 = vld [vmem:[#allocation5 + $0x2218] sm:$0xff]  ;;  %v8926_v31 = vadd.f32 %v8878_v42, %v22541_v6  ;;  %v18411_v47 = vcombine.high %v798_v25, %v810_v20  ;;  %v18410_v61 = vcombine.low %v798_v25, %v810_v20 }
 0x49e   :  { %v1194_v24 = vld [vmem:[#allocation5 + $0x2278] sm:$0xff]  ;;  %v8950_v23 = vmul.f32 0.7978845, %v8902_v55 }
 0x49f   :  { %8636 = vmatpush1.bf16.msra.mxu0 %v18098_v59  ;;  %v9107_v16 = vmul.f32 %v9059_v32, %v8723_v10  ;;  %v18795_v50 = vcombine.high %v1182_v35, %v1194_v24  ;;  %v774_v17 = vld [vmem:[#allocation5 + $0x1558] sm:$0xff]  ;;  %v18794_v37 = vcombine.low %v1182_v35, %v1194_v24 }
 0x4a0   :  { %v21780_v57 = vpop.eup %21779  ;;  %8679 = vmatpush1.bf16.msra.mxu1 %v18482_v60  ;;  %8637 = vmatprep.subr.bf16.mxu0 %v18459_v51  ;;  %v786_v59 = vld [vmem:[#allocation5 + $0x15b8] sm:$0xff] }
 0x4a1   :  { %8680 = vmatprep.subr.bf16.mxu1 %v18843_v0  ;;  %v9083_v54 = vadd.f32 1.0, %v21780_v57  ;;  %v1158_v60 = vld [vmem:[#allocation5 + $0x2158] sm:$0xff]  ;;  %v8974_v0 = vmul.f32 0.7978845, %v8926_v31  ;;  %v18387_v33 = vcombine.high %v774_v17, %v786_v59  ;;  %v18386_v49 = vcombine.low %v774_v17, %v786_v59 }
 0x4a2   :  { %v1170_v51 = vld [vmem:[#allocation5 + $0x21b8] sm:$0xff] }
 0x4a3   :  { %8638 = vmatpush2.bf16.msra.mxu0 %v18458_v40  ;;  %v9131_v62 = vmul.f32 %v9083_v54, %v8747_v27  ;;  %v18771_v42 = vcombine.high %v1158_v60, %v1170_v51  ;;  %v750_v40 = vld [vmem:[#allocation5 + $0x1498] sm:$0xff]  ;;  %21783 = vtanh.f32 %v8974_v0 }
 0x4a4   :  { %8681 = vmatpush2.bf16.msra.mxu1 %v18842_v43  ;;  %8639 = vmatprep.subr.bf16.mxu0 %v18435_v45  ;;  %v762_v32 = vld [vmem:[#allocation5 + $0x14f8] sm:$0xff]  ;;  %21785 = vtanh.f32 %v8948_v19  ;;  %v18770_v43 = vcombine.low %v1158_v60, %v1170_v51 }
 0x4a5   :  { %8682 = vmatprep.subr.bf16.mxu1 %v18819_v30  ;;  %v22564_v52 = vpack.c.bf16 %v9131_v62, %v9107_v16  ;;  %v1134_v57 = vld [vmem:[#allocation5 + $0x2098] sm:$0xff]  ;;  %v18363_v45 = vcombine.high %v750_v40, %v762_v32  ;;  %21787 = vtanh.f32 %v8950_v23  ;;  %v18362_v54 = vcombine.low %v750_v40, %v762_v32 }
 0x4a6   :  { %v1146_v36 = vld [vmem:[#allocation5 + $0x20f8] sm:$0xff] }
 0x4a7   :  { %8640 = vmatpush2.bf16.msra.mxu0 %v18434_v9  ;;  %v18747_v10 = vcombine.high %v1134_v57, %v1146_v36  ;;  %v726_v27 = vld [vmem:[#allocation5 + $0x13d8] sm:$0xff]  ;;  %v18746_v5 = vcombine.low %v1134_v57, %v1146_v36 }
 0x4a8   :  { %8683 = vmatpush2.bf16.msra.mxu1 %v18818_v14  ;;  %8641 = vmatprep.subr.bf16.mxu0 %v18411_v47  ;;  %v738_v30 = vld [vmem:[#allocation5 + $0x1438] sm:$0xff]  ;;  %v21782_v0 = vpop.eup %21781 }
 0x4a9   :  { %8684 = vmatprep.subr.bf16.mxu1 %v18795_v50  ;;  %v1110_v25 = vld [vmem:[#allocation5 + $0x1fd8] sm:$0xff]  ;;  %v18339_v35 = vcombine.high %v726_v27, %v738_v30  ;;  %v18338_v14 = vcombine.low %v726_v27, %v738_v30  ;;  %v8354_v50 = vpop.f32.mrf.mxu1  ;;  %v9068_v57 = vadd.f32 1.0, %v21782_v0  ;;  %v1324_v30 = vrot.slane %v22467_v21, %v22148_v3 }
 0x4aa   :  { %v1122_v20 = vld [vmem:[#allocation5 + $0x2038] sm:$0xff] }
 0x4ab   :  { %8642 = vmatpush2.bf16.msra.mxu0 %v18410_v61  ;;  %v18723_v24 = vcombine.high %v1110_v25, %v1122_v20  ;;  %v702_v31 = vld [vmem:[#allocation5 + $0x1318] sm:$0xff]  ;;  %v18722_v47 = vcombine.low %v1110_v25, %v1122_v20  ;;  %v20022_v20 = vld [vmem:[#allocation8 + $0x454] ss:$24 sps:$4 sm:$0xff]  }
 0x4ac   :  { %8685 = vmatpush2.bf16.msra.mxu1 %v18794_v37  ;;  %8643 = vmatprep.subr.bf16.mxu0 %v18387_v33  ;;  %v714_v9 = vld [vmem:[#allocation5 + $0x1378] sm:$0xff] }
 0x4ad   :  { %8686 = vmatprep.subr.bf16.mxu1 %v18771_v42  ;;  %v1086_v16 = vld [vmem:[#allocation5 + $0x1f18] sm:$0xff]  ;;  %v18315_v55 = vcombine.high %v702_v31, %v714_v9  ;;  %v18314_v61 = vcombine.low %v702_v31, %v714_v9  ;;  %v22568_v42 = vpop.f32.mrf.mxu1  ;;  %v20017_v31 = vld [vmem:[#allocation8 + $0x150] ss:$24 sps:$4 sm:$0xff]   ;;  %v8710_v9 = vmul.f32 0.5, %v22544_v53 }
 0x4ae   :  { %v1098_v62 = vld [vmem:[#allocation5 + $0x1f78] sm:$0xff] }
 0x4af   :  { %8644 = vmatpush2.bf16.msra.mxu0 %v18386_v49  ;;  %v18699_v17 = vcombine.high %v1086_v16, %v1098_v62  ;;  %v678_v59 = vld [vmem:[#allocation5 + $0x1258] sm:$0xff]  ;;  %v18698_v37 = vcombine.low %v1086_v16, %v1098_v62  ;;  %v8358_v25 = vpop.f32.mrf.mxu1  ;;  %v22576_v62 = vpop.f32.mrf.mxu0 }
 0x4b0   :  { %8687 = vmatpush2.bf16.msra.mxu1 %v18770_v43  ;;  %8645 = vmatprep.subr.bf16.mxu0 %v18363_v45  ;;  %v690_v11 = vld [vmem:[#allocation5 + $0x12b8] sm:$0xff]  ;;  %v21784_v19 = vpop.eup %21783  ;;  %v20019_v45 = vld [vmem:[#allocation8 + $0x154] ss:$24 sps:$4 sm:$0xff]  }
 0x4b1   :  { %8688 = vmatprep.subr.bf16.mxu1 %v18747_v10  ;;  %v1062_v60 = vld [vmem:[#allocation5 + $0x1e58] sm:$0xff]  ;;  %v18291_v33 = vcombine.high %v678_v59, %v690_v11  ;;  %v21786_v23 = vpop.eup %21785  ;;  %v18290_v36 = vcombine.low %v678_v59, %v690_v11  ;;  %v9070_v49 = vadd.f32 1.0, %v21784_v19  ;;  %v8732_v10 = vmul.f32 0.5, %v22535_v56  ;;  %v20020_v56 = vld [vmem:[#allocation8 + $0x450] ss:$24 sps:$4 sm:$0xff]  }
 0x4b2   :  { %v1074_v51 = vld [vmem:[#allocation5 + $0x1eb8] sm:$0xff]  ;;  %v21788_v32 = vpop.eup %21787  ;;  %v9044_v27 = vadd.f32 1.0, %v21786_v23  ;;  %v20031_v19 = vld [vmem:[#allocation8 + $0xf4] ss:$24 sps:$4 sm:$0xff]  }
 0x4b3   :  { %8646 = vmatpush2.bf16.msra.mxu0 %v18362_v54  ;;  %v18675_v40 = vcombine.high %v1062_v60, %v1074_v51  ;;  %v18674_v43 = vcombine.low %v1062_v60, %v1074_v51  ;;  %v8734_v54 = vmul.f32 0.5, %v22541_v6  ;;  %v20028_v11 = vld [vmem:[#allocation8 + $0x424] ss:$24 sps:$4 sm:$0xff]   ;;  %v20023_v0 = vld [vmem:[#allocation8 + $0x120] ss:$24 sps:$4 sm:$0xff]  }
 0x4b4   :  { %8689 = vmatpush2.bf16.msra.mxu1 %v18746_v5  ;;  %8647 = vmatprep.subr.bf16.mxu0 %v18339_v35  ;;  %v9046_v5 = vadd.f32 1.0, %v21788_v32  ;;  %v8708_v35 = vmul.f32 0.5, %v22538_v12  ;;  %v21876_v12 = vld [vmem:[#allocation2 + $0x8] ss:$24 sps:$4 sm:$0xff]  }
 0x4b5   :  { %8690 = vmatprep.subr.bf16.mxu1 %v18723_v24  ;;  %v9116_v24 = vmul.f32 %v9068_v57, %v8732_v10  ;;  %v9118_v16 = vmul.f32 %v9070_v49, %v8734_v54  ;;  %v22597_v57 = vsub.s32 7, %v22093_v15  ;;  %v20032_v10 = vld [vmem:[#allocation8 + $0x3f0] ss:$24 sps:$4 sm:$0xff]  }
 0x4b6   :  { %v9092_v21 = vmul.f32 %v9044_v27, %v8708_v35  ;;  %v9094_v6 = vmul.f32 %v9046_v5, %v8710_v9  ;;  %v20037_v27 = vld [vmem:[#allocation8 + $0xc4] ss:$24 sps:$4 sm:$0xff]   ;;  %v20038_v9 = vld [vmem:[#allocation8 + $0x3c0] ss:$24 sps:$4 sm:$0xff]  }
 0x4b7   :  { %8648 = vmatpush2.bf16.msra.mxu0 %v18338_v14  ;;  %v8355_v14 = vadd.f32 %v8354_v50, %v1324_v30  ;;  %v1280_v54 = vrot.slane %v22515_v28, %v22597_v57 }
 0x4b8   :  { %8691 = vmatpush2.bf16.msra.mxu1 %v18722_v47  ;;  %8649 = vmatprep.subr.bf16.mxu0 %v18315_v55  ;;  %v22578_v47 = vpop.f32.mrf.mxu1  ;;  %v20025_v55 = vld [vmem:[#allocation8 + $0x124] ss:$24 sps:$4 sm:$0xff]   ;;  %v22580_v59 = vpack.c.bf16 %v9116_v24, %v9092_v21  ;;  %v22583_v51 = vpack.c.bf16 %v9118_v16, %v9094_v6  ;;  %v20035_v24 = vld [vmem:[#allocation8 + $0xc0] ss:$24 sps:$4 sm:$0xff]   ;;  %v20043_v16 = vld [vmem:[#allocation8 + $0x94] ss:$24 sps:$4 sm:$0xff]  }
 0x4b9   :  { %8692 = vmatprep.subr.bf16.mxu1 %v18699_v17 }
 0x4bb   :  { %8650 = vmatpush2.bf16.msra.mxu0 %v18314_v61  ;;  %v20026_v61 = vld [vmem:[#allocation8 + $0x420] ss:$24 sps:$4 sm:$0xff]  }
 0x4bc   :  { %8693 = vmatpush2.bf16.msra.mxu1 %v18698_v37  ;;  %8651 = vmatprep.subr.bf16.mxu0 %v18291_v33  ;;  %v8359_v37 = vadd.f32 %v8358_v25, %v1324_v30 }
 0x4bd   :  { %8694 = vmatprep.subr.bf16.mxu1 %v18675_v40  ;;  %v22594_v40 = vsub.s32 5, %v22093_v15 }
 0x4bf   :  { %8652 = vmatpush2.bf16.msra.mxu0 %v18290_v36  ;;  %23220 = vst [vmem:[#allocation55_spill] sm:$0xff] %v22594_v40  ;;  %v1272_v15 = vrot.slane %v22515_v28, %v22594_v40  ;;  %v20046_v28 = vld [vmem:[#allocation8 + $0x394] ss:$24 sps:$4 sm:$0xff]  }
 0x4c0   :  { %8695 = vmatpush2.bf16.msra.mxu1 %v18674_v43  ;;  %16107 = vmatprep.subr.bf16.mxu0 %v20019_v45  ;;  %v20029_v43 = vld [vmem:[#allocation8 + $0xf0] ss:$24 sps:$4 sm:$0xff]  }
 0x4c1   :  { %16150 = vmatprep.subr.bf16.mxu1 %v20022_v20  ;;  %v20040_v20 = vld [vmem:[#allocation8 + $0x3c4] ss:$24 sps:$4 sm:$0xff]   ;;  %v7454_v6 = vadd.f32 %v22201_v38, %v1272_v15 }
 0x4c2   :  { %v8397_v17 = vpop.f32.mrf.mxu0  ;;  %8654 = vmatmul.mubr.bf16.vlgmr.msra.gmra.mxu0 %v21876_v12  ;;  %v20052_v38 = vld [vmem:[#allocation8 + $0x364] ss:$24 sps:$4 sm:$0xff]  }
 0x4c3   :  { %v8398_v53 = vadd.f32 %v8397_v17, %v8355_v14  ;;  %v8440_v60 = vpop.f32.mrf.mxu1  ;;  %8697 = vmatmul.mubr.bf16.vlgmr.msra.gmra.mxu1 %v22493_v48  ;;  %16108 = vmatpush1.bf16.msra.mxu0 %v20017_v31  ;;  %v20034_v48 = vld [vmem:[#allocation8 + $0x3f4] ss:$24 sps:$4 sm:$0xff]   ;;  %v7458_v31 = vadd.f32 %v22213_v41, %v1272_v15 }
 0x4c4   :  { %16139 = vmatprep.mubr.bf16.mxu0 %v22580_v59  ;;  %16151 = vmatpush1.bf16.msra.mxu1 %v20020_v56  ;;  %v22586_v50 = vpop.f32.mrf.mxu0  ;;  %v7587_v56 = vadd.f32 %v22253_v63, %v1280_v54  ;;  %v20044_v63 = vld [vmem:[#allocation8 + $0x390] ss:$24 sps:$4 sm:$0xff]  }
 0x4c5   :  { %v22588_v33 = vadd.f32 %v8440_v60, %v8398_v53  ;;  %16182 = vmatprep.mubr.bf16.mxu1 %v22583_v51  ;;  %v22591_v23 = vpop.f32.mrf.mxu1  ;;  %16109 = vmatprep.subr.bf16.mxu0 %v20025_v55  ;;  %v7583_v55 = vadd.f32 %v22248_v26, %v1280_v54  ;;  %v7501_v53 = vadd.f32 %v22243_v34, %v7458_v31  ;;  %v20049_v60 = vld [vmem:[#allocation8 + $0x64] ss:$24 sps:$4 sm:$0xff]   ;;  %v20062_v54 = vld [vmem:[#allocation8 + $0x300] ss:$24 sps:$4 sm:$0xff]  }
 0x4c6   :  { %v8401_v32 = vpop.f32.mrf.mxu0  ;;  %16152 = vmatprep.subr.bf16.mxu1 %v20028_v11  ;;  %v7630_v17 = vadd.f32 %v22287_v7, %v7587_v56  ;;  %v20041_v11 = vld [vmem:[#allocation8 + $0x90] ss:$24 sps:$4 sm:$0xff]   ;;  %v7497_v26 = vadd.f32 %v22205_v44, %v7454_v6  ;;  %v20058_v44 = vld [vmem:[#allocation8 + $0x334] ss:$24 sps:$4 sm:$0xff]  }
 0x4c7   :  { %v8773_v36 = vmul.f32 %v22588_v33, %v22588_v33  ;;  %v8402_v49 = vadd.f32 %v8401_v32, %v8359_v37  ;;  %16110 = vmatpush1.bf16.msra.mxu0 %v20023_v0  ;;  %v8444_v45 = vpop.f32.mrf.mxu1  ;;  %v7626_v0 = vadd.f32 %v22259_v13, %v7583_v55  ;;  %v22622_v7 = vadd.f32 %v22251_v46, %v7501_v53  ;;  %v20047_v37 = vld [vmem:[#allocation8 + $0x60] ss:$24 sps:$4 sm:$0xff]   ;;  %v20055_v32 = vld [vmem:[#allocation8 + $0x34] ss:$24 sps:$4 sm:$0xff]   ;;  %v20065_v56 = vld [vmem:[#allocation8 + $0x2d0] ss:$24 sps:$4 sm:$0xff]  }
 0x4c8   :  { %16153 = vmatpush1.bf16.msra.mxu1 %v20026_v61  ;;  %16111 = vmatprep.subr.bf16.mxu0 %v20031_v19  ;;  %v22625_v19 = vadd.f32 %v22289_v2, %v7630_v17  ;;  %v20050_v13 = vld [vmem:[#allocation8 + $0x360] ss:$24 sps:$4 sm:$0xff]   ;;  %v20076_v55 = vld [vmem:[#allocation8 + $0x5a4] ss:$24 sps:$4 sm:$0xff]   ;;  %v8725_v53 = vmul.f32 0.5, %v22588_v33 }
 0x4c9   :  { %v8821_v30 = vmul.f32 %v8773_v36, %v22588_v33  ;;  %v22602_v25 = vadd.f32 %v8444_v45, %v8402_v49  ;;  %16154 = vmatprep.subr.bf16.mxu1 %v20034_v48  ;;  %v22628_v48 = vadd.f32 %v22222_v58, %v7497_v26  ;;  %v22631_v36 = vadd.f32 %v22263_v29, %v7626_v0  ;;  %v20053_v49 = vld [vmem:[#allocation8 + $0x30] ss:$24 sps:$4 sm:$0xff]   ;;  %v20061_v45 = vld [vmem:[#allocation8 + $0x4] ss:$24 sps:$4 sm:$0xff]   ;;  %v20079_v26 = vld [vmem:[#allocation8 + $0x274] ss:$24 sps:$4 sm:$0xff]  }
 0x4ca   :  { %v8784_v46 = vmul.f32 %v22622_v7, %v22622_v7  ;;  %v8786_v2 = vmul.f32 %v22625_v19, %v22625_v19 }
 0x4cb   :  { %v8869_v5 = vmul.f32 0.044715, %v8821_v30  ;;  %v8797_v35 = vmul.f32 %v22602_v25, %v22602_v25  ;;  %16112 = vmatpush1.bf16.msra.mxu0 %v20029_v43  ;;  %v8760_v58 = vmul.f32 %v22628_v48, %v22628_v48  ;;  %v20056_v43 = vld [vmem:[#allocation8 + $0x330] ss:$24 sps:$4 sm:$0xff]   ;;  %v8762_v29 = vmul.f32 %v22631_v36, %v22631_v36 }
 0x4cc   :  { %16155 = vmatpush1.bf16.msra.mxu1 %v20032_v10  ;;  %16113 = vmatprep.subr.bf16.mxu0 %v20037_v27  ;;  %v20064_v10 = vld [vmem:[#allocation8 + $0x304] ss:$24 sps:$4 sm:$0xff]   ;;  %v8832_v27 = vmul.f32 %v8784_v46, %v22622_v7  ;;  %v8834_v30 = vmul.f32 %v8786_v2, %v22625_v19 }
 0x4cd   :  { %v8917_v21 = vadd.f32 %v8869_v5, %v22588_v33  ;;  %v8845_v14 = vmul.f32 %v8797_v35, %v22602_v25  ;;  %16156 = vmatprep.subr.bf16.mxu1 %v20040_v20  ;;  %v20059_v20 = vld [vmem:[#allocation8] ss:$24 sps:$4 sm:$0xff]   ;;  %v8808_v15 = vmul.f32 %v8760_v58, %v22628_v48  ;;  %v20067_v5 = vld [vmem:[#allocation8 + $0x2d4] ss:$24 sps:$4 sm:$0xff]   ;;  %v8810_v35 = vmul.f32 %v8762_v29, %v22631_v36  ;;  %v20077_v33 = vld [vmem:[#allocation8 + $0x270] ss:$24 sps:$4 sm:$0xff]  }
 0x4ce   :  { %v20085_v58 = vld [vmem:[#allocation8 + $0x244] ss:$24 sps:$4 sm:$0xff]   ;;  %v20083_v29 = vld [vmem:[#allocation8 + $0x240] ss:$24 sps:$4 sm:$0xff]  }
 0x4cf   :  { %v8965_v12 = vmul.f32 0.7978845, %v8917_v21  ;;  %v8893_v41 = vmul.f32 0.044715, %v8845_v14  ;;  %16114 = vmatpush1.bf16.msra.mxu0 %v20035_v24  ;;  %v20070_v24 = vld [vmem:[#allocation8 + $0x5d4] ss:$24 sps:$4 sm:$0xff]  }
 0x4d0   :  { %16157 = vmatpush1.bf16.msra.mxu1 %v20038_v9  ;;  %16115 = vmatprep.subr.bf16.mxu0 %v20043_v16  ;;  %v8880_v9 = vmul.f32 0.044715, %v8832_v27  ;;  %v8882_v16 = vmul.f32 0.044715, %v8834_v30  ;;  %v8856_v21 = vmul.f32 0.044715, %v8808_v15 }
 0x4d1   :  { %21789 = vtanh.f32 %v8965_v12  ;;  %v8941_v61 = vadd.f32 %v8893_v41, %v22602_v25  ;;  %16158 = vmatprep.subr.bf16.mxu1 %v20046_v28  ;;  %v20068_v14 = vld [vmem:[#allocation8 + $0x5d0] ss:$24 sps:$4 sm:$0xff]   ;;  %v20073_v28 = vld [vmem:[#allocation8 + $0x2a4] ss:$24 sps:$4 sm:$0xff]   ;;  %v8858_v6 = vmul.f32 0.044715, %v8810_v35 }
 0x4d2   :  { %v8928_v41 = vadd.f32 %v8880_v9, %v22622_v7  ;;  %v20091_v27 = vld [vmem:[#allocation8 + $0x214] ss:$24 sps:$4 sm:$0xff]   ;;  %v20092_v15 = vld [vmem:[#allocation8 + $0x510] ss:$24 sps:$4 sm:$0xff]   ;;  %v20095_v35 = vld [vmem:[#allocation8 + $0x1e0] ss:$24 sps:$4 sm:$0xff]  }
 0x4d3   :  { %v8989_v34 = vmul.f32 0.7978845, %v8941_v61  ;;  %16116 = vmatpush1.bf16.msra.mxu0 %v20041_v11  ;;  %v8930_v11 = vadd.f32 %v8882_v16, %v22625_v19  ;;  %v8904_v61 = vadd.f32 %v8856_v21, %v22628_v48  ;;  %v20094_v30 = vld [vmem:[#allocation8 + $0x514] ss:$24 sps:$4 sm:$0xff]  }
 0x4d4   :  { %16159 = vmatpush1.bf16.msra.mxu1 %v20044_v63  ;;  %16117 = vmatprep.subr.bf16.mxu0 %v20049_v60  ;;  %v8749_v63 = vmul.f32 0.5, %v22602_v25  ;;  %v20071_v60 = vld [vmem:[#allocation8 + $0x2a0] ss:$24 sps:$4 sm:$0xff]   ;;  %v20106_v9 = vld [vmem:[#allocation8 + $0x4b4] ss:$24 sps:$4 sm:$0xff]  }
 0x4d5   :  { %21791 = vtanh.f32 %v8989_v34  ;;  %16160 = vmatprep.subr.bf16.mxu1 %v20052_v38  ;;  %v20074_v38 = vld [vmem:[#allocation8 + $0x5a0] ss:$24 sps:$4 sm:$0xff]   ;;  %v8906_v34 = vadd.f32 %v8858_v6, %v22631_v36  ;;  %v8978_v46 = vmul.f32 0.7978845, %v8930_v11  ;;  %v8952_v2 = vmul.f32 0.7978845, %v8904_v61 }
 0x4d6   :  { %v20118_v61 = vld [vmem:[#allocation8 + $0xa54] ss:$24 sps:$4 sm:$0xff]  }
 0x4d7   :  { %16118 = vmatpush1.bf16.msra.mxu0 %v20047_v37  ;;  %v20082_v37 = vld [vmem:[#allocation8 + $0x574] ss:$24 sps:$4 sm:$0xff]  }
 0x4d8   :  { %16161 = vmatpush1.bf16.msra.mxu1 %v20050_v13  ;;  %16119 = vmatprep.subr.bf16.mxu0 %v20055_v32 }
 0x4d9   :  { %16162 = vmatprep.subr.bf16.mxu1 %v20058_v44  ;;  %v8976_v44 = vmul.f32 0.7978845, %v8928_v41  ;;  %v20107_v41 = vld [vmem:[#allocation8 + $0x180] ss:$24 sps:$4 sm:$0xff]  }
 0x4db   :  { %16120 = vmatpush1.bf16.msra.mxu0 %v20053_v49  ;;  %v20080_v49 = vld [vmem:[#allocation8 + $0x570] ss:$24 sps:$4 sm:$0xff]   ;;  %21793 = vtanh.f32 %v8976_v44 }
 0x4dc   :  { %16163 = vmatpush1.bf16.msra.mxu1 %v20056_v43  ;;  %16121 = vmatprep.subr.bf16.mxu0 %v20061_v45  ;;  %v8954_v43 = vmul.f32 0.7978845, %v8906_v34  ;;  %v20088_v45 = vld [vmem:[#allocation8 + $0x544] ss:$24 sps:$4 sm:$0xff]   ;;  %21795 = vtanh.f32 %v8978_v46  ;;  %v8712_v34 = vmul.f32 0.5, %v22628_v48  ;;  %v8714_v46 = vmul.f32 0.5, %v22631_v36 }
 0x4dd   :  { %16164 = vmatprep.subr.bf16.mxu1 %v20064_v10  ;;  %21797 = vtanh.f32 %v8952_v2  ;;  %v20086_v10 = vld [vmem:[#allocation8 + $0x540] ss:$24 sps:$4 sm:$0xff]   ;;  %v20113_v44 = vld [vmem:[#allocation8 + $0x750] ss:$24 sps:$4 sm:$0xff]  }
 0x4de   :  { %v21790_v31 = vpop.eup %21789  ;;  %21799 = vtanh.f32 %v8954_v43  ;;  %v20116_v2 = vld [vmem:[#allocation8 + $0xa50] ss:$24 sps:$4 sm:$0xff]  }
 0x4df   :  { %16122 = vmatpush1.bf16.msra.mxu0 %v20059_v20  ;;  %v9061_v17 = vadd.f32 1.0, %v21790_v31  ;;  %v20089_v20 = vld [vmem:[#allocation8 + $0x210] ss:$24 sps:$4 sm:$0xff]   ;;  %v20103_v31 = vld [vmem:[#allocation8 + $0x1b4] ss:$24 sps:$4 sm:$0xff]  }
 0x4e0   :  { %16165 = vmatpush1.bf16.msra.mxu1 %v20062_v54  ;;  %16123 = vmatprep.subr.bf16.mxu0 %v20067_v5  ;;  %v20097_v54 = vld [vmem:[#allocation8 + $0x1e4] ss:$24 sps:$4 sm:$0xff]  }
 0x4e1   :  { %16166 = vmatprep.subr.bf16.mxu1 %v20070_v24  ;;  %v9109_v13 = vmul.f32 %v9061_v17, %v8725_v53  ;;  %v20100_v5 = vld [vmem:[#allocation8 + $0x4e4] ss:$24 sps:$4 sm:$0xff]   ;;  %v20098_v24 = vld [vmem:[#allocation8 + $0x4e0] ss:$24 sps:$4 sm:$0xff]  }
 0x4e2   :  { %v21792_v12 = vpop.eup %21791  ;;  %v20110_v53 = vld [vmem:[#allocation8 + $0x480] ss:$24 sps:$4 sm:$0xff]  }
 0x4e3   :  { %16124 = vmatpush2.bf16.msra.mxu0 %v20065_v56  ;;  %v9085_v0 = vadd.f32 1.0, %v21792_v12  ;;  %v20101_v56 = vld [vmem:[#allocation8 + $0x1b0] ss:$24 sps:$4 sm:$0xff]  }
 0x4e4   :  { %16167 = vmatpush2.bf16.msra.mxu1 %v20068_v14  ;;  %16125 = vmatprep.subr.bf16.mxu0 %v20073_v28  ;;  %v20104_v14 = vld [vmem:[#allocation8 + $0x4b0] ss:$24 sps:$4 sm:$0xff]   ;;  %v20109_v28 = vld [vmem:[#allocation8 + $0x184] ss:$24 sps:$4 sm:$0xff]  }
 0x4e5   :  { %16168 = vmatprep.subr.bf16.mxu1 %v20076_v55  ;;  %v9133_v32 = vmul.f32 %v9085_v0, %v8749_v63  ;;  %v20112_v55 = vld [vmem:[#allocation8 + $0x484] ss:$24 sps:$4 sm:$0xff]   ;;  %v20115_v63 = vld [vmem:[#allocation8 + $0x754] ss:$24 sps:$4 sm:$0xff]  }
 0x4e7   :  { %16126 = vmatpush2.bf16.msra.mxu0 %v20071_v60  ;;  %v22651_v25 = vpack.c.bf16 %v9133_v32, %v9109_v13  ;;  %v8736_v60 = vmul.f32 0.5, %v22622_v7  ;;  %v22656_v13 = vld [vmem:[#allocation7 + $0x10] sm:$0xff]  ;;  %v22661_v7 = vpop.f32.mrf.mxu0 }
 0x4e8   :  { %16169 = vmatpush2.bf16.msra.mxu1 %v20074_v38  ;;  %16127 = vmatprep.subr.bf16.mxu0 %v20079_v26  ;;  %v21794_v16 = vpop.eup %21793  ;;  %v8738_v38 = vmul.f32 0.5, %v22625_v19  ;;  %v1332_v32 = vrot.slane %v22656_v13, %v22189_v4  ;;  %v20847_v4 = vld [vmem:[#allocation8 + $0xe7c] ss:$24 sps:$4 sm:$0xff]  }
 0x4e9   :  { %16170 = vmatprep.subr.bf16.mxu1 %v20082_v37  ;;  %v21796_v21 = vpop.eup %21795  ;;  %v9072_v12 = vadd.f32 1.0, %v21794_v16  ;;  %v20125_v16 = vld [vmem:[#allocation8 + $0x6f0] ss:$24 sps:$4 sm:$0xff]  }
 0x4ea   :  { %v21798_v6 = vpop.eup %21797  ;;  %v9074_v11 = vadd.f32 1.0, %v21796_v21  ;;  %v20128_v21 = vld [vmem:[#allocation8 + $0x9f0] ss:$24 sps:$4 sm:$0xff]  }
 0x4eb   :  { %16128 = vmatpush2.bf16.msra.mxu0 %v20077_v33  ;;  %v21800_v17 = vpop.eup %21799  ;;  %v9048_v0 = vadd.f32 1.0, %v21798_v6  ;;  %v9120_v37 = vmul.f32 %v9072_v12, %v8736_v60  ;;  %v20136_v6 = vld [vmem:[#allocation8 + $0x9c4] ss:$24 sps:$4 sm:$0xff]   ;;  %v20139_v60 = vld [vmem:[#allocation8 + $0x694] ss:$24 sps:$4 sm:$0xff]  }
 0x4ec   :  { %16171 = vmatpush2.bf16.msra.mxu1 %v20080_v49  ;;  %16129 = vmatprep.subr.bf16.mxu0 %v20085_v58  ;;  %v9050_v26 = vadd.f32 1.0, %v21800_v17  ;;  %v9122_v33 = vmul.f32 %v9074_v11, %v8738_v38  ;;  %v22663_v49 = vpop.f32.mrf.mxu1  ;;  %v20121_v58 = vld [vmem:[#allocation8 + $0x724] ss:$24 sps:$4 sm:$0xff]   ;;  %v20142_v38 = vld [vmem:[#allocation8 + $0x994] ss:$24 sps:$4 sm:$0xff]  }
 0x4ed   :  { %16172 = vmatprep.subr.bf16.mxu1 %v20088_v45  ;;  %v9096_v19 = vmul.f32 %v9048_v0, %v8712_v34  ;;  %v23221_v11 = vld [vmem:[#allocation24_spill] sm:$0xff]  ;;  %v23222_v0 = vld [vmem:[#allocation30_spill] sm:$0xff] }
 0x4ee   :  { %v9098_v48 = vmul.f32 %v9050_v26, %v8714_v46  ;;  %v23223_v26 = vld [vmem:[#allocation22_spill] sm:$0xff] }
 0x4ef   :  { %16130 = vmatpush2.bf16.msra.mxu0 %v20083_v29  ;;  %v22666_v45 = vpack.c.bf16 %v9120_v37, %v9096_v19  ;;  %v20124_v29 = vld [vmem:[#allocation8 + $0xa24] ss:$24 sps:$4 sm:$0xff]  }
 0x4f0   :  { %16173 = vmatpush2.bf16.msra.mxu1 %v20086_v10  ;;  %16131 = vmatprep.subr.bf16.mxu0 %v20091_v27  ;;  %v22669_v27 = vpack.c.bf16 %v9122_v33, %v9098_v48  ;;  %v23224_v37 = vld [vmem:[#allocation28_spill] sm:$0xff] }
 0x4f1   :  { %16174 = vmatprep.subr.bf16.mxu1 %v20094_v30  ;;  %v20119_v30 = vld [vmem:[#allocation8 + $0x720] ss:$24 sps:$4 sm:$0xff]   ;;  %v20137_v33 = vld [vmem:[#allocation8 + $0x690] ss:$24 sps:$4 sm:$0xff]  }
 0x4f2   :  { %v20140_v48 = vld [vmem:[#allocation8 + $0x990] ss:$24 sps:$4 sm:$0xff]  }
 0x4f3   :  { %16132 = vmatpush2.bf16.msra.mxu0 %v20089_v20 }
 0x4f4   :  { %16175 = vmatpush2.bf16.msra.mxu1 %v20092_v15  ;;  %16133 = vmatprep.subr.bf16.mxu0 %v20097_v54  ;;  %v20122_v15 = vld [vmem:[#allocation8 + $0xa20] ss:$24 sps:$4 sm:$0xff]   ;;  %v20127_v54 = vld [vmem:[#allocation8 + $0x6f4] ss:$24 sps:$4 sm:$0xff]  }
 0x4f5   :  { %16176 = vmatprep.subr.bf16.mxu1 %v20100_v5 }
 0x4f7   :  { %16134 = vmatpush2.bf16.msra.mxu0 %v20095_v35 }
 0x4f8   :  { %16177 = vmatpush2.bf16.msra.mxu1 %v20098_v24  ;;  %16135 = vmatprep.subr.bf16.mxu0 %v20103_v31  ;;  %v20130_v24 = vld [vmem:[#allocation8 + $0x9f4] ss:$24 sps:$4 sm:$0xff]  }
 0x4f9   :  { %16178 = vmatprep.subr.bf16.mxu1 %v20106_v9 }
 0x4fb   :  { %16136 = vmatpush2.bf16.msra.mxu0 %v20101_v56 }
 0x4fc   :  { %16179 = vmatpush2.bf16.msra.mxu1 %v20104_v14  ;;  %16137 = vmatprep.subr.bf16.mxu0 %v20109_v28  ;;  %v20133_v14 = vld [vmem:[#allocation8 + $0x6c4] ss:$24 sps:$4 sm:$0xff]  }
 0x4fd   :  { %16180 = vmatprep.subr.bf16.mxu1 %v20112_v55  ;;  %v22681_v55 = vld [vmem:[#allocation7 + $0x8] sm:$0xff] }
 0x4fe   :  { %v1288_v17 = vrot.slane %v22681_v55, %v22501_v8  ;;  %v1296_v12 = vrot.slane %v22681_v55, %v22508_v39 }
 0x4ff   :  { %16138 = vmatpush2.bf16.msra.mxu0 %v20107_v41  ;;  %v20131_v41 = vld [vmem:[#allocation8 + $0x6c0] ss:$24 sps:$4 sm:$0xff]  }
 0x500   :  { %16181 = vmatpush2.bf16.msra.mxu1 %v20110_v53  ;;  %16193 = vmatprep.subr.bf16.mxu0 %v20115_v63  ;;  %v7716_v53 = vadd.f32 %v23221_v11, %v1288_v17  ;;  %v20134_v63 = vld [vmem:[#allocation8 + $0x9c0] ss:$24 sps:$4 sm:$0xff]   ;;  %v7712_v34 = vadd.f32 %v23223_v26, %v1288_v17 }
 0x501   :  { %16236 = vmatprep.subr.bf16.mxu1 %v20118_v61  ;;  %v7845_v61 = vadd.f32 %v23222_v0, %v1296_v12  ;;  %v20157_v0 = vld [vmem:[#allocation8 + $0x604] ss:$24 sps:$4 sm:$0xff]  }
 0x502   :  { %v8483_v43 = vpop.f32.mrf.mxu0  ;;  %16140 = vmatmul.mubr.bf16.vlgmr.msra.gmra.mxu0 %v22143_v22 }
 0x503   :  { %v8484_v10 = vadd.f32 %v8483_v43, %v1332_v32  ;;  %v8526_v36 = vpop.f32.mrf.mxu1  ;;  %16183 = vmatmul.mubr.bf16.vlgmr.msra.gmra.mxu1 %v22186_v18  ;;  %16194 = vmatpush1.bf16.msra.mxu0 %v20113_v44  ;;  %v23225_v44 = vld [vmem:[#allocation34_spill] sm:$0xff]  ;;  %v23227_v43 = vld [vmem:[#allocation31_spill] sm:$0xff] }
 0x504   :  { %16225 = vmatprep.mubr.bf16.mxu0 %v22666_v45  ;;  %16237 = vmatpush1.bf16.msra.mxu1 %v20116_v2  ;;  %v22672_v20 = vpop.f32.mrf.mxu0  ;;  %v7888_v46 = vadd.f32 %v23225_v44, %v7845_v61  ;;  %v23226_v2 = vld [vmem:[#allocation27_spill] sm:$0xff] }
 0x505   :  { %v22674_v5 = vadd.f32 %v8526_v36, %v8484_v10  ;;  %16268 = vmatprep.mubr.bf16.mxu1 %v22669_v27  ;;  %v22677_v35 = vpop.f32.mrf.mxu1  ;;  %16195 = vmatprep.subr.bf16.mxu0 %v20121_v58  ;;  %v7759_v19 = vadd.f32 %v23226_v2, %v7716_v53  ;;  %v20145_v58 = vld [vmem:[#allocation8 + $0x664] ss:$24 sps:$4 sm:$0xff]   ;;  %v20149_v53 = vld [vmem:[#allocation8 + $0x630] ss:$24 sps:$4 sm:$0xff]   ;;  %v20158_v44 = vld [vmem:[#allocation8 + $0x900] ss:$24 sps:$4 sm:$0xff]  }
 0x506   :  { %v8487_v31 = vpop.f32.mrf.mxu0  ;;  %16238 = vmatprep.subr.bf16.mxu1 %v20124_v29  ;;  %v20148_v10 = vld [vmem:[#allocation8 + $0x964] ss:$24 sps:$4 sm:$0xff]   ;;  %v20166_v2 = vld [vmem:[#allocation8 + $0xbd4] ss:$24 sps:$4 sm:$0xff]  }
 0x507   :  { %v8488_v9 = vadd.f32 %v8487_v31, %v1332_v32  ;;  %16196 = vmatpush1.bf16.msra.mxu0 %v20119_v30  ;;  %v8530_v56 = vpop.f32.mrf.mxu1  ;;  %v7841_v32 = vadd.f32 %v23224_v37, %v1296_v12  ;;  %v23228_v36 = vld [vmem:[#allocation23_spill] sm:$0xff]  ;;  %v20154_v12 = vld [vmem:[#allocation8 + $0x934] ss:$24 sps:$4 sm:$0xff]  }
 0x508   :  { %16239 = vmatpush1.bf16.msra.mxu1 %v20122_v15  ;;  %16197 = vmatprep.subr.bf16.mxu0 %v20127_v54  ;;  %v7755_v30 = vadd.f32 %v23228_v36, %v7712_v34  ;;  %v23229_v15 = vld [vmem:[#allocation29_spill] sm:$0xff]  ;;  %v20155_v37 = vld [vmem:[#allocation8 + $0x600] ss:$24 sps:$4 sm:$0xff]  }
 0x509   :  { %v22679_v28 = vadd.f32 %v8530_v56, %v8488_v9  ;;  %16240 = vmatprep.subr.bf16.mxu1 %v20130_v24  ;;  %v7884_v29 = vadd.f32 %v23227_v43, %v7841_v32  ;;  %v22696_v54 = vadd.f32 %v23229_v15, %v7759_v19  ;;  %v23230_v24 = vld [vmem:[#allocation35_spill] sm:$0xff] }
 0x50a   :  { %v22699_v31 = vadd.f32 %v23230_v24, %v7888_v46  ;;  %v20143_v9 = vld [vmem:[#allocation8 + $0x660] ss:$24 sps:$4 sm:$0xff]   ;;  %v20163_v46 = vld [vmem:[#allocation8 + $0x8d4] ss:$24 sps:$4 sm:$0xff]  }
 0x50b   :  { %16198 = vmatpush1.bf16.msra.mxu0 %v20125_v16  ;;  %v23231_v16 = vld [vmem:[#allocation25_spill] sm:$0xff] }
 0x50c   :  { %16241 = vmatpush1.bf16.msra.mxu1 %v20128_v21  ;;  %16199 = vmatprep.subr.bf16.mxu0 %v20133_v14  ;;  %v22702_v56 = vadd.f32 %v23231_v16, %v7755_v30  ;;  %v20146_v21 = vld [vmem:[#allocation8 + $0x960] ss:$24 sps:$4 sm:$0xff]   ;;  %v20151_v14 = vld [vmem:[#allocation8 + $0x634] ss:$24 sps:$4 sm:$0xff]   ;;  %v8790_v11 = vmul.f32 %v22699_v31, %v22699_v31  ;;  %v20172_v30 = vld [vmem:[#allocation8 + $0xba4] ss:$24 sps:$4 sm:$0xff]  }
 0x50d   :  { %16242 = vmatprep.subr.bf16.mxu1 %v20136_v6  ;;  %v23232_v6 = vld [vmem:[#allocation32_spill] sm:$0xff] }
 0x50e   :  { %v22705_v17 = vadd.f32 %v23232_v6, %v7884_v29  ;;  %v8838_v34 = vmul.f32 %v8790_v11, %v22699_v31  ;;  %v20164_v29 = vld [vmem:[#allocation8 + $0xbd0] ss:$24 sps:$4 sm:$0xff]  }
 0x50f   :  { %16200 = vmatpush1.bf16.msra.mxu0 %v20131_v41  ;;  %v8788_v41 = vmul.f32 %v22696_v54, %v22696_v54 }
 0x510   :  { %16243 = vmatpush1.bf16.msra.mxu1 %v20134_v63  ;;  %16201 = vmatprep.subr.bf16.mxu0 %v20139_v60  ;;  %v8764_v63 = vmul.f32 %v22702_v56, %v22702_v56  ;;  %v20152_v60 = vld [vmem:[#allocation8 + $0x930] ss:$24 sps:$4 sm:$0xff]   ;;  %v8766_v61 = vmul.f32 %v22705_v17, %v22705_v17 }
 0x511   :  { %16244 = vmatprep.subr.bf16.mxu1 %v20142_v38  ;;  %v20160_v38 = vld [vmem:[#allocation8 + $0x904] ss:$24 sps:$4 sm:$0xff]   ;;  %v8836_v26 = vmul.f32 %v8788_v41, %v22696_v54 }
 0x512   :  { %v8812_v32 = vmul.f32 %v8764_v63, %v22702_v56 }
 0x513   :  { %16202 = vmatpush1.bf16.msra.mxu0 %v20137_v33  ;;  %v8814_v33 = vmul.f32 %v8766_v61, %v22705_v17  ;;  %v8884_v19 = vmul.f32 0.044715, %v8836_v26  ;;  %v20179_v26 = vld [vmem:[#allocation8 + $0x840] ss:$24 sps:$4 sm:$0xff]  }
 0x514   :  { %16245 = vmatpush1.bf16.msra.mxu1 %v20140_v48  ;;  %16203 = vmatprep.subr.bf16.mxu0 %v20145_v58  ;;  %v8886_v48 = vmul.f32 0.044715, %v8838_v34  ;;  %v20161_v58 = vld [vmem:[#allocation8 + $0x8d0] ss:$24 sps:$4 sm:$0xff]   ;;  %v8860_v43 = vmul.f32 0.044715, %v8812_v32 }
 0x515   :  { %16246 = vmatprep.subr.bf16.mxu1 %v20148_v10  ;;  %v20169_v10 = vld [vmem:[#allocation8 + $0x8a4] ss:$24 sps:$4 sm:$0xff]   ;;  %v8862_v36 = vmul.f32 0.044715, %v8814_v33  ;;  %v8932_v15 = vadd.f32 %v8884_v19, %v22696_v54  ;;  %v20182_v34 = vld [vmem:[#allocation8 + $0xb40] ss:$24 sps:$4 sm:$0xff]  }
 0x516   :  { %v8934_v24 = vadd.f32 %v8886_v48, %v22699_v31  ;;  %v8908_v16 = vadd.f32 %v8860_v43, %v22702_v56  ;;  %v20190_v32 = vld [vmem:[#allocation8 + $0xb14] ss:$24 sps:$4 sm:$0xff]   ;;  %v20193_v33 = vld [vmem:[#allocation8 + $0x7e4] ss:$24 sps:$4 sm:$0xff]   ;;  %v20191_v19 = vld [vmem:[#allocation8 + $0x7e0] ss:$24 sps:$4 sm:$0xff]  }
 0x517   :  { %16204 = vmatpush1.bf16.msra.mxu0 %v20143_v9  ;;  %v20167_v9 = vld [vmem:[#allocation8 + $0x8a0] ss:$24 sps:$4 sm:$0xff]   ;;  %v8910_v6 = vadd.f32 %v8862_v36, %v22705_v17  ;;  %v8980_v41 = vmul.f32 0.7978845, %v8932_v15  ;;  %v20202_v43 = vld [vmem:[#allocation8 + $0xab4] ss:$24 sps:$4 sm:$0xff]  }
 0x518   :  { %16247 = vmatpush1.bf16.msra.mxu1 %v20146_v21  ;;  %16205 = vmatprep.subr.bf16.mxu0 %v20151_v14  ;;  %v20170_v21 = vld [vmem:[#allocation8 + $0xba0] ss:$24 sps:$4 sm:$0xff]   ;;  %v20175_v14 = vld [vmem:[#allocation8 + $0x874] ss:$24 sps:$4 sm:$0xff]   ;;  %v8982_v11 = vmul.f32 0.7978845, %v8934_v24 }
 0x519   :  { %16248 = vmatprep.subr.bf16.mxu1 %v20154_v12  ;;  %v20178_v12 = vld [vmem:[#allocation8 + $0xb74] ss:$24 sps:$4 sm:$0xff]   ;;  %v8956_v63 = vmul.f32 0.7978845, %v8908_v16  ;;  %v8958_v61 = vmul.f32 0.7978845, %v8910_v6  ;;  %21801 = vtanh.f32 %v8980_v41 }
 0x51a   :  { %21803 = vtanh.f32 %v8982_v11  ;;  %v20194_v48 = vld [vmem:[#allocation8 + $0xae0] ss:$24 sps:$4 sm:$0xff]   ;;  %v20205_v15 = vld [vmem:[#allocation8 + $0x784] ss:$24 sps:$4 sm:$0xff]   ;;  %v20211_v41 = vld [vmem:[#allocation8 + $0xd54] ss:$24 sps:$4 sm:$0xff]  }
 0x51b   :  { %16206 = vmatpush1.bf16.msra.mxu0 %v20149_v53  ;;  %v20173_v53 = vld [vmem:[#allocation8 + $0x870] ss:$24 sps:$4 sm:$0xff]   ;;  %21805 = vtanh.f32 %v8956_v63  ;;  %v8740_v11 = vmul.f32 0.5, %v22696_v54  ;;  %v20214_v63 = vld [vmem:[#allocation8 + $0x1054] ss:$24 sps:$4 sm:$0xff]  }
 0x51c   :  { %16249 = vmatpush1.bf16.msra.mxu1 %v20152_v60  ;;  %16207 = vmatprep.subr.bf16.mxu0 %v20157_v0  ;;  %v20176_v60 = vld [vmem:[#allocation8 + $0xb70] ss:$24 sps:$4 sm:$0xff]   ;;  %v20181_v0 = vld [vmem:[#allocation8 + $0x844] ss:$24 sps:$4 sm:$0xff]   ;;  %21807 = vtanh.f32 %v8958_v61  ;;  %v8716_v61 = vmul.f32 0.5, %v22702_v56 }
 0x51d   :  { %16250 = vmatprep.subr.bf16.mxu1 %v20160_v38  ;;  %v20184_v38 = vld [vmem:[#allocation8 + $0xb44] ss:$24 sps:$4 sm:$0xff]  }
 0x51e   :  { %v20220_v56 = vld [vmem:[#allocation8 + $0x1024] ss:$24 sps:$4 sm:$0xff]  }
 0x51f   :  { %16208 = vmatpush1.bf16.msra.mxu0 %v20155_v37  ;;  %v20187_v37 = vld [vmem:[#allocation8 + $0x814] ss:$24 sps:$4 sm:$0xff]  }
 0x520   :  { %16251 = vmatpush1.bf16.msra.mxu1 %v20158_v44  ;;  %16209 = vmatprep.subr.bf16.mxu0 %v20163_v46  ;;  %v20185_v44 = vld [vmem:[#allocation8 + $0x810] ss:$24 sps:$4 sm:$0xff]  }
 0x521   :  { %16252 = vmatprep.subr.bf16.mxu1 %v20166_v2  ;;  %v20188_v46 = vld [vmem:[#allocation8 + $0xb10] ss:$24 sps:$4 sm:$0xff]   ;;  %v20196_v2 = vld [vmem:[#allocation8 + $0xae4] ss:$24 sps:$4 sm:$0xff]  }
 0x523   :  { %16210 = vmatpush2.bf16.msra.mxu0 %v20161_v58  ;;  %v20199_v58 = vld [vmem:[#allocation8 + $0x7b4] ss:$24 sps:$4 sm:$0xff]  }
 0x524   :  { %16253 = vmatpush2.bf16.msra.mxu1 %v20164_v29  ;;  %16211 = vmatprep.subr.bf16.mxu0 %v20169_v10  ;;  %v20197_v10 = vld [vmem:[#allocation8 + $0x7b0] ss:$24 sps:$4 sm:$0xff]  }
 0x525   :  { %16254 = vmatprep.subr.bf16.mxu1 %v20172_v30  ;;  %v20200_v30 = vld [vmem:[#allocation8 + $0xab0] ss:$24 sps:$4 sm:$0xff]  }
 0x526   :  { %v21802_v29 = vpop.eup %21801 }
 0x527   :  { %16212 = vmatpush2.bf16.msra.mxu0 %v20167_v9  ;;  %v21804_v36 = vpop.eup %21803  ;;  %v20208_v9 = vld [vmem:[#allocation8 + $0xa84] ss:$24 sps:$4 sm:$0xff]  }
 0x528   :  { %16255 = vmatpush2.bf16.msra.mxu1 %v20170_v21  ;;  %16213 = vmatprep.subr.bf16.mxu0 %v20175_v14  ;;  %v21806_v24 = vpop.eup %21805  ;;  %v9076_v21 = vadd.f32 1.0, %v21802_v29  ;;  %v20203_v14 = vld [vmem:[#allocation8 + $0x780] ss:$24 sps:$4 sm:$0xff]   ;;  %v9078_v6 = vadd.f32 1.0, %v21804_v36  ;;  %v20223_v36 = vld [vmem:[#allocation8 + $0xcf4] ss:$24 sps:$4 sm:$0xff]  }
 0x529   :  { %16256 = vmatprep.subr.bf16.mxu1 %v20178_v12  ;;  %v21808_v16 = vpop.eup %21807  ;;  %v20206_v12 = vld [vmem:[#allocation8 + $0xa80] ss:$24 sps:$4 sm:$0xff]  }
 0x52b   :  { %16214 = vmatpush2.bf16.msra.mxu0 %v20173_v53  ;;  %v9052_v53 = vadd.f32 1.0, %v21806_v24 }
 0x52c   :  { %16257 = vmatpush2.bf16.msra.mxu1 %v20176_v60  ;;  %16215 = vmatprep.subr.bf16.mxu0 %v20181_v0  ;;  %v8742_v60 = vmul.f32 0.5, %v22699_v31  ;;  %v9054_v0 = vadd.f32 1.0, %v21808_v16  ;;  %v23233_v31 = vld [vmem:[#allocation19_spill] sm:$0xff]  ;;  %v20221_v16 = vld [vmem:[#allocation8 + $0xcf0] ss:$24 sps:$4 sm:$0xff]  }
 0x52d   :  { %16258 = vmatprep.subr.bf16.mxu1 %v20184_v38  ;;  %v9124_v38 = vmul.f32 %v9076_v21, %v8740_v11  ;;  %v9100_v54 = vmul.f32 %v9052_v53, %v8716_v61  ;;  %v1304_v21 = vrot.slane %v22681_v55, %v22594_v40  ;;  %v20232_v11 = vld [vmem:[#allocation8 + $0xfc4] ss:$24 sps:$4 sm:$0xff]   ;;  %v1312_v53 = vrot.slane %v22681_v55, %v22597_v57  ;;  %v20238_v55 = vld [vmem:[#allocation8 + $0xf94] ss:$24 sps:$4 sm:$0xff]  }
 0x52f   :  { %16216 = vmatpush2.bf16.msra.mxu0 %v20179_v26  ;;  %v20209_v26 = vld [vmem:[#allocation8 + $0xd50] ss:$24 sps:$4 sm:$0xff]  }
 0x530   :  { %16259 = vmatpush2.bf16.msra.mxu1 %v20182_v34  ;;  %16217 = vmatprep.subr.bf16.mxu0 %v20187_v37  ;;  %v8718_v34 = vmul.f32 0.5, %v22705_v17  ;;  %v9126_v37 = vmul.f32 %v9078_v6, %v8742_v60  ;;  %v23235_v17 = vld [vmem:[#allocation21_spill] sm:$0xff]  ;;  %v20229_v6 = vld [vmem:[#allocation8 + $0xcc4] ss:$24 sps:$4 sm:$0xff]   ;;  %v20227_v60 = vld [vmem:[#allocation8 + $0xcc0] ss:$24 sps:$4 sm:$0xff]  }
 0x531   :  { %16260 = vmatprep.subr.bf16.mxu1 %v20190_v32  ;;  %v22727_v32 = vpop.f32.mrf.mxu0 }
 0x533   :  { %16218 = vmatpush2.bf16.msra.mxu0 %v20185_v44  ;;  %v20212_v44 = vld [vmem:[#allocation8 + $0x1050] ss:$24 sps:$4 sm:$0xff]  }
 0x534   :  { %16261 = vmatpush2.bf16.msra.mxu1 %v20188_v46  ;;  %16219 = vmatprep.subr.bf16.mxu0 %v20193_v33  ;;  %v9102_v46 = vmul.f32 %v9054_v0, %v8718_v34  ;;  %v20217_v33 = vld [vmem:[#allocation8 + $0xd24] ss:$24 sps:$4 sm:$0xff]   ;;  %v20230_v34 = vld [vmem:[#allocation8 + $0xfc0] ss:$24 sps:$4 sm:$0xff]  }
 0x535   :  { %16262 = vmatprep.subr.bf16.mxu1 %v20196_v2  ;;  %v23237_v0 = vld [vmem:[#allocation36_spill] sm:$0xff] }
 0x536   :  { %v7970_v61 = vadd.f32 %v23237_v0, %v1304_v21 }
 0x537   :  { %16220 = vmatpush2.bf16.msra.mxu0 %v20191_v19  ;;  %v22730_v19 = vpack.c.bf16 %v9124_v38, %v9100_v54  ;;  %v23238_v38 = vld [vmem:[#allocation38_spill] sm:$0xff] }
 0x538   :  { %16263 = vmatpush2.bf16.msra.mxu1 %v20194_v48  ;;  %16221 = vmatprep.subr.bf16.mxu0 %v20199_v58  ;;  %v22736_v58 = vpack.c.bf16 %v9126_v37, %v9102_v46  ;;  %v20235_v37 = vld [vmem:[#allocation8 + $0xc94] ss:$24 sps:$4 sm:$0xff]  }
 0x539   :  { %16264 = vmatprep.subr.bf16.mxu1 %v20202_v43  ;;  %23234 = vst [vmem:[#allocation24_spill] sm:$0xff] %v22730_v19  ;;  %v20215_v43 = vld [vmem:[#allocation8 + $0xd20] ss:$24 sps:$4 sm:$0xff]  }
 0x53a   :  { %23236 = vst [vmem:[#allocation30_spill] sm:$0xff] %v22736_v58 }
 0x53b   :  { %16222 = vmatpush2.bf16.msra.mxu0 %v20197_v10  ;;  %v20218_v10 = vld [vmem:[#allocation8 + $0x1020] ss:$24 sps:$4 sm:$0xff]  }
 0x53c   :  { %16265 = vmatpush2.bf16.msra.mxu1 %v20200_v30  ;;  %16223 = vmatprep.subr.bf16.mxu0 %v20205_v15 }
 0x53d   :  { %16266 = vmatprep.subr.bf16.mxu1 %v20208_v9 }
 0x53f   :  { %16224 = vmatpush2.bf16.msra.mxu0 %v20203_v14  ;;  %v20224_v14 = vld [vmem:[#allocation8 + $0xff0] ss:$24 sps:$4 sm:$0xff]  }
 0x540   :  { %16267 = vmatpush2.bf16.msra.mxu1 %v20206_v12  ;;  %16279 = vmatprep.subr.bf16.mxu0 %v20211_v41 }
 0x541   :  { %16322 = vmatprep.subr.bf16.mxu1 %v20214_v63 }
 0x542   :  { %v8569_v2 = vpop.f32.mrf.mxu0  ;;  %16226 = vmatmul.mubr.bf16.vlgmr.msra.gmra.mxu0 %v23233_v31 }
 0x543   :  { %v22733_v48 = vadd.f32 %v8569_v2, %v22674_v5  ;;  %16269 = vmatmul.mubr.bf16.vlgmr.msra.gmra.mxu1 %v23235_v17  ;;  %16280 = vmatpush1.bf16.msra.mxu0 %v20209_v26  ;;  %v20226_v5 = vld [vmem:[#allocation8 + $0xff4] ss:$24 sps:$4 sm:$0xff]   ;;  %v7974_v26 = vadd.f32 %v23238_v38, %v1304_v21 }
 0x544   :  { %16311 = vmatprep.mubr.bf16.mxu0 %v22730_v19  ;;  %16323 = vmatpush1.bf16.msra.mxu1 %v20212_v44  ;;  %v22739_v29 = vpop.f32.mrf.mxu0  ;;  %v23239_v44 = vld [vmem:[#allocation44_spill] sm:$0xff]  ;;  %v23240_v2 = vld [vmem:[#allocation42_spill] sm:$0xff]  ;;  %v23244_v21 = vld [vmem:[#allocation45_spill] sm:$0xff] }
 0x545   :  { %v8775_v30 = vmul.f32 %v22733_v48, %v22733_v48  ;;  %16354 = vmatprep.mubr.bf16.mxu1 %v22736_v58  ;;  %16281 = vmatprep.subr.bf16.mxu0 %v20217_v33  ;;  %v8103_v54 = vadd.f32 %v23239_v44, %v1312_v53  ;;  %v20247_v44 = vld [vmem:[#allocation8 + $0xc34] ss:$24 sps:$4 sm:$0xff]  }
 0x546   :  { %v8573_v15 = vpop.f32.mrf.mxu0  ;;  %16324 = vmatprep.subr.bf16.mxu1 %v20220_v56  ;;  %v8099_v56 = vadd.f32 %v23240_v2, %v1312_v53  ;;  %v23245_v53 = vld [vmem:[#allocation39_spill] sm:$0xff]  ;;  %v20245_v2 = vld [vmem:[#allocation8 + $0xc30] ss:$24 sps:$4 sm:$0xff]  }
 0x547   :  { %v8823_v24 = vmul.f32 %v8775_v30, %v22733_v48  ;;  %v22746_v9 = vadd.f32 %v8573_v15, %v22679_v28  ;;  %16282 = vmatpush1.bf16.msra.mxu0 %v20215_v43  ;;  %v23241_v43 = vld [vmem:[#allocation48_spill] sm:$0xff] }
 0x548   :  { %16325 = vmatpush1.bf16.msra.mxu1 %v20218_v10  ;;  %16283 = vmatprep.subr.bf16.mxu0 %v20223_v36  ;;  %v8146_v10 = vadd.f32 %v23241_v43, %v8103_v54  ;;  %v20233_v30 = vld [vmem:[#allocation8 + $0xc90] ss:$24 sps:$4 sm:$0xff]   ;;  %v20250_v54 = vld [vmem:[#allocation8 + $0xf34] ss:$24 sps:$4 sm:$0xff]  }
 0x549   :  { %v8871_v12 = vmul.f32 0.044715, %v8823_v24  ;;  %v8799_v41 = vmul.f32 %v22746_v9, %v22746_v9  ;;  %16326 = vmatprep.subr.bf16.mxu1 %v20226_v5  ;;  %v23242_v5 = vld [vmem:[#allocation37_spill] sm:$0xff] }
 0x54a   :  { %v8013_v15 = vadd.f32 %v23242_v5, %v7970_v61  ;;  %v23243_v24 = vld [vmem:[#allocation41_spill] sm:$0xff]  ;;  %v20239_v61 = vld [vmem:[#allocation8 + $0xc60] ss:$24 sps:$4 sm:$0xff]  }
 0x54b   :  { %v8919_v28 = vadd.f32 %v8871_v12, %v22733_v48  ;;  %v8847_v63 = vmul.f32 %v8799_v41, %v22746_v9  ;;  %16284 = vmatpush1.bf16.msra.mxu0 %v20221_v16  ;;  %v8017_v16 = vadd.f32 %v23243_v24, %v7974_v26  ;;  %v20241_v12 = vld [vmem:[#allocation8 + $0xc64] ss:$24 sps:$4 sm:$0xff]   ;;  %v20248_v43 = vld [vmem:[#allocation8 + $0xf30] ss:$24 sps:$4 sm:$0xff]   ;;  %v20251_v24 = vld [vmem:[#allocation8 + $0xc00] ss:$24 sps:$4 sm:$0xff]  }
 0x54c   :  { %16327 = vmatpush1.bf16.msra.mxu1 %v20224_v14  ;;  %16285 = vmatprep.subr.bf16.mxu0 %v20229_v6  ;;  %v8142_v14 = vadd.f32 %v23244_v21, %v8099_v56  ;;  %v20236_v6 = vld [vmem:[#allocation8 + $0xf90] ss:$24 sps:$4 sm:$0xff]   ;;  %v23248_v26 = vld [vmem:[#allocation46_spill] sm:$0xff] }
 0x54d   :  { %v8967_v46 = vmul.f32 0.7978845, %v8919_v28  ;;  %v8895_v33 = vmul.f32 0.044715, %v8847_v63  ;;  %16328 = vmatprep.subr.bf16.mxu1 %v20232_v11  ;;  %v20244_v11 = vld [vmem:[#allocation8 + $0xf64] ss:$24 sps:$4 sm:$0xff]   ;;  %v22766_v28 = vadd.f32 %v23245_v53, %v8013_v15 }
 0x54e   :  { %v23246_v63 = vld [vmem:[#allocation43_spill] sm:$0xff] }
 0x54f   :  { %21809 = vtanh.f32 %v8967_v46  ;;  %v8943_v36 = vadd.f32 %v8895_v33, %v22746_v9  ;;  %16286 = vmatpush1.bf16.msra.mxu0 %v20227_v60  ;;  %v22769_v0 = vadd.f32 %v23246_v63, %v8017_v16  ;;  %v23247_v60 = vld [vmem:[#allocation49_spill] sm:$0xff]  ;;  %v8768_v46 = vmul.f32 %v22766_v28, %v22766_v28 }
 0x550   :  { %16329 = vmatpush1.bf16.msra.mxu1 %v20230_v34  ;;  %16287 = vmatprep.subr.bf16.mxu0 %v20235_v37  ;;  %v22772_v38 = vadd.f32 %v23247_v60, %v8146_v10  ;;  %v22775_v34 = vadd.f32 %v23248_v26, %v8142_v14  ;;  %v20242_v37 = vld [vmem:[#allocation8 + $0xf60] ss:$24 sps:$4 sm:$0xff]   ;;  %v20253_v10 = vld [vmem:[#allocation8 + $0xc04] ss:$24 sps:$4 sm:$0xff]   ;;  %v20257_v63 = vld [vmem:[#allocation8 + $0xed0] ss:$24 sps:$4 sm:$0xff]  }
 0x551   :  { %v8991_v41 = vmul.f32 0.7978845, %v8943_v36  ;;  %16330 = vmatprep.subr.bf16.mxu1 %v20238_v55  ;;  %v8792_v33 = vmul.f32 %v22769_v0, %v22769_v0  ;;  %v20256_v36 = vld [vmem:[#allocation8 + $0xf04] ss:$24 sps:$4 sm:$0xff]   ;;  %v20254_v14 = vld [vmem:[#allocation8 + $0xf00] ss:$24 sps:$4 sm:$0xff]  }
 0x552   :  { %v8794_v55 = vmul.f32 %v22772_v38, %v22772_v38  ;;  %v8770_v56 = vmul.f32 %v22775_v34, %v22775_v34 }
 0x553   :  { %21811 = vtanh.f32 %v8991_v41  ;;  %16288 = vmatpush1.bf16.msra.mxu0 %v20233_v30  ;;  %v8816_v30 = vmul.f32 %v8768_v46, %v22766_v28  ;;  %v8840_v5 = vmul.f32 %v8792_v33, %v22769_v0  ;;  %v8751_v46 = vmul.f32 0.5, %v22746_v9  ;;  %v20268_v33 = vld [vmem:[#allocation8 + $0x11a4] ss:$24 sps:$4 sm:$0xff]   ;;  %v20274_v9 = vld [vmem:[#allocation8 + $0x1174] ss:$24 sps:$4 sm:$0xff]  }
 0x554   :  { %16331 = vmatpush1.bf16.msra.mxu1 %v20236_v6  ;;  %16289 = vmatprep.subr.bf16.mxu0 %v20241_v12  ;;  %v8842_v15 = vmul.f32 %v8794_v55, %v22772_v38  ;;  %v8818_v21 = vmul.f32 %v8770_v56, %v22775_v34  ;;  %v20259_v6 = vld [vmem:[#allocation8 + $0xed4] ss:$24 sps:$4 sm:$0xff]  }
 0x555   :  { %16332 = vmatprep.subr.bf16.mxu1 %v20244_v11  ;;  %v20262_v12 = vld [vmem:[#allocation8 + $0x11d4] ss:$24 sps:$4 sm:$0xff]   ;;  %v8864_v41 = vmul.f32 0.044715, %v8816_v30  ;;  %v8888_v11 = vmul.f32 0.044715, %v8840_v5 }
 0x556   :  { %v8890_v53 = vmul.f32 0.044715, %v8842_v15  ;;  %v8866_v26 = vmul.f32 0.044715, %v8818_v21  ;;  %v20266_v5 = vld [vmem:[#allocation8 + $0x11a0] ss:$24 sps:$4 sm:$0xff]  }
 0x557   :  { %16290 = vmatpush1.bf16.msra.mxu0 %v20239_v61  ;;  %v8912_v30 = vadd.f32 %v8864_v41, %v22766_v28  ;;  %v20271_v15 = vld [vmem:[#allocation8 + $0xe74] ss:$24 sps:$4 sm:$0xff]  }
 0x558   :  { %16333 = vmatpush1.bf16.msra.mxu1 %v20242_v37  ;;  %16291 = vmatprep.subr.bf16.mxu0 %v20247_v44  ;;  %v20260_v37 = vld [vmem:[#allocation8 + $0x11d0] ss:$24 sps:$4 sm:$0xff]   ;;  %v20265_v44 = vld [vmem:[#allocation8 + $0xea4] ss:$24 sps:$4 sm:$0xff]   ;;  %v8938_v56 = vadd.f32 %v8890_v53, %v22772_v38 }
 0x559   :  { %16334 = vmatprep.subr.bf16.mxu1 %v20250_v54  ;;  %v8727_v54 = vmul.f32 0.5, %v22733_v48  ;;  %v8914_v48 = vadd.f32 %v8866_v26, %v22775_v34  ;;  %v20280_v53 = vld [vmem:[#allocation8 + $0x1144] ss:$24 sps:$4 sm:$0xff]   ;;  %v20286_v26 = vld [vmem:[#allocation8 + $0x1114] ss:$24 sps:$4 sm:$0xff]  }
 0x55a   :  { %v8986_v21 = vmul.f32 0.7978845, %v8938_v56  ;;  %v20295_v56 = vld [vmem:[#allocation8 + $0xdb4] ss:$24 sps:$4 sm:$0xff]  }
 0x55b   :  { %16292 = vmatpush1.bf16.msra.mxu0 %v20245_v2  ;;  %v8936_v2 = vadd.f32 %v8888_v11, %v22769_v0  ;;  %v20277_v11 = vld [vmem:[#allocation8 + $0xe44] ss:$24 sps:$4 sm:$0xff]   ;;  %v8962_v41 = vmul.f32 0.7978845, %v8914_v48 }
 0x55c   :  { %v21810_v16 = vpop.eup %21809  ;;  %16335 = vmatpush1.bf16.msra.mxu1 %v20248_v43  ;;  %16293 = vmatprep.subr.bf16.mxu0 %v20253_v10  ;;  %v20263_v43 = vld [vmem:[#allocation8 + $0xea0] ss:$24 sps:$4 sm:$0xff]   ;;  %v20301_v48 = vld [vmem:[#allocation8 + $0xd84] ss:$24 sps:$4 sm:$0xff]  }
 0x55d   :  { %16336 = vmatprep.subr.bf16.mxu1 %v20256_v36  ;;  %v9063_v60 = vadd.f32 1.0, %v21810_v16  ;;  %v8984_v16 = vmul.f32 0.7978845, %v8936_v2  ;;  %v20290_v2 = vld [vmem:[#allocation8 + $0x10e0] ss:$24 sps:$4 sm:$0xff]  }
 0x55f   :  { %16294 = vmatpush1.bf16.msra.mxu0 %v20251_v24  ;;  %v9111_v10 = vmul.f32 %v9063_v60, %v8727_v54  ;;  %21813 = vtanh.f32 %v8984_v16  ;;  %v20278_v60 = vld [vmem:[#allocation8 + $0x1140] ss:$24 sps:$4 sm:$0xff]   ;;  %v20289_v54 = vld [vmem:[#allocation8 + $0xde4] ss:$24 sps:$4 sm:$0xff]  }
 0x560   :  { %v21812_v61 = vpop.eup %21811  ;;  %16337 = vmatpush1.bf16.msra.mxu1 %v20254_v14  ;;  %16295 = vmatprep.subr.bf16.mxu0 %v20259_v6  ;;  %v20269_v14 = vld [vmem:[#allocation8 + $0xe70] ss:$24 sps:$4 sm:$0xff]   ;;  %v8960_v6 = vmul.f32 0.7978845, %v8912_v30  ;;  %21815 = vtanh.f32 %v8986_v21  ;;  %v20304_v21 = vld [vmem:[#allocation8 + $0x1084] ss:$24 sps:$4 sm:$0xff]  }
 0x561   :  { %16338 = vmatprep.subr.bf16.mxu1 %v20262_v12  ;;  %v9087_v55 = vadd.f32 1.0, %v21812_v61  ;;  %v20272_v12 = vld [vmem:[#allocation8 + $0x1170] ss:$24 sps:$4 sm:$0xff]   ;;  %v20283_v61 = vld [vmem:[#allocation8 + $0xe14] ss:$24 sps:$4 sm:$0xff]  }
 0x562   :  { %21817 = vtanh.f32 %v8960_v6  ;;  %v20293_v30 = vld [vmem:[#allocation8 + $0xdb0] ss:$24 sps:$4 sm:$0xff]  }
 0x563   :  { %16296 = vmatpush2.bf16.msra.mxu0 %v20257_v63  ;;  %v9135_v36 = vmul.f32 %v9087_v55, %v8751_v46  ;;  %v20275_v63 = vld [vmem:[#allocation8 + $0xe40] ss:$24 sps:$4 sm:$0xff]   ;;  %21819 = vtanh.f32 %v8962_v41  ;;  %v20292_v46 = vld [vmem:[#allocation8 + $0x10e4] ss:$24 sps:$4 sm:$0xff]  }
 0x564   :  { %16339 = vmatpush2.bf16.msra.mxu1 %v20260_v37  ;;  %16297 = vmatprep.subr.bf16.mxu0 %v20265_v44  ;;  %v20281_v37 = vld [vmem:[#allocation8 + $0xe10] ss:$24 sps:$4 sm:$0xff]   ;;  %v20287_v55 = vld [vmem:[#allocation8 + $0xde0] ss:$24 sps:$4 sm:$0xff]  }
 0x565   :  { %16340 = vmatprep.subr.bf16.mxu1 %v20268_v33  ;;  %v22795_v24 = vpack.c.bf16 %v9135_v36, %v9111_v10  ;;  %v20284_v44 = vld [vmem:[#allocation8 + $0x1110] ss:$24 sps:$4 sm:$0xff]   ;;  %v22797_v33 = vpop.f32.mrf.mxu1  ;;  %v20298_v10 = vld [vmem:[#allocation8 + $0x10b4] ss:$24 sps:$4 sm:$0xff]   ;;  %v20302_v41 = vld [vmem:[#allocation8 + $0x1080] ss:$24 sps:$4 sm:$0xff]  }
 0x567   :  { %16298 = vmatpush2.bf16.msra.mxu0 %v20263_v43  ;;  %v8612_v43 = vpop.f32.mrf.mxu1 }
 0x568   :  { %16341 = vmatpush2.bf16.msra.mxu1 %v20266_v5  ;;  %16299 = vmatprep.subr.bf16.mxu0 %v20271_v15  ;;  %v20296_v15 = vld [vmem:[#allocation8 + $0x10b0] ss:$24 sps:$4 sm:$0xff]  }
 0x569   :  { %16342 = vmatprep.subr.bf16.mxu1 %v20274_v9  ;;  %v22799_v16 = vpop.f32.mrf.mxu1 }
 0x56b   :  { %16300 = vmatpush2.bf16.msra.mxu0 %v20269_v14 }
 0x56c   :  { %16343 = vmatpush2.bf16.msra.mxu1 %v20272_v12  ;;  %16301 = vmatprep.subr.bf16.mxu0 %v20277_v11  ;;  %v21814_v36 = vpop.eup %21813  ;;  %v20299_v12 = vld [vmem:[#allocation8 + $0xd80] ss:$24 sps:$4 sm:$0xff]  }
 0x56d   :  { %16344 = vmatprep.subr.bf16.mxu1 %v20280_v53  ;;  %v21816_v5 = vpop.eup %21815  ;;  %v9080_v6 = vadd.f32 1.0, %v21814_v36  ;;  %v20307_v53 = vld [vmem:[#allocation8 + $0x1354] ss:$24 sps:$4 sm:$0xff]  }
 0x56e   :  { %v9082_v11 = vadd.f32 1.0, %v21816_v5 }
 0x56f   :  { %16302 = vmatpush2.bf16.msra.mxu0 %v20275_v63  ;;  %v21818_v9 = vpop.eup %21817  ;;  %v8744_v63 = vmul.f32 0.5, %v22769_v0  ;;  %v20308_v0 = vld [vmem:[#allocation8 + $0x1650] ss:$24 sps:$4 sm:$0xff]  }
 0x570   :  { %16345 = vmatpush2.bf16.msra.mxu1 %v20278_v60  ;;  %16303 = vmatprep.subr.bf16.mxu0 %v20283_v61  ;;  %v21820_v14 = vpop.eup %21819  ;;  %v9056_v60 = vadd.f32 1.0, %v21818_v9  ;;  %v23249_v61 = vld [vmem:[#allocation20_spill] sm:$0xff] }
 0x571   :  { %16346 = vmatprep.subr.bf16.mxu1 %v20286_v26  ;;  %v1340_v26 = vrot.slane %v22656_v13, %v23249_v61  ;;  %v20313_v9 = vld [vmem:[#allocation8 + $0x1324] ss:$24 sps:$4 sm:$0xff]  }
 0x573   :  { %16304 = vmatpush2.bf16.msra.mxu0 %v20281_v37  ;;  %v8616_v37 = vpop.f32.mrf.mxu1 }
 0x574   :  { %16347 = vmatpush2.bf16.msra.mxu1 %v20284_v44  ;;  %16305 = vmatprep.subr.bf16.mxu0 %v20289_v54  ;;  %v20310_v44 = vld [vmem:[#allocation8 + $0x1654] ss:$24 sps:$4 sm:$0xff]   ;;  %v8746_v54 = vmul.f32 0.5, %v22772_v38  ;;  %v8617_v61 = vadd.f32 %v8616_v37, %v1340_v26  ;;  %v20325_v37 = vld [vmem:[#allocation8 + $0x12c4] ss:$24 sps:$4 sm:$0xff]  }
 0x575   :  { %16348 = vmatprep.subr.bf16.mxu1 %v20292_v46  ;;  %v9058_v46 = vadd.f32 1.0, %v21820_v14 }
 0x576   :  { %v9130_v36 = vmul.f32 %v9082_v11, %v8746_v54  ;;  %v23251_v11 = vld [vmem:[#allocation33_spill] sm:$0xff] }
 0x577   :  { %16306 = vmatpush2.bf16.msra.mxu0 %v20287_v55  ;;  %v8720_v55 = vmul.f32 0.5, %v22766_v28  ;;  %v23250_v28 = vld [vmem:[#allocation26_spill] sm:$0xff] }
 0x578   :  { %16349 = vmatpush2.bf16.msra.mxu1 %v20290_v2  ;;  %16307 = vmatprep.subr.bf16.mxu0 %v20295_v56  ;;  %v9128_v2 = vmul.f32 %v9080_v6, %v8744_v63  ;;  %v20305_v56 = vld [vmem:[#allocation8 + $0x1350] ss:$24 sps:$4 sm:$0xff]   ;;  %v20316_v6 = vld [vmem:[#allocation8 + $0x1624] ss:$24 sps:$4 sm:$0xff]   ;;  %v20314_v63 = vld [vmem:[#allocation8 + $0x1620] ss:$24 sps:$4 sm:$0xff]  }
 0x579   :  { %16350 = vmatprep.subr.bf16.mxu1 %v20298_v10  ;;  %v8722_v10 = vmul.f32 0.5, %v22775_v34  ;;  %v9104_v5 = vmul.f32 %v9056_v60, %v8720_v55  ;;  %v20319_v60 = vld [vmem:[#allocation8 + $0x12f4] ss:$24 sps:$4 sm:$0xff]  }
 0x57b   :  { %16308 = vmatpush2.bf16.msra.mxu0 %v20293_v30  ;;  %v22807_v30 = vpop.f32.mrf.mxu0  ;;  %v9106_v38 = vmul.f32 %v9058_v46, %v8722_v10  ;;  %v22812_v14 = vpack.c.bf16 %v9128_v2, %v9104_v5  ;;  %v20322_v46 = vld [vmem:[#allocation8 + $0x15f4] ss:$24 sps:$4 sm:$0xff]   ;;  %v20317_v10 = vld [vmem:[#allocation8 + $0x12f0] ss:$24 sps:$4 sm:$0xff]  }
 0x57c   :  { %16351 = vmatpush2.bf16.msra.mxu1 %v20296_v15  ;;  %16309 = vmatprep.subr.bf16.mxu0 %v20301_v48  ;;  %v8613_v15 = vadd.f32 %v8612_v43, %v1340_v26  ;;  %v22809_v48 = vpop.f32.mrf.mxu1  ;;  %v20320_v26 = vld [vmem:[#allocation8 + $0x15f0] ss:$24 sps:$4 sm:$0xff]  }
 0x57d   :  { %16352 = vmatprep.subr.bf16.mxu1 %v20304_v21 }
 0x57f   :  { %16310 = vmatpush2.bf16.msra.mxu0 %v20299_v12 }
 0x580   :  { %16353 = vmatpush2.bf16.msra.mxu1 %v20302_v41  ;;  %16365 = vmatprep.subr.bf16.mxu0 %v20307_v53  ;;  %v22815_v41 = vpack.c.bf16 %v9130_v36, %v9106_v38  ;;  %v20311_v53 = vld [vmem:[#allocation8 + $0x1320] ss:$24 sps:$4 sm:$0xff]   ;;  %v1320_v38 = vrot.slane %v22656_v13, %v22501_v8 }
 0x581   :  { %16408 = vmatprep.subr.bf16.mxu1 %v20310_v44 }
 0x582   :  { %v8655_v21 = vpop.f32.mrf.mxu0  ;;  %16312 = vmatmul.mubr.bf16.vlgmr.msra.gmra.mxu0 %v23250_v28 }
 0x583   :  { %v8656_v34 = vadd.f32 %v8655_v21, %v8613_v15  ;;  %v8698_v12 = vpop.f32.mrf.mxu1  ;;  %16355 = vmatmul.mubr.bf16.vlgmr.msra.gmra.mxu1 %v23251_v11  ;;  %16366 = vmatpush1.bf16.msra.mxu0 %v20305_v56  ;;  %v20328_v15 = vld [vmem:[#allocation8 + $0x15c4] ss:$24 sps:$4 sm:$0xff]  }
 0x584   :  { %16397 = vmatprep.mubr.bf16.mxu0 %v22812_v14  ;;  %16409 = vmatpush1.bf16.msra.mxu1 %v20308_v0  ;;  %v22818_v43 = vpop.f32.mrf.mxu0 }
 0x585   :  { %v22820_v44 = vadd.f32 %v8698_v12, %v8656_v34  ;;  %16440 = vmatprep.mubr.bf16.mxu1 %v22815_v41  ;;  %v22823_v54 = vpop.f32.mrf.mxu1  ;;  %16367 = vmatprep.subr.bf16.mxu0 %v20313_v9  ;;  %v1328_v9 = vrot.slane %v22656_v13, %v22508_v39  ;;  %v20323_v34 = vld [vmem:[#allocation8 + $0x12c0] ss:$24 sps:$4 sm:$0xff]   ;;  %v23252_v12 = vld [vmem:[#allocation52_spill] sm:$0xff] }
 0x586   :  { %v8659_v55 = vpop.f32.mrf.mxu0  ;;  %16410 = vmatprep.subr.bf16.mxu1 %v20316_v6  ;;  %v20334_v13 = vld [vmem:[#allocation8 + $0x1594] ss:$24 sps:$4 sm:$0xff]  }
 0x587   :  { %v8777_v2 = vmul.f32 %v22820_v44, %v22820_v44  ;;  %v8660_v56 = vadd.f32 %v8659_v55, %v8617_v61  ;;  %16368 = vmatpush1.bf16.msra.mxu0 %v20311_v53  ;;  %v8702_v36 = vpop.f32.mrf.mxu1  ;;  %v8232_v53 = vadd.f32 %v23252_v12, %v1320_v38  ;;  %v8361_v61 = vadd.f32 %v22578_v47, %v1328_v9  ;;  %v20332_v47 = vld [vmem:[#allocation8 + $0x1590] ss:$24 sps:$4 sm:$0xff]  }
 0x588   :  { %16411 = vmatpush1.bf16.msra.mxu1 %v20314_v63  ;;  %16369 = vmatprep.subr.bf16.mxu0 %v20319_v60  ;;  %v20326_v63 = vld [vmem:[#allocation8 + $0x15c0] ss:$24 sps:$4 sm:$0xff]   ;;  %v20331_v60 = vld [vmem:[#allocation8 + $0x1294] ss:$24 sps:$4 sm:$0xff]  }
 0x589   :  { %v8825_v0 = vmul.f32 %v8777_v2, %v22820_v44  ;;  %v22828_v5 = vadd.f32 %v8702_v36, %v8660_v56  ;;  %16412 = vmatprep.subr.bf16.mxu1 %v20322_v46  ;;  %v23253_v2 = vld [vmem:[#allocation50_spill] sm:$0xff]  ;;  %v8357_v36 = vadd.f32 %v22568_v42, %v1328_v9  ;;  %v23254_v42 = vld [vmem:[#allocation51_spill] sm:$0xff] }
 0x58a   :  { %v8228_v56 = vadd.f32 %v23253_v2, %v1320_v38  ;;  %v20340_v38 = vld [vmem:[#allocation8 + $0x1564] ss:$24 sps:$4 sm:$0xff]  }
 0x58b   :  { %v8873_v21 = vmul.f32 0.044715, %v8825_v0  ;;  %v8801_v6 = vmul.f32 %v22828_v5, %v22828_v5  ;;  %16370 = vmatpush1.bf16.msra.mxu0 %v20317_v10  ;;  %v8404_v10 = vadd.f32 %v22661_v7, %v8361_v61  ;;  %v20343_v61 = vld [vmem:[#allocation8 + $0x1234] ss:$24 sps:$4 sm:$0xff]  }
 0x58c   :  { %16413 = vmatpush1.bf16.msra.mxu1 %v20320_v26  ;;  %16371 = vmatprep.subr.bf16.mxu0 %v20325_v37  ;;  %v20329_v26 = vld [vmem:[#allocation8 + $0x1290] ss:$24 sps:$4 sm:$0xff]   ;;  %v8275_v37 = vadd.f32 %v22566_v1, %v8232_v53  ;;  %v8271_v9 = vadd.f32 %v23254_v42, %v8228_v56  ;;  %v20335_v53 = vld [vmem:[#allocation8 + $0x1260] ss:$24 sps:$4 sm:$0xff]  }
 0x58d   :  { %v8921_v46 = vadd.f32 %v8873_v21, %v22820_v44  ;;  %v8849_v55 = vmul.f32 %v8801_v6, %v22828_v5  ;;  %16414 = vmatprep.subr.bf16.mxu1 %v20328_v15  ;;  %v20337_v21 = vld [vmem:[#allocation8 + $0x1264] ss:$24 sps:$4 sm:$0xff]   ;;  %v8400_v6 = vadd.f32 %v22586_v50, %v8357_v36  ;;  %v20338_v50 = vld [vmem:[#allocation8 + $0x1560] ss:$24 sps:$4 sm:$0xff]   ;;  %v20344_v56 = vld [vmem:[#allocation8 + $0x1530] ss:$24 sps:$4 sm:$0xff]  }
 0x58e   :  { %v22848_v7 = vadd.f32 %v22576_v62, %v8275_v37  ;;  %v20346_v62 = vld [vmem:[#allocation8 + $0x1534] ss:$24 sps:$4 sm:$0xff]   ;;  %v20349_v36 = vld [vmem:[#allocation8 + $0x1204] ss:$24 sps:$4 sm:$0xff]  }
 0x58f   :  { %v8969_v0 = vmul.f32 0.7978845, %v8921_v46  ;;  %v8897_v12 = vmul.f32 0.044715, %v8849_v55  ;;  %16372 = vmatpush1.bf16.msra.mxu0 %v20323_v34  ;;  %v22851_v34 = vadd.f32 %v22663_v49, %v8404_v10  ;;  %v22857_v46 = vadd.f32 %v22591_v23, %v8400_v6  ;;  %v20352_v10 = vld [vmem:[#allocation8 + $0x1504] ss:$24 sps:$4 sm:$0xff]  }
 0x590   :  { %16415 = vmatpush1.bf16.msra.mxu1 %v20326_v63  ;;  %16373 = vmatprep.subr.bf16.mxu0 %v20331_v60  ;;  %v23255_v63 = vld [vmem:[#allocation53_spill] sm:$0xff]  ;;  %v8796_v49 = vmul.f32 %v22848_v7, %v22848_v7 }
 0x591   :  { %21821 = vtanh.f32 %v8969_v0  ;;  %v8945_v15 = vadd.f32 %v8897_v12, %v22828_v5  ;;  %16416 = vmatprep.subr.bf16.mxu1 %v20334_v13  ;;  %v22854_v60 = vadd.f32 %v23255_v63, %v8271_v9  ;;  %v8798_v55 = vmul.f32 %v22851_v34, %v22851_v34  ;;  %v20341_v13 = vld [vmem:[#allocation8 + $0x1230] ss:$24 sps:$4 sm:$0xff]  }
 0x592   :  { %v8774_v23 = vmul.f32 %v22857_v46, %v22857_v46  ;;  %v8844_v0 = vmul.f32 %v8796_v49, %v22848_v7  ;;  %v20356_v63 = vld [vmem:[#allocation8 + $0x17d0] ss:$24 sps:$4 sm:$0xff]  }
 0x593   :  { %v8993_v1 = vmul.f32 0.7978845, %v8945_v15  ;;  %16374 = vmatpush1.bf16.msra.mxu0 %v20329_v26  ;;  %v8772_v2 = vmul.f32 %v22854_v60, %v22854_v60  ;;  %v8846_v12 = vmul.f32 %v8798_v55, %v22851_v34  ;;  %v20347_v26 = vld [vmem:[#allocation8 + $0x1200] ss:$24 sps:$4 sm:$0xff]   ;;  %v20358_v15 = vld [vmem:[#allocation8 + $0x17d4] ss:$24 sps:$4 sm:$0xff]  }
 0x594   :  { %16417 = vmatpush1.bf16.msra.mxu1 %v20332_v47  ;;  %16375 = vmatprep.subr.bf16.mxu0 %v20337_v21  ;;  %v20350_v47 = vld [vmem:[#allocation8 + $0x1500] ss:$24 sps:$4 sm:$0xff]   ;;  %v20355_v21 = vld [vmem:[#allocation8 + $0x14d4] ss:$24 sps:$4 sm:$0xff]   ;;  %v8822_v6 = vmul.f32 %v8774_v23, %v22857_v46  ;;  %v8892_v42 = vmul.f32 0.044715, %v8844_v0 }
 0x595   :  { %21823 = vtanh.f32 %v8993_v1  ;;  %16418 = vmatprep.subr.bf16.mxu1 %v20340_v38  ;;  %v8820_v37 = vmul.f32 %v8772_v2, %v22854_v60  ;;  %v8894_v9 = vmul.f32 0.044715, %v8846_v12  ;;  %v20353_v1 = vld [vmem:[#allocation8 + $0x14d0] ss:$24 sps:$4 sm:$0xff]   ;;  %v20359_v23 = vld [vmem:[#allocation8 + $0x14a0] ss:$24 sps:$4 sm:$0xff]  }
 0x596   :  { %v20362_v12 = vld [vmem:[#allocation8 + $0x17a0] ss:$24 sps:$4 sm:$0xff]  }
 0x597   :  { %16376 = vmatpush1.bf16.msra.mxu0 %v20335_v53  ;;  %v8868_v53 = vmul.f32 0.044715, %v8820_v37  ;;  %v8942_v2 = vadd.f32 %v8894_v9, %v22851_v34  ;;  %v20368_v9 = vld [vmem:[#allocation8 + $0x1770] ss:$24 sps:$4 sm:$0xff]  }
 0x598   :  { %16419 = vmatpush1.bf16.msra.mxu1 %v20338_v50  ;;  %16377 = vmatprep.subr.bf16.mxu0 %v20343_v61  ;;  %v20361_v50 = vld [vmem:[#allocation8 + $0x14a4] ss:$24 sps:$4 sm:$0xff]   ;;  %v8870_v61 = vmul.f32 0.044715, %v8822_v6 }
 0x599   :  { %16420 = vmatprep.subr.bf16.mxu1 %v20346_v62  ;;  %v20364_v62 = vld [vmem:[#allocation8 + $0x17a4] ss:$24 sps:$4 sm:$0xff]   ;;  %v8916_v0 = vadd.f32 %v8868_v53, %v22854_v60 }
 0x59a   :  { %v8918_v37 = vadd.f32 %v8870_v61, %v22857_v46  ;;  %v20374_v61 = vld [vmem:[#allocation8 + $0x1740] ss:$24 sps:$4 sm:$0xff]  }
 0x59b   :  { %16378 = vmatpush1.bf16.msra.mxu0 %v20341_v13  ;;  %v8940_v13 = vadd.f32 %v8892_v42, %v22848_v7  ;;  %v8964_v42 = vmul.f32 0.7978845, %v8916_v0  ;;  %v20394_v0 = vld [vmem:[#allocation8 + $0x16b4] ss:$24 sps:$4 sm:$0xff]  }
 0x59c   :  { %16421 = vmatpush1.bf16.msra.mxu1 %v20344_v56  ;;  %16379 = vmatprep.subr.bf16.mxu0 %v20349_v36  ;;  %v8729_v56 = vmul.f32 0.5, %v22820_v44  ;;  %v8753_v36 = vmul.f32 0.5, %v22828_v5  ;;  %v20365_v44 = vld [vmem:[#allocation8 + $0x1470] ss:$24 sps:$4 sm:$0xff]   ;;  %v8966_v53 = vmul.f32 0.7978845, %v8918_v37 }
 0x59d   :  { %16422 = vmatprep.subr.bf16.mxu1 %v20352_v10 }
 0x59e   :  { %v21822_v38 = vpop.eup %21821 }
 0x59f   :  { %16380 = vmatpush1.bf16.msra.mxu0 %v20347_v26  ;;  %v9065_v49 = vadd.f32 1.0, %v21822_v38  ;;  %v20367_v26 = vld [vmem:[#allocation8 + $0x1474] ss:$24 sps:$4 sm:$0xff]   ;;  %v8990_v38 = vmul.f32 0.7978845, %v8942_v2 }
 0x5a0   :  { %16423 = vmatpush1.bf16.msra.mxu1 %v20350_v47  ;;  %16381 = vmatprep.subr.bf16.mxu0 %v20355_v21  ;;  %v20370_v47 = vld [vmem:[#allocation8 + $0x1774] ss:$24 sps:$4 sm:$0xff]   ;;  %v20385_v2 = vld [vmem:[#allocation8 + $0x13e4] ss:$24 sps:$4 sm:$0xff]  }
 0x5a1   :  { %16424 = vmatprep.subr.bf16.mxu1 %v20358_v15  ;;  %v9113_v21 = vmul.f32 %v9065_v49, %v8729_v56  ;;  %v8988_v15 = vmul.f32 0.7978845, %v8940_v13  ;;  %v20382_v49 = vld [vmem:[#allocation8 + $0x1714] ss:$24 sps:$4 sm:$0xff]   ;;  %v20380_v13 = vld [vmem:[#allocation8 + $0x1710] ss:$24 sps:$4 sm:$0xff]  }
 0x5a2   :  { %v21824_v55 = vpop.eup %21823  ;;  %v20388_v56 = vld [vmem:[#allocation8 + $0x16e4] ss:$24 sps:$4 sm:$0xff]  }
 0x5a3   :  { %16382 = vmatpush2.bf16.msra.mxu0 %v20353_v1  ;;  %v9089_v10 = vadd.f32 1.0, %v21824_v55  ;;  %v20373_v1 = vld [vmem:[#allocation8 + $0x1444] ss:$24 sps:$4 sm:$0xff]   ;;  %21825 = vtanh.f32 %v8988_v15  ;;  %v20377_v55 = vld [vmem:[#allocation8 + $0x1410] ss:$24 sps:$4 sm:$0xff]  }
 0x5a4   :  { %16425 = vmatpush2.bf16.msra.mxu1 %v20356_v63  ;;  %16383 = vmatprep.subr.bf16.mxu0 %v20361_v50  ;;  %v20376_v63 = vld [vmem:[#allocation8 + $0x1744] ss:$24 sps:$4 sm:$0xff]   ;;  %21827 = vtanh.f32 %v8990_v38  ;;  %v20371_v50 = vld [vmem:[#allocation8 + $0x1440] ss:$24 sps:$4 sm:$0xff]  }
 0x5a5   :  { %16426 = vmatprep.subr.bf16.mxu1 %v20364_v62  ;;  %v9137_v6 = vmul.f32 %v9089_v10, %v8753_v36  ;;  %21829 = vtanh.f32 %v8964_v42  ;;  %v20379_v62 = vld [vmem:[#allocation8 + $0x1414] ss:$24 sps:$4 sm:$0xff]   ;;  %v20383_v36 = vld [vmem:[#allocation8 + $0x13e0] ss:$24 sps:$4 sm:$0xff]   ;;  %v20400_v15 = vld [vmem:[#allocation8 + $0x1684] ss:$24 sps:$4 sm:$0xff]  }
 0x5a6   :  { %21831 = vtanh.f32 %v8966_v53  ;;  %v20391_v10 = vld [vmem:[#allocation8 + $0x13b4] ss:$24 sps:$4 sm:$0xff]   ;;  %v20395_v42 = vld [vmem:[#allocation8 + $0x1380] ss:$24 sps:$4 sm:$0xff]  }
 0x5a7   :  { %16384 = vmatpush2.bf16.msra.mxu0 %v20359_v23  ;;  %v22877_v5 = vpack.c.bf16 %v9137_v6, %v9113_v21  ;;  %v20386_v23 = vld [vmem:[#allocation8 + $0x16e0] ss:$24 sps:$4 sm:$0xff]   ;;  %v20397_v21 = vld [vmem:[#allocation8 + $0x1384] ss:$24 sps:$4 sm:$0xff]   ;;  %v20403_v53 = vld [vmem:[#allocation8 + $0x1954] ss:$24 sps:$4 sm:$0xff]  }
 0x5a8   :  { %16427 = vmatpush2.bf16.msra.mxu1 %v20362_v12  ;;  %16385 = vmatprep.subr.bf16.mxu0 %v20367_v26  ;;  %v20389_v26 = vld [vmem:[#allocation8 + $0x13b0] ss:$24 sps:$4 sm:$0xff]  }
 0x5a9   :  { %16428 = vmatprep.subr.bf16.mxu1 %v20370_v47  ;;  %v20392_v47 = vld [vmem:[#allocation8 + $0x16b0] ss:$24 sps:$4 sm:$0xff]  }
 0x5ab   :  { %16386 = vmatpush2.bf16.msra.mxu0 %v20365_v44 }
 0x5ac   :  { %16429 = vmatpush2.bf16.msra.mxu1 %v20368_v9  ;;  %16387 = vmatprep.subr.bf16.mxu0 %v20373_v1  ;;  %v20398_v1 = vld [vmem:[#allocation8 + $0x1680] ss:$24 sps:$4 sm:$0xff]  }
 0x5ad   :  { %16430 = vmatprep.subr.bf16.mxu1 %v20376_v63  ;;  %v8748_v63 = vmul.f32 0.5, %v22848_v7 }
 0x5af   :  { %16388 = vmatpush2.bf16.msra.mxu0 %v20371_v50 }
 0x5b0   :  { %16431 = vmatpush2.bf16.msra.mxu1 %v20374_v61  ;;  %16389 = vmatprep.subr.bf16.mxu0 %v20379_v62  ;;  %v21826_v12 = vpop.eup %21825  ;;  %v20406_v61 = vld [vmem:[#allocation8 + $0x1c54] ss:$24 sps:$4 sm:$0xff]   ;;  %v8750_v62 = vmul.f32 0.5, %v22851_v34  ;;  %v20412_v34 = vld [vmem:[#allocation8 + $0x1c24] ss:$24 sps:$4 sm:$0xff]  }
 0x5b1   :  { %16432 = vmatprep.subr.bf16.mxu1 %v20382_v49  ;;  %v21828_v37 = vpop.eup %21827  ;;  %v9084_v44 = vadd.f32 1.0, %v21826_v12  ;;  %v23256_v12 = vld [vmem:[#allocation40_spill] sm:$0xff] }
 0x5b2   :  { %v21830_v6 = vpop.eup %21829  ;;  %v9086_v9 = vadd.f32 1.0, %v21828_v37  ;;  %v23257_v37 = vld [vmem:[#allocation47_spill] sm:$0xff] }
 0x5b3   :  { %16390 = vmatpush2.bf16.msra.mxu0 %v20377_v55  ;;  %v21832_v38 = vpop.eup %21831  ;;  %v9060_v50 = vadd.f32 1.0, %v21830_v6  ;;  %v8724_v55 = vmul.f32 0.5, %v22854_v60  ;;  %v20418_v6 = vld [vmem:[#allocation8 + $0x1bf4] ss:$24 sps:$4 sm:$0xff]  }
 0x5b4   :  { %16433 = vmatpush2.bf16.msra.mxu1 %v20380_v13  ;;  %16391 = vmatprep.subr.bf16.mxu0 %v20385_v2  ;;  %v9062_v49 = vadd.f32 1.0, %v21832_v38  ;;  %v9132_v13 = vmul.f32 %v9084_v44, %v8748_v63  ;;  %v20401_v2 = vld [vmem:[#allocation8 + $0x1950] ss:$24 sps:$4 sm:$0xff]   ;;  %v20421_v44 = vld [vmem:[#allocation8 + $0x18c4] ss:$24 sps:$4 sm:$0xff]  }
 0x5b5   :  { %16434 = vmatprep.subr.bf16.mxu1 %v20388_v56  ;;  %v8726_v56 = vmul.f32 0.5, %v22857_v46  ;;  %v20410_v46 = vld [vmem:[#allocation8 + $0x1c20] ss:$24 sps:$4 sm:$0xff]   ;;  %v20416_v38 = vld [vmem:[#allocation8 + $0x1bf0] ss:$24 sps:$4 sm:$0xff]  }
 0x5b6   :  { %v20419_v63 = vld [vmem:[#allocation8 + $0x18c0] ss:$24 sps:$4 sm:$0xff]  }
 0x5b7   :  { %16392 = vmatpush2.bf16.msra.mxu0 %v20383_v36  ;;  %v9134_v36 = vmul.f32 %v9086_v9, %v8750_v62  ;;  %v9110_v7 = vmul.f32 %v9062_v49, %v8726_v56  ;;  %v21879_v9 = vld [vmem:[#allocation7 + $0x10] sm:$0xff]  ;;  %v20427_v49 = vld [vmem:[#allocation8 + $0x1894] ss:$24 sps:$4 sm:$0xff]  }
 0x5b8   :  { %16435 = vmatpush2.bf16.msra.mxu1 %v20386_v23  ;;  %16393 = vmatprep.subr.bf16.mxu0 %v20391_v10  ;;  %v20404_v23 = vld [vmem:[#allocation8 + $0x1c50] ss:$24 sps:$4 sm:$0xff]   ;;  %v9108_v10 = vmul.f32 %v9060_v50, %v8724_v55  ;;  %v20422_v62 = vld [vmem:[#allocation8 + $0x1bc0] ss:$24 sps:$4 sm:$0xff]  }
 0x5b9   :  { %16436 = vmatprep.subr.bf16.mxu1 %v20394_v0  ;;  %v20409_v0 = vld [vmem:[#allocation8 + $0x1924] ss:$24 sps:$4 sm:$0xff]   ;;  %v22887_v60 = vpack.c.bf16 %v9134_v36, %v9110_v7 }
 0x5bb   :  { %16394 = vmatpush2.bf16.msra.mxu0 %v20389_v26  ;;  %v22884_v26 = vpack.c.bf16 %v9132_v13, %v9108_v10  ;;  %v20430_v13 = vld [vmem:[#allocation8 + $0x1b94] ss:$24 sps:$4 sm:$0xff]   ;;  %v20433_v10 = vld [vmem:[#allocation8 + $0x1864] ss:$24 sps:$4 sm:$0xff]  }
 0x5bc   :  { %16437 = vmatpush2.bf16.msra.mxu1 %v20392_v47  ;;  %16395 = vmatprep.subr.bf16.mxu0 %v20397_v21  ;;  %v20407_v47 = vld [vmem:[#allocation8 + $0x1920] ss:$24 sps:$4 sm:$0xff]   ;;  %v20415_v21 = vld [vmem:[#allocation8 + $0x18f4] ss:$24 sps:$4 sm:$0xff]  }
 0x5bd   :  { %16438 = vmatprep.subr.bf16.mxu1 %v20400_v15  ;;  %v20413_v15 = vld [vmem:[#allocation8 + $0x18f0] ss:$24 sps:$4 sm:$0xff]  }
 0x5bf   :  { %16396 = vmatpush2.bf16.msra.mxu0 %v20395_v42  ;;  %v20424_v42 = vld [vmem:[#allocation8 + $0x1bc4] ss:$24 sps:$4 sm:$0xff]  }
 0x5c0   :  { %16439 = vmatpush2.bf16.msra.mxu1 %v20398_v1  ;;  %16451 = vmatprep.subr.bf16.mxu0 %v20403_v53  ;;  %v1336_v1 = vrot.slane %v21879_v9, %v22594_v40  ;;  %v1344_v53 = vrot.slane %v21879_v9, %v22597_v57  ;;  %v20425_v57 = vld [vmem:[#allocation8 + $0x1890] ss:$24 sps:$4 sm:$0xff]  }
 0x5c1   :  { %16494 = vmatprep.subr.bf16.mxu1 %v20406_v61  ;;  %v8661_v61 = vpop.f32.mrf.mxu0 }
 0x5c2   :  { %16398 = vmatmul.mubr.bf16.vlgmr.msra.gmra.mxu0 %v23256_v12  ;;  %v8490_v50 = vadd.f32 %v22727_v32, %v1336_v1  ;;  %v8619_v55 = vadd.f32 %v22809_v48, %v1344_v53  ;;  %v8615_v56 = vadd.f32 %v22799_v16, %v1344_v53  ;;  %v20428_v32 = vld [vmem:[#allocation8 + $0x1b90] ss:$24 sps:$4 sm:$0xff]   ;;  %v20443_v53 = vld [vmem:[#allocation8 + $0x1800] ss:$24 sps:$4 sm:$0xff]  }
 0x5c3   :  { %16441 = vmatmul.mubr.bf16.vlgmr.msra.gmra.mxu1 %v23257_v37  ;;  %16452 = vmatpush1.bf16.msra.mxu0 %v20401_v2  ;;  %v8486_v2 = vadd.f32 %v22672_v20, %v1336_v1  ;;  %v8704_v20 = vpop.f32.mrf.mxu1 }
 0x5c4   :  { %16483 = vmatprep.mubr.bf16.mxu0 %v22884_v26  ;;  %16495 = vmatpush1.bf16.msra.mxu1 %v20404_v23  ;;  %v8662_v36 = vadd.f32 %v8661_v61, %v8619_v55  ;;  %v8533_v23 = vadd.f32 %v22797_v33, %v8490_v50  ;;  %v8658_v7 = vadd.f32 %v22818_v43, %v8615_v56  ;;  %v20446_v50 = vld [vmem:[#allocation8 + $0x1b00] ss:$24 sps:$4 sm:$0xff]   ;;  %v20451_v61 = vld [vmem:[#allocation8 + $0x1ad4] ss:$24 sps:$4 sm:$0xff]  }
 0x5c5   :  { %16526 = vmatprep.mubr.bf16.mxu1 %v22887_v60  ;;  %16453 = vmatprep.subr.bf16.mxu0 %v20409_v0  ;;  %v20436_v0 = vld [vmem:[#allocation8 + $0x1b64] ss:$24 sps:$4 sm:$0xff]   ;;  %v8529_v48 = vadd.f32 %v22677_v35, %v8486_v2  ;;  %v20442_v35 = vld [vmem:[#allocation8 + $0x1b34] ss:$24 sps:$4 sm:$0xff]   ;;  %v20449_v2 = vld [vmem:[#allocation8 + $0x1ad0] ss:$24 sps:$4 sm:$0xff]  }
 0x5c6   :  { %16496 = vmatprep.subr.bf16.mxu1 %v20412_v34  ;;  %v22901_v34 = vadd.f32 %v22807_v30, %v8533_v23  ;;  %v22903_v16 = vadd.f32 %v8704_v20, %v8662_v36  ;;  %v22909_v43 = vadd.f32 %v22823_v54, %v8658_v7  ;;  %v20452_v36 = vld [vmem:[#allocation8 + $0x1dd0] ss:$24 sps:$4 sm:$0xff]   ;;  %v20458_v20 = vld [vmem:[#allocation8 + $0x1da0] ss:$24 sps:$4 sm:$0xff]  }
 0x5c7   :  { %16454 = vmatpush1.bf16.msra.mxu0 %v20407_v47  ;;  %v20431_v47 = vld [vmem:[#allocation8 + $0x1860] ss:$24 sps:$4 sm:$0xff]   ;;  %v22906_v33 = vadd.f32 %v22739_v29, %v8529_v48 }
 0x5c8   :  { %16497 = vmatpush1.bf16.msra.mxu1 %v20410_v46  ;;  %16455 = vmatprep.subr.bf16.mxu0 %v20415_v21  ;;  %v20434_v46 = vld [vmem:[#allocation8 + $0x1b60] ss:$24 sps:$4 sm:$0xff]   ;;  %v20439_v21 = vld [vmem:[#allocation8 + $0x1834] ss:$24 sps:$4 sm:$0xff]   ;;  %v8800_v30 = vmul.f32 %v22901_v34, %v22901_v34  ;;  %v8778_v54 = vmul.f32 %v22909_v43, %v22909_v43 }
 0x5c9   :  { %16498 = vmatprep.subr.bf16.mxu1 %v20418_v6  ;;  %v8802_v6 = vmul.f32 %v22903_v16, %v22903_v16  ;;  %v8776_v29 = vmul.f32 %v22906_v33, %v22906_v33 }
 0x5ca   :  { %v8848_v9 = vmul.f32 %v8800_v30, %v22901_v34 }
 0x5cb   :  { %16456 = vmatpush1.bf16.msra.mxu0 %v20413_v15  ;;  %v20437_v15 = vld [vmem:[#allocation8 + $0x1830] ss:$24 sps:$4 sm:$0xff]   ;;  %v8850_v1 = vmul.f32 %v8802_v6, %v22903_v16 }
 0x5cc   :  { %16499 = vmatpush1.bf16.msra.mxu1 %v20416_v38  ;;  %16457 = vmatprep.subr.bf16.mxu0 %v20421_v44  ;;  %v20440_v38 = vld [vmem:[#allocation8 + $0x1b30] ss:$24 sps:$4 sm:$0xff]   ;;  %v20445_v44 = vld [vmem:[#allocation8 + $0x1804] ss:$24 sps:$4 sm:$0xff]   ;;  %v8896_v55 = vmul.f32 0.044715, %v8848_v9 }
 0x5cd   :  { %16500 = vmatprep.subr.bf16.mxu1 %v20424_v42  ;;  %v20448_v42 = vld [vmem:[#allocation8 + $0x1b04] ss:$24 sps:$4 sm:$0xff]   ;;  %v20461_v6 = vld [vmem:[#allocation8 + $0x1a70] ss:$24 sps:$4 sm:$0xff]   ;;  %v20470_v9 = vld [vmem:[#allocation8 + $0x1d40] ss:$24 sps:$4 sm:$0xff]  }
 0x5cf   :  { %16458 = vmatpush1.bf16.msra.mxu0 %v20419_v63  ;;  %v8824_v63 = vmul.f32 %v8776_v29, %v22906_v33  ;;  %v20464_v29 = vld [vmem:[#allocation8 + $0x1d70] ss:$24 sps:$4 sm:$0xff]  }
 0x5d0   :  { %16501 = vmatpush1.bf16.msra.mxu1 %v20422_v62  ;;  %16459 = vmatprep.subr.bf16.mxu0 %v20427_v49  ;;  %v8826_v62 = vmul.f32 %v8778_v54, %v22909_v43  ;;  %v20454_v49 = vld [vmem:[#allocation8 + $0x1dd4] ss:$24 sps:$4 sm:$0xff]   ;;  %v20472_v54 = vld [vmem:[#allocation8 + $0x1d44] ss:$24 sps:$4 sm:$0xff]  }
 0x5d1   :  { %16502 = vmatprep.subr.bf16.mxu1 %v20430_v13  ;;  %v8898_v13 = vmul.f32 0.044715, %v8850_v1  ;;  %v8872_v56 = vmul.f32 0.044715, %v8824_v63  ;;  %v20475_v1 = vld [vmem:[#allocation8 + $0x1a14] ss:$24 sps:$4 sm:$0xff]  }
 0x5d2   :  { %v8874_v23 = vmul.f32 0.044715, %v8826_v62  ;;  %v20473_v63 = vld [vmem:[#allocation8 + $0x1a10] ss:$24 sps:$4 sm:$0xff]   ;;  %v20484_v62 = vld [vmem:[#allocation8 + $0x1ce4] ss:$24 sps:$4 sm:$0xff]  }
 0x5d3   :  { %16460 = vmatpush1.bf16.msra.mxu0 %v20425_v57  ;;  %v20457_v57 = vld [vmem:[#allocation8 + $0x1aa4] ss:$24 sps:$4 sm:$0xff]   ;;  %v8946_v7 = vadd.f32 %v8898_v13, %v22903_v16  ;;  %v8920_v48 = vadd.f32 %v8872_v56, %v22906_v33  ;;  %v20487_v13 = vld [vmem:[#allocation8 + $0x19b4] ss:$24 sps:$4 sm:$0xff]  }
 0x5d4   :  { %16503 = vmatpush1.bf16.msra.mxu1 %v20428_v32  ;;  %16461 = vmatprep.subr.bf16.mxu0 %v20433_v10  ;;  %v20460_v32 = vld [vmem:[#allocation8 + $0x1da4] ss:$24 sps:$4 sm:$0xff]   ;;  %v8944_v10 = vadd.f32 %v8896_v55, %v22901_v34  ;;  %v20482_v55 = vld [vmem:[#allocation8 + $0x1ce0] ss:$24 sps:$4 sm:$0xff]  }
 0x5d5   :  { %16504 = vmatprep.subr.bf16.mxu1 %v20436_v0  ;;  %v20455_v0 = vld [vmem:[#allocation8 + $0x1aa0] ss:$24 sps:$4 sm:$0xff]   ;;  %v8994_v30 = vmul.f32 0.7978845, %v8946_v7  ;;  %v20496_v7 = vld [vmem:[#allocation8 + $0x1c84] ss:$24 sps:$4 sm:$0xff]  }
 0x5d7   :  { %16462 = vmatpush1.bf16.msra.mxu0 %v20431_v47  ;;  %v20463_v47 = vld [vmem:[#allocation8 + $0x1a74] ss:$24 sps:$4 sm:$0xff]  }
 0x5d8   :  { %16505 = vmatpush1.bf16.msra.mxu1 %v20434_v46  ;;  %16463 = vmatprep.subr.bf16.mxu0 %v20439_v21  ;;  %v8922_v46 = vadd.f32 %v8874_v23, %v22909_v43  ;;  %v20466_v21 = vld [vmem:[#allocation8 + $0x1d74] ss:$24 sps:$4 sm:$0xff]   ;;  %v20488_v23 = vld [vmem:[#allocation8 + $0x1cb0] ss:$24 sps:$4 sm:$0xff]  }
 0x5d9   :  { %16506 = vmatprep.subr.bf16.mxu1 %v20442_v35  ;;  %v8992_v35 = vmul.f32 0.7978845, %v8944_v10 }
 0x5db   :  { %16464 = vmatpush1.bf16.msra.mxu0 %v20437_v15  ;;  %v8968_v15 = vmul.f32 0.7978845, %v8920_v48  ;;  %21833 = vtanh.f32 %v8992_v35  ;;  %v8752_v35 = vmul.f32 0.5, %v22901_v34 }
 0x5dc   :  { %16507 = vmatpush1.bf16.msra.mxu1 %v20440_v38  ;;  %16465 = vmatprep.subr.bf16.mxu0 %v20445_v44  ;;  %v20469_v38 = vld [vmem:[#allocation8 + $0x1a44] ss:$24 sps:$4 sm:$0xff]   ;;  %v8970_v44 = vmul.f32 0.7978845, %v8922_v46  ;;  %21835 = vtanh.f32 %v8994_v30  ;;  %v20494_v46 = vld [vmem:[#allocation8 + $0x1c80] ss:$24 sps:$4 sm:$0xff]  }
 0x5dd   :  { %16508 = vmatprep.subr.bf16.mxu1 %v20448_v42  ;;  %v20467_v42 = vld [vmem:[#allocation8 + $0x1a40] ss:$24 sps:$4 sm:$0xff]   ;;  %21837 = vtanh.f32 %v8968_v15  ;;  %v8754_v15 = vmul.f32 0.5, %v22903_v16  ;;  %v20508_v16 = vld [vmem:[#allocation8 + $0x2224] ss:$24 sps:$4 sm:$0xff]  }
 0x5de   :  { %21839 = vtanh.f32 %v8970_v44 }
 0x5df   :  { %16466 = vmatpush1.bf16.msra.mxu0 %v20443_v53  ;;  %v20478_v53 = vld [vmem:[#allocation8 + $0x1d14] ss:$24 sps:$4 sm:$0xff]  }
 0x5e0   :  { %16509 = vmatpush1.bf16.msra.mxu1 %v20446_v50  ;;  %16467 = vmatprep.subr.bf16.mxu0 %v20451_v61  ;;  %v20476_v50 = vld [vmem:[#allocation8 + $0x1d10] ss:$24 sps:$4 sm:$0xff]   ;;  %v20481_v61 = vld [vmem:[#allocation8 + $0x19e4] ss:$24 sps:$4 sm:$0xff]  }
 0x5e1   :  { %16510 = vmatprep.subr.bf16.mxu1 %v20454_v49  ;;  %v20479_v49 = vld [vmem:[#allocation8 + $0x19e0] ss:$24 sps:$4 sm:$0xff]  }
 0x5e3   :  { %16468 = vmatpush2.bf16.msra.mxu0 %v20449_v2  ;;  %v20490_v2 = vld [vmem:[#allocation8 + $0x1cb4] ss:$24 sps:$4 sm:$0xff]  }
 0x5e4   :  { %16511 = vmatpush2.bf16.msra.mxu1 %v20452_v36  ;;  %16469 = vmatprep.subr.bf16.mxu0 %v20457_v57  ;;  %v20485_v36 = vld [vmem:[#allocation8 + $0x19b0] ss:$24 sps:$4 sm:$0xff]  }
 0x5e5   :  { %16512 = vmatprep.subr.bf16.mxu1 %v20460_v32  ;;  %v20493_v32 = vld [vmem:[#allocation8 + $0x1984] ss:$24 sps:$4 sm:$0xff]  }
 0x5e7   :  { %16470 = vmatpush2.bf16.msra.mxu0 %v20455_v0 }
 0x5e8   :  { %16513 = vmatpush2.bf16.msra.mxu1 %v20458_v20  ;;  %16471 = vmatprep.subr.bf16.mxu0 %v20463_v47  ;;  %v21834_v56 = vpop.eup %21833  ;;  %v20491_v20 = vld [vmem:[#allocation8 + $0x1980] ss:$24 sps:$4 sm:$0xff]  }
 0x5e9   :  { %16514 = vmatprep.subr.bf16.mxu1 %v20466_v21  ;;  %v21836_v57 = vpop.eup %21835  ;;  %v9088_v48 = vadd.f32 1.0, %v21834_v56  ;;  %v20499_v21 = vld [vmem:[#allocation8 + $0x1f54] ss:$24 sps:$4 sm:$0xff]   ;;  %v20520_v56 = vld [vmem:[#allocation8 + $0x21c4] ss:$24 sps:$4 sm:$0xff]  }
 0x5ea   :  { %v21838_v10 = vpop.eup %21837  ;;  %v9090_v47 = vadd.f32 1.0, %v21836_v57  ;;  %v20518_v57 = vld [vmem:[#allocation8 + $0x21c0] ss:$24 sps:$4 sm:$0xff]  }
 0x5eb   :  { %16472 = vmatpush2.bf16.msra.mxu0 %v20461_v6  ;;  %v21840_v0 = vpop.eup %21839  ;;  %v9064_v30 = vadd.f32 1.0, %v21838_v10  ;;  %v20502_v6 = vld [vmem:[#allocation8 + $0x2254] ss:$24 sps:$4 sm:$0xff]   ;;  %v9136_v44 = vmul.f32 %v9088_v48, %v8752_v35  ;;  %v20521_v10 = vld [vmem:[#allocation8 + $0x1e90] ss:$24 sps:$4 sm:$0xff]  }
 0x5ec   :  { %16515 = vmatpush2.bf16.msra.mxu1 %v20464_v29  ;;  %16473 = vmatprep.subr.bf16.mxu0 %v20469_v38  ;;  %v9066_v29 = vadd.f32 1.0, %v21840_v0  ;;  %v8728_v38 = vmul.f32 0.5, %v22906_v33  ;;  %v20529_v0 = vld [vmem:[#allocation8 + $0x1e64] ss:$24 sps:$4 sm:$0xff]   ;;  %v20533_v35 = vld [vmem:[#allocation8 + $0x1e30] ss:$24 sps:$4 sm:$0xff]  }
 0x5ed   :  { %16516 = vmatprep.subr.bf16.mxu1 %v20472_v54  ;;  %v20497_v54 = vld [vmem:[#allocation8 + $0x1f50] ss:$24 sps:$4 sm:$0xff]   ;;  %v20532_v48 = vld [vmem:[#allocation8 + $0x2164] ss:$24 sps:$4 sm:$0xff]  }
 0x5ef   :  { %16474 = vmatpush2.bf16.msra.mxu0 %v20467_v42  ;;  %v8730_v42 = vmul.f32 0.5, %v22909_v43  ;;  %v20506_v43 = vld [vmem:[#allocation8 + $0x2220] ss:$24 sps:$4 sm:$0xff]  }
 0x5f0   :  { %16517 = vmatpush2.bf16.msra.mxu1 %v20470_v9  ;;  %16475 = vmatprep.subr.bf16.mxu0 %v20475_v1  ;;  %v9138_v9 = vmul.f32 %v9090_v47, %v8754_v15  ;;  %v20500_v1 = vld [vmem:[#allocation8 + $0x2250] ss:$24 sps:$4 sm:$0xff]   ;;  %v20530_v47 = vld [vmem:[#allocation8 + $0x2160] ss:$24 sps:$4 sm:$0xff]   ;;  %v20544_v15 = vld [vmem:[#allocation8 + $0x2104] ss:$24 sps:$4 sm:$0xff]  }
 0x5f1   :  { %16518 = vmatprep.subr.bf16.mxu1 %v20478_v53  ;;  %v9112_v53 = vmul.f32 %v9064_v30, %v8728_v38  ;;  %v9114_v34 = vmul.f32 %v9066_v29, %v8730_v42  ;;  %v20536_v30 = vld [vmem:[#allocation8 + $0x2130] ss:$24 sps:$4 sm:$0xff]   ;;  %v20539_v29 = vld [vmem:[#allocation8 + $0x1e00] ss:$24 sps:$4 sm:$0xff]  }
 0x5f2   :  { %v20542_v38 = vld [vmem:[#allocation8 + $0x2100] ss:$24 sps:$4 sm:$0xff]   ;;  %v20545_v42 = vld [vmem:[#allocation8 + $0x20d0] ss:$24 sps:$4 sm:$0xff]  }
 0x5f3   :  { %16476 = vmatpush2.bf16.msra.mxu0 %v20473_v63  ;;  %v20505_v63 = vld [vmem:[#allocation8 + $0x1f24] ss:$24 sps:$4 sm:$0xff]   ;;  %v22935_v33 = vpack.c.bf16 %v9138_v9, %v9114_v34  ;;  %v20548_v9 = vld [vmem:[#allocation8 + $0x23d0] ss:$24 sps:$4 sm:$0xff]   ;;  %v20551_v34 = vld [vmem:[#allocation8 + $0x20a0] ss:$24 sps:$4 sm:$0xff]  }
 0x5f4   :  { %16519 = vmatpush2.bf16.msra.mxu1 %v20476_v50  ;;  %16477 = vmatprep.subr.bf16.mxu0 %v20481_v61  ;;  %v22932_v50 = vpack.c.bf16 %v9136_v44, %v9112_v53  ;;  %v20503_v61 = vld [vmem:[#allocation8 + $0x1f20] ss:$24 sps:$4 sm:$0xff]   ;;  %v20547_v44 = vld [vmem:[#allocation8 + $0x20d4] ss:$24 sps:$4 sm:$0xff]   ;;  %v20556_v53 = vld [vmem:[#allocation8 + $0x23a4] ss:$24 sps:$4 sm:$0xff]  }
 0x5f5   :  { %16520 = vmatprep.subr.bf16.mxu1 %v20484_v62  ;;  %v20511_v62 = vld [vmem:[#allocation8 + $0x1ef4] ss:$24 sps:$4 sm:$0xff]  }
 0x5f7   :  { %16478 = vmatpush2.bf16.msra.mxu0 %v20479_v49  ;;  %v20514_v49 = vld [vmem:[#allocation8 + $0x21f4] ss:$24 sps:$4 sm:$0xff]  }
 0x5f8   :  { %16521 = vmatpush2.bf16.msra.mxu1 %v20482_v55  ;;  %16479 = vmatprep.subr.bf16.mxu0 %v20487_v13  ;;  %v20509_v55 = vld [vmem:[#allocation8 + $0x1ef0] ss:$24 sps:$4 sm:$0xff]  }
 0x5f9   :  { %16522 = vmatprep.subr.bf16.mxu1 %v20490_v2  ;;  %v20512_v13 = vld [vmem:[#allocation8 + $0x21f0] ss:$24 sps:$4 sm:$0xff]   ;;  %v20517_v2 = vld [vmem:[#allocation8 + $0x1ec4] ss:$24 sps:$4 sm:$0xff]  }
 0x5fb   :  { %16480 = vmatpush2.bf16.msra.mxu0 %v20485_v36  ;;  %v20515_v36 = vld [vmem:[#allocation8 + $0x1ec0] ss:$24 sps:$4 sm:$0xff]  }
 0x5fc   :  { %16523 = vmatpush2.bf16.msra.mxu1 %v20488_v23  ;;  %16481 = vmatprep.subr.bf16.mxu0 %v20493_v32  ;;  %v20523_v23 = vld [vmem:[#allocation8 + $0x1e94] ss:$24 sps:$4 sm:$0xff]  }
 0x5fd   :  { %16524 = vmatprep.subr.bf16.mxu1 %v20496_v7  ;;  %v20526_v32 = vld [vmem:[#allocation8 + $0x2194] ss:$24 sps:$4 sm:$0xff]   ;;  %v20524_v7 = vld [vmem:[#allocation8 + $0x2190] ss:$24 sps:$4 sm:$0xff]  }
 0x5ff   :  { %16482 = vmatpush2.bf16.msra.mxu0 %v20491_v20  ;;  %v20527_v20 = vld [vmem:[#allocation8 + $0x1e60] ss:$24 sps:$4 sm:$0xff]  }
 0x600   :  { %16525 = vmatpush2.bf16.msra.mxu1 %v20494_v46  ;;  %16537 = vmatprep.subr.bf16.mxu0 %v20499_v21  ;;  %v20535_v46 = vld [vmem:[#allocation8 + $0x1e34] ss:$24 sps:$4 sm:$0xff]  }
 0x601   :  { %16580 = vmatprep.subr.bf16.mxu1 %v20502_v6  ;;  %v20538_v21 = vld [vmem:[#allocation8 + $0x2134] ss:$24 sps:$4 sm:$0xff]   ;;  %v20541_v6 = vld [vmem:[#allocation8 + $0x1e04] ss:$24 sps:$4 sm:$0xff]  }
 0x602   :  { %16484 = vmatmul.mubr.bf16.vlgmr.msra.gmra.mxu0 %v22564_v52 }
 0x603   :  { %16527 = vmatmul.mubr.bf16.vlgmr.msra.gmra.mxu1 %v22651_v25  ;;  %16538 = vmatpush1.bf16.msra.mxu0 %v20497_v54  ;;  %v20550_v54 = vld [vmem:[#allocation8 + $0x23d4] ss:$24 sps:$4 sm:$0xff]  }
 0x604   :  { %16569 = vmatprep.mubr.bf16.mxu0 %v22932_v50  ;;  %16581 = vmatpush1.bf16.msra.mxu1 %v20500_v1  ;;  %v20553_v1 = vld [vmem:[#allocation8 + $0x20a4] ss:$24 sps:$4 sm:$0xff]  }
 0x605   :  { %16612 = vmatprep.mubr.bf16.mxu1 %v22935_v33  ;;  %16539 = vmatprep.subr.bf16.mxu0 %v20505_v63  ;;  %v20554_v63 = vld [vmem:[#allocation8 + $0x23a0] ss:$24 sps:$4 sm:$0xff]  }
 0x606   :  { %16582 = vmatprep.subr.bf16.mxu1 %v20508_v16  ;;  %v20559_v16 = vld [vmem:[#allocation8 + $0x2074] ss:$24 sps:$4 sm:$0xff]  }
 0x607   :  { %16540 = vmatpush1.bf16.msra.mxu0 %v20503_v61  ;;  %v20562_v61 = vld [vmem:[#allocation8 + $0x2374] ss:$24 sps:$4 sm:$0xff]  }
 0x608   :  { %16583 = vmatpush1.bf16.msra.mxu1 %v20506_v43  ;;  %16541 = vmatprep.subr.bf16.mxu0 %v20511_v62  ;;  %v20557_v43 = vld [vmem:[#allocation8 + $0x2070] ss:$24 sps:$4 sm:$0xff]  }
 0x609   :  { %16584 = vmatprep.subr.bf16.mxu1 %v20514_v49  ;;  %v20560_v62 = vld [vmem:[#allocation8 + $0x2370] ss:$24 sps:$4 sm:$0xff]   ;;  %v20565_v49 = vld [vmem:[#allocation8 + $0x2044] ss:$24 sps:$4 sm:$0xff]  }
 0x60b   :  { %16542 = vmatpush1.bf16.msra.mxu0 %v20509_v55  ;;  %v20568_v55 = vld [vmem:[#allocation8 + $0x2344] ss:$24 sps:$4 sm:$0xff]  }
 0x60c   :  { %16585 = vmatpush1.bf16.msra.mxu1 %v20512_v13  ;;  %16543 = vmatprep.subr.bf16.mxu0 %v20517_v2  ;;  %v20563_v13 = vld [vmem:[#allocation8 + $0x2040] ss:$24 sps:$4 sm:$0xff]  }
 0x60d   :  { %16586 = vmatprep.subr.bf16.mxu1 %v20520_v56  ;;  %v20566_v2 = vld [vmem:[#allocation8 + $0x2340] ss:$24 sps:$4 sm:$0xff]   ;;  %v20571_v56 = vld [vmem:[#allocation8 + $0x2014] ss:$24 sps:$4 sm:$0xff]  }
 0x60f   :  { %16544 = vmatpush1.bf16.msra.mxu0 %v20515_v36  ;;  %v20574_v36 = vld [vmem:[#allocation8 + $0x2314] ss:$24 sps:$4 sm:$0xff]  }
 0x610   :  { %16587 = vmatpush1.bf16.msra.mxu1 %v20518_v57  ;;  %16545 = vmatprep.subr.bf16.mxu0 %v20523_v23  ;;  %v20569_v57 = vld [vmem:[#allocation8 + $0x2010] ss:$24 sps:$4 sm:$0xff]  }
 0x611   :  { %16588 = vmatprep.subr.bf16.mxu1 %v20526_v32  ;;  %v20572_v23 = vld [vmem:[#allocation8 + $0x2310] ss:$24 sps:$4 sm:$0xff]   ;;  %v20577_v32 = vld [vmem:[#allocation8 + $0x1fe4] ss:$24 sps:$4 sm:$0xff]  }
 0x613   :  { %16546 = vmatpush1.bf16.msra.mxu0 %v20521_v10  ;;  %v20580_v10 = vld [vmem:[#allocation8 + $0x22e4] ss:$24 sps:$4 sm:$0xff]  }
 0x614   :  { %16589 = vmatpush1.bf16.msra.mxu1 %v20524_v7  ;;  %16547 = vmatprep.subr.bf16.mxu0 %v20529_v0  ;;  %v20575_v7 = vld [vmem:[#allocation8 + $0x1fe0] ss:$24 sps:$4 sm:$0xff]  }
 0x615   :  { %16590 = vmatprep.subr.bf16.mxu1 %v20532_v48  ;;  %v20578_v0 = vld [vmem:[#allocation8 + $0x22e0] ss:$24 sps:$4 sm:$0xff]   ;;  %v20583_v48 = vld [vmem:[#allocation8 + $0x1fb4] ss:$24 sps:$4 sm:$0xff]  }
 0x617   :  { %16548 = vmatpush1.bf16.msra.mxu0 %v20527_v20  ;;  %v20586_v20 = vld [vmem:[#allocation8 + $0x22b4] ss:$24 sps:$4 sm:$0xff]  }
 0x618   :  { %16591 = vmatpush1.bf16.msra.mxu1 %v20530_v47  ;;  %16549 = vmatprep.subr.bf16.mxu0 %v20535_v46  ;;  %v20581_v47 = vld [vmem:[#allocation8 + $0x1fb0] ss:$24 sps:$4 sm:$0xff]  }
 0x619   :  { %16592 = vmatprep.subr.bf16.mxu1 %v20538_v21  ;;  %v20584_v46 = vld [vmem:[#allocation8 + $0x22b0] ss:$24 sps:$4 sm:$0xff]   ;;  %v20589_v21 = vld [vmem:[#allocation8 + $0x1f84] ss:$24 sps:$4 sm:$0xff]  }
 0x61b   :  { %16550 = vmatpush1.bf16.msra.mxu0 %v20533_v35  ;;  %v20592_v35 = vld [vmem:[#allocation8 + $0x2284] ss:$24 sps:$4 sm:$0xff]  }
 0x61c   :  { %16593 = vmatpush1.bf16.msra.mxu1 %v20536_v30  ;;  %16551 = vmatprep.subr.bf16.mxu0 %v20541_v6  ;;  %v20587_v30 = vld [vmem:[#allocation8 + $0x1f80] ss:$24 sps:$4 sm:$0xff]  }
 0x61d   :  { %16594 = vmatprep.subr.bf16.mxu1 %v20544_v15  ;;  %v20590_v6 = vld [vmem:[#allocation8 + $0x2280] ss:$24 sps:$4 sm:$0xff]   ;;  %v20595_v15 = vld [vmem:[#allocation8 + $0x15c] ss:$24 sps:$4 sm:$0xff]  }
 0x61f   :  { %16552 = vmatpush1.bf16.msra.mxu0 %v20539_v29  ;;  %v20598_v29 = vld [vmem:[#allocation8 + $0x45c] ss:$24 sps:$4 sm:$0xff]  }
 0x620   :  { %16595 = vmatpush1.bf16.msra.mxu1 %v20542_v38  ;;  %16553 = vmatprep.subr.bf16.mxu0 %v20547_v44  ;;  %v20593_v38 = vld [vmem:[#allocation8 + $0x158] ss:$24 sps:$4 sm:$0xff]  }
 0x621   :  { %16596 = vmatprep.subr.bf16.mxu1 %v20550_v54  ;;  %v20596_v44 = vld [vmem:[#allocation8 + $0x458] ss:$24 sps:$4 sm:$0xff]   ;;  %v20601_v54 = vld [vmem:[#allocation8 + $0x12c] ss:$24 sps:$4 sm:$0xff]  }
 0x623   :  { %16554 = vmatpush2.bf16.msra.mxu0 %v20545_v42  ;;  %v20604_v42 = vld [vmem:[#allocation8 + $0x42c] ss:$24 sps:$4 sm:$0xff]  }
 0x624   :  { %16597 = vmatpush2.bf16.msra.mxu1 %v20548_v9  ;;  %16555 = vmatprep.subr.bf16.mxu0 %v20553_v1  ;;  %v20599_v9 = vld [vmem:[#allocation8 + $0x128] ss:$24 sps:$4 sm:$0xff]  }
 0x625   :  { %16598 = vmatprep.subr.bf16.mxu1 %v20556_v53  ;;  %v20602_v1 = vld [vmem:[#allocation8 + $0x428] ss:$24 sps:$4 sm:$0xff]   ;;  %v20607_v53 = vld [vmem:[#allocation8 + $0xfc] ss:$24 sps:$4 sm:$0xff]  }
 0x627   :  { %16556 = vmatpush2.bf16.msra.mxu0 %v20551_v34  ;;  %v20610_v34 = vld [vmem:[#allocation8 + $0x3fc] ss:$24 sps:$4 sm:$0xff]  }
 0x628   :  { %16599 = vmatpush2.bf16.msra.mxu1 %v20554_v63  ;;  %16557 = vmatprep.subr.bf16.mxu0 %v20559_v16  ;;  %v20605_v63 = vld [vmem:[#allocation8 + $0xf8] ss:$24 sps:$4 sm:$0xff]  }
 0x629   :  { %16600 = vmatprep.subr.bf16.mxu1 %v20562_v61  ;;  %v20608_v16 = vld [vmem:[#allocation8 + $0x3f8] ss:$24 sps:$4 sm:$0xff]   ;;  %v20613_v61 = vld [vmem:[#allocation8 + $0xcc] ss:$24 sps:$4 sm:$0xff]  }
 0x62b   :  { %16558 = vmatpush2.bf16.msra.mxu0 %v20557_v43  ;;  %v20616_v43 = vld [vmem:[#allocation8 + $0x3cc] ss:$24 sps:$4 sm:$0xff]  }
 0x62c   :  { %16601 = vmatpush2.bf16.msra.mxu1 %v20560_v62  ;;  %16559 = vmatprep.subr.bf16.mxu0 %v20565_v49  ;;  %v20611_v62 = vld [vmem:[#allocation8 + $0xc8] ss:$24 sps:$4 sm:$0xff]  }
 0x62d   :  { %16602 = vmatprep.subr.bf16.mxu1 %v20568_v55  ;;  %v20614_v49 = vld [vmem:[#allocation8 + $0x3c8] ss:$24 sps:$4 sm:$0xff]   ;;  %v20619_v55 = vld [vmem:[#allocation8 + $0x9c] ss:$24 sps:$4 sm:$0xff]  }
 0x62f   :  { %16560 = vmatpush2.bf16.msra.mxu0 %v20563_v13  ;;  %v20622_v13 = vld [vmem:[#allocation8 + $0x39c] ss:$24 sps:$4 sm:$0xff]  }
 0x630   :  { %16603 = vmatpush2.bf16.msra.mxu1 %v20566_v2  ;;  %16561 = vmatprep.subr.bf16.mxu0 %v20571_v56  ;;  %v20617_v2 = vld [vmem:[#allocation8 + $0x98] ss:$24 sps:$4 sm:$0xff]  }
 0x631   :  { %16604 = vmatprep.subr.bf16.mxu1 %v20574_v36  ;;  %v20620_v56 = vld [vmem:[#allocation8 + $0x398] ss:$24 sps:$4 sm:$0xff]   ;;  %v20625_v36 = vld [vmem:[#allocation8 + $0x6c] ss:$24 sps:$4 sm:$0xff]  }
 0x633   :  { %16562 = vmatpush2.bf16.msra.mxu0 %v20569_v57  ;;  %v20628_v57 = vld [vmem:[#allocation8 + $0x36c] ss:$24 sps:$4 sm:$0xff]  }
 0x634   :  { %16605 = vmatpush2.bf16.msra.mxu1 %v20572_v23  ;;  %16563 = vmatprep.subr.bf16.mxu0 %v20577_v32  ;;  %v20623_v23 = vld [vmem:[#allocation8 + $0x68] ss:$24 sps:$4 sm:$0xff]  }
 0x635   :  { %16606 = vmatprep.subr.bf16.mxu1 %v20580_v10  ;;  %v20626_v32 = vld [vmem:[#allocation8 + $0x368] ss:$24 sps:$4 sm:$0xff]   ;;  %v20631_v10 = vld [vmem:[#allocation8 + $0x3c] ss:$24 sps:$4 sm:$0xff]  }
 0x637   :  { %16564 = vmatpush2.bf16.msra.mxu0 %v20575_v7  ;;  %v20634_v7 = vld [vmem:[#allocation8 + $0x33c] ss:$24 sps:$4 sm:$0xff]  }
 0x638   :  { %16607 = vmatpush2.bf16.msra.mxu1 %v20578_v0  ;;  %16565 = vmatprep.subr.bf16.mxu0 %v20583_v48  ;;  %v20629_v0 = vld [vmem:[#allocation8 + $0x38] ss:$24 sps:$4 sm:$0xff]  }
 0x639   :  { %16608 = vmatprep.subr.bf16.mxu1 %v20586_v20  ;;  %v20632_v48 = vld [vmem:[#allocation8 + $0x338] ss:$24 sps:$4 sm:$0xff]   ;;  %v20637_v20 = vld [vmem:[#allocation8 + $0xc] ss:$24 sps:$4 sm:$0xff]  }
 0x63b   :  { %16566 = vmatpush2.bf16.msra.mxu0 %v20581_v47  ;;  %v20640_v47 = vld [vmem:[#allocation8 + $0x30c] ss:$24 sps:$4 sm:$0xff]  }
 0x63c   :  { %16609 = vmatpush2.bf16.msra.mxu1 %v20584_v46  ;;  %16567 = vmatprep.subr.bf16.mxu0 %v20589_v21  ;;  %v20635_v46 = vld [vmem:[#allocation8 + $0x8] ss:$24 sps:$4 sm:$0xff]  }
 0x63d   :  { %16610 = vmatprep.subr.bf16.mxu1 %v20592_v35  ;;  %v20638_v21 = vld [vmem:[#allocation8 + $0x308] ss:$24 sps:$4 sm:$0xff]   ;;  %v20643_v35 = vld [vmem:[#allocation8 + $0x2dc] ss:$24 sps:$4 sm:$0xff]  }
 0x63f   :  { %16568 = vmatpush2.bf16.msra.mxu0 %v20587_v30  ;;  %v20646_v30 = vld [vmem:[#allocation8 + $0x5dc] ss:$24 sps:$4 sm:$0xff]  }
 0x640   :  { %16611 = vmatpush2.bf16.msra.mxu1 %v20590_v6  ;;  %16623 = vmatprep.subr.bf16.mxu0 %v20595_v15  ;;  %v20641_v6 = vld [vmem:[#allocation8 + $0x2d8] ss:$24 sps:$4 sm:$0xff]  }
 0x641   :  { %16666 = vmatprep.subr.bf16.mxu1 %v20598_v29  ;;  %v20644_v15 = vld [vmem:[#allocation8 + $0x5d8] ss:$24 sps:$4 sm:$0xff]   ;;  %v20649_v29 = vld [vmem:[#allocation8 + $0x2ac] ss:$24 sps:$4 sm:$0xff]  }
 0x642   :  { %16570 = vmatmul.mubr.bf16.vlgmr.msra.gmra.mxu0 %v22795_v24 }
 0x643   :  { %16613 = vmatmul.mubr.bf16.vlgmr.msra.gmra.mxu1 %v22877_v5  ;;  %16624 = vmatpush1.bf16.msra.mxu0 %v20593_v38  ;;  %v20652_v38 = vld [vmem:[#allocation8 + $0x5ac] ss:$24 sps:$4 sm:$0xff]  }
 0x644   :  { %16655 = vmatprep.mubr.bf16.mxu0 %v22580_v59  ;;  %16667 = vmatpush1.bf16.msra.mxu1 %v20596_v44  ;;  %v20647_v44 = vld [vmem:[#allocation8 + $0x2a8] ss:$24 sps:$4 sm:$0xff]  }
 0x645   :  { %16698 = vmatprep.mubr.bf16.mxu1 %v22583_v51  ;;  %16625 = vmatprep.subr.bf16.mxu0 %v20601_v54  ;;  %v20650_v54 = vld [vmem:[#allocation8 + $0x5a8] ss:$24 sps:$4 sm:$0xff]  }
 0x646   :  { %16668 = vmatprep.subr.bf16.mxu1 %v20604_v42  ;;  %v20655_v42 = vld [vmem:[#allocation8 + $0x27c] ss:$24 sps:$4 sm:$0xff]  }
 0x647   :  { %16626 = vmatpush1.bf16.msra.mxu0 %v20599_v9  ;;  %v20658_v9 = vld [vmem:[#allocation8 + $0x57c] ss:$24 sps:$4 sm:$0xff]  }
 0x648   :  { %16669 = vmatpush1.bf16.msra.mxu1 %v20602_v1  ;;  %16627 = vmatprep.subr.bf16.mxu0 %v20607_v53  ;;  %v20653_v1 = vld [vmem:[#allocation8 + $0x278] ss:$24 sps:$4 sm:$0xff]  }
 0x649   :  { %16670 = vmatprep.subr.bf16.mxu1 %v20610_v34  ;;  %v20656_v53 = vld [vmem:[#allocation8 + $0x578] ss:$24 sps:$4 sm:$0xff]   ;;  %v20661_v34 = vld [vmem:[#allocation8 + $0x24c] ss:$24 sps:$4 sm:$0xff]  }
 0x64b   :  { %16628 = vmatpush1.bf16.msra.mxu0 %v20605_v63  ;;  %v20664_v63 = vld [vmem:[#allocation8 + $0x54c] ss:$24 sps:$4 sm:$0xff]  }
 0x64c   :  { %16671 = vmatpush1.bf16.msra.mxu1 %v20608_v16  ;;  %16629 = vmatprep.subr.bf16.mxu0 %v20613_v61  ;;  %v20659_v16 = vld [vmem:[#allocation8 + $0x248] ss:$24 sps:$4 sm:$0xff]  }
 0x64d   :  { %16672 = vmatprep.subr.bf16.mxu1 %v20616_v43  ;;  %v20662_v61 = vld [vmem:[#allocation8 + $0x548] ss:$24 sps:$4 sm:$0xff]   ;;  %v20667_v43 = vld [vmem:[#allocation8 + $0x21c] ss:$24 sps:$4 sm:$0xff]  }
 0x64f   :  { %16630 = vmatpush1.bf16.msra.mxu0 %v20611_v62  ;;  %v20670_v62 = vld [vmem:[#allocation8 + $0x51c] ss:$24 sps:$4 sm:$0xff]  }
 0x650   :  { %16673 = vmatpush1.bf16.msra.mxu1 %v20614_v49  ;;  %16631 = vmatprep.subr.bf16.mxu0 %v20619_v55  ;;  %v20665_v49 = vld [vmem:[#allocation8 + $0x218] ss:$24 sps:$4 sm:$0xff]  }
 0x651   :  { %16674 = vmatprep.subr.bf16.mxu1 %v20622_v13  ;;  %v20668_v55 = vld [vmem:[#allocation8 + $0x518] ss:$24 sps:$4 sm:$0xff]   ;;  %v20673_v13 = vld [vmem:[#allocation8 + $0x1ec] ss:$24 sps:$4 sm:$0xff]  }
 0x653   :  { %16632 = vmatpush1.bf16.msra.mxu0 %v20617_v2  ;;  %v20676_v2 = vld [vmem:[#allocation8 + $0x4ec] ss:$24 sps:$4 sm:$0xff]  }
 0x654   :  { %16675 = vmatpush1.bf16.msra.mxu1 %v20620_v56  ;;  %16633 = vmatprep.subr.bf16.mxu0 %v20625_v36  ;;  %v20671_v56 = vld [vmem:[#allocation8 + $0x1e8] ss:$24 sps:$4 sm:$0xff]  }
 0x655   :  { %16676 = vmatprep.subr.bf16.mxu1 %v20628_v57  ;;  %v20674_v36 = vld [vmem:[#allocation8 + $0x4e8] ss:$24 sps:$4 sm:$0xff]   ;;  %v20679_v57 = vld [vmem:[#allocation8 + $0x1bc] ss:$24 sps:$4 sm:$0xff]  }
 0x657   :  { %16634 = vmatpush1.bf16.msra.mxu0 %v20623_v23  ;;  %v20682_v23 = vld [vmem:[#allocation8 + $0x4bc] ss:$24 sps:$4 sm:$0xff]  }
 0x658   :  { %16677 = vmatpush1.bf16.msra.mxu1 %v20626_v32  ;;  %16635 = vmatprep.subr.bf16.mxu0 %v20631_v10  ;;  %v20677_v32 = vld [vmem:[#allocation8 + $0x1b8] ss:$24 sps:$4 sm:$0xff]  }
 0x659   :  { %16678 = vmatprep.subr.bf16.mxu1 %v20634_v7  ;;  %v20680_v10 = vld [vmem:[#allocation8 + $0x4b8] ss:$24 sps:$4 sm:$0xff]   ;;  %v20685_v7 = vld [vmem:[#allocation8 + $0x18c] ss:$24 sps:$4 sm:$0xff]  }
 0x65b   :  { %16636 = vmatpush1.bf16.msra.mxu0 %v20629_v0  ;;  %v20688_v0 = vld [vmem:[#allocation8 + $0x48c] ss:$24 sps:$4 sm:$0xff]  }
 0x65c   :  { %16679 = vmatpush1.bf16.msra.mxu1 %v20632_v48  ;;  %16637 = vmatprep.subr.bf16.mxu0 %v20637_v20  ;;  %v20683_v48 = vld [vmem:[#allocation8 + $0x188] ss:$24 sps:$4 sm:$0xff]  }
 0x65d   :  { %16680 = vmatprep.subr.bf16.mxu1 %v20640_v47  ;;  %v20686_v20 = vld [vmem:[#allocation8 + $0x488] ss:$24 sps:$4 sm:$0xff]   ;;  %v20691_v47 = vld [vmem:[#allocation8 + $0x75c] ss:$24 sps:$4 sm:$0xff]  }
 0x65f   :  { %16638 = vmatpush1.bf16.msra.mxu0 %v20635_v46  ;;  %v20694_v46 = vld [vmem:[#allocation8 + $0xa5c] ss:$24 sps:$4 sm:$0xff]  }
 0x660   :  { %16681 = vmatpush1.bf16.msra.mxu1 %v20638_v21  ;;  %16639 = vmatprep.subr.bf16.mxu0 %v20643_v35  ;;  %v20689_v21 = vld [vmem:[#allocation8 + $0x758] ss:$24 sps:$4 sm:$0xff]  }
 0x661   :  { %16682 = vmatprep.subr.bf16.mxu1 %v20646_v30  ;;  %v20692_v35 = vld [vmem:[#allocation8 + $0xa58] ss:$24 sps:$4 sm:$0xff]   ;;  %v20697_v30 = vld [vmem:[#allocation8 + $0x72c] ss:$24 sps:$4 sm:$0xff]  }
 0x663   :  { %16640 = vmatpush2.bf16.msra.mxu0 %v20641_v6  ;;  %v20700_v6 = vld [vmem:[#allocation8 + $0xa2c] ss:$24 sps:$4 sm:$0xff]  }
 0x664   :  { %16683 = vmatpush2.bf16.msra.mxu1 %v20644_v15  ;;  %16641 = vmatprep.subr.bf16.mxu0 %v20649_v29  ;;  %v20695_v15 = vld [vmem:[#allocation8 + $0x728] ss:$24 sps:$4 sm:$0xff]  }
 0x665   :  { %16684 = vmatprep.subr.bf16.mxu1 %v20652_v38  ;;  %v20698_v29 = vld [vmem:[#allocation8 + $0xa28] ss:$24 sps:$4 sm:$0xff]   ;;  %v20703_v38 = vld [vmem:[#allocation8 + $0x6fc] ss:$24 sps:$4 sm:$0xff]  }
 0x667   :  { %16642 = vmatpush2.bf16.msra.mxu0 %v20647_v44  ;;  %v20706_v44 = vld [vmem:[#allocation8 + $0x9fc] ss:$24 sps:$4 sm:$0xff]  }
 0x668   :  { %16685 = vmatpush2.bf16.msra.mxu1 %v20650_v54  ;;  %16643 = vmatprep.subr.bf16.mxu0 %v20655_v42  ;;  %v20701_v54 = vld [vmem:[#allocation8 + $0x6f8] ss:$24 sps:$4 sm:$0xff]  }
 0x669   :  { %16686 = vmatprep.subr.bf16.mxu1 %v20658_v9  ;;  %v20704_v42 = vld [vmem:[#allocation8 + $0x9f8] ss:$24 sps:$4 sm:$0xff]   ;;  %v20709_v9 = vld [vmem:[#allocation8 + $0x6cc] ss:$24 sps:$4 sm:$0xff]  }
 0x66b   :  { %16644 = vmatpush2.bf16.msra.mxu0 %v20653_v1  ;;  %v20712_v1 = vld [vmem:[#allocation8 + $0x9cc] ss:$24 sps:$4 sm:$0xff]  }
 0x66c   :  { %16687 = vmatpush2.bf16.msra.mxu1 %v20656_v53  ;;  %16645 = vmatprep.subr.bf16.mxu0 %v20661_v34  ;;  %v20707_v53 = vld [vmem:[#allocation8 + $0x6c8] ss:$24 sps:$4 sm:$0xff]  }
 0x66d   :  { %16688 = vmatprep.subr.bf16.mxu1 %v20664_v63  ;;  %v20710_v34 = vld [vmem:[#allocation8 + $0x9c8] ss:$24 sps:$4 sm:$0xff]   ;;  %v20715_v63 = vld [vmem:[#allocation8 + $0x69c] ss:$24 sps:$4 sm:$0xff]  }
 0x66f   :  { %16646 = vmatpush2.bf16.msra.mxu0 %v20659_v16  ;;  %v20718_v16 = vld [vmem:[#allocation8 + $0x99c] ss:$24 sps:$4 sm:$0xff]  }
 0x670   :  { %16689 = vmatpush2.bf16.msra.mxu1 %v20662_v61  ;;  %16647 = vmatprep.subr.bf16.mxu0 %v20667_v43  ;;  %v20713_v61 = vld [vmem:[#allocation8 + $0x698] ss:$24 sps:$4 sm:$0xff]  }
 0x671   :  { %16690 = vmatprep.subr.bf16.mxu1 %v20670_v62  ;;  %v20716_v43 = vld [vmem:[#allocation8 + $0x998] ss:$24 sps:$4 sm:$0xff]   ;;  %v20721_v62 = vld [vmem:[#allocation8 + $0x66c] ss:$24 sps:$4 sm:$0xff]  }
 0x673   :  { %16648 = vmatpush2.bf16.msra.mxu0 %v20665_v49  ;;  %v20724_v49 = vld [vmem:[#allocation8 + $0x96c] ss:$24 sps:$4 sm:$0xff]  }
 0x674   :  { %16691 = vmatpush2.bf16.msra.mxu1 %v20668_v55  ;;  %16649 = vmatprep.subr.bf16.mxu0 %v20673_v13  ;;  %v20719_v55 = vld [vmem:[#allocation8 + $0x668] ss:$24 sps:$4 sm:$0xff]  }
 0x675   :  { %16692 = vmatprep.subr.bf16.mxu1 %v20676_v2  ;;  %v20722_v13 = vld [vmem:[#allocation8 + $0x968] ss:$24 sps:$4 sm:$0xff]   ;;  %v20727_v2 = vld [vmem:[#allocation8 + $0x63c] ss:$24 sps:$4 sm:$0xff]  }
 0x677   :  { %16650 = vmatpush2.bf16.msra.mxu0 %v20671_v56  ;;  %v20730_v56 = vld [vmem:[#allocation8 + $0x93c] ss:$24 sps:$4 sm:$0xff]  }
 0x678   :  { %16693 = vmatpush2.bf16.msra.mxu1 %v20674_v36  ;;  %16651 = vmatprep.subr.bf16.mxu0 %v20679_v57  ;;  %v20725_v36 = vld [vmem:[#allocation8 + $0x638] ss:$24 sps:$4 sm:$0xff]  }
 0x679   :  { %16694 = vmatprep.subr.bf16.mxu1 %v20682_v23  ;;  %v20728_v57 = vld [vmem:[#allocation8 + $0x938] ss:$24 sps:$4 sm:$0xff]   ;;  %v20733_v23 = vld [vmem:[#allocation8 + $0x60c] ss:$24 sps:$4 sm:$0xff]  }
 0x67b   :  { %16652 = vmatpush2.bf16.msra.mxu0 %v20677_v32  ;;  %v20736_v32 = vld [vmem:[#allocation8 + $0x90c] ss:$24 sps:$4 sm:$0xff]  }
 0x67c   :  { %16695 = vmatpush2.bf16.msra.mxu1 %v20680_v10  ;;  %16653 = vmatprep.subr.bf16.mxu0 %v20685_v7  ;;  %v20731_v10 = vld [vmem:[#allocation8 + $0x608] ss:$24 sps:$4 sm:$0xff]  }
 0x67d   :  { %16696 = vmatprep.subr.bf16.mxu1 %v20688_v0  ;;  %v20734_v7 = vld [vmem:[#allocation8 + $0x908] ss:$24 sps:$4 sm:$0xff]   ;;  %v20739_v0 = vld [vmem:[#allocation8 + $0x8dc] ss:$24 sps:$4 sm:$0xff]  }
 0x67f   :  { %16654 = vmatpush2.bf16.msra.mxu0 %v20683_v48  ;;  %v20742_v48 = vld [vmem:[#allocation8 + $0xbdc] ss:$24 sps:$4 sm:$0xff]  }
 0x680   :  { %16697 = vmatpush2.bf16.msra.mxu1 %v20686_v20  ;;  %16709 = vmatprep.subr.bf16.mxu0 %v20691_v47  ;;  %v20737_v20 = vld [vmem:[#allocation8 + $0x8d8] ss:$24 sps:$4 sm:$0xff]  }
 0x681   :  { %16752 = vmatprep.subr.bf16.mxu1 %v20694_v46  ;;  %v20740_v47 = vld [vmem:[#allocation8 + $0xbd8] ss:$24 sps:$4 sm:$0xff]   ;;  %v20745_v46 = vld [vmem:[#allocation8 + $0x8ac] ss:$24 sps:$4 sm:$0xff]  }
 0x682   :  { %16656 = vmatmul.mubr.bf16.vlgmr.msra.gmra.mxu0 %v22143_v22 }
 0x683   :  { %16699 = vmatmul.mubr.bf16.vlgmr.msra.gmra.mxu1 %v22186_v18  ;;  %16710 = vmatpush1.bf16.msra.mxu0 %v20689_v21  ;;  %v20748_v21 = vld [vmem:[#allocation8 + $0xbac] ss:$24 sps:$4 sm:$0xff]  }
 0x684   :  { %16741 = vmatprep.mubr.bf16.mxu0 %v22666_v45  ;;  %16753 = vmatpush1.bf16.msra.mxu1 %v20692_v35  ;;  %v20743_v35 = vld [vmem:[#allocation8 + $0x8a8] ss:$24 sps:$4 sm:$0xff]  }
 0x685   :  { %16784 = vmatprep.mubr.bf16.mxu1 %v22669_v27  ;;  %16711 = vmatprep.subr.bf16.mxu0 %v20697_v30  ;;  %v20746_v30 = vld [vmem:[#allocation8 + $0xba8] ss:$24 sps:$4 sm:$0xff]  }
 0x686   :  { %16754 = vmatprep.subr.bf16.mxu1 %v20700_v6  ;;  %v20751_v6 = vld [vmem:[#allocation8 + $0x87c] ss:$24 sps:$4 sm:$0xff]  }
 0x687   :  { %16712 = vmatpush1.bf16.msra.mxu0 %v20695_v15  ;;  %v20754_v15 = vld [vmem:[#allocation8 + $0xb7c] ss:$24 sps:$4 sm:$0xff]  }
 0x688   :  { %16755 = vmatpush1.bf16.msra.mxu1 %v20698_v29  ;;  %16713 = vmatprep.subr.bf16.mxu0 %v20703_v38  ;;  %v20749_v29 = vld [vmem:[#allocation8 + $0x878] ss:$24 sps:$4 sm:$0xff]  }
 0x689   :  { %16756 = vmatprep.subr.bf16.mxu1 %v20706_v44  ;;  %v20752_v38 = vld [vmem:[#allocation8 + $0xb78] ss:$24 sps:$4 sm:$0xff]   ;;  %v20757_v44 = vld [vmem:[#allocation8 + $0x84c] ss:$24 sps:$4 sm:$0xff]  }
 0x68b   :  { %16714 = vmatpush1.bf16.msra.mxu0 %v20701_v54  ;;  %v20760_v54 = vld [vmem:[#allocation8 + $0xb4c] ss:$24 sps:$4 sm:$0xff]  }
 0x68c   :  { %16757 = vmatpush1.bf16.msra.mxu1 %v20704_v42  ;;  %16715 = vmatprep.subr.bf16.mxu0 %v20709_v9  ;;  %v20755_v42 = vld [vmem:[#allocation8 + $0x848] ss:$24 sps:$4 sm:$0xff]  }
 0x68d   :  { %16758 = vmatprep.subr.bf16.mxu1 %v20712_v1  ;;  %v20758_v9 = vld [vmem:[#allocation8 + $0xb48] ss:$24 sps:$4 sm:$0xff]   ;;  %v20763_v1 = vld [vmem:[#allocation8 + $0x81c] ss:$24 sps:$4 sm:$0xff]  }
 0x68f   :  { %16716 = vmatpush1.bf16.msra.mxu0 %v20707_v53  ;;  %v20766_v53 = vld [vmem:[#allocation8 + $0xb1c] ss:$24 sps:$4 sm:$0xff]  }
 0x690   :  { %16759 = vmatpush1.bf16.msra.mxu1 %v20710_v34  ;;  %16717 = vmatprep.subr.bf16.mxu0 %v20715_v63  ;;  %v20761_v34 = vld [vmem:[#allocation8 + $0x818] ss:$24 sps:$4 sm:$0xff]  }
 0x691   :  { %16760 = vmatprep.subr.bf16.mxu1 %v20718_v16  ;;  %v20764_v63 = vld [vmem:[#allocation8 + $0xb18] ss:$24 sps:$4 sm:$0xff]   ;;  %v20769_v16 = vld [vmem:[#allocation8 + $0x7ec] ss:$24 sps:$4 sm:$0xff]  }
 0x693   :  { %16718 = vmatpush1.bf16.msra.mxu0 %v20713_v61  ;;  %v20772_v61 = vld [vmem:[#allocation8 + $0xaec] ss:$24 sps:$4 sm:$0xff]  }
 0x694   :  { %16761 = vmatpush1.bf16.msra.mxu1 %v20716_v43  ;;  %16719 = vmatprep.subr.bf16.mxu0 %v20721_v62  ;;  %v20767_v43 = vld [vmem:[#allocation8 + $0x7e8] ss:$24 sps:$4 sm:$0xff]  }
 0x695   :  { %16762 = vmatprep.subr.bf16.mxu1 %v20724_v49  ;;  %v20770_v62 = vld [vmem:[#allocation8 + $0xae8] ss:$24 sps:$4 sm:$0xff]   ;;  %v20775_v49 = vld [vmem:[#allocation8 + $0x7bc] ss:$24 sps:$4 sm:$0xff]  }
 0x697   :  { %16720 = vmatpush1.bf16.msra.mxu0 %v20719_v55  ;;  %v20778_v55 = vld [vmem:[#allocation8 + $0xabc] ss:$24 sps:$4 sm:$0xff]  }
 0x698   :  { %16763 = vmatpush1.bf16.msra.mxu1 %v20722_v13  ;;  %16721 = vmatprep.subr.bf16.mxu0 %v20727_v2  ;;  %v20773_v13 = vld [vmem:[#allocation8 + $0x7b8] ss:$24 sps:$4 sm:$0xff]  }
 0x699   :  { %16764 = vmatprep.subr.bf16.mxu1 %v20730_v56  ;;  %v20776_v2 = vld [vmem:[#allocation8 + $0xab8] ss:$24 sps:$4 sm:$0xff]   ;;  %v20781_v56 = vld [vmem:[#allocation8 + $0x78c] ss:$24 sps:$4 sm:$0xff]  }
 0x69b   :  { %16722 = vmatpush1.bf16.msra.mxu0 %v20725_v36  ;;  %v20784_v36 = vld [vmem:[#allocation8 + $0xa8c] ss:$24 sps:$4 sm:$0xff]  }
 0x69c   :  { %16765 = vmatpush1.bf16.msra.mxu1 %v20728_v57  ;;  %16723 = vmatprep.subr.bf16.mxu0 %v20733_v23  ;;  %v20779_v57 = vld [vmem:[#allocation8 + $0x788] ss:$24 sps:$4 sm:$0xff]   ;;  %v22947_v23 = vpop.f32.mrf.mxu0 }
 0x69d   :  { %16766 = vmatprep.subr.bf16.mxu1 %v20736_v32  ;;  %v20782_v32 = vld [vmem:[#allocation8 + $0xa88] ss:$24 sps:$4 sm:$0xff]  }
 0x69f   :  { %16724 = vmatpush1.bf16.msra.mxu0 %v20731_v10  ;;  %v20787_v10 = vld [vmem:[#allocation8 + $0xd5c] ss:$24 sps:$4 sm:$0xff]  }
 0x6a0   :  { %16767 = vmatpush1.bf16.msra.mxu1 %v20734_v7  ;;  %16725 = vmatprep.subr.bf16.mxu0 %v20739_v0  ;;  %v22949_v7 = vpop.f32.mrf.mxu1  ;;  %v20790_v0 = vld [vmem:[#allocation8 + $0x105c] ss:$24 sps:$4 sm:$0xff]  }
 0x6a1   :  { %16768 = vmatprep.subr.bf16.mxu1 %v20742_v48  ;;  %v20785_v48 = vld [vmem:[#allocation8 + $0xd58] ss:$24 sps:$4 sm:$0xff]  }
 0x6a3   :  { %16726 = vmatpush2.bf16.msra.mxu0 %v20737_v20  ;;  %v22951_v20 = vpop.f32.mrf.mxu0 }
 0x6a4   :  { %16769 = vmatpush2.bf16.msra.mxu1 %v20740_v47  ;;  %16727 = vmatprep.subr.bf16.mxu0 %v20745_v46  ;;  %v20788_v47 = vld [vmem:[#allocation8 + $0x1058] ss:$24 sps:$4 sm:$0xff]   ;;  %v22953_v46 = vpop.f32.mrf.mxu1 }
 0x6a5   :  { %16770 = vmatprep.subr.bf16.mxu1 %v20748_v21  ;;  %v20793_v21 = vld [vmem:[#allocation8 + $0xd2c] ss:$24 sps:$4 sm:$0xff]  }
 0x6a7   :  { %16728 = vmatpush2.bf16.msra.mxu0 %v20743_v35  ;;  %v20796_v35 = vld [vmem:[#allocation8 + $0x102c] ss:$24 sps:$4 sm:$0xff]  }
 0x6a8   :  { %16771 = vmatpush2.bf16.msra.mxu1 %v20746_v30  ;;  %16729 = vmatprep.subr.bf16.mxu0 %v20751_v6  ;;  %v20791_v30 = vld [vmem:[#allocation8 + $0xd28] ss:$24 sps:$4 sm:$0xff]   ;;  %v22957_v6 = vpop.f32.mrf.mxu0 }
 0x6a9   :  { %16772 = vmatprep.subr.bf16.mxu1 %v20754_v15  ;;  %v20794_v15 = vld [vmem:[#allocation8 + $0x1028] ss:$24 sps:$4 sm:$0xff]  }
 0x6ab   :  { %16730 = vmatpush2.bf16.msra.mxu0 %v20749_v29  ;;  %v20799_v29 = vld [vmem:[#allocation8 + $0xcfc] ss:$24 sps:$4 sm:$0xff]  }
 0x6ac   :  { %16773 = vmatpush2.bf16.msra.mxu1 %v20752_v38  ;;  %16731 = vmatprep.subr.bf16.mxu0 %v20757_v44  ;;  %v22960_v38 = vpop.f32.mrf.mxu1  ;;  %v20802_v44 = vld [vmem:[#allocation8 + $0xffc] ss:$24 sps:$4 sm:$0xff]  }
 0x6ad   :  { %16774 = vmatprep.subr.bf16.mxu1 %v20760_v54  ;;  %v20797_v54 = vld [vmem:[#allocation8 + $0xcf8] ss:$24 sps:$4 sm:$0xff]  }
 0x6af   :  { %16732 = vmatpush2.bf16.msra.mxu0 %v20755_v42  ;;  %v22963_v42 = vpop.f32.mrf.mxu0 }
 0x6b0   :  { %16775 = vmatpush2.bf16.msra.mxu1 %v20758_v9  ;;  %16733 = vmatprep.subr.bf16.mxu0 %v20763_v1  ;;  %v20800_v9 = vld [vmem:[#allocation8 + $0xff8] ss:$24 sps:$4 sm:$0xff]   ;;  %v20805_v1 = vld [vmem:[#allocation8 + $0xccc] ss:$24 sps:$4 sm:$0xff]  }
 0x6b1   :  { %16776 = vmatprep.subr.bf16.mxu1 %v20766_v53  ;;  %v22965_v53 = vpop.f32.mrf.mxu1 }
 0x6b3   :  { %16734 = vmatpush2.bf16.msra.mxu0 %v20761_v34  ;;  %v20808_v34 = vld [vmem:[#allocation8 + $0xfcc] ss:$24 sps:$4 sm:$0xff]  }
 0x6b4   :  { %16777 = vmatpush2.bf16.msra.mxu1 %v20764_v63  ;;  %16735 = vmatprep.subr.bf16.mxu0 %v20769_v16  ;;  %v22967_v63 = vpop.f32.mrf.mxu0  ;;  %v22969_v16 = vpop.f32.mrf.mxu1 }
 0x6b5   :  { %16778 = vmatprep.subr.bf16.mxu1 %v20772_v61  ;;  %v20803_v61 = vld [vmem:[#allocation8 + $0xcc8] ss:$24 sps:$4 sm:$0xff]  }
 0x6b7   :  { %16736 = vmatpush2.bf16.msra.mxu0 %v20767_v43  ;;  %v20806_v43 = vld [vmem:[#allocation8 + $0xfc8] ss:$24 sps:$4 sm:$0xff]  }
 0x6b8   :  { %16779 = vmatpush2.bf16.msra.mxu1 %v20770_v62  ;;  %16737 = vmatprep.subr.bf16.mxu0 %v20775_v49  ;;  %v20811_v62 = vld [vmem:[#allocation8 + $0xc9c] ss:$24 sps:$4 sm:$0xff]  }
 0x6b9   :  { %16780 = vmatprep.subr.bf16.mxu1 %v20778_v55  ;;  %v20814_v49 = vld [vmem:[#allocation8 + $0xf9c] ss:$24 sps:$4 sm:$0xff]   ;;  %v22971_v55 = vpop.f32.mrf.mxu0 }
 0x6bb   :  { %16738 = vmatpush2.bf16.msra.mxu0 %v20773_v13  ;;  %v22973_v13 = vpop.f32.mrf.mxu1 }
 0x6bc   :  { %16781 = vmatpush2.bf16.msra.mxu1 %v20776_v2  ;;  %16739 = vmatprep.subr.bf16.mxu0 %v20781_v56  ;;  %v20809_v2 = vld [vmem:[#allocation8 + $0xc98] ss:$24 sps:$4 sm:$0xff]  }
 0x6bd   :  { %16782 = vmatprep.subr.bf16.mxu1 %v20784_v36  ;;  %v20812_v56 = vld [vmem:[#allocation8 + $0xf98] ss:$24 sps:$4 sm:$0xff]   ;;  %v20817_v36 = vld [vmem:[#allocation8 + $0xc6c] ss:$24 sps:$4 sm:$0xff]  }
 0x6bf   :  { %16740 = vmatpush2.bf16.msra.mxu0 %v20779_v57  ;;  %v20820_v57 = vld [vmem:[#allocation8 + $0xf6c] ss:$24 sps:$4 sm:$0xff]  }
 0x6c0   :  { %16783 = vmatpush2.bf16.msra.mxu1 %v20782_v32  ;;  %16795 = vmatprep.subr.bf16.mxu0 %v20787_v10  ;;  %v22975_v32 = vpop.f32.mrf.mxu0  ;;  %v22977_v10 = vpop.f32.mrf.mxu1 }
 0x6c1   :  { %16838 = vmatprep.subr.bf16.mxu1 %v20790_v0  ;;  %v20815_v0 = vld [vmem:[#allocation8 + $0xc68] ss:$24 sps:$4 sm:$0xff]  }
 0x6c2   :  { %16742 = vmatmul.mubr.bf16.vlgmr.msra.gmra.mxu0 %v23233_v31 }
 0x6c3   :  { %16785 = vmatmul.mubr.bf16.vlgmr.msra.gmra.mxu1 %v23235_v17  ;;  %16796 = vmatpush1.bf16.msra.mxu0 %v20785_v48  ;;  %v20818_v48 = vld [vmem:[#allocation8 + $0xf68] ss:$24 sps:$4 sm:$0xff]  }
 0x6c4   :  { %16827 = vmatprep.mubr.bf16.mxu0 %v22730_v19  ;;  %16839 = vmatpush1.bf16.msra.mxu1 %v20788_v47  ;;  %v20823_v47 = vld [vmem:[#allocation8 + $0xc3c] ss:$24 sps:$4 sm:$0xff]  }
 0x6c5   :  { %16870 = vmatprep.mubr.bf16.mxu1 %v22736_v58  ;;  %16797 = vmatprep.subr.bf16.mxu0 %v20793_v21  ;;  %v20826_v21 = vld [vmem:[#allocation8 + $0xf3c] ss:$24 sps:$4 sm:$0xff]  }
 0x6c6   :  { %16840 = vmatprep.subr.bf16.mxu1 %v20796_v35  ;;  %v22979_v35 = vpop.f32.mrf.mxu0 }
 0x6c7   :  { %16798 = vmatpush1.bf16.msra.mxu0 %v20791_v30  ;;  %v22981_v30 = vpop.f32.mrf.mxu1 }
 0x6c8   :  { %16841 = vmatpush1.bf16.msra.mxu1 %v20794_v15  ;;  %16799 = vmatprep.subr.bf16.mxu0 %v20799_v29  ;;  %v20821_v15 = vld [vmem:[#allocation8 + $0xc38] ss:$24 sps:$4 sm:$0xff]   ;;  %v22983_v29 = vpop.f32.mrf.mxu0 }
 0x6c9   :  { %16842 = vmatprep.subr.bf16.mxu1 %v20802_v44  ;;  %v20824_v44 = vld [vmem:[#allocation8 + $0xf38] ss:$24 sps:$4 sm:$0xff]  }
 0x6cb   :  { %16800 = vmatpush1.bf16.msra.mxu0 %v20797_v54  ;;  %v20829_v54 = vld [vmem:[#allocation8 + $0xc0c] ss:$24 sps:$4 sm:$0xff]  }
 0x6cc   :  { %16843 = vmatpush1.bf16.msra.mxu1 %v20800_v9  ;;  %16801 = vmatprep.subr.bf16.mxu0 %v20805_v1  ;;  %v22985_v9 = vpop.f32.mrf.mxu1  ;;  %v20832_v1 = vld [vmem:[#allocation8 + $0xf0c] ss:$24 sps:$4 sm:$0xff]  }
 0x6cd   :  { %16844 = vmatprep.subr.bf16.mxu1 %v20808_v34  ;;  %v20827_v34 = vld [vmem:[#allocation8 + $0xc08] ss:$24 sps:$4 sm:$0xff]  }
 0x6cf   :  { %16802 = vmatpush1.bf16.msra.mxu0 %v20803_v61  ;;  %v22987_v61 = vpop.f32.mrf.mxu0 }
 0x6d0   :  { %16845 = vmatpush1.bf16.msra.mxu1 %v20806_v43  ;;  %16803 = vmatprep.subr.bf16.mxu0 %v20811_v62  ;;  %v20830_v43 = vld [vmem:[#allocation8 + $0xf08] ss:$24 sps:$4 sm:$0xff]   ;;  %v20835_v62 = vld [vmem:[#allocation8 + $0xedc] ss:$24 sps:$4 sm:$0xff]  }
 0x6d1   :  { %16846 = vmatprep.subr.bf16.mxu1 %v20814_v49  ;;  %v22989_v49 = vpop.f32.mrf.mxu1 }
 0x6d3   :  { %16804 = vmatpush1.bf16.msra.mxu0 %v20809_v2  ;;  %v20838_v2 = vld [vmem:[#allocation8 + $0x11dc] ss:$24 sps:$4 sm:$0xff]  }
 0x6d4   :  { %16847 = vmatpush1.bf16.msra.mxu1 %v20812_v56  ;;  %16805 = vmatprep.subr.bf16.mxu0 %v20817_v36  ;;  %v10315_v56 = vld [vmem:[#allocation10] sm:$0x3f]  ;;  %v20833_v36 = vld [vmem:[#allocation8 + $0xed8] ss:$24 sps:$4 sm:$0xff]  }
 0x6d5   :  { %16848 = vmatprep.subr.bf16.mxu1 %v20820_v57  ;;  %v22991_v57 = vpop.f32.mrf.mxu0 }
 0x6d7   :  { %16806 = vmatpush1.bf16.msra.mxu0 %v20815_v0  ;;  %v20836_v0 = vld [vmem:[#allocation8 + $0x11d8] ss:$24 sps:$4 sm:$0xff]   ;;  %v22997_v40 = vpop.f32.mrf.mxu0 }
 0x6d8   :  { %16849 = vmatpush1.bf16.msra.mxu1 %v20818_v48  ;;  %16807 = vmatprep.subr.bf16.mxu0 %v20823_v47  ;;  %v20841_v48 = vld [vmem:[#allocation8 + $0xeac] ss:$24 sps:$4 sm:$0xff]  }
 0x6d9   :  { %16850 = vmatprep.subr.bf16.mxu1 %v20826_v21  ;;  %v23258_v47 = vld [vmem:[#allocation16_spill] sm:$0xff]  ;;  %v23002_v39 = vpop.f32.mrf.mxu0 }
 0x6da   :  { %v10320_v21 = vrot.slane %v10315_v56, %v23258_v47  ;;  %v20850_v47 = vld [vmem:[#allocation8 + $0x117c] ss:$24 sps:$4 sm:$0xff]  }
 0x6db   :  { %16808 = vmatpush1.bf16.msra.mxu0 %v20821_v15  ;;  %v22994_v15 = vpop.f32.mrf.mxu1 }
 0x6dc   :  { %16851 = vmatpush1.bf16.msra.mxu1 %v20824_v44  ;;  %16809 = vmatprep.subr.bf16.mxu0 %v20829_v54  ;;  %v20844_v44 = vld [vmem:[#allocation8 + $0x11ac] ss:$24 sps:$4 sm:$0xff]   ;;  %v10324_v54 = vrot.slane %v10315_v56, %v22501_v8  ;;  %v20845_v8 = vld [vmem:[#allocation8 + $0xe78] ss:$24 sps:$4 sm:$0xff]  }
 0x6dd   :  { %16852 = vmatprep.subr.bf16.mxu1 %v20832_v1  ;;  %v20839_v1 = vld [vmem:[#allocation8 + $0xea8] ss:$24 sps:$4 sm:$0xff]   ;;  %v20848_v56 = vld [vmem:[#allocation8 + $0x1178] ss:$24 sps:$4 sm:$0xff]  }
 0x6de   :  { %v16148_v19 = vadd.f32 %v22963_v42, %v10324_v54 }
 0x6df   :  { %16810 = vmatpush1.bf16.msra.mxu0 %v20827_v34  ;;  %v20842_v34 = vld [vmem:[#allocation8 + $0x11a8] ss:$24 sps:$4 sm:$0xff]  }
 0x6e0   :  { %16853 = vmatpush1.bf16.msra.mxu1 %v20830_v43  ;;  %16811 = vmatprep.subr.bf16.mxu0 %v20835_v62  ;;  %v16142_v43 = vadd.f32 %v22947_v23, %v10320_v21  ;;  %v23000_v62 = vpop.f32.mrf.mxu1  ;;  %v16146_v23 = vadd.f32 %v22957_v6, %v10320_v21  ;;  %v20862_v21 = vld [vmem:[#allocation8 + $0x111c] ss:$24 sps:$4 sm:$0xff]  }
 0x6e1   :  { %16854 = vmatprep.subr.bf16.mxu1 %v20838_v2  ;;  %v16144_v2 = vadd.f32 %v22951_v20, %v10324_v54 }
 0x6e2   :  { %v23005_v3 = vpop.f32.mrf.mxu1 }
 0x6e3   :  { %16812 = vmatpush2.bf16.msra.mxu0 %v20833_v36  ;;  %v20853_v36 = vld [vmem:[#allocation8 + $0xe4c] ss:$24 sps:$4 sm:$0xff]   ;;  %v16187_v58 = vadd.f32 %v22953_v46, %v16144_v2  ;;  %v16191_v46 = vadd.f32 %v22965_v53, %v16148_v19  ;;  %v20860_v2 = vld [vmem:[#allocation8 + $0x1118] ss:$24 sps:$4 sm:$0xff]  }
 0x6e4   :  { %16855 = vmatpush2.bf16.msra.mxu1 %v20836_v0  ;;  %16813 = vmatprep.subr.bf16.mxu0 %v20841_v48  ;;  %v16185_v0 = vadd.f32 %v22949_v7, %v16142_v43  ;;  %v20856_v48 = vld [vmem:[#allocation8 + $0x114c] ss:$24 sps:$4 sm:$0xff]   ;;  %v23012_v17 = vpop.f32.mrf.mxu1  ;;  %v16189_v7 = vadd.f32 %v22960_v38, %v16146_v23  ;;  %v20866_v23 = vld [vmem:[#allocation8 + $0x10e8] ss:$24 sps:$4 sm:$0xff]  }
 0x6e5   :  { %16856 = vmatprep.subr.bf16.mxu1 %v20844_v44  ;;  %v16401_v44 = vpop.f32.mrf.mxu0  ;;  %v16230_v6 = vadd.f32 %v22971_v55, %v16187_v58  ;;  %v16234_v58 = vadd.f32 %v22979_v35, %v16191_v46  ;;  %v20880_v46 = vld [vmem:[#allocation8 + $0x108c] ss:$24 sps:$4 sm:$0xff]  }
 0x6e6   :  { %v16228_v20 = vadd.f32 %v22967_v63, %v16185_v0  ;;  %v16232_v63 = vadd.f32 %v22975_v32, %v16189_v7  ;;  %v16446_v54 = vpop.f32.mrf.mxu1 }
 0x6e7   :  { %16814 = vmatpush2.bf16.msra.mxu0 %v20839_v1  ;;  %v20851_v1 = vld [vmem:[#allocation8 + $0xe48] ss:$24 sps:$4 sm:$0xff]   ;;  %v16403_v43 = vpop.f32.mrf.mxu0  ;;  %v16273_v38 = vadd.f32 %v22973_v13, %v16230_v6  ;;  %v16277_v13 = vadd.f32 %v22981_v30, %v16234_v58  ;;  %v20872_v6 = vld [vmem:[#allocation8 + $0x10b8] ss:$24 sps:$4 sm:$0xff]   ;;  %v20877_v30 = vld [vmem:[#allocation8 + $0xd8c] ss:$24 sps:$4 sm:$0xff]  }
 0x6e8   :  { %16857 = vmatpush2.bf16.msra.mxu1 %v20842_v34  ;;  %16815 = vmatprep.subr.bf16.mxu0 %v20847_v4  ;;  %v20854_v4 = vld [vmem:[#allocation8 + $0x1148] ss:$24 sps:$4 sm:$0xff]   ;;  %v20859_v34 = vld [vmem:[#allocation8 + $0xe1c] ss:$24 sps:$4 sm:$0xff]   ;;  %v16271_v42 = vadd.f32 %v22969_v16, %v16228_v20  ;;  %v16275_v53 = vadd.f32 %v22977_v10, %v16232_v63  ;;  %v16448_v32 = vpop.f32.mrf.mxu1 }
 0x6e9   :  { %16858 = vmatprep.subr.bf16.mxu1 %v20850_v47  ;;  %v20857_v47 = vld [vmem:[#allocation8 + $0xe18] ss:$24 sps:$4 sm:$0xff]   ;;  %v16405_v19 = vpop.f32.mrf.mxu0  ;;  %v16316_v16 = vadd.f32 %v22987_v61, %v16273_v38  ;;  %v16320_v61 = vadd.f32 %v22997_v40, %v16277_v13  ;;  %v20886_v58 = vld [vmem:[#allocation8 + $0x165c] ss:$24 sps:$4 sm:$0xff]  }
 0x6ea   :  { %v16314_v55 = vadd.f32 %v22983_v29, %v16271_v42  ;;  %v16318_v29 = vadd.f32 %v22991_v57, %v16275_v53  ;;  %v16528_v20 = vpop.f32.mrf.mxu1 }
 0x6eb   :  { %16816 = vmatpush2.bf16.msra.mxu0 %v20845_v8  ;;  %v20865_v8 = vld [vmem:[#allocation8 + $0xdec] ss:$24 sps:$4 sm:$0xff]   ;;  %v16485_v0 = vpop.f32.mrf.mxu0  ;;  %v16359_v10 = vadd.f32 %v22989_v49, %v16316_v16  ;;  %v16363_v42 = vadd.f32 %v23000_v62, %v16320_v61  ;;  %v20881_v62 = vld [vmem:[#allocation8 + $0x1358] ss:$24 sps:$4 sm:$0xff]  }
 0x6ec   :  { %16859 = vmatpush2.bf16.msra.mxu1 %v20848_v56  ;;  %16817 = vmatprep.subr.bf16.mxu0 %v20853_v36  ;;  %v20868_v56 = vld [vmem:[#allocation8 + $0x10ec] ss:$24 sps:$4 sm:$0xff]   ;;  %v20863_v36 = vld [vmem:[#allocation8 + $0xde8] ss:$24 sps:$4 sm:$0xff]   ;;  %v16357_v35 = vadd.f32 %v22985_v9, %v16314_v55  ;;  %v16361_v9 = vadd.f32 %v22994_v15, %v16318_v29  ;;  %v16530_v57 = vpop.f32.mrf.mxu1 }
 0x6ed   :  { %16860 = vmatprep.subr.bf16.mxu1 %v20856_v48  ;;  %v20871_v48 = vld [vmem:[#allocation8 + $0xdbc] ss:$24 sps:$4 sm:$0xff]   ;;  %v16487_v7 = vpop.f32.mrf.mxu0  ;;  %v16406_v38 = vadd.f32 %v16405_v19, %v16363_v42  ;;  %v20892_v19 = vld [vmem:[#allocation8 + $0x162c] ss:$24 sps:$4 sm:$0xff]   ;;  %v20887_v29 = vld [vmem:[#allocation8 + $0x1328] ss:$24 sps:$4 sm:$0xff]  }
 0x6ee   :  { %v16404_v40 = vadd.f32 %v16403_v43, %v16361_v9  ;;  %v20884_v43 = vld [vmem:[#allocation8 + $0x1658] ss:$24 sps:$4 sm:$0xff]  }
 0x6ef   :  { %16818 = vmatpush2.bf16.msra.mxu0 %v20851_v1  ;;  %v20874_v1 = vld [vmem:[#allocation8 + $0x10bc] ss:$24 sps:$4 sm:$0xff]   ;;  %v16489_v63 = vpop.f32.mrf.mxu0  ;;  %v16449_v53 = vadd.f32 %v16448_v32, %v16406_v38  ;;  %v20899_v38 = vld [vmem:[#allocation8 + $0x12c8] ss:$24 sps:$4 sm:$0xff]  }
 0x6f0   :  { %16861 = vmatpush2.bf16.msra.mxu1 %v20854_v4  ;;  %16819 = vmatprep.subr.bf16.mxu0 %v20859_v34  ;;  %v16400_v4 = vadd.f32 %v23002_v39, %v16357_v35  ;;  %v20869_v34 = vld [vmem:[#allocation8 + $0xdb8] ss:$24 sps:$4 sm:$0xff]   ;;  %v20875_v39 = vld [vmem:[#allocation8 + $0xd88] ss:$24 sps:$4 sm:$0xff]   ;;  %v16447_v55 = vadd.f32 %v16446_v54, %v16404_v40  ;;  %v20901_v40 = vld [vmem:[#allocation8 + $0x12cc] ss:$24 sps:$4 sm:$0xff]  }
 0x6f1   :  { %16862 = vmatprep.subr.bf16.mxu1 %v20862_v21  ;;  %v16402_v21 = vadd.f32 %v16401_v44, %v16359_v10  ;;  %v16532_v44 = vpop.f32.mrf.mxu1 }
 0x6f2   :  { %v16443_v49 = vadd.f32 %v23005_v3, %v16400_v4  ;;  %v16491_v3 = vpop.f32.mrf.mxu0 }
 0x6f3   :  { %16820 = vmatpush2.bf16.msra.mxu0 %v20857_v47  ;;  %v20878_v47 = vld [vmem:[#allocation8 + $0x1088] ss:$24 sps:$4 sm:$0xff]   ;;  %v16492_v13 = vadd.f32 %v16491_v3, %v16449_v53  ;;  %v20916_v3 = vld [vmem:[#allocation8 + $0x156c] ss:$24 sps:$4 sm:$0xff]  }
 0x6f4   :  { %16863 = vmatpush2.bf16.msra.mxu1 %v20860_v2  ;;  %16821 = vmatprep.subr.bf16.mxu0 %v20865_v8  ;;  %v20883_v2 = vld [vmem:[#allocation8 + $0x135c] ss:$24 sps:$4 sm:$0xff]   ;;  %v16445_v8 = vadd.f32 %v23012_v17, %v16402_v21  ;;  %v16486_v15 = vadd.f32 %v16485_v0, %v16443_v49  ;;  %v20896_v49 = vld [vmem:[#allocation8 + $0x15f8] ss:$24 sps:$4 sm:$0xff]   ;;  %v20914_v53 = vld [vmem:[#allocation8 + $0x1568] ss:$24 sps:$4 sm:$0xff]  }
 0x6f5   :  { %16864 = vmatprep.subr.bf16.mxu1 %v20868_v56 }
 0x6f6   :  { %v16488_v56 = vadd.f32 %v16487_v7, %v16445_v8  ;;  %v16529_v16 = vadd.f32 %v16528_v20, %v16486_v15  ;;  %v20890_v20 = vld [vmem:[#allocation8 + $0x1628] ss:$24 sps:$4 sm:$0xff]   ;;  %v20898_v7 = vld [vmem:[#allocation8 + $0x15fc] ss:$24 sps:$4 sm:$0xff]  }
 0x6f7   :  { %16822 = vmatpush2.bf16.msra.mxu0 %v20863_v36  ;;  %v16490_v36 = vadd.f32 %v16489_v63, %v16447_v55  ;;  %v20902_v15 = vld [vmem:[#allocation8 + $0x15c8] ss:$24 sps:$4 sm:$0xff]   ;;  %v20905_v55 = vld [vmem:[#allocation8 + $0x1298] ss:$24 sps:$4 sm:$0xff]  }
 0x6f8   :  { %16865 = vmatpush2.bf16.msra.mxu1 %v20866_v23  ;;  %16823 = vmatprep.subr.bf16.mxu0 %v20871_v48  ;;  %v16534_v23 = vpop.f32.mrf.mxu1  ;;  %v20889_v48 = vld [vmem:[#allocation8 + $0x132c] ss:$24 sps:$4 sm:$0xff]   ;;  %v16531_v0 = vadd.f32 %v16530_v57, %v16488_v56  ;;  %v20908_v56 = vld [vmem:[#allocation8 + $0x1598] ss:$24 sps:$4 sm:$0xff]  }
 0x6f9   :  { %16866 = vmatprep.subr.bf16.mxu1 %v20874_v1  ;;  %v20895_v1 = vld [vmem:[#allocation8 + $0x12fc] ss:$24 sps:$4 sm:$0xff]   ;;  %v16533_v10 = vadd.f32 %v16532_v44, %v16490_v36 }
 0x6fa   :  { %v20907_v44 = vld [vmem:[#allocation8 + $0x129c] ss:$24 sps:$4 sm:$0xff]  }
 0x6fb   :  { %16824 = vmatpush2.bf16.msra.mxu0 %v20869_v34  ;;  %v20922_v36 = vld [vmem:[#allocation8 + $0x153c] ss:$24 sps:$4 sm:$0xff]  }
 0x6fc   :  { %16867 = vmatpush2.bf16.msra.mxu1 %v20872_v6  ;;  %16825 = vmatprep.subr.bf16.mxu0 %v20877_v30  ;;  %v16535_v30 = vadd.f32 %v16534_v23, %v16492_v13  ;;  %v20917_v23 = vld [vmem:[#allocation8 + $0x1238] ss:$24 sps:$4 sm:$0xff]   ;;  %v20926_v13 = vld [vmem:[#allocation8 + $0x1508] ss:$24 sps:$4 sm:$0xff]  }
 0x6fd   :  { %16868 = vmatprep.subr.bf16.mxu1 %v20880_v46  ;;  %v20893_v46 = vld [vmem:[#allocation8 + $0x12f8] ss:$24 sps:$4 sm:$0xff]  }
 0x6ff   :  { %16826 = vmatpush2.bf16.msra.mxu0 %v20875_v39 }
 0x700   :  { %16869 = vmatpush2.bf16.msra.mxu1 %v20878_v47  ;;  %16881 = vmatprep.subr.bf16.mxu0 %v20883_v2  ;;  %v20904_v47 = vld [vmem:[#allocation8 + $0x15cc] ss:$24 sps:$4 sm:$0xff]  }
 0x701   :  { %16924 = vmatprep.subr.bf16.mxu1 %v20886_v58  ;;  %v20910_v58 = vld [vmem:[#allocation8 + $0x159c] ss:$24 sps:$4 sm:$0xff]  }
 0x702   :  { %v16571_v17 = vpop.f32.mrf.mxu0  ;;  %16828 = vmatmul.mubr.bf16.vlgmr.msra.gmra.mxu0 %v23250_v28 }
 0x703   :  { %v16572_v54 = vadd.f32 %v16571_v17, %v16529_v16  ;;  %v16614_v35 = vpop.f32.mrf.mxu1  ;;  %16871 = vmatmul.mubr.bf16.vlgmr.msra.gmra.mxu1 %v23251_v11  ;;  %16882 = vmatpush1.bf16.msra.mxu0 %v20881_v62  ;;  %v20913_v62 = vld [vmem:[#allocation8 + $0x126c] ss:$24 sps:$4 sm:$0xff]   ;;  %v20919_v16 = vld [vmem:[#allocation8 + $0x123c] ss:$24 sps:$4 sm:$0xff]  }
 0x704   :  { %16913 = vmatprep.mubr.bf16.mxu0 %v22812_v14  ;;  %16925 = vmatpush1.bf16.msra.mxu1 %v20884_v43  ;;  %v16573_v32 = vpop.f32.mrf.mxu0  ;;  %v20911_v43 = vld [vmem:[#allocation8 + $0x1268] ss:$24 sps:$4 sm:$0xff]   ;;  %v20925_v17 = vld [vmem:[#allocation8 + $0x120c] ss:$24 sps:$4 sm:$0xff]  }
 0x705   :  { %v16615_v61 = vadd.f32 %v16614_v35, %v16572_v54  ;;  %16956 = vmatprep.mubr.bf16.mxu1 %v22815_v41  ;;  %v16574_v4 = vadd.f32 %v16573_v32, %v16531_v0  ;;  %v16616_v34 = vpop.f32.mrf.mxu1  ;;  %16883 = vmatprep.subr.bf16.mxu0 %v20889_v48  ;;  %v20920_v48 = vld [vmem:[#allocation8 + $0x1538] ss:$24 sps:$4 sm:$0xff]   ;;  %v20923_v0 = vld [vmem:[#allocation8 + $0x1208] ss:$24 sps:$4 sm:$0xff]   ;;  %v20931_v54 = vld [vmem:[#allocation8 + $0x14dc] ss:$24 sps:$4 sm:$0xff]  }
 0x706   :  { %v16575_v6 = vpop.f32.mrf.mxu0  ;;  %16926 = vmatprep.subr.bf16.mxu1 %v20892_v19  ;;  %v20928_v19 = vld [vmem:[#allocation8 + $0x150c] ss:$24 sps:$4 sm:$0xff]   ;;  %v20934_v35 = vld [vmem:[#allocation8 + $0x17dc] ss:$24 sps:$4 sm:$0xff]   ;;  %v20932_v32 = vld [vmem:[#allocation8 + $0x17d8] ss:$24 sps:$4 sm:$0xff]  }
 0x707   :  { %17655 = vst [vmem:[#allocation11] sm:$0xff] %v16615_v61  ;;  %v16617_v9 = vadd.f32 %v16616_v34, %v16574_v4  ;;  %v16576_v21 = vadd.f32 %v16575_v6, %v16533_v10  ;;  %v16618_v57 = vpop.f32.mrf.mxu1  ;;  %16884 = vmatpush1.bf16.msra.mxu0 %v20887_v29  ;;  %v20929_v29 = vld [vmem:[#allocation8 + $0x14d8] ss:$24 sps:$4 sm:$0xff]   ;;  %v20935_v10 = vld [vmem:[#allocation8 + $0x14a8] ss:$24 sps:$4 sm:$0xff]  }
 0x708   :  { %16927 = vmatpush1.bf16.msra.mxu1 %v20890_v20  ;;  %v16577_v42 = vpop.f32.mrf.mxu0  ;;  %16885 = vmatprep.subr.bf16.mxu0 %v20895_v1  ;;  %v20937_v20 = vld [vmem:[#allocation8 + $0x14ac] ss:$24 sps:$4 sm:$0xff]   ;;  %v20938_v61 = vld [vmem:[#allocation8 + $0x17a8] ss:$24 sps:$4 sm:$0xff]   ;;  %v20943_v4 = vld [vmem:[#allocation8 + $0x147c] ss:$24 sps:$4 sm:$0xff]  }
 0x709   :  { %17656 = vst [vmem:[#allocation11 + $0x8] sm:$0xff] %v16617_v9  ;;  %v16619_v39 = vadd.f32 %v16618_v57, %v16576_v21  ;;  %v16578_v63 = vadd.f32 %v16577_v42, %v16535_v30  ;;  %16928 = vmatprep.subr.bf16.mxu1 %v20898_v7  ;;  %v16620_v2 = vpop.f32.mrf.mxu1  ;;  %v20940_v1 = vld [vmem:[#allocation8 + $0x17ac] ss:$24 sps:$4 sm:$0xff]   ;;  %v20946_v34 = vld [vmem:[#allocation8 + $0x177c] ss:$24 sps:$4 sm:$0xff]  }
 0x70a   :  { %v20941_v7 = vld [vmem:[#allocation8 + $0x1478] ss:$24 sps:$4 sm:$0xff]   ;;  %v20949_v30 = vld [vmem:[#allocation8 + $0x144c] ss:$24 sps:$4 sm:$0xff]   ;;  %v20947_v21 = vld [vmem:[#allocation8 + $0x1448] ss:$24 sps:$4 sm:$0xff]  }
 0x70b   :  { %17661 = vst [vmem:[#allocation11 + $0x30] sm:$0xff] %v16619_v39  ;;  %v16621_v8 = vadd.f32 %v16620_v2, %v16578_v63  ;;  %16886 = vmatpush1.bf16.msra.mxu0 %v20893_v46  ;;  %v20944_v6 = vld [vmem:[#allocation8 + $0x1778] ss:$24 sps:$4 sm:$0xff]   ;;  %v20952_v9 = vld [vmem:[#allocation8 + $0x174c] ss:$24 sps:$4 sm:$0xff]  }
 0x70c   :  { %16929 = vmatpush1.bf16.msra.mxu1 %v20896_v49  ;;  %16887 = vmatprep.subr.bf16.mxu0 %v20901_v40  ;;  %v20950_v57 = vld [vmem:[#allocation8 + $0x1748] ss:$24 sps:$4 sm:$0xff]   ;;  %v20955_v46 = vld [vmem:[#allocation8 + $0x141c] ss:$24 sps:$4 sm:$0xff]   ;;  %v20953_v49 = vld [vmem:[#allocation8 + $0x1418] ss:$24 sps:$4 sm:$0xff]  }
 0x70d   :  { %17662 = vst [vmem:[#allocation11 + $0x38] sm:$0xff] %v16621_v8  ;;  %16930 = vmatprep.subr.bf16.mxu1 %v20904_v47  ;;  %v20958_v42 = vld [vmem:[#allocation8 + $0x171c] ss:$24 sps:$4 sm:$0xff]   ;;  %v20956_v40 = vld [vmem:[#allocation8 + $0x1718] ss:$24 sps:$4 sm:$0xff]  }
 0x70e   :  { %v20961_v39 = vld [vmem:[#allocation8 + $0x13ec] ss:$24 sps:$4 sm:$0xff]   ;;  %v20959_v47 = vld [vmem:[#allocation8 + $0x13e8] ss:$24 sps:$4 sm:$0xff]   ;;  %v20967_v8 = vld [vmem:[#allocation8 + $0x13bc] ss:$24 sps:$4 sm:$0xff]  }
 0x70f   :  { %16888 = vmatpush1.bf16.msra.mxu0 %v20899_v38  ;;  %v20964_v63 = vld [vmem:[#allocation8 + $0x16ec] ss:$24 sps:$4 sm:$0xff]   ;;  %v20962_v2 = vld [vmem:[#allocation8 + $0x16e8] ss:$24 sps:$4 sm:$0xff]   ;;  %v20970_v38 = vld [vmem:[#allocation8 + $0x16bc] ss:$24 sps:$4 sm:$0xff]  }
 0x710   :  { %16931 = vmatpush1.bf16.msra.mxu1 %v20902_v15  ;;  %16889 = vmatprep.subr.bf16.mxu0 %v20907_v44  ;;  %v20965_v15 = vld [vmem:[#allocation8 + $0x13b8] ss:$24 sps:$4 sm:$0xff]  }
 0x711   :  { %16932 = vmatprep.subr.bf16.mxu1 %v20910_v58  ;;  %v20968_v44 = vld [vmem:[#allocation8 + $0x16b8] ss:$24 sps:$4 sm:$0xff]   ;;  %v20973_v58 = vld [vmem:[#allocation8 + $0x138c] ss:$24 sps:$4 sm:$0xff]  }
 0x713   :  { %16890 = vmatpush1.bf16.msra.mxu0 %v20905_v55  ;;  %v20976_v55 = vld [vmem:[#allocation8 + $0x168c] ss:$24 sps:$4 sm:$0xff]  }
 0x714   :  { %16933 = vmatpush1.bf16.msra.mxu1 %v20908_v56  ;;  %16891 = vmatprep.subr.bf16.mxu0 %v20913_v62  ;;  %v20971_v56 = vld [vmem:[#allocation8 + $0x1388] ss:$24 sps:$4 sm:$0xff]  }
 0x715   :  { %16934 = vmatprep.subr.bf16.mxu1 %v20916_v3  ;;  %v20974_v62 = vld [vmem:[#allocation8 + $0x1688] ss:$24 sps:$4 sm:$0xff]   ;;  %v20979_v3 = vld [vmem:[#allocation8 + $0x195c] ss:$24 sps:$4 sm:$0xff]  }
 0x717   :  { %16892 = vmatpush1.bf16.msra.mxu0 %v20911_v43  ;;  %v20982_v43 = vld [vmem:[#allocation8 + $0x1c5c] ss:$24 sps:$4 sm:$0xff]  }
 0x718   :  { %16935 = vmatpush1.bf16.msra.mxu1 %v20914_v53  ;;  %16893 = vmatprep.subr.bf16.mxu0 %v20919_v16  ;;  %v20977_v53 = vld [vmem:[#allocation8 + $0x1958] ss:$24 sps:$4 sm:$0xff]  }
 0x719   :  { %16936 = vmatprep.subr.bf16.mxu1 %v20922_v36  ;;  %v20980_v16 = vld [vmem:[#allocation8 + $0x1c58] ss:$24 sps:$4 sm:$0xff]   ;;  %v20985_v36 = vld [vmem:[#allocation8 + $0x192c] ss:$24 sps:$4 sm:$0xff]  }
 0x71b   :  { %16894 = vmatpush1.bf16.msra.mxu0 %v20917_v23  ;;  %v20988_v23 = vld [vmem:[#allocation8 + $0x1c2c] ss:$24 sps:$4 sm:$0xff]  }
 0x71c   :  { %16937 = vmatpush1.bf16.msra.mxu1 %v20920_v48  ;;  %16895 = vmatprep.subr.bf16.mxu0 %v20925_v17  ;;  %v20983_v48 = vld [vmem:[#allocation8 + $0x1928] ss:$24 sps:$4 sm:$0xff]  }
 0x71d   :  { %16938 = vmatprep.subr.bf16.mxu1 %v20928_v19  ;;  %v20986_v17 = vld [vmem:[#allocation8 + $0x1c28] ss:$24 sps:$4 sm:$0xff]   ;;  %v20991_v19 = vld [vmem:[#allocation8 + $0x18fc] ss:$24 sps:$4 sm:$0xff]  }
 0x71f   :  { %16896 = vmatpush1.bf16.msra.mxu0 %v20923_v0  ;;  %v20994_v0 = vld [vmem:[#allocation8 + $0x1bfc] ss:$24 sps:$4 sm:$0xff]  }
 0x720   :  { %16939 = vmatpush1.bf16.msra.mxu1 %v20926_v13  ;;  %16897 = vmatprep.subr.bf16.mxu0 %v20931_v54  ;;  %v20989_v13 = vld [vmem:[#allocation8 + $0x18f8] ss:$24 sps:$4 sm:$0xff]  }
 0x721   :  { %16940 = vmatprep.subr.bf16.mxu1 %v20934_v35  ;;  %v20992_v54 = vld [vmem:[#allocation8 + $0x1bf8] ss:$24 sps:$4 sm:$0xff]   ;;  %v20997_v35 = vld [vmem:[#allocation8 + $0x18cc] ss:$24 sps:$4 sm:$0xff]  }
 0x723   :  { %16898 = vmatpush2.bf16.msra.mxu0 %v20929_v29  ;;  %v21000_v29 = vld [vmem:[#allocation8 + $0x1bcc] ss:$24 sps:$4 sm:$0xff]  }
 0x724   :  { %16941 = vmatpush2.bf16.msra.mxu1 %v20932_v32  ;;  %16899 = vmatprep.subr.bf16.mxu0 %v20937_v20  ;;  %v20995_v32 = vld [vmem:[#allocation8 + $0x18c8] ss:$24 sps:$4 sm:$0xff]  }
 0x725   :  { %16942 = vmatprep.subr.bf16.mxu1 %v20940_v1  ;;  %v20998_v20 = vld [vmem:[#allocation8 + $0x1bc8] ss:$24 sps:$4 sm:$0xff]   ;;  %v21003_v1 = vld [vmem:[#allocation8 + $0x189c] ss:$24 sps:$4 sm:$0xff]  }
 0x727   :  { %16900 = vmatpush2.bf16.msra.mxu0 %v20935_v10  ;;  %v21006_v10 = vld [vmem:[#allocation8 + $0x1b9c] ss:$24 sps:$4 sm:$0xff]  }
 0x728   :  { %16943 = vmatpush2.bf16.msra.mxu1 %v20938_v61  ;;  %16901 = vmatprep.subr.bf16.mxu0 %v20943_v4  ;;  %v21001_v61 = vld [vmem:[#allocation8 + $0x1898] ss:$24 sps:$4 sm:$0xff]  }
 0x729   :  { %16944 = vmatprep.subr.bf16.mxu1 %v20946_v34  ;;  %v21004_v4 = vld [vmem:[#allocation8 + $0x1b98] ss:$24 sps:$4 sm:$0xff]   ;;  %v21009_v34 = vld [vmem:[#allocation8 + $0x186c] ss:$24 sps:$4 sm:$0xff]  }
 0x72b   :  { %16902 = vmatpush2.bf16.msra.mxu0 %v20941_v7  ;;  %v21012_v7 = vld [vmem:[#allocation8 + $0x1b6c] ss:$24 sps:$4 sm:$0xff]  }
 0x72c   :  { %16945 = vmatpush2.bf16.msra.mxu1 %v20944_v6  ;;  %16903 = vmatprep.subr.bf16.mxu0 %v20949_v30  ;;  %v21007_v6 = vld [vmem:[#allocation8 + $0x1868] ss:$24 sps:$4 sm:$0xff]  }
 0x72d   :  { %16946 = vmatprep.subr.bf16.mxu1 %v20952_v9  ;;  %v21010_v30 = vld [vmem:[#allocation8 + $0x1b68] ss:$24 sps:$4 sm:$0xff]   ;;  %v21015_v9 = vld [vmem:[#allocation8 + $0x183c] ss:$24 sps:$4 sm:$0xff]  }
 0x72f   :  { %16904 = vmatpush2.bf16.msra.mxu0 %v20947_v21  ;;  %v21018_v21 = vld [vmem:[#allocation8 + $0x1b3c] ss:$24 sps:$4 sm:$0xff]  }
 0x730   :  { %16947 = vmatpush2.bf16.msra.mxu1 %v20950_v57  ;;  %16905 = vmatprep.subr.bf16.mxu0 %v20955_v46  ;;  %v21013_v57 = vld [vmem:[#allocation8 + $0x1838] ss:$24 sps:$4 sm:$0xff]  }
 0x731   :  { %16948 = vmatprep.subr.bf16.mxu1 %v20958_v42  ;;  %v21016_v46 = vld [vmem:[#allocation8 + $0x1b38] ss:$24 sps:$4 sm:$0xff]   ;;  %v21021_v42 = vld [vmem:[#allocation8 + $0x180c] ss:$24 sps:$4 sm:$0xff]  }
 0x733   :  { %16906 = vmatpush2.bf16.msra.mxu0 %v20953_v49  ;;  %v21024_v49 = vld [vmem:[#allocation8 + $0x1b0c] ss:$24 sps:$4 sm:$0xff]  }
 0x734   :  { %16949 = vmatpush2.bf16.msra.mxu1 %v20956_v40  ;;  %16907 = vmatprep.subr.bf16.mxu0 %v20961_v39  ;;  %v21019_v40 = vld [vmem:[#allocation8 + $0x1808] ss:$24 sps:$4 sm:$0xff]  }
 0x735   :  { %16950 = vmatprep.subr.bf16.mxu1 %v20964_v63  ;;  %v21022_v39 = vld [vmem:[#allocation8 + $0x1b08] ss:$24 sps:$4 sm:$0xff]   ;;  %v21027_v63 = vld [vmem:[#allocation8 + $0x1adc] ss:$24 sps:$4 sm:$0xff]  }
 0x737   :  { %16908 = vmatpush2.bf16.msra.mxu0 %v20959_v47  ;;  %v21030_v47 = vld [vmem:[#allocation8 + $0x1ddc] ss:$24 sps:$4 sm:$0xff]  }
 0x738   :  { %16951 = vmatpush2.bf16.msra.mxu1 %v20962_v2  ;;  %16909 = vmatprep.subr.bf16.mxu0 %v20967_v8  ;;  %v21025_v2 = vld [vmem:[#allocation8 + $0x1ad8] ss:$24 sps:$4 sm:$0xff]  }
 0x739   :  { %16952 = vmatprep.subr.bf16.mxu1 %v20970_v38  ;;  %v21028_v8 = vld [vmem:[#allocation8 + $0x1dd8] ss:$24 sps:$4 sm:$0xff]   ;;  %v21033_v38 = vld [vmem:[#allocation8 + $0x1aac] ss:$24 sps:$4 sm:$0xff]  }
 0x73b   :  { %16910 = vmatpush2.bf16.msra.mxu0 %v20965_v15  ;;  %v21036_v15 = vld [vmem:[#allocation8 + $0x1dac] ss:$24 sps:$4 sm:$0xff]  }
 0x73c   :  { %16953 = vmatpush2.bf16.msra.mxu1 %v20968_v44  ;;  %16911 = vmatprep.subr.bf16.mxu0 %v20973_v58  ;;  %v21031_v44 = vld [vmem:[#allocation8 + $0x1aa8] ss:$24 sps:$4 sm:$0xff]  }
 0x73d   :  { %16954 = vmatprep.subr.bf16.mxu1 %v20976_v55  ;;  %v21034_v58 = vld [vmem:[#allocation8 + $0x1da8] ss:$24 sps:$4 sm:$0xff]   ;;  %v21039_v55 = vld [vmem:[#allocation8 + $0x1a7c] ss:$24 sps:$4 sm:$0xff]  }
 0x73f   :  { %16912 = vmatpush2.bf16.msra.mxu0 %v20971_v56  ;;  %v21042_v56 = vld [vmem:[#allocation8 + $0x1d7c] ss:$24 sps:$4 sm:$0xff]  }
 0x740   :  { %16955 = vmatpush2.bf16.msra.mxu1 %v20974_v62  ;;  %16967 = vmatprep.subr.bf16.mxu0 %v20979_v3  ;;  %v21037_v62 = vld [vmem:[#allocation8 + $0x1a78] ss:$24 sps:$4 sm:$0xff]  }
 0x741   :  { %17010 = vmatprep.subr.bf16.mxu1 %v20982_v43  ;;  %v21040_v3 = vld [vmem:[#allocation8 + $0x1d78] ss:$24 sps:$4 sm:$0xff]   ;;  %v21045_v43 = vld [vmem:[#allocation8 + $0x1a4c] ss:$24 sps:$4 sm:$0xff]  }
 0x742   :  { %16914 = vmatmul.mubr.bf16.vlgmr.msra.gmra.mxu0 %v23256_v12 }
 0x743   :  { %16957 = vmatmul.mubr.bf16.vlgmr.msra.gmra.mxu1 %v23257_v37  ;;  %16968 = vmatpush1.bf16.msra.mxu0 %v20977_v53  ;;  %v21048_v53 = vld [vmem:[#allocation8 + $0x1d4c] ss:$24 sps:$4 sm:$0xff]  }
 0x744   :  { %16999 = vmatprep.mubr.bf16.mxu0 %v22884_v26  ;;  %17011 = vmatpush1.bf16.msra.mxu1 %v20980_v16  ;;  %v21043_v16 = vld [vmem:[#allocation8 + $0x1a48] ss:$24 sps:$4 sm:$0xff]  }
 0x745   :  { %17042 = vmatprep.mubr.bf16.mxu1 %v22887_v60  ;;  %16969 = vmatprep.subr.bf16.mxu0 %v20985_v36  ;;  %v21046_v36 = vld [vmem:[#allocation8 + $0x1d48] ss:$24 sps:$4 sm:$0xff]  }
 0x746   :  { %17012 = vmatprep.subr.bf16.mxu1 %v20988_v23  ;;  %v21051_v23 = vld [vmem:[#allocation8 + $0x1a1c] ss:$24 sps:$4 sm:$0xff]  }
 0x747   :  { %16970 = vmatpush1.bf16.msra.mxu0 %v20983_v48  ;;  %v21054_v48 = vld [vmem:[#allocation8 + $0x1d1c] ss:$24 sps:$4 sm:$0xff]  }
 0x748   :  { %17013 = vmatpush1.bf16.msra.mxu1 %v20986_v17  ;;  %16971 = vmatprep.subr.bf16.mxu0 %v20991_v19  ;;  %v21049_v17 = vld [vmem:[#allocation8 + $0x1a18] ss:$24 sps:$4 sm:$0xff]  }
 0x749   :  { %17014 = vmatprep.subr.bf16.mxu1 %v20994_v0  ;;  %v21052_v19 = vld [vmem:[#allocation8 + $0x1d18] ss:$24 sps:$4 sm:$0xff]   ;;  %v21057_v0 = vld [vmem:[#allocation8 + $0x19ec] ss:$24 sps:$4 sm:$0xff]  }
 0x74b   :  { %16972 = vmatpush1.bf16.msra.mxu0 %v20989_v13  ;;  %v21060_v13 = vld [vmem:[#allocation8 + $0x1cec] ss:$24 sps:$4 sm:$0xff]  }
 0x74c   :  { %17015 = vmatpush1.bf16.msra.mxu1 %v20992_v54  ;;  %16973 = vmatprep.subr.bf16.mxu0 %v20997_v35  ;;  %v21055_v54 = vld [vmem:[#allocation8 + $0x19e8] ss:$24 sps:$4 sm:$0xff]  }
 0x74d   :  { %17016 = vmatprep.subr.bf16.mxu1 %v21000_v29  ;;  %v21058_v35 = vld [vmem:[#allocation8 + $0x1ce8] ss:$24 sps:$4 sm:$0xff]   ;;  %v21063_v29 = vld [vmem:[#allocation8 + $0x19bc] ss:$24 sps:$4 sm:$0xff]  }
 0x74f   :  { %16974 = vmatpush1.bf16.msra.mxu0 %v20995_v32  ;;  %v21066_v32 = vld [vmem:[#allocation8 + $0x1cbc] ss:$24 sps:$4 sm:$0xff]  }
 0x750   :  { %17017 = vmatpush1.bf16.msra.mxu1 %v20998_v20  ;;  %16975 = vmatprep.subr.bf16.mxu0 %v21003_v1  ;;  %v21061_v20 = vld [vmem:[#allocation8 + $0x19b8] ss:$24 sps:$4 sm:$0xff]  }
 0x751   :  { %17018 = vmatprep.subr.bf16.mxu1 %v21006_v10  ;;  %v21064_v1 = vld [vmem:[#allocation8 + $0x1cb8] ss:$24 sps:$4 sm:$0xff]   ;;  %v21069_v10 = vld [vmem:[#allocation8 + $0x198c] ss:$24 sps:$4 sm:$0xff]  }
 0x753   :  { %16976 = vmatpush1.bf16.msra.mxu0 %v21001_v61  ;;  %v21072_v61 = vld [vmem:[#allocation8 + $0x1c8c] ss:$24 sps:$4 sm:$0xff]  }
 0x754   :  { %17019 = vmatpush1.bf16.msra.mxu1 %v21004_v4  ;;  %16977 = vmatprep.subr.bf16.mxu0 %v21009_v34  ;;  %v21067_v4 = vld [vmem:[#allocation8 + $0x1988] ss:$24 sps:$4 sm:$0xff]  }
 0x755   :  { %17020 = vmatprep.subr.bf16.mxu1 %v21012_v7  ;;  %v21070_v34 = vld [vmem:[#allocation8 + $0x1c88] ss:$24 sps:$4 sm:$0xff]   ;;  %v21075_v7 = vld [vmem:[#allocation8 + $0x1f5c] ss:$24 sps:$4 sm:$0xff]  }
 0x757   :  { %16978 = vmatpush1.bf16.msra.mxu0 %v21007_v6  ;;  %v21078_v6 = vld [vmem:[#allocation8 + $0x225c] ss:$24 sps:$4 sm:$0xff]  }
 0x758   :  { %17021 = vmatpush1.bf16.msra.mxu1 %v21010_v30  ;;  %16979 = vmatprep.subr.bf16.mxu0 %v21015_v9  ;;  %v21073_v30 = vld [vmem:[#allocation8 + $0x1f58] ss:$24 sps:$4 sm:$0xff]  }
 0x759   :  { %17022 = vmatprep.subr.bf16.mxu1 %v21018_v21  ;;  %v21076_v9 = vld [vmem:[#allocation8 + $0x2258] ss:$24 sps:$4 sm:$0xff]   ;;  %v21081_v21 = vld [vmem:[#allocation8 + $0x1f2c] ss:$24 sps:$4 sm:$0xff]  }
 0x75b   :  { %16980 = vmatpush1.bf16.msra.mxu0 %v21013_v57  ;;  %v21084_v57 = vld [vmem:[#allocation8 + $0x222c] ss:$24 sps:$4 sm:$0xff]  }
 0x75c   :  { %17023 = vmatpush1.bf16.msra.mxu1 %v21016_v46  ;;  %16981 = vmatprep.subr.bf16.mxu0 %v21021_v42  ;;  %v21079_v46 = vld [vmem:[#allocation8 + $0x1f28] ss:$24 sps:$4 sm:$0xff]  }
 0x75d   :  { %17024 = vmatprep.subr.bf16.mxu1 %v21024_v49  ;;  %v21082_v42 = vld [vmem:[#allocation8 + $0x2228] ss:$24 sps:$4 sm:$0xff]   ;;  %v21087_v49 = vld [vmem:[#allocation8 + $0x1efc] ss:$24 sps:$4 sm:$0xff]  }
 0x75f   :  { %16982 = vmatpush1.bf16.msra.mxu0 %v21019_v40  ;;  %v21090_v40 = vld [vmem:[#allocation8 + $0x21fc] ss:$24 sps:$4 sm:$0xff]  }
 0x760   :  { %17025 = vmatpush1.bf16.msra.mxu1 %v21022_v39  ;;  %16983 = vmatprep.subr.bf16.mxu0 %v21027_v63  ;;  %v21085_v39 = vld [vmem:[#allocation8 + $0x1ef8] ss:$24 sps:$4 sm:$0xff]  }
 0x761   :  { %17026 = vmatprep.subr.bf16.mxu1 %v21030_v47  ;;  %v21088_v63 = vld [vmem:[#allocation8 + $0x21f8] ss:$24 sps:$4 sm:$0xff]   ;;  %v21093_v47 = vld [vmem:[#allocation8 + $0x1ecc] ss:$24 sps:$4 sm:$0xff]  }
 0x763   :  { %16984 = vmatpush2.bf16.msra.mxu0 %v21025_v2  ;;  %v21096_v2 = vld [vmem:[#allocation8 + $0x21cc] ss:$24 sps:$4 sm:$0xff]  }
 0x764   :  { %17027 = vmatpush2.bf16.msra.mxu1 %v21028_v8  ;;  %16985 = vmatprep.subr.bf16.mxu0 %v21033_v38  ;;  %v21091_v8 = vld [vmem:[#allocation8 + $0x1ec8] ss:$24 sps:$4 sm:$0xff]  }
 0x765   :  { %17028 = vmatprep.subr.bf16.mxu1 %v21036_v15  ;;  %v21094_v38 = vld [vmem:[#allocation8 + $0x21c8] ss:$24 sps:$4 sm:$0xff]   ;;  %v21099_v15 = vld [vmem:[#allocation8 + $0x1e9c] ss:$24 sps:$4 sm:$0xff]  }
 0x767   :  { %16986 = vmatpush2.bf16.msra.mxu0 %v21031_v44  ;;  %v21102_v44 = vld [vmem:[#allocation8 + $0x219c] ss:$24 sps:$4 sm:$0xff]  }
 0x768   :  { %17029 = vmatpush2.bf16.msra.mxu1 %v21034_v58  ;;  %16987 = vmatprep.subr.bf16.mxu0 %v21039_v55  ;;  %v21097_v58 = vld [vmem:[#allocation8 + $0x1e98] ss:$24 sps:$4 sm:$0xff]  }
 0x769   :  { %17030 = vmatprep.subr.bf16.mxu1 %v21042_v56  ;;  %v21100_v55 = vld [vmem:[#allocation8 + $0x2198] ss:$24 sps:$4 sm:$0xff]   ;;  %v21105_v56 = vld [vmem:[#allocation8 + $0x1e6c] ss:$24 sps:$4 sm:$0xff]  }
 0x76b   :  { %16988 = vmatpush2.bf16.msra.mxu0 %v21037_v62  ;;  %v21108_v62 = vld [vmem:[#allocation8 + $0x216c] ss:$24 sps:$4 sm:$0xff]  }
 0x76c   :  { %17031 = vmatpush2.bf16.msra.mxu1 %v21040_v3  ;;  %16989 = vmatprep.subr.bf16.mxu0 %v21045_v43  ;;  %v21103_v3 = vld [vmem:[#allocation8 + $0x1e68] ss:$24 sps:$4 sm:$0xff]  }
 0x76d   :  { %17032 = vmatprep.subr.bf16.mxu1 %v21048_v53  ;;  %v21106_v43 = vld [vmem:[#allocation8 + $0x2168] ss:$24 sps:$4 sm:$0xff]   ;;  %v21111_v53 = vld [vmem:[#allocation8 + $0x1e3c] ss:$24 sps:$4 sm:$0xff]  }
 0x76f   :  { %16990 = vmatpush2.bf16.msra.mxu0 %v21043_v16  ;;  %v21114_v16 = vld [vmem:[#allocation8 + $0x213c] ss:$24 sps:$4 sm:$0xff]  }
 0x770   :  { %17033 = vmatpush2.bf16.msra.mxu1 %v21046_v36  ;;  %16991 = vmatprep.subr.bf16.mxu0 %v21051_v23  ;;  %v21109_v36 = vld [vmem:[#allocation8 + $0x1e38] ss:$24 sps:$4 sm:$0xff]  }
 0x771   :  { %17034 = vmatprep.subr.bf16.mxu1 %v21054_v48  ;;  %v21112_v23 = vld [vmem:[#allocation8 + $0x2138] ss:$24 sps:$4 sm:$0xff]   ;;  %v21117_v48 = vld [vmem:[#allocation8 + $0x1e0c] ss:$24 sps:$4 sm:$0xff]  }
 0x773   :  { %16992 = vmatpush2.bf16.msra.mxu0 %v21049_v17  ;;  %v21120_v17 = vld [vmem:[#allocation8 + $0x210c] ss:$24 sps:$4 sm:$0xff]  }
 0x774   :  { %17035 = vmatpush2.bf16.msra.mxu1 %v21052_v19  ;;  %16993 = vmatprep.subr.bf16.mxu0 %v21057_v0  ;;  %v21115_v19 = vld [vmem:[#allocation8 + $0x1e08] ss:$24 sps:$4 sm:$0xff]  }
 0x775   :  { %17036 = vmatprep.subr.bf16.mxu1 %v21060_v13  ;;  %v21118_v0 = vld [vmem:[#allocation8 + $0x2108] ss:$24 sps:$4 sm:$0xff]   ;;  %v21123_v13 = vld [vmem:[#allocation8 + $0x20dc] ss:$24 sps:$4 sm:$0xff]  }
 0x777   :  { %16994 = vmatpush2.bf16.msra.mxu0 %v21055_v54  ;;  %v21126_v54 = vld [vmem:[#allocation8 + $0x23dc] ss:$24 sps:$4 sm:$0xff]  }
 0x778   :  { %17037 = vmatpush2.bf16.msra.mxu1 %v21058_v35  ;;  %16995 = vmatprep.subr.bf16.mxu0 %v21063_v29  ;;  %v21121_v35 = vld [vmem:[#allocation8 + $0x20d8] ss:$24 sps:$4 sm:$0xff]  }
 0x779   :  { %17038 = vmatprep.subr.bf16.mxu1 %v21066_v32  ;;  %v21124_v29 = vld [vmem:[#allocation8 + $0x23d8] ss:$24 sps:$4 sm:$0xff]   ;;  %v21129_v32 = vld [vmem:[#allocation8 + $0x20ac] ss:$24 sps:$4 sm:$0xff]  }
 0x77b   :  { %16996 = vmatpush2.bf16.msra.mxu0 %v21061_v20  ;;  %v21132_v20 = vld [vmem:[#allocation8 + $0x23ac] ss:$24 sps:$4 sm:$0xff]  }
 0x77c   :  { %17039 = vmatpush2.bf16.msra.mxu1 %v21064_v1  ;;  %16997 = vmatprep.subr.bf16.mxu0 %v21069_v10  ;;  %v21127_v1 = vld [vmem:[#allocation8 + $0x20a8] ss:$24 sps:$4 sm:$0xff]  }
 0x77d   :  { %17040 = vmatprep.subr.bf16.mxu1 %v21072_v61  ;;  %v21130_v10 = vld [vmem:[#allocation8 + $0x23a8] ss:$24 sps:$4 sm:$0xff]   ;;  %v21135_v61 = vld [vmem:[#allocation8 + $0x207c] ss:$24 sps:$4 sm:$0xff]  }
 0x77f   :  { %16998 = vmatpush2.bf16.msra.mxu0 %v21067_v4  ;;  %v21138_v4 = vld [vmem:[#allocation8 + $0x237c] ss:$24 sps:$4 sm:$0xff]  }
 0x780   :  { %17041 = vmatpush2.bf16.msra.mxu1 %v21070_v34  ;;  %17053 = vmatprep.subr.bf16.mxu0 %v21075_v7  ;;  %v21133_v34 = vld [vmem:[#allocation8 + $0x2078] ss:$24 sps:$4 sm:$0xff]  }
 0x781   :  { %17096 = vmatprep.subr.bf16.mxu1 %v21078_v6  ;;  %v21136_v7 = vld [vmem:[#allocation8 + $0x2378] ss:$24 sps:$4 sm:$0xff]   ;;  %v21141_v6 = vld [vmem:[#allocation8 + $0x204c] ss:$24 sps:$4 sm:$0xff]  }
 0x782   :  { %17000 = vmatmul.mubr.bf16.vlgmr.msra.gmra.mxu0 %v22564_v52 }
 0x783   :  { %17043 = vmatmul.mubr.bf16.vlgmr.msra.gmra.mxu1 %v22651_v25  ;;  %17054 = vmatpush1.bf16.msra.mxu0 %v21073_v30  ;;  %v21144_v30 = vld [vmem:[#allocation8 + $0x234c] ss:$24 sps:$4 sm:$0xff]  }
 0x784   :  { %17085 = vmatprep.mubr.bf16.mxu0 %v22932_v50  ;;  %17097 = vmatpush1.bf16.msra.mxu1 %v21076_v9  ;;  %v21139_v9 = vld [vmem:[#allocation8 + $0x2048] ss:$24 sps:$4 sm:$0xff]  }
 0x785   :  { %17128 = vmatprep.mubr.bf16.mxu1 %v22935_v33  ;;  %17055 = vmatprep.subr.bf16.mxu0 %v21081_v21  ;;  %v21142_v21 = vld [vmem:[#allocation8 + $0x2348] ss:$24 sps:$4 sm:$0xff]  }
 0x786   :  { %17098 = vmatprep.subr.bf16.mxu1 %v21084_v57  ;;  %v21147_v57 = vld [vmem:[#allocation8 + $0x201c] ss:$24 sps:$4 sm:$0xff]  }
 0x787   :  { %17056 = vmatpush1.bf16.msra.mxu0 %v21079_v46  ;;  %v21150_v46 = vld [vmem:[#allocation8 + $0x231c] ss:$24 sps:$4 sm:$0xff]  }
 0x788   :  { %17099 = vmatpush1.bf16.msra.mxu1 %v21082_v42  ;;  %17057 = vmatprep.subr.bf16.mxu0 %v21087_v49  ;;  %v21145_v42 = vld [vmem:[#allocation8 + $0x2018] ss:$24 sps:$4 sm:$0xff]  }
 0x789   :  { %17100 = vmatprep.subr.bf16.mxu1 %v21090_v40  ;;  %v21148_v49 = vld [vmem:[#allocation8 + $0x2318] ss:$24 sps:$4 sm:$0xff]   ;;  %v21153_v40 = vld [vmem:[#allocation8 + $0x1fec] ss:$24 sps:$4 sm:$0xff]  }
 0x78b   :  { %17058 = vmatpush1.bf16.msra.mxu0 %v21085_v39  ;;  %v21156_v39 = vld [vmem:[#allocation8 + $0x22ec] ss:$24 sps:$4 sm:$0xff]  }
 0x78c   :  { %17101 = vmatpush1.bf16.msra.mxu1 %v21088_v63  ;;  %17059 = vmatprep.subr.bf16.mxu0 %v21093_v47  ;;  %v21151_v63 = vld [vmem:[#allocation8 + $0x1fe8] ss:$24 sps:$4 sm:$0xff]  }
 0x78d   :  { %17102 = vmatprep.subr.bf16.mxu1 %v21096_v2  ;;  %v21154_v47 = vld [vmem:[#allocation8 + $0x22e8] ss:$24 sps:$4 sm:$0xff]   ;;  %v21159_v2 = vld [vmem:[#allocation8 + $0x1fbc] ss:$24 sps:$4 sm:$0xff]  }
 0x78f   :  { %17060 = vmatpush1.bf16.msra.mxu0 %v21091_v8  ;;  %v21162_v8 = vld [vmem:[#allocation8 + $0x22bc] ss:$24 sps:$4 sm:$0xff]  }
 0x790   :  { %17103 = vmatpush1.bf16.msra.mxu1 %v21094_v38  ;;  %17061 = vmatprep.subr.bf16.mxu0 %v21099_v15  ;;  %v21157_v38 = vld [vmem:[#allocation8 + $0x1fb8] ss:$24 sps:$4 sm:$0xff]  }
 0x791   :  { %17104 = vmatprep.subr.bf16.mxu1 %v21102_v44  ;;  %v21160_v15 = vld [vmem:[#allocation8 + $0x22b8] ss:$24 sps:$4 sm:$0xff]   ;;  %v21165_v44 = vld [vmem:[#allocation8 + $0x1f8c] ss:$24 sps:$4 sm:$0xff]  }
 0x793   :  { %17062 = vmatpush1.bf16.msra.mxu0 %v21097_v58  ;;  %v21168_v58 = vld [vmem:[#allocation8 + $0x228c] ss:$24 sps:$4 sm:$0xff]  }
 0x794   :  { %17105 = vmatpush1.bf16.msra.mxu1 %v21100_v55  ;;  %17063 = vmatprep.subr.bf16.mxu0 %v21105_v56  ;;  %v21163_v55 = vld [vmem:[#allocation8 + $0x1f88] ss:$24 sps:$4 sm:$0xff]  }
 0x795   :  { %17106 = vmatprep.subr.bf16.mxu1 %v21108_v62  ;;  %v21166_v56 = vld [vmem:[#allocation8 + $0x2288] ss:$24 sps:$4 sm:$0xff]   ;;  %v21171_v62 = vld [vmem:[#allocation8 + $0x164] ss:$24 sps:$4 sm:$0xff]  }
 0x797   :  { %17064 = vmatpush1.bf16.msra.mxu0 %v21103_v3  ;;  %v21174_v3 = vld [vmem:[#allocation8 + $0x464] ss:$24 sps:$4 sm:$0xff]  }
 0x798   :  { %17107 = vmatpush1.bf16.msra.mxu1 %v21106_v43  ;;  %17065 = vmatprep.subr.bf16.mxu0 %v21111_v53  ;;  %v21169_v43 = vld [vmem:[#allocation8 + $0x160] ss:$24 sps:$4 sm:$0xff]  }
 0x799   :  { %17108 = vmatprep.subr.bf16.mxu1 %v21114_v16  ;;  %v21172_v53 = vld [vmem:[#allocation8 + $0x460] ss:$24 sps:$4 sm:$0xff]   ;;  %v21177_v16 = vld [vmem:[#allocation8 + $0x134] ss:$24 sps:$4 sm:$0xff]  }
 0x79b   :  { %17066 = vmatpush1.bf16.msra.mxu0 %v21109_v36  ;;  %v21180_v36 = vld [vmem:[#allocation8 + $0x434] ss:$24 sps:$4 sm:$0xff]  }
 0x79c   :  { %17109 = vmatpush1.bf16.msra.mxu1 %v21112_v23  ;;  %17067 = vmatprep.subr.bf16.mxu0 %v21117_v48  ;;  %v21175_v23 = vld [vmem:[#allocation8 + $0x130] ss:$24 sps:$4 sm:$0xff]  }
 0x79d   :  { %17110 = vmatprep.subr.bf16.mxu1 %v21120_v17  ;;  %v21178_v48 = vld [vmem:[#allocation8 + $0x430] ss:$24 sps:$4 sm:$0xff]   ;;  %v21183_v17 = vld [vmem:[#allocation8 + $0x104] ss:$24 sps:$4 sm:$0xff]  }
 0x79f   :  { %17068 = vmatpush1.bf16.msra.mxu0 %v21115_v19  ;;  %v21186_v19 = vld [vmem:[#allocation8 + $0x404] ss:$24 sps:$4 sm:$0xff]  }
 0x7a0   :  { %17111 = vmatpush1.bf16.msra.mxu1 %v21118_v0  ;;  %17069 = vmatprep.subr.bf16.mxu0 %v21123_v13  ;;  %v21181_v0 = vld [vmem:[#allocation8 + $0x100] ss:$24 sps:$4 sm:$0xff]  }
 0x7a1   :  { %17112 = vmatprep.subr.bf16.mxu1 %v21126_v54  ;;  %v21184_v13 = vld [vmem:[#allocation8 + $0x400] ss:$24 sps:$4 sm:$0xff]   ;;  %v21189_v54 = vld [vmem:[#allocation8 + $0xd4] ss:$24 sps:$4 sm:$0xff]  }
 0x7a3   :  { %17070 = vmatpush2.bf16.msra.mxu0 %v21121_v35  ;;  %v21192_v35 = vld [vmem:[#allocation8 + $0x3d4] ss:$24 sps:$4 sm:$0xff]  }
 0x7a4   :  { %17113 = vmatpush2.bf16.msra.mxu1 %v21124_v29  ;;  %17071 = vmatprep.subr.bf16.mxu0 %v21129_v32  ;;  %v21187_v29 = vld [vmem:[#allocation8 + $0xd0] ss:$24 sps:$4 sm:$0xff]   ;;  %v21195_v32 = vld [vmem:[#allocation8 + $0xa4] ss:$24 sps:$4 sm:$0xff]  }
 0x7a5   :  { %17114 = vmatprep.subr.bf16.mxu1 %v21132_v20  ;;  %v21198_v20 = vld [vmem:[#allocation8 + $0x3a4] ss:$24 sps:$4 sm:$0xff]  }
 0x7a7   :  { %17072 = vmatpush2.bf16.msra.mxu0 %v21127_v1  ;;  %v21196_v1 = vld [vmem:[#allocation8 + $0x3a0] ss:$24 sps:$4 sm:$0xff]  }
 0x7a8   :  { %17115 = vmatpush2.bf16.msra.mxu1 %v21130_v10  ;;  %17073 = vmatprep.subr.bf16.mxu0 %v21135_v61  ;;  %v21201_v10 = vld [vmem:[#allocation8 + $0x74] ss:$24 sps:$4 sm:$0xff]  }
 0x7a9   :  { %17116 = vmatprep.subr.bf16.mxu1 %v21138_v4  ;;  %v21204_v61 = vld [vmem:[#allocation8 + $0x374] ss:$24 sps:$4 sm:$0xff]   ;;  %v21199_v4 = vld [vmem:[#allocation8 + $0x70] ss:$24 sps:$4 sm:$0xff]  }
 0x7ab   :  { %17074 = vmatpush2.bf16.msra.mxu0 %v21133_v34  ;;  %v21202_v34 = vld [vmem:[#allocation8 + $0x370] ss:$24 sps:$4 sm:$0xff]  }
 0x7ac   :  { %17117 = vmatpush2.bf16.msra.mxu1 %v21136_v7  ;;  %17075 = vmatprep.subr.bf16.mxu0 %v21141_v6  ;;  %v21207_v7 = vld [vmem:[#allocation8 + $0x44] ss:$24 sps:$4 sm:$0xff]  }
 0x7ad   :  { %17118 = vmatprep.subr.bf16.mxu1 %v21144_v30  ;;  %v21210_v6 = vld [vmem:[#allocation8 + $0x344] ss:$24 sps:$4 sm:$0xff]   ;;  %v21205_v30 = vld [vmem:[#allocation8 + $0x40] ss:$24 sps:$4 sm:$0xff]  }
 0x7af   :  { %17076 = vmatpush2.bf16.msra.mxu0 %v21139_v9  ;;  %v21208_v9 = vld [vmem:[#allocation8 + $0x340] ss:$24 sps:$4 sm:$0xff]  }
 0x7b0   :  { %17119 = vmatpush2.bf16.msra.mxu1 %v21142_v21  ;;  %17077 = vmatprep.subr.bf16.mxu0 %v21147_v57  ;;  %v21213_v21 = vld [vmem:[#allocation8 + $0x14] ss:$24 sps:$4 sm:$0xff]  }
 0x7b1   :  { %17120 = vmatprep.subr.bf16.mxu1 %v21150_v46  ;;  %v21216_v57 = vld [vmem:[#allocation8 + $0x314] ss:$24 sps:$4 sm:$0xff]   ;;  %v21211_v46 = vld [vmem:[#allocation8 + $0x10] ss:$24 sps:$4 sm:$0xff]  }
 0x7b3   :  { %17078 = vmatpush2.bf16.msra.mxu0 %v21145_v42  ;;  %v21214_v42 = vld [vmem:[#allocation8 + $0x310] ss:$24 sps:$4 sm:$0xff]  }
 0x7b4   :  { %17121 = vmatpush2.bf16.msra.mxu1 %v21148_v49  ;;  %17079 = vmatprep.subr.bf16.mxu0 %v21153_v40  ;;  %v21219_v49 = vld [vmem:[#allocation8 + $0x2e4] ss:$24 sps:$4 sm:$0xff]  }
 0x7b5   :  { %17122 = vmatprep.subr.bf16.mxu1 %v21156_v39  ;;  %v21222_v40 = vld [vmem:[#allocation8 + $0x5e4] ss:$24 sps:$4 sm:$0xff]   ;;  %v21217_v39 = vld [vmem:[#allocation8 + $0x2e0] ss:$24 sps:$4 sm:$0xff]  }
 0x7b7   :  { %17080 = vmatpush2.bf16.msra.mxu0 %v21151_v63  ;;  %v21220_v63 = vld [vmem:[#allocation8 + $0x5e0] ss:$24 sps:$4 sm:$0xff]  }
 0x7b8   :  { %17123 = vmatpush2.bf16.msra.mxu1 %v21154_v47  ;;  %17081 = vmatprep.subr.bf16.mxu0 %v21159_v2  ;;  %v21225_v47 = vld [vmem:[#allocation8 + $0x2b4] ss:$24 sps:$4 sm:$0xff]  }
 0x7b9   :  { %17124 = vmatprep.subr.bf16.mxu1 %v21162_v8  ;;  %v21228_v2 = vld [vmem:[#allocation8 + $0x5b4] ss:$24 sps:$4 sm:$0xff]   ;;  %v21223_v8 = vld [vmem:[#allocation8 + $0x2b0] ss:$24 sps:$4 sm:$0xff]  }
 0x7bb   :  { %17082 = vmatpush2.bf16.msra.mxu0 %v21157_v38  ;;  %v21226_v38 = vld [vmem:[#allocation8 + $0x5b0] ss:$24 sps:$4 sm:$0xff]  }
 0x7bc   :  { %17125 = vmatpush2.bf16.msra.mxu1 %v21160_v15  ;;  %17083 = vmatprep.subr.bf16.mxu0 %v21165_v44  ;;  %v21231_v15 = vld [vmem:[#allocation8 + $0x284] ss:$24 sps:$4 sm:$0xff]  }
 0x7bd   :  { %17126 = vmatprep.subr.bf16.mxu1 %v21168_v58  ;;  %v21234_v44 = vld [vmem:[#allocation8 + $0x584] ss:$24 sps:$4 sm:$0xff]   ;;  %v21229_v58 = vld [vmem:[#allocation8 + $0x280] ss:$24 sps:$4 sm:$0xff]  }
 0x7bf   :  { %17084 = vmatpush2.bf16.msra.mxu0 %v21163_v55  ;;  %v21232_v55 = vld [vmem:[#allocation8 + $0x580] ss:$24 sps:$4 sm:$0xff]  }
 0x7c0   :  { %17127 = vmatpush2.bf16.msra.mxu1 %v21166_v56  ;;  %17139 = vmatprep.subr.bf16.mxu0 %v21171_v62  ;;  %v21237_v56 = vld [vmem:[#allocation8 + $0x254] ss:$24 sps:$4 sm:$0xff]  }
 0x7c1   :  { %17182 = vmatprep.subr.bf16.mxu1 %v21174_v3  ;;  %v21240_v62 = vld [vmem:[#allocation8 + $0x554] ss:$24 sps:$4 sm:$0xff]   ;;  %v21235_v3 = vld [vmem:[#allocation8 + $0x250] ss:$24 sps:$4 sm:$0xff]  }
 0x7c2   :  { %17086 = vmatmul.mubr.bf16.vlgmr.msra.gmra.mxu0 %v22795_v24 }
 0x7c3   :  { %17129 = vmatmul.mubr.bf16.vlgmr.msra.gmra.mxu1 %v22877_v5  ;;  %17140 = vmatpush1.bf16.msra.mxu0 %v21169_v43  ;;  %v21238_v43 = vld [vmem:[#allocation8 + $0x550] ss:$24 sps:$4 sm:$0xff]  }
 0x7c4   :  { %17171 = vmatprep.mubr.bf16.mxu0 %v22580_v59  ;;  %17183 = vmatpush1.bf16.msra.mxu1 %v21172_v53  ;;  %v21190_v59 = vld [vmem:[#allocation8 + $0x3d0] ss:$24 sps:$4 sm:$0xff]   ;;  %v21243_v53 = vld [vmem:[#allocation8 + $0x224] ss:$24 sps:$4 sm:$0xff]  }
 0x7c5   :  { %17214 = vmatprep.mubr.bf16.mxu1 %v22583_v51  ;;  %17141 = vmatprep.subr.bf16.mxu0 %v21177_v16  ;;  %v21193_v51 = vld [vmem:[#allocation8 + $0xa0] ss:$24 sps:$4 sm:$0xff]   ;;  %v21246_v16 = vld [vmem:[#allocation8 + $0x524] ss:$24 sps:$4 sm:$0xff]  }
 0x7c6   :  { %17184 = vmatprep.subr.bf16.mxu1 %v21180_v36  ;;  %v21241_v36 = vld [vmem:[#allocation8 + $0x220] ss:$24 sps:$4 sm:$0xff]  }
 0x7c7   :  { %17142 = vmatpush1.bf16.msra.mxu0 %v21175_v23  ;;  %v21244_v23 = vld [vmem:[#allocation8 + $0x520] ss:$24 sps:$4 sm:$0xff]  }
 0x7c8   :  { %17185 = vmatpush1.bf16.msra.mxu1 %v21178_v48  ;;  %17143 = vmatprep.subr.bf16.mxu0 %v21183_v17  ;;  %v21249_v48 = vld [vmem:[#allocation8 + $0x1f4] ss:$24 sps:$4 sm:$0xff]  }
 0x7c9   :  { %17186 = vmatprep.subr.bf16.mxu1 %v21186_v19  ;;  %v21252_v17 = vld [vmem:[#allocation8 + $0x4f4] ss:$24 sps:$4 sm:$0xff]   ;;  %v21247_v19 = vld [vmem:[#allocation8 + $0x1f0] ss:$24 sps:$4 sm:$0xff]  }
 0x7cb   :  { %17144 = vmatpush1.bf16.msra.mxu0 %v21181_v0  ;;  %v21250_v0 = vld [vmem:[#allocation8 + $0x4f0] ss:$24 sps:$4 sm:$0xff]  }
 0x7cc   :  { %17187 = vmatpush1.bf16.msra.mxu1 %v21184_v13  ;;  %17145 = vmatprep.subr.bf16.mxu0 %v21189_v54  ;;  %v21255_v13 = vld [vmem:[#allocation8 + $0x1c4] ss:$24 sps:$4 sm:$0xff]  }
 0x7cd   :  { %17188 = vmatprep.subr.bf16.mxu1 %v21192_v35  ;;  %v21258_v54 = vld [vmem:[#allocation8 + $0x4c4] ss:$24 sps:$4 sm:$0xff]   ;;  %v21253_v35 = vld [vmem:[#allocation8 + $0x1c0] ss:$24 sps:$4 sm:$0xff]  }
 0x7cf   :  { %17146 = vmatpush1.bf16.msra.mxu0 %v21187_v29  ;;  %v21256_v29 = vld [vmem:[#allocation8 + $0x4c0] ss:$24 sps:$4 sm:$0xff]  }
 0x7d0   :  { %17189 = vmatpush1.bf16.msra.mxu1 %v21190_v59  ;;  %17147 = vmatprep.subr.bf16.mxu0 %v21195_v32  ;;  %v21261_v59 = vld [vmem:[#allocation8 + $0x194] ss:$24 sps:$4 sm:$0xff]  }
 0x7d1   :  { %17190 = vmatprep.subr.bf16.mxu1 %v21198_v20  ;;  %v21264_v32 = vld [vmem:[#allocation8 + $0x494] ss:$24 sps:$4 sm:$0xff]   ;;  %v21259_v20 = vld [vmem:[#allocation8 + $0x190] ss:$24 sps:$4 sm:$0xff]  }
 0x7d3   :  { %17148 = vmatpush1.bf16.msra.mxu0 %v21193_v51  ;;  %v21262_v51 = vld [vmem:[#allocation8 + $0x490] ss:$24 sps:$4 sm:$0xff]  }
 0x7d4   :  { %17191 = vmatpush1.bf16.msra.mxu1 %v21196_v1  ;;  %17149 = vmatprep.subr.bf16.mxu0 %v21201_v10  ;;  %v21267_v1 = vld [vmem:[#allocation8 + $0x764] ss:$24 sps:$4 sm:$0xff]  }
 0x7d5   :  { %17192 = vmatprep.subr.bf16.mxu1 %v21204_v61  ;;  %v21270_v10 = vld [vmem:[#allocation8 + $0xa64] ss:$24 sps:$4 sm:$0xff]   ;;  %v21265_v61 = vld [vmem:[#allocation8 + $0x760] ss:$24 sps:$4 sm:$0xff]  }
 0x7d7   :  { %17150 = vmatpush1.bf16.msra.mxu0 %v21199_v4  ;;  %v21268_v4 = vld [vmem:[#allocation8 + $0xa60] ss:$24 sps:$4 sm:$0xff]  }
 0x7d8   :  { %17193 = vmatpush1.bf16.msra.mxu1 %v21202_v34  ;;  %17151 = vmatprep.subr.bf16.mxu0 %v21207_v7  ;;  %v21273_v34 = vld [vmem:[#allocation8 + $0x734] ss:$24 sps:$4 sm:$0xff]  }
 0x7d9   :  { %17194 = vmatprep.subr.bf16.mxu1 %v21210_v6  ;;  %v21276_v7 = vld [vmem:[#allocation8 + $0xa34] ss:$24 sps:$4 sm:$0xff]   ;;  %v21271_v6 = vld [vmem:[#allocation8 + $0x730] ss:$24 sps:$4 sm:$0xff]  }
 0x7db   :  { %17152 = vmatpush1.bf16.msra.mxu0 %v21205_v30  ;;  %v21274_v30 = vld [vmem:[#allocation8 + $0xa30] ss:$24 sps:$4 sm:$0xff]  }
 0x7dc   :  { %17195 = vmatpush1.bf16.msra.mxu1 %v21208_v9  ;;  %17153 = vmatprep.subr.bf16.mxu0 %v21213_v21  ;;  %v21279_v9 = vld [vmem:[#allocation8 + $0x704] ss:$24 sps:$4 sm:$0xff]  }
 0x7dd   :  { %17196 = vmatprep.subr.bf16.mxu1 %v21216_v57  ;;  %v21282_v21 = vld [vmem:[#allocation8 + $0xa04] ss:$24 sps:$4 sm:$0xff]   ;;  %v21277_v57 = vld [vmem:[#allocation8 + $0x700] ss:$24 sps:$4 sm:$0xff]  }
 0x7df   :  { %17154 = vmatpush1.bf16.msra.mxu0 %v21211_v46  ;;  %v21285_v46 = vld [vmem:[#allocation8 + $0x6d4] ss:$24 sps:$4 sm:$0xff]  }
 0x7e0   :  { %17197 = vmatpush1.bf16.msra.mxu1 %v21214_v42  ;;  %17155 = vmatprep.subr.bf16.mxu0 %v21219_v49  ;;  %v21283_v42 = vld [vmem:[#allocation8 + $0x6d0] ss:$24 sps:$4 sm:$0xff]   ;;  %v21291_v49 = vld [vmem:[#allocation8 + $0x6a4] ss:$24 sps:$4 sm:$0xff]  }
 0x7e1   :  { %17198 = vmatprep.subr.bf16.mxu1 %v21222_v40  ;;  %v21294_v40 = vld [vmem:[#allocation8 + $0x9a4] ss:$24 sps:$4 sm:$0xff]  }
 0x7e3   :  { %17156 = vmatpush2.bf16.msra.mxu0 %v21217_v39  ;;  %v21292_v39 = vld [vmem:[#allocation8 + $0x9a0] ss:$24 sps:$4 sm:$0xff]  }
 0x7e4   :  { %17199 = vmatpush2.bf16.msra.mxu1 %v21220_v63  ;;  %17157 = vmatprep.subr.bf16.mxu0 %v21225_v47  ;;  %v21297_v63 = vld [vmem:[#allocation8 + $0x674] ss:$24 sps:$4 sm:$0xff]  }
 0x7e5   :  { %17200 = vmatprep.subr.bf16.mxu1 %v21228_v2  ;;  %v21300_v47 = vld [vmem:[#allocation8 + $0x974] ss:$24 sps:$4 sm:$0xff]   ;;  %v21295_v2 = vld [vmem:[#allocation8 + $0x670] ss:$24 sps:$4 sm:$0xff]  }
 0x7e7   :  { %17158 = vmatpush2.bf16.msra.mxu0 %v21223_v8  ;;  %v21298_v8 = vld [vmem:[#allocation8 + $0x970] ss:$24 sps:$4 sm:$0xff]  }
 0x7e8   :  { %17201 = vmatpush2.bf16.msra.mxu1 %v21226_v38  ;;  %17159 = vmatprep.subr.bf16.mxu0 %v21231_v15  ;;  %v21303_v38 = vld [vmem:[#allocation8 + $0x644] ss:$24 sps:$4 sm:$0xff]  }
 0x7e9   :  { %17202 = vmatprep.subr.bf16.mxu1 %v21234_v44  ;;  %v21306_v15 = vld [vmem:[#allocation8 + $0x944] ss:$24 sps:$4 sm:$0xff]   ;;  %v21301_v44 = vld [vmem:[#allocation8 + $0x640] ss:$24 sps:$4 sm:$0xff]  }
 0x7eb   :  { %17160 = vmatpush2.bf16.msra.mxu0 %v21229_v58  ;;  %v21304_v58 = vld [vmem:[#allocation8 + $0x940] ss:$24 sps:$4 sm:$0xff]  }
 0x7ec   :  { %17203 = vmatpush2.bf16.msra.mxu1 %v21232_v55  ;;  %17161 = vmatprep.subr.bf16.mxu0 %v21237_v56  ;;  %v21309_v55 = vld [vmem:[#allocation8 + $0x614] ss:$24 sps:$4 sm:$0xff]  }
 0x7ed   :  { %17204 = vmatprep.subr.bf16.mxu1 %v21240_v62  ;;  %v21312_v56 = vld [vmem:[#allocation8 + $0x914] ss:$24 sps:$4 sm:$0xff]   ;;  %v21307_v62 = vld [vmem:[#allocation8 + $0x610] ss:$24 sps:$4 sm:$0xff]  }
 0x7ef   :  { %17162 = vmatpush2.bf16.msra.mxu0 %v21235_v3  ;;  %v21310_v3 = vld [vmem:[#allocation8 + $0x910] ss:$24 sps:$4 sm:$0xff]  }
 0x7f0   :  { %17205 = vmatpush2.bf16.msra.mxu1 %v21238_v43  ;;  %17163 = vmatprep.subr.bf16.mxu0 %v21243_v53  ;;  %v21315_v43 = vld [vmem:[#allocation8 + $0x8e4] ss:$24 sps:$4 sm:$0xff]  }
 0x7f1   :  { %17206 = vmatprep.subr.bf16.mxu1 %v21246_v16  ;;  %v21318_v53 = vld [vmem:[#allocation8 + $0xbe4] ss:$24 sps:$4 sm:$0xff]   ;;  %v21313_v16 = vld [vmem:[#allocation8 + $0x8e0] ss:$24 sps:$4 sm:$0xff]  }
 0x7f3   :  { %17164 = vmatpush2.bf16.msra.mxu0 %v21241_v36  ;;  %v21316_v36 = vld [vmem:[#allocation8 + $0xbe0] ss:$24 sps:$4 sm:$0xff]  }
 0x7f4   :  { %17207 = vmatpush2.bf16.msra.mxu1 %v21244_v23  ;;  %17165 = vmatprep.subr.bf16.mxu0 %v21249_v48  ;;  %v21321_v23 = vld [vmem:[#allocation8 + $0x8b4] ss:$24 sps:$4 sm:$0xff]  }
 0x7f5   :  { %17208 = vmatprep.subr.bf16.mxu1 %v21252_v17  ;;  %v21324_v48 = vld [vmem:[#allocation8 + $0xbb4] ss:$24 sps:$4 sm:$0xff]   ;;  %v21319_v17 = vld [vmem:[#allocation8 + $0x8b0] ss:$24 sps:$4 sm:$0xff]  }
 0x7f7   :  { %17166 = vmatpush2.bf16.msra.mxu0 %v21247_v19  ;;  %v21322_v19 = vld [vmem:[#allocation8 + $0xbb0] ss:$24 sps:$4 sm:$0xff]  }
 0x7f8   :  { %17209 = vmatpush2.bf16.msra.mxu1 %v21250_v0  ;;  %17167 = vmatprep.subr.bf16.mxu0 %v21255_v13  ;;  %v21327_v0 = vld [vmem:[#allocation8 + $0x884] ss:$24 sps:$4 sm:$0xff]  }
 0x7f9   :  { %17210 = vmatprep.subr.bf16.mxu1 %v21258_v54  ;;  %v21330_v13 = vld [vmem:[#allocation8 + $0xb84] ss:$24 sps:$4 sm:$0xff]   ;;  %v21325_v54 = vld [vmem:[#allocation8 + $0x880] ss:$24 sps:$4 sm:$0xff]  }
 0x7fb   :  { %17168 = vmatpush2.bf16.msra.mxu0 %v21253_v35  ;;  %v21328_v35 = vld [vmem:[#allocation8 + $0xb80] ss:$24 sps:$4 sm:$0xff]  }
 0x7fc   :  { %17211 = vmatpush2.bf16.msra.mxu1 %v21256_v29  ;;  %17169 = vmatprep.subr.bf16.mxu0 %v21261_v59  ;;  %v21333_v29 = vld [vmem:[#allocation8 + $0x854] ss:$24 sps:$4 sm:$0xff]  }
 0x7fd   :  { %17212 = vmatprep.subr.bf16.mxu1 %v21264_v32  ;;  %v21336_v59 = vld [vmem:[#allocation8 + $0xb54] ss:$24 sps:$4 sm:$0xff]   ;;  %v21331_v32 = vld [vmem:[#allocation8 + $0x850] ss:$24 sps:$4 sm:$0xff]  }
 0x7ff   :  { %17170 = vmatpush2.bf16.msra.mxu0 %v21259_v20  ;;  %v21334_v20 = vld [vmem:[#allocation8 + $0xb50] ss:$24 sps:$4 sm:$0xff]  }
 0x800   :  { %17213 = vmatpush2.bf16.msra.mxu1 %v21262_v51  ;;  %17225 = vmatprep.subr.bf16.mxu0 %v21267_v1  ;;  %v21339_v51 = vld [vmem:[#allocation8 + $0x824] ss:$24 sps:$4 sm:$0xff]  }
 0x801   :  { %17268 = vmatprep.subr.bf16.mxu1 %v21270_v10  ;;  %v21342_v1 = vld [vmem:[#allocation8 + $0xb24] ss:$24 sps:$4 sm:$0xff]   ;;  %v21337_v10 = vld [vmem:[#allocation8 + $0x820] ss:$24 sps:$4 sm:$0xff]  }
 0x802   :  { %17172 = vmatmul.mubr.bf16.vlgmr.msra.gmra.mxu0 %v22143_v22  ;;  %v21280_v22 = vld [vmem:[#allocation8 + $0xa00] ss:$24 sps:$4 sm:$0xff]  }
 0x803   :  { %17215 = vmatmul.mubr.bf16.vlgmr.msra.gmra.mxu1 %v22186_v18  ;;  %17226 = vmatpush1.bf16.msra.mxu0 %v21265_v61  ;;  %v21288_v18 = vld [vmem:[#allocation8 + $0x9d4] ss:$24 sps:$4 sm:$0xff]   ;;  %v21340_v61 = vld [vmem:[#allocation8 + $0xb20] ss:$24 sps:$4 sm:$0xff]  }
 0x804   :  { %17257 = vmatprep.mubr.bf16.mxu0 %v22666_v45  ;;  %17269 = vmatpush1.bf16.msra.mxu1 %v21268_v4  ;;  %v21286_v45 = vld [vmem:[#allocation8 + $0x9d0] ss:$24 sps:$4 sm:$0xff]   ;;  %v21345_v4 = vld [vmem:[#allocation8 + $0x7f4] ss:$24 sps:$4 sm:$0xff]  }
 0x805   :  { %17300 = vmatprep.mubr.bf16.mxu1 %v22669_v27  ;;  %17227 = vmatprep.subr.bf16.mxu0 %v21273_v34  ;;  %v21289_v27 = vld [vmem:[#allocation8 + $0x6a0] ss:$24 sps:$4 sm:$0xff]   ;;  %v21348_v34 = vld [vmem:[#allocation8 + $0xaf4] ss:$24 sps:$4 sm:$0xff]  }
 0x806   :  { %17270 = vmatprep.subr.bf16.mxu1 %v21276_v7  ;;  %v21343_v7 = vld [vmem:[#allocation8 + $0x7f0] ss:$24 sps:$4 sm:$0xff]  }
 0x807   :  { %17228 = vmatpush1.bf16.msra.mxu0 %v21271_v6  ;;  %v21346_v6 = vld [vmem:[#allocation8 + $0xaf0] ss:$24 sps:$4 sm:$0xff]  }
 0x808   :  { %17271 = vmatpush1.bf16.msra.mxu1 %v21274_v30  ;;  %17229 = vmatprep.subr.bf16.mxu0 %v21279_v9  ;;  %v21351_v30 = vld [vmem:[#allocation8 + $0x7c4] ss:$24 sps:$4 sm:$0xff]  }
 0x809   :  { %17272 = vmatprep.subr.bf16.mxu1 %v21282_v21  ;;  %v21354_v9 = vld [vmem:[#allocation8 + $0xac4] ss:$24 sps:$4 sm:$0xff]   ;;  %v21349_v21 = vld [vmem:[#allocation8 + $0x7c0] ss:$24 sps:$4 sm:$0xff]  }
 0x80b   :  { %17230 = vmatpush1.bf16.msra.mxu0 %v21277_v57  ;;  %v21352_v57 = vld [vmem:[#allocation8 + $0xac0] ss:$24 sps:$4 sm:$0xff]  }
 0x80c   :  { %17273 = vmatpush1.bf16.msra.mxu1 %v21280_v22  ;;  %17231 = vmatprep.subr.bf16.mxu0 %v21285_v46  ;;  %v21357_v22 = vld [vmem:[#allocation8 + $0x794] ss:$24 sps:$4 sm:$0xff]  }
 0x80d   :  { %17274 = vmatprep.subr.bf16.mxu1 %v21288_v18  ;;  %v21360_v46 = vld [vmem:[#allocation8 + $0xa94] ss:$24 sps:$4 sm:$0xff]   ;;  %v21355_v18 = vld [vmem:[#allocation8 + $0x790] ss:$24 sps:$4 sm:$0xff]  }
 0x80f   :  { %17232 = vmatpush1.bf16.msra.mxu0 %v21283_v42  ;;  %v23054_v42 = vpop.f32.mrf.mxu0 }
 0x810   :  { %17275 = vmatpush1.bf16.msra.mxu1 %v21286_v45  ;;  %17233 = vmatprep.subr.bf16.mxu0 %v21291_v49  ;;  %v21358_v45 = vld [vmem:[#allocation8 + $0xa90] ss:$24 sps:$4 sm:$0xff]   ;;  %v21363_v49 = vld [vmem:[#allocation8 + $0xd64] ss:$24 sps:$4 sm:$0xff]  }
 0x811   :  { %17276 = vmatprep.subr.bf16.mxu1 %v21294_v40  ;;  %v23056_v40 = vpop.f32.mrf.mxu1 }
 0x813   :  { %17234 = vmatpush1.bf16.msra.mxu0 %v21289_v27  ;;  %v21366_v27 = vld [vmem:[#allocation8 + $0x1064] ss:$24 sps:$4 sm:$0xff]  }
 0x814   :  { %17277 = vmatpush1.bf16.msra.mxu1 %v21292_v39  ;;  %17235 = vmatprep.subr.bf16.mxu0 %v21297_v63  ;;  %v21361_v39 = vld [vmem:[#allocation8 + $0xd60] ss:$24 sps:$4 sm:$0xff]   ;;  %v23058_v63 = vpop.f32.mrf.mxu0 }
 0x815   :  { %17278 = vmatprep.subr.bf16.mxu1 %v21300_v47  ;;  %v21364_v47 = vld [vmem:[#allocation8 + $0x1060] ss:$24 sps:$4 sm:$0xff]  }
 0x817   :  { %17236 = vmatpush1.bf16.msra.mxu0 %v21295_v2  ;;  %v23060_v2 = vpop.f32.mrf.mxu1 }
 0x818   :  { %17279 = vmatpush1.bf16.msra.mxu1 %v21298_v8  ;;  %17237 = vmatprep.subr.bf16.mxu0 %v21303_v38  ;;  %v21369_v8 = vld [vmem:[#allocation8 + $0xd34] ss:$24 sps:$4 sm:$0xff]  }
 0x819   :  { %17280 = vmatprep.subr.bf16.mxu1 %v21306_v15  ;;  %v21372_v38 = vld [vmem:[#allocation8 + $0x1034] ss:$24 sps:$4 sm:$0xff]  }
 0x81a   :  { %v23259_v15 = vld [vmem:[#allocation21_spill] sm:$0xff] }
 0x81b   :  { %17238 = vmatpush1.bf16.msra.mxu0 %v21301_v44  ;;  %v21367_v44 = vld [vmem:[#allocation8 + $0xd30] ss:$24 sps:$4 sm:$0xff]  }
 0x81c   :  { %17281 = vmatpush1.bf16.msra.mxu1 %v21304_v58  ;;  %17239 = vmatprep.subr.bf16.mxu0 %v21309_v55  ;;  %v23064_v58 = vpop.f32.mrf.mxu0  ;;  %v23260_v55 = vld [vmem:[#allocation24_spill] sm:$0xff] }
 0x81d   :  { %17282 = vmatprep.subr.bf16.mxu1 %v21312_v56  ;;  %v21370_v56 = vld [vmem:[#allocation8 + $0x1030] ss:$24 sps:$4 sm:$0xff]  }
 0x81f   :  { %17240 = vmatpush1.bf16.msra.mxu0 %v21307_v62  ;;  %v21375_v62 = vld [vmem:[#allocation8 + $0xd04] ss:$24 sps:$4 sm:$0xff]  }
 0x820   :  { %17283 = vmatpush1.bf16.msra.mxu1 %v21310_v3  ;;  %17241 = vmatprep.subr.bf16.mxu0 %v21315_v43  ;;  %v23067_v3 = vpop.f32.mrf.mxu1  ;;  %v23261_v43 = vld [vmem:[#allocation30_spill] sm:$0xff] }
 0x821   :  { %17284 = vmatprep.subr.bf16.mxu1 %v21318_v53  ;;  %v21378_v53 = vld [vmem:[#allocation8 + $0x1004] ss:$24 sps:$4 sm:$0xff]  }
 0x823   :  { %17242 = vmatpush2.bf16.msra.mxu0 %v21313_v16  ;;  %v23070_v16 = vpop.f32.mrf.mxu0 }
 0x824   :  { %17285 = vmatpush2.bf16.msra.mxu1 %v21316_v36  ;;  %17243 = vmatprep.subr.bf16.mxu0 %v21321_v23  ;;  %v21376_v36 = vld [vmem:[#allocation8 + $0x1000] ss:$24 sps:$4 sm:$0xff]   ;;  %v21381_v23 = vld [vmem:[#allocation8 + $0xcd4] ss:$24 sps:$4 sm:$0xff]  }
 0x825   :  { %17286 = vmatprep.subr.bf16.mxu1 %v21324_v48  ;;  %v23072_v48 = vpop.f32.mrf.mxu1 }
 0x827   :  { %17244 = vmatpush2.bf16.msra.mxu0 %v21319_v17  ;;  %v21384_v17 = vld [vmem:[#allocation8 + $0xfd4] ss:$24 sps:$4 sm:$0xff]  }
 0x828   :  { %17287 = vmatpush2.bf16.msra.mxu1 %v21322_v19  ;;  %17245 = vmatprep.subr.bf16.mxu0 %v21327_v0  ;;  %v23074_v19 = vpop.f32.mrf.mxu0  ;;  %v23076_v0 = vpop.f32.mrf.mxu1 }
 0x829   :  { %17288 = vmatprep.subr.bf16.mxu1 %v21330_v13  ;;  %v21379_v13 = vld [vmem:[#allocation8 + $0xcd0] ss:$24 sps:$4 sm:$0xff]  }
 0x82b   :  { %17246 = vmatpush2.bf16.msra.mxu0 %v21325_v54  ;;  %v21382_v54 = vld [vmem:[#allocation8 + $0xfd0] ss:$24 sps:$4 sm:$0xff]  }
 0x82c   :  { %17289 = vmatpush2.bf16.msra.mxu1 %v21328_v35  ;;  %17247 = vmatprep.subr.bf16.mxu0 %v21333_v29  ;;  %v21387_v35 = vld [vmem:[#allocation8 + $0xca4] ss:$24 sps:$4 sm:$0xff]  }
 0x82d   :  { %17290 = vmatprep.subr.bf16.mxu1 %v21336_v59  ;;  %v21390_v29 = vld [vmem:[#allocation8 + $0xfa4] ss:$24 sps:$4 sm:$0xff]   ;;  %v23078_v59 = vpop.f32.mrf.mxu0 }
 0x82f   :  { %17248 = vmatpush2.bf16.msra.mxu0 %v21331_v32  ;;  %v23080_v32 = vpop.f32.mrf.mxu1 }
 0x830   :  { %17291 = vmatpush2.bf16.msra.mxu1 %v21334_v20  ;;  %17249 = vmatprep.subr.bf16.mxu0 %v21339_v51  ;;  %v21385_v20 = vld [vmem:[#allocation8 + $0xca0] ss:$24 sps:$4 sm:$0xff]  }
 0x831   :  { %17292 = vmatprep.subr.bf16.mxu1 %v21342_v1  ;;  %v21388_v51 = vld [vmem:[#allocation8 + $0xfa0] ss:$24 sps:$4 sm:$0xff]   ;;  %v21393_v1 = vld [vmem:[#allocation8 + $0xc74] ss:$24 sps:$4 sm:$0xff]  }
 0x833   :  { %17250 = vmatpush2.bf16.msra.mxu0 %v21337_v10  ;;  %v21396_v10 = vld [vmem:[#allocation8 + $0xf74] ss:$24 sps:$4 sm:$0xff]  }
 0x834   :  { %17293 = vmatpush2.bf16.msra.mxu1 %v21340_v61  ;;  %17251 = vmatprep.subr.bf16.mxu0 %v21345_v4  ;;  %v23082_v61 = vpop.f32.mrf.mxu0  ;;  %v23084_v4 = vpop.f32.mrf.mxu1 }
 0x835   :  { %17294 = vmatprep.subr.bf16.mxu1 %v21348_v34  ;;  %v21391_v34 = vld [vmem:[#allocation8 + $0xc70] ss:$24 sps:$4 sm:$0xff]  }
 0x837   :  { %17252 = vmatpush2.bf16.msra.mxu0 %v21343_v7  ;;  %v21394_v7 = vld [vmem:[#allocation8 + $0xf70] ss:$24 sps:$4 sm:$0xff]  }
 0x838   :  { %17295 = vmatpush2.bf16.msra.mxu1 %v21346_v6  ;;  %17253 = vmatprep.subr.bf16.mxu0 %v21351_v30  ;;  %v21399_v6 = vld [vmem:[#allocation8 + $0xc44] ss:$24 sps:$4 sm:$0xff]  }
 0x839   :  { %17296 = vmatprep.subr.bf16.mxu1 %v21354_v9  ;;  %v21402_v30 = vld [vmem:[#allocation8 + $0xf44] ss:$24 sps:$4 sm:$0xff]   ;;  %v23086_v9 = vpop.f32.mrf.mxu0 }
 0x83b   :  { %17254 = vmatpush2.bf16.msra.mxu0 %v21349_v21  ;;  %v23088_v21 = vpop.f32.mrf.mxu1 }
 0x83c   :  { %17297 = vmatpush2.bf16.msra.mxu1 %v21352_v57  ;;  %17255 = vmatprep.subr.bf16.mxu0 %v21357_v22  ;;  %v21397_v57 = vld [vmem:[#allocation8 + $0xc40] ss:$24 sps:$4 sm:$0xff]   ;;  %v23090_v22 = vpop.f32.mrf.mxu0 }
 0x83d   :  { %17298 = vmatprep.subr.bf16.mxu1 %v21360_v46  ;;  %v21400_v46 = vld [vmem:[#allocation8 + $0xf40] ss:$24 sps:$4 sm:$0xff]  }
 0x83f   :  { %17256 = vmatpush2.bf16.msra.mxu0 %v21355_v18  ;;  %v21405_v18 = vld [vmem:[#allocation8 + $0xc14] ss:$24 sps:$4 sm:$0xff]  }
 0x840   :  { %17299 = vmatpush2.bf16.msra.mxu1 %v21358_v45  ;;  %17311 = vmatprep.subr.bf16.mxu0 %v21363_v49  ;;  %v23092_v45 = vpop.f32.mrf.mxu1  ;;  %v21408_v49 = vld [vmem:[#allocation8 + $0xf14] ss:$24 sps:$4 sm:$0xff]  }
 0x841   :  { %17354 = vmatprep.subr.bf16.mxu1 %v21366_v27  ;;  %v21403_v27 = vld [vmem:[#allocation8 + $0xc10] ss:$24 sps:$4 sm:$0xff]  }
 0x842   :  { %17258 = vmatmul.mubr.bf16.vlgmr.msra.gmra.mxu0 %v23233_v31  ;;  %v21373_v31 = vld [vmem:[#allocation8 + $0xd00] ss:$24 sps:$4 sm:$0xff]  }
 0x843   :  { %17301 = vmatmul.mubr.bf16.vlgmr.msra.gmra.mxu1 %v23259_v15  ;;  %17312 = vmatpush1.bf16.msra.mxu0 %v21361_v39  ;;  %v23094_v39 = vpop.f32.mrf.mxu0  ;;  %v21414_v15 = vld [vmem:[#allocation8 + $0x11e4] ss:$24 sps:$4 sm:$0xff]  }
 0x844   :  { %17343 = vmatprep.mubr.bf16.mxu0 %v23260_v55  ;;  %17355 = vmatpush1.bf16.msra.mxu1 %v21364_v47  ;;  %v21406_v47 = vld [vmem:[#allocation8 + $0xf10] ss:$24 sps:$4 sm:$0xff]  }
 0x845   :  { %17386 = vmatprep.mubr.bf16.mxu1 %v23261_v43  ;;  %17313 = vmatprep.subr.bf16.mxu0 %v21369_v8  ;;  %v21411_v8 = vld [vmem:[#allocation8 + $0xee4] ss:$24 sps:$4 sm:$0xff]   ;;  %v23098_v55 = vpop.f32.mrf.mxu0 }
 0x846   :  { %17356 = vmatprep.subr.bf16.mxu1 %v21372_v38  ;;  %v23096_v38 = vpop.f32.mrf.mxu1  ;;  %v21880_v43 = vld [vmem:[#allocation10] sm:$0x3f] }
 0x847   :  { %17314 = vmatpush1.bf16.msra.mxu0 %v21367_v44  ;;  %v21409_v44 = vld [vmem:[#allocation8 + $0xee0] ss:$24 sps:$4 sm:$0xff]  }
 0x848   :  { %17357 = vmatpush1.bf16.msra.mxu1 %v21370_v56  ;;  %17315 = vmatprep.subr.bf16.mxu0 %v21375_v62  ;;  %v21412_v56 = vld [vmem:[#allocation8 + $0x11e0] ss:$24 sps:$4 sm:$0xff]   ;;  %v21417_v62 = vld [vmem:[#allocation8 + $0xeb4] ss:$24 sps:$4 sm:$0xff]  }
 0x849   :  { %17358 = vmatprep.subr.bf16.mxu1 %v21378_v53  ;;  %v23262_v53 = vld [vmem:[#allocation17_spill] sm:$0xff] }
 0x84b   :  { %17316 = vmatpush1.bf16.msra.mxu0 %v21373_v31  ;;  %v10328_v31 = vrot.slane %v21880_v43, %v23262_v53 }
 0x84c   :  { %17359 = vmatpush1.bf16.msra.mxu1 %v21376_v36  ;;  %17317 = vmatprep.subr.bf16.mxu0 %v21381_v23  ;;  %v23101_v36 = vpop.f32.mrf.mxu1  ;;  %v21420_v23 = vld [vmem:[#allocation8 + $0x11b4] ss:$24 sps:$4 sm:$0xff]  }
 0x84d   :  { %17360 = vmatprep.subr.bf16.mxu1 %v21384_v17  ;;  %v23263_v17 = vld [vmem:[#allocation54_spill] sm:$0xff] }
 0x84f   :  { %17318 = vmatpush1.bf16.msra.mxu0 %v21379_v13  ;;  %v10332_v13 = vrot.slane %v21880_v43, %v23263_v17  ;;  %v21438_v43 = vld [vmem:[#allocation8 + $0x1124] ss:$24 sps:$4 sm:$0xff]   ;;  %v21436_v17 = vld [vmem:[#allocation8 + $0x1120] ss:$24 sps:$4 sm:$0xff]  }
 0x850   :  { %17361 = vmatpush1.bf16.msra.mxu1 %v21382_v54  ;;  %17319 = vmatprep.subr.bf16.mxu0 %v21387_v35  ;;  %v21415_v54 = vld [vmem:[#allocation8 + $0xeb0] ss:$24 sps:$4 sm:$0xff]   ;;  %v23104_v35 = vpop.f32.mrf.mxu0 }
 0x851   :  { %17362 = vmatprep.subr.bf16.mxu1 %v21390_v29  ;;  %v21418_v29 = vld [vmem:[#allocation8 + $0x11b0] ss:$24 sps:$4 sm:$0xff]  }
 0x853   :  { %17320 = vmatpush1.bf16.msra.mxu0 %v21385_v20  ;;  %v21423_v20 = vld [vmem:[#allocation8 + $0xe84] ss:$24 sps:$4 sm:$0xff]  }
 0x854   :  { %17363 = vmatpush1.bf16.msra.mxu1 %v21388_v51  ;;  %17321 = vmatprep.subr.bf16.mxu0 %v21393_v1  ;;  %v16658_v51 = vadd.f32 %v23054_v42, %v10328_v31  ;;  %v23107_v1 = vpop.f32.mrf.mxu1  ;;  %v16662_v42 = vadd.f32 %v23064_v58, %v10328_v31 }
 0x855   :  { %17364 = vmatprep.subr.bf16.mxu1 %v21396_v10  ;;  %v21426_v10 = vld [vmem:[#allocation8 + $0x1184] ss:$24 sps:$4 sm:$0xff]  }
 0x857   :  { %17322 = vmatpush1.bf16.msra.mxu0 %v21391_v34  ;;  %v23109_v34 = vpop.f32.mrf.mxu0 }
 0x858   :  { %17365 = vmatpush1.bf16.msra.mxu1 %v21394_v7  ;;  %17323 = vmatprep.subr.bf16.mxu0 %v21399_v6  ;;  %v16660_v7 = vadd.f32 %v23058_v63, %v10332_v13  ;;  %v23112_v6 = vpop.f32.mrf.mxu1 }
 0x859   :  { %17366 = vmatprep.subr.bf16.mxu1 %v21402_v30  ;;  %v21421_v30 = vld [vmem:[#allocation8 + $0xe80] ss:$24 sps:$4 sm:$0xff]  }
 0x85b   :  { %17324 = vmatpush1.bf16.msra.mxu0 %v21397_v57  ;;  %v21424_v57 = vld [vmem:[#allocation8 + $0x1180] ss:$24 sps:$4 sm:$0xff]  }
 0x85c   :  { %17367 = vmatpush1.bf16.msra.mxu1 %v21400_v46  ;;  %17325 = vmatprep.subr.bf16.mxu0 %v21405_v18  ;;  %v21429_v46 = vld [vmem:[#allocation8 + $0xe54] ss:$24 sps:$4 sm:$0xff]   ;;  %v16701_v18 = vadd.f32 %v23056_v40, %v16658_v51  ;;  %v16705_v40 = vadd.f32 %v23067_v3, %v16662_v42  ;;  %v21439_v51 = vld [vmem:[#allocation8 + $0xdf0] ss:$24 sps:$4 sm:$0xff]   ;;  %v21445_v42 = vld [vmem:[#allocation8 + $0xdc0] ss:$24 sps:$4 sm:$0xff]  }
 0x85d   :  { %17368 = vmatprep.subr.bf16.mxu1 %v21408_v49  ;;  %v21432_v49 = vld [vmem:[#allocation8 + $0x1154] ss:$24 sps:$4 sm:$0xff]  }
 0x85e   :  { %v16744_v63 = vadd.f32 %v23074_v19, %v16701_v18  ;;  %v16748_v19 = vadd.f32 %v23082_v61, %v16705_v40  ;;  %v21459_v40 = vld [vmem:[#allocation8 + $0x1364] ss:$24 sps:$4 sm:$0xff]  }
 0x85f   :  { %17326 = vmatpush1.bf16.msra.mxu0 %v21403_v27  ;;  %v16917_v27 = vpop.f32.mrf.mxu0 }
 0x860   :  { %17369 = vmatpush1.bf16.msra.mxu1 %v21406_v47  ;;  %17327 = vmatprep.subr.bf16.mxu0 %v21411_v8  ;;  %v16703_v47 = vadd.f32 %v23060_v2, %v16660_v7  ;;  %v16664_v8 = vadd.f32 %v23070_v16, %v10332_v13  ;;  %v16787_v16 = vadd.f32 %v23076_v0, %v16744_v63  ;;  %v21441_v13 = vld [vmem:[#allocation8 + $0xdf4] ss:$24 sps:$4 sm:$0xff]   ;;  %v21442_v7 = vld [vmem:[#allocation8 + $0x10f0] ss:$24 sps:$4 sm:$0xff]  }
 0x861   :  { %17370 = vmatprep.subr.bf16.mxu1 %v21414_v15  ;;  %v23119_v15 = vpop.f32.mrf.mxu1  ;;  %v16919_v53 = vpop.f32.mrf.mxu0  ;;  %v16791_v0 = vadd.f32 %v23084_v4, %v16748_v19  ;;  %v21456_v63 = vld [vmem:[#allocation8 + $0x1094] ss:$24 sps:$4 sm:$0xff]  }
 0x862   :  { %v16746_v58 = vadd.f32 %v23078_v59, %v16703_v47  ;;  %v16707_v2 = vadd.f32 %v23072_v48, %v16664_v8  ;;  %v21448_v47 = vld [vmem:[#allocation8 + $0x10c0] ss:$24 sps:$4 sm:$0xff]  }
 0x863   :  { %17328 = vmatpush2.bf16.msra.mxu0 %v21409_v44  ;;  %v21427_v44 = vld [vmem:[#allocation8 + $0xe50] ss:$24 sps:$4 sm:$0xff]   ;;  %v16962_v31 = vpop.f32.mrf.mxu1  ;;  %v16921_v48 = vpop.f32.mrf.mxu0 }
 0x864   :  { %17371 = vmatpush2.bf16.msra.mxu1 %v21412_v56  ;;  %17329 = vmatprep.subr.bf16.mxu0 %v21417_v62  ;;  %v21430_v56 = vld [vmem:[#allocation8 + $0x1150] ss:$24 sps:$4 sm:$0xff]   ;;  %v21435_v62 = vld [vmem:[#allocation8 + $0xe24] ss:$24 sps:$4 sm:$0xff]   ;;  %v16789_v3 = vadd.f32 %v23080_v32, %v16746_v58  ;;  %v16750_v59 = vadd.f32 %v23086_v9, %v16707_v2 }
 0x865   :  { %17372 = vmatprep.subr.bf16.mxu1 %v21420_v23  ;;  %v21433_v23 = vld [vmem:[#allocation8 + $0xe20] ss:$24 sps:$4 sm:$0xff]   ;;  %v21462_v2 = vld [vmem:[#allocation8 + $0x1664] ss:$24 sps:$4 sm:$0xff]  }
 0x866   :  { %v16832_v61 = vadd.f32 %v23094_v39, %v16789_v3  ;;  %v16793_v32 = vadd.f32 %v23088_v21, %v16750_v59  ;;  %v21453_v21 = vld [vmem:[#allocation8 + $0xd94] ss:$24 sps:$4 sm:$0xff]  }
 0x867   :  { %17330 = vmatpush2.bf16.msra.mxu0 %v21415_v54  ;;  %v16830_v54 = vadd.f32 %v23090_v22, %v16787_v16  ;;  %v16834_v22 = vadd.f32 %v23098_v55, %v16791_v0  ;;  %v21465_v59 = vld [vmem:[#allocation8 + $0x1334] ss:$24 sps:$4 sm:$0xff]  }
 0x868   :  { %17373 = vmatpush2.bf16.msra.mxu1 %v21418_v29  ;;  %17331 = vmatprep.subr.bf16.mxu0 %v21423_v20  ;;  %v21444_v29 = vld [vmem:[#allocation8 + $0x10f4] ss:$24 sps:$4 sm:$0xff]   ;;  %v16964_v20 = vpop.f32.mrf.mxu1  ;;  %v16875_v4 = vadd.f32 %v23096_v38, %v16832_v61  ;;  %v16836_v39 = vadd.f32 %v23104_v35, %v16793_v32  ;;  %v21463_v61 = vld [vmem:[#allocation8 + $0x1330] ss:$24 sps:$4 sm:$0xff]  }
 0x869   :  { %17374 = vmatprep.subr.bf16.mxu1 %v21426_v10  ;;  %v17001_v10 = vpop.f32.mrf.mxu0  ;;  %v16873_v9 = vadd.f32 %v23092_v45, %v16830_v54  ;;  %v16877_v45 = vadd.f32 %v23101_v36, %v16834_v22  ;;  %v21468_v54 = vld [vmem:[#allocation8 + $0x1634] ss:$24 sps:$4 sm:$0xff]  }
 0x86a   :  { %v16918_v8 = vadd.f32 %v16917_v27, %v16875_v4 }
 0x86b   :  { %17332 = vmatpush2.bf16.msra.mxu0 %v21421_v30  ;;  %v21447_v30 = vld [vmem:[#allocation8 + $0xdc4] ss:$24 sps:$4 sm:$0xff]   ;;  %v16916_v18 = vadd.f32 %v23109_v34, %v16873_v9  ;;  %v16920_v35 = vadd.f32 %v16919_v53, %v16877_v45  ;;  %v21451_v34 = vld [vmem:[#allocation8 + $0xd90] ss:$24 sps:$4 sm:$0xff]   ;;  %v21460_v53 = vld [vmem:[#allocation8 + $0x1660] ss:$24 sps:$4 sm:$0xff]  }
 0x86c   :  { %17375 = vmatpush2.bf16.msra.mxu1 %v21424_v57  ;;  %17333 = vmatprep.subr.bf16.mxu0 %v21429_v46  ;;  %v17044_v57 = vpop.f32.mrf.mxu1  ;;  %v21450_v46 = vld [vmem:[#allocation8 + $0x10c4] ss:$24 sps:$4 sm:$0xff]   ;;  %v16961_v58 = vadd.f32 %v23119_v15, %v16918_v8  ;;  %v21475_v8 = vld [vmem:[#allocation8 + $0x12d0] ss:$24 sps:$4 sm:$0xff]  }
 0x86d   :  { %17376 = vmatprep.subr.bf16.mxu1 %v21432_v49  ;;  %v17003_v49 = vpop.f32.mrf.mxu0  ;;  %v16959_v38 = vadd.f32 %v23112_v6, %v16916_v18  ;;  %v16963_v16 = vadd.f32 %v16962_v31, %v16920_v35  ;;  %v21474_v9 = vld [vmem:[#allocation8 + $0x1604] ss:$24 sps:$4 sm:$0xff]   ;;  %v21472_v18 = vld [vmem:[#allocation8 + $0x1600] ss:$24 sps:$4 sm:$0xff]  }
 0x86e   :  { %v17046_v55 = vpop.f32.mrf.mxu1  ;;  %v17004_v19 = vadd.f32 %v17003_v49, %v16961_v58  ;;  %v21484_v35 = vld [vmem:[#allocation8 + $0x15a0] ss:$24 sps:$4 sm:$0xff]   ;;  %v21495_v58 = vld [vmem:[#allocation8 + $0x1244] ss:$24 sps:$4 sm:$0xff]  }
 0x86f   :  { %17334 = vmatpush2.bf16.msra.mxu0 %v21427_v44  ;;  %v16879_v44 = vadd.f32 %v23107_v1, %v16836_v39  ;;  %v17002_v36 = vadd.f32 %v17001_v10, %v16959_v38  ;;  %v21457_v1 = vld [vmem:[#allocation8 + $0x1360] ss:$24 sps:$4 sm:$0xff]   ;;  %v21471_v10 = vld [vmem:[#allocation8 + $0x1304] ss:$24 sps:$4 sm:$0xff]  }
 0x870   :  { %17377 = vmatpush2.bf16.msra.mxu1 %v21430_v56  ;;  %17335 = vmatprep.subr.bf16.mxu0 %v21435_v62  ;;  %v17005_v56 = vpop.f32.mrf.mxu0  ;;  %v21454_v62 = vld [vmem:[#allocation8 + $0x1090] ss:$24 sps:$4 sm:$0xff]   ;;  %v17048_v27 = vpop.f32.mrf.mxu1  ;;  %v21481_v38 = vld [vmem:[#allocation8 + $0x12a0] ss:$24 sps:$4 sm:$0xff]  }
 0x871   :  { %17378 = vmatprep.subr.bf16.mxu1 %v21438_v43  ;;  %v16922_v43 = vadd.f32 %v16921_v48, %v16879_v44  ;;  %v21486_v44 = vld [vmem:[#allocation8 + $0x15a4] ss:$24 sps:$4 sm:$0xff]  }
 0x872   :  { %v17007_v6 = vpop.f32.mrf.mxu0  ;;  %v17050_v3 = vpop.f32.mrf.mxu1 }
 0x873   :  { %17336 = vmatpush2.bf16.msra.mxu0 %v21433_v23  ;;  %v16965_v23 = vadd.f32 %v16964_v20, %v16922_v43  ;;  %v21498_v43 = vld [vmem:[#allocation8 + $0x1544] ss:$24 sps:$4 sm:$0xff]  }
 0x874   :  { %17379 = vmatpush2.bf16.msra.mxu1 %v21436_v17  ;;  %17337 = vmatprep.subr.bf16.mxu0 %v21441_v13  ;;  %v17045_v17 = vadd.f32 %v17044_v57, %v17002_v36  ;;  %v17006_v13 = vadd.f32 %v17005_v56, %v16963_v16  ;;  %v21492_v56 = vld [vmem:[#allocation8 + $0x1574] ss:$24 sps:$4 sm:$0xff]   ;;  %v21493_v36 = vld [vmem:[#allocation8 + $0x1240] ss:$24 sps:$4 sm:$0xff]  }
 0x875   :  { %17380 = vmatprep.subr.bf16.mxu1 %v21444_v29  ;;  %v17047_v29 = vadd.f32 %v17046_v55, %v17004_v19  ;;  %v17008_v48 = vadd.f32 %v17007_v6, %v16965_v23  ;;  %v21478_v55 = vld [vmem:[#allocation8 + $0x15d0] ss:$24 sps:$4 sm:$0xff]   ;;  %v21504_v16 = vld [vmem:[#allocation8 + $0x1514] ss:$24 sps:$4 sm:$0xff]   ;;  %v21507_v6 = vld [vmem:[#allocation8 + $0x14e4] ss:$24 sps:$4 sm:$0xff]  }
 0x876   :  { %v21499_v19 = vld [vmem:[#allocation8 + $0x1210] ss:$24 sps:$4 sm:$0xff]   ;;  %v21505_v23 = vld [vmem:[#allocation8 + $0x14e0] ss:$24 sps:$4 sm:$0xff]  }
 0x877   :  { %17338 = vmatpush2.bf16.msra.mxu0 %v21439_v51  ;;  %v21466_v51 = vld [vmem:[#allocation8 + $0x1630] ss:$24 sps:$4 sm:$0xff]   ;;  %v17051_v57 = vadd.f32 %v17050_v3, %v17008_v48  ;;  %v21516_v3 = vld [vmem:[#allocation8 + $0x17b4] ss:$24 sps:$4 sm:$0xff]   ;;  %v21517_v48 = vld [vmem:[#allocation8 + $0x1480] ss:$24 sps:$4 sm:$0xff]  }
 0x878   :  { %17381 = vmatpush2.bf16.msra.mxu1 %v21442_v7  ;;  %17339 = vmatprep.subr.bf16.mxu0 %v21447_v30  ;;  %v17049_v7 = vadd.f32 %v17048_v27, %v17006_v13  ;;  %v21496_v27 = vld [vmem:[#allocation8 + $0x1540] ss:$24 sps:$4 sm:$0xff]   ;;  %v21513_v13 = vld [vmem:[#allocation8 + $0x14b4] ss:$24 sps:$4 sm:$0xff]  }
 0x879   :  { %17382 = vmatprep.subr.bf16.mxu1 %v21450_v46 }
 0x87b   :  { %17340 = vmatpush2.bf16.msra.mxu0 %v21445_v42  ;;  %v21477_v42 = vld [vmem:[#allocation8 + $0x12d4] ss:$24 sps:$4 sm:$0xff]  }
 0x87c   :  { %17383 = vmatpush2.bf16.msra.mxu1 %v21448_v47  ;;  %17341 = vmatprep.subr.bf16.mxu0 %v21453_v21  ;;  %v21480_v47 = vld [vmem:[#allocation8 + $0x15d4] ss:$24 sps:$4 sm:$0xff]  }
 0x87d   :  { %17384 = vmatprep.subr.bf16.mxu1 %v21456_v63  ;;  %v21483_v63 = vld [vmem:[#allocation8 + $0x12a4] ss:$24 sps:$4 sm:$0xff]  }
 0x87f   :  { %17342 = vmatpush2.bf16.msra.mxu0 %v21451_v34  ;;  %v21489_v34 = vld [vmem:[#allocation8 + $0x1274] ss:$24 sps:$4 sm:$0xff]  }
 0x880   :  { %17385 = vmatpush2.bf16.msra.mxu1 %v21454_v62  ;;  %17397 = vmatprep.subr.bf16.mxu0 %v21459_v40  ;;  %v21487_v62 = vld [vmem:[#allocation8 + $0x1270] ss:$24 sps:$4 sm:$0xff]  }
 0x881   :  { %17440 = vmatprep.subr.bf16.mxu1 %v21462_v2  ;;  %v21490_v40 = vld [vmem:[#allocation8 + $0x1570] ss:$24 sps:$4 sm:$0xff]   ;;  %v21501_v2 = vld [vmem:[#allocation8 + $0x1214] ss:$24 sps:$4 sm:$0xff]  }
 0x882   :  { %v17087_v15 = vpop.f32.mrf.mxu0  ;;  %17344 = vmatmul.mubr.bf16.vlgmr.msra.gmra.mxu0 %v23250_v28 }
 0x883   :  { %v17088_v31 = vadd.f32 %v17087_v15, %v17045_v17  ;;  %v17130_v0 = vpop.f32.mrf.mxu1  ;;  %17387 = vmatmul.mubr.bf16.vlgmr.msra.gmra.mxu1 %v23251_v11  ;;  %17398 = vmatpush1.bf16.msra.mxu0 %v21457_v1  ;;  %v21502_v1 = vld [vmem:[#allocation8 + $0x1510] ss:$24 sps:$4 sm:$0xff]   ;;  %v21508_v17 = vld [vmem:[#allocation8 + $0x17e0] ss:$24 sps:$4 sm:$0xff]  }
 0x884   :  { %17429 = vmatprep.mubr.bf16.mxu0 %v22812_v14  ;;  %17441 = vmatpush1.bf16.msra.mxu1 %v21460_v53  ;;  %v17089_v20 = vpop.f32.mrf.mxu0  ;;  %v21469_v14 = vld [vmem:[#allocation8 + $0x1300] ss:$24 sps:$4 sm:$0xff]   ;;  %v21510_v53 = vld [vmem:[#allocation8 + $0x17e4] ss:$24 sps:$4 sm:$0xff]   ;;  %v21514_v15 = vld [vmem:[#allocation8 + $0x17b0] ss:$24 sps:$4 sm:$0xff]  }
 0x885   :  { %v17131_v30 = vadd.f32 %v17130_v0, %v17088_v31  ;;  %17472 = vmatprep.mubr.bf16.mxu1 %v22815_v41  ;;  %v17090_v28 = vadd.f32 %v17089_v20, %v17047_v29  ;;  %v17132_v32 = vpop.f32.mrf.mxu1  ;;  %17399 = vmatprep.subr.bf16.mxu0 %v21465_v59  ;;  %v21511_v59 = vld [vmem:[#allocation8 + $0x14b0] ss:$24 sps:$4 sm:$0xff]   ;;  %v21522_v29 = vld [vmem:[#allocation8 + $0x1784] ss:$24 sps:$4 sm:$0xff]   ;;  %v21520_v31 = vld [vmem:[#allocation8 + $0x1780] ss:$24 sps:$4 sm:$0xff]  }
 0x886   :  { %v17091_v22 = vpop.f32.mrf.mxu0  ;;  %17442 = vmatprep.subr.bf16.mxu1 %v21468_v54  ;;  %v21519_v54 = vld [vmem:[#allocation8 + $0x1484] ss:$24 sps:$4 sm:$0xff]   ;;  %v21525_v0 = vld [vmem:[#allocation8 + $0x1454] ss:$24 sps:$4 sm:$0xff]   ;;  %v21523_v20 = vld [vmem:[#allocation8 + $0x1450] ss:$24 sps:$4 sm:$0xff]  }
 0x887   :  { %17657 = vst [vmem:[#allocation11 + $0x10] sm:$0xff] %v17131_v30  ;;  %v17133_v11 = vadd.f32 %v17132_v32, %v17090_v28  ;;  %v17092_v46 = vadd.f32 %v17091_v22, %v17049_v7  ;;  %v17134_v4 = vpop.f32.mrf.mxu1  ;;  %17400 = vmatpush1.bf16.msra.mxu0 %v21463_v61  ;;  %v21528_v61 = vld [vmem:[#allocation8 + $0x1754] ss:$24 sps:$4 sm:$0xff]   ;;  %v21534_v7 = vld [vmem:[#allocation8 + $0x1724] ss:$24 sps:$4 sm:$0xff]  }
 0x888   :  { %17443 = vmatpush1.bf16.msra.mxu1 %v21466_v51  ;;  %v17093_v39 = vpop.f32.mrf.mxu0  ;;  %17401 = vmatprep.subr.bf16.mxu0 %v21471_v10  ;;  %v21526_v51 = vld [vmem:[#allocation8 + $0x1750] ss:$24 sps:$4 sm:$0xff]   ;;  %v21531_v10 = vld [vmem:[#allocation8 + $0x1424] ss:$24 sps:$4 sm:$0xff]   ;;  %v21529_v30 = vld [vmem:[#allocation8 + $0x1420] ss:$24 sps:$4 sm:$0xff]  }
 0x889   :  { %17658 = vst [vmem:[#allocation11 + $0x18] sm:$0xff] %v17133_v11  ;;  %v17135_v41 = vadd.f32 %v17134_v4, %v17092_v46  ;;  %v17094_v49 = vadd.f32 %v17093_v39, %v17051_v57  ;;  %17444 = vmatprep.subr.bf16.mxu1 %v21474_v9  ;;  %v17136_v21 = vpop.f32.mrf.mxu1  ;;  %v21532_v28 = vld [vmem:[#allocation8 + $0x1720] ss:$24 sps:$4 sm:$0xff]   ;;  %v21537_v32 = vld [vmem:[#allocation8 + $0x13f4] ss:$24 sps:$4 sm:$0xff]  }
 0x88a   :  { %v21540_v9 = vld [vmem:[#allocation8 + $0x16f4] ss:$24 sps:$4 sm:$0xff]   ;;  %v21535_v22 = vld [vmem:[#allocation8 + $0x13f0] ss:$24 sps:$4 sm:$0xff]   ;;  %v21543_v11 = vld [vmem:[#allocation8 + $0x13c4] ss:$24 sps:$4 sm:$0xff]  }
 0x88b   :  { %17663 = vst [vmem:[#allocation11 + $0x40] sm:$0xff] %v17135_v41  ;;  %v17137_v45 = vadd.f32 %v17136_v21, %v17094_v49  ;;  %17402 = vmatpush1.bf16.msra.mxu0 %v21469_v14  ;;  %v21538_v57 = vld [vmem:[#allocation8 + $0x16f0] ss:$24 sps:$4 sm:$0xff]   ;;  %v21546_v46 = vld [vmem:[#allocation8 + $0x16c4] ss:$24 sps:$4 sm:$0xff]  }
 0x88c   :  { %17445 = vmatpush1.bf16.msra.mxu1 %v21472_v18  ;;  %17403 = vmatprep.subr.bf16.mxu0 %v21477_v42  ;;  %v21541_v4 = vld [vmem:[#allocation8 + $0x13c0] ss:$24 sps:$4 sm:$0xff]   ;;  %v21549_v39 = vld [vmem:[#allocation8 + $0x1394] ss:$24 sps:$4 sm:$0xff]   ;;  %v21547_v42 = vld [vmem:[#allocation8 + $0x1390] ss:$24 sps:$4 sm:$0xff]  }
 0x88d   :  { %17664 = vst [vmem:[#allocation11 + $0x48] sm:$0xff] %v17137_v45  ;;  %17446 = vmatprep.subr.bf16.mxu1 %v21480_v47  ;;  %v21544_v14 = vld [vmem:[#allocation8 + $0x16c0] ss:$24 sps:$4 sm:$0xff]   ;;  %v21552_v18 = vld [vmem:[#allocation8 + $0x1694] ss:$24 sps:$4 sm:$0xff]  }
 0x88e   :  { %v21550_v41 = vld [vmem:[#allocation8 + $0x1690] ss:$24 sps:$4 sm:$0xff]   ;;  %v21555_v49 = vld [vmem:[#allocation8 + $0x1964] ss:$24 sps:$4 sm:$0xff]   ;;  %v21553_v21 = vld [vmem:[#allocation8 + $0x1960] ss:$24 sps:$4 sm:$0xff]  }
 0x88f   :  { %17404 = vmatpush1.bf16.msra.mxu0 %v21475_v8  ;;  %v21558_v47 = vld [vmem:[#allocation8 + $0x1c64] ss:$24 sps:$4 sm:$0xff]   ;;  %v21556_v45 = vld [vmem:[#allocation8 + $0x1c60] ss:$24 sps:$4 sm:$0xff]   ;;  %v21561_v8 = vld [vmem:[#allocation8 + $0x1934] ss:$24 sps:$4 sm:$0xff]  }
 0x890   :  { %17447 = vmatpush1.bf16.msra.mxu1 %v21478_v55  ;;  %17405 = vmatprep.subr.bf16.mxu0 %v21483_v63  ;;  %v21564_v55 = vld [vmem:[#allocation8 + $0x1c34] ss:$24 sps:$4 sm:$0xff]   ;;  %v21559_v63 = vld [vmem:[#allocation8 + $0x1930] ss:$24 sps:$4 sm:$0xff]  }
 0x891   :  { %17448 = vmatprep.subr.bf16.mxu1 %v21486_v44  ;;  %v21562_v44 = vld [vmem:[#allocation8 + $0x1c30] ss:$24 sps:$4 sm:$0xff]  }
 0x893   :  { %17406 = vmatpush1.bf16.msra.mxu0 %v21481_v38  ;;  %v21567_v38 = vld [vmem:[#allocation8 + $0x1904] ss:$24 sps:$4 sm:$0xff]  }
 0x894   :  { %17449 = vmatpush1.bf16.msra.mxu1 %v21484_v35  ;;  %17407 = vmatprep.subr.bf16.mxu0 %v21489_v34  ;;  %v21570_v35 = vld [vmem:[#allocation8 + $0x1c04] ss:$24 sps:$4 sm:$0xff]   ;;  %v21565_v34 = vld [vmem:[#allocation8 + $0x1900] ss:$24 sps:$4 sm:$0xff]  }
 0x895   :  { %17450 = vmatprep.subr.bf16.mxu1 %v21492_v56  ;;  %v21573_v56 = vld [vmem:[#allocation8 + $0x18d4] ss:$24 sps:$4 sm:$0xff]  }
 0x897   :  { %17408 = vmatpush1.bf16.msra.mxu0 %v21487_v62  ;;  %v21571_v62 = vld [vmem:[#allocation8 + $0x18d0] ss:$24 sps:$4 sm:$0xff]  }
 0x898   :  { %17451 = vmatpush1.bf16.msra.mxu1 %v21490_v40  ;;  %17409 = vmatprep.subr.bf16.mxu0 %v21495_v58  ;;  %v21579_v40 = vld [vmem:[#allocation8 + $0x18a4] ss:$24 sps:$4 sm:$0xff]  }
 0x899   :  { %17452 = vmatprep.subr.bf16.mxu1 %v21498_v43  ;;  %v21582_v58 = vld [vmem:[#allocation8 + $0x1ba4] ss:$24 sps:$4 sm:$0xff]   ;;  %v21580_v43 = vld [vmem:[#allocation8 + $0x1ba0] ss:$24 sps:$4 sm:$0xff]  }
 0x89b   :  { %17410 = vmatpush1.bf16.msra.mxu0 %v21493_v36  ;;  %v21585_v36 = vld [vmem:[#allocation8 + $0x1874] ss:$24 sps:$4 sm:$0xff]  }
 0x89c   :  { %17453 = vmatpush1.bf16.msra.mxu1 %v21496_v27  ;;  %17411 = vmatprep.subr.bf16.mxu0 %v21501_v2  ;;  %v21588_v27 = vld [vmem:[#allocation8 + $0x1b74] ss:$24 sps:$4 sm:$0xff]   ;;  %v21583_v2 = vld [vmem:[#allocation8 + $0x1870] ss:$24 sps:$4 sm:$0xff]  }
 0x89d   :  { %17454 = vmatprep.subr.bf16.mxu1 %v21504_v16  ;;  %v21586_v16 = vld [vmem:[#allocation8 + $0x1b70] ss:$24 sps:$4 sm:$0xff]  }
 0x89f   :  { %17412 = vmatpush1.bf16.msra.mxu0 %v21499_v19  ;;  %v21591_v19 = vld [vmem:[#allocation8 + $0x1844] ss:$24 sps:$4 sm:$0xff]  }
 0x8a0   :  { %17455 = vmatpush1.bf16.msra.mxu1 %v21502_v1  ;;  %17413 = vmatprep.subr.bf16.mxu0 %v21507_v6  ;;  %v21594_v1 = vld [vmem:[#allocation8 + $0x1b44] ss:$24 sps:$4 sm:$0xff]   ;;  %v21589_v6 = vld [vmem:[#allocation8 + $0x1840] ss:$24 sps:$4 sm:$0xff]  }
 0x8a1   :  { %17456 = vmatprep.subr.bf16.mxu1 %v21510_v53  ;;  %v21592_v53 = vld [vmem:[#allocation8 + $0x1b40] ss:$24 sps:$4 sm:$0xff]  }
 0x8a3   :  { %17414 = vmatpush2.bf16.msra.mxu0 %v21505_v23  ;;  %v21597_v23 = vld [vmem:[#allocation8 + $0x1814] ss:$24 sps:$4 sm:$0xff]  }
 0x8a4   :  { %17457 = vmatpush2.bf16.msra.mxu1 %v21508_v17  ;;  %17415 = vmatprep.subr.bf16.mxu0 %v21513_v13  ;;  %v21600_v17 = vld [vmem:[#allocation8 + $0x1b14] ss:$24 sps:$4 sm:$0xff]   ;;  %v21595_v13 = vld [vmem:[#allocation8 + $0x1810] ss:$24 sps:$4 sm:$0xff]  }
 0x8a5   :  { %17458 = vmatprep.subr.bf16.mxu1 %v21516_v3  ;;  %v21598_v3 = vld [vmem:[#allocation8 + $0x1b10] ss:$24 sps:$4 sm:$0xff]  }
 0x8a7   :  { %17416 = vmatpush2.bf16.msra.mxu0 %v21511_v59  ;;  %v21603_v59 = vld [vmem:[#allocation8 + $0x1ae4] ss:$24 sps:$4 sm:$0xff]  }
 0x8a8   :  { %17459 = vmatpush2.bf16.msra.mxu1 %v21514_v15  ;;  %17417 = vmatprep.subr.bf16.mxu0 %v21519_v54  ;;  %v21606_v15 = vld [vmem:[#allocation8 + $0x1de4] ss:$24 sps:$4 sm:$0xff]   ;;  %v21601_v54 = vld [vmem:[#allocation8 + $0x1ae0] ss:$24 sps:$4 sm:$0xff]  }
 0x8a9   :  { %17460 = vmatprep.subr.bf16.mxu1 %v21522_v29  ;;  %v21604_v29 = vld [vmem:[#allocation8 + $0x1de0] ss:$24 sps:$4 sm:$0xff]  }
 0x8ab   :  { %17418 = vmatpush2.bf16.msra.mxu0 %v21517_v48  ;;  %v21609_v48 = vld [vmem:[#allocation8 + $0x1ab4] ss:$24 sps:$4 sm:$0xff]  }
 0x8ac   :  { %17461 = vmatpush2.bf16.msra.mxu1 %v21520_v31  ;;  %17419 = vmatprep.subr.bf16.mxu0 %v21525_v0  ;;  %v21612_v31 = vld [vmem:[#allocation8 + $0x1db4] ss:$24 sps:$4 sm:$0xff]   ;;  %v21607_v0 = vld [vmem:[#allocation8 + $0x1ab0] ss:$24 sps:$4 sm:$0xff]  }
 0x8ad   :  { %17462 = vmatprep.subr.bf16.mxu1 %v21528_v61  ;;  %v21610_v61 = vld [vmem:[#allocation8 + $0x1db0] ss:$24 sps:$4 sm:$0xff]  }
 0x8af   :  { %17420 = vmatpush2.bf16.msra.mxu0 %v21523_v20  ;;  %v21615_v20 = vld [vmem:[#allocation8 + $0x1a84] ss:$24 sps:$4 sm:$0xff]  }
 0x8b0   :  { %17463 = vmatpush2.bf16.msra.mxu1 %v21526_v51  ;;  %17421 = vmatprep.subr.bf16.mxu0 %v21531_v10  ;;  %v21618_v51 = vld [vmem:[#allocation8 + $0x1d84] ss:$24 sps:$4 sm:$0xff]   ;;  %v21613_v10 = vld [vmem:[#allocation8 + $0x1a80] ss:$24 sps:$4 sm:$0xff]  }
 0x8b1   :  { %17464 = vmatprep.subr.bf16.mxu1 %v21534_v7  ;;  %v21616_v7 = vld [vmem:[#allocation8 + $0x1d80] ss:$24 sps:$4 sm:$0xff]  }
 0x8b3   :  { %17422 = vmatpush2.bf16.msra.mxu0 %v21529_v30  ;;  %v21621_v30 = vld [vmem:[#allocation8 + $0x1a54] ss:$24 sps:$4 sm:$0xff]  }
 0x8b4   :  { %17465 = vmatpush2.bf16.msra.mxu1 %v21532_v28  ;;  %17423 = vmatprep.subr.bf16.mxu0 %v21537_v32  ;;  %v21624_v28 = vld [vmem:[#allocation8 + $0x1d54] ss:$24 sps:$4 sm:$0xff]   ;;  %v21619_v32 = vld [vmem:[#allocation8 + $0x1a50] ss:$24 sps:$4 sm:$0xff]  }
 0x8b5   :  { %17466 = vmatprep.subr.bf16.mxu1 %v21540_v9  ;;  %v21622_v9 = vld [vmem:[#allocation8 + $0x1d50] ss:$24 sps:$4 sm:$0xff]  }
 0x8b7   :  { %17424 = vmatpush2.bf16.msra.mxu0 %v21535_v22  ;;  %v21627_v22 = vld [vmem:[#allocation8 + $0x1a24] ss:$24 sps:$4 sm:$0xff]  }
 0x8b8   :  { %17467 = vmatpush2.bf16.msra.mxu1 %v21538_v57  ;;  %17425 = vmatprep.subr.bf16.mxu0 %v21543_v11  ;;  %v21630_v57 = vld [vmem:[#allocation8 + $0x1d24] ss:$24 sps:$4 sm:$0xff]   ;;  %v21625_v11 = vld [vmem:[#allocation8 + $0x1a20] ss:$24 sps:$4 sm:$0xff]  }
 0x8b9   :  { %17468 = vmatprep.subr.bf16.mxu1 %v21546_v46  ;;  %v21628_v46 = vld [vmem:[#allocation8 + $0x1d20] ss:$24 sps:$4 sm:$0xff]  }
 0x8bb   :  { %17426 = vmatpush2.bf16.msra.mxu0 %v21541_v4  ;;  %v21633_v4 = vld [vmem:[#allocation8 + $0x19f4] ss:$24 sps:$4 sm:$0xff]  }
 0x8bc   :  { %17469 = vmatpush2.bf16.msra.mxu1 %v21544_v14  ;;  %17427 = vmatprep.subr.bf16.mxu0 %v21549_v39  ;;  %v21636_v14 = vld [vmem:[#allocation8 + $0x1cf4] ss:$24 sps:$4 sm:$0xff]   ;;  %v21631_v39 = vld [vmem:[#allocation8 + $0x19f0] ss:$24 sps:$4 sm:$0xff]  }
 0x8bd   :  { %17470 = vmatprep.subr.bf16.mxu1 %v21552_v18  ;;  %v21634_v18 = vld [vmem:[#allocation8 + $0x1cf0] ss:$24 sps:$4 sm:$0xff]  }
 0x8bf   :  { %17428 = vmatpush2.bf16.msra.mxu0 %v21547_v42  ;;  %v21639_v42 = vld [vmem:[#allocation8 + $0x19c4] ss:$24 sps:$4 sm:$0xff]  }
 0x8c0   :  { %17471 = vmatpush2.bf16.msra.mxu1 %v21550_v41  ;;  %17483 = vmatprep.subr.bf16.mxu0 %v21555_v49  ;;  %v21642_v41 = vld [vmem:[#allocation8 + $0x1cc4] ss:$24 sps:$4 sm:$0xff]   ;;  %v21637_v49 = vld [vmem:[#allocation8 + $0x19c0] ss:$24 sps:$4 sm:$0xff]  }
 0x8c1   :  { %17526 = vmatprep.subr.bf16.mxu1 %v21558_v47  ;;  %v21640_v47 = vld [vmem:[#allocation8 + $0x1cc0] ss:$24 sps:$4 sm:$0xff]  }
 0x8c2   :  { %17430 = vmatmul.mubr.bf16.vlgmr.msra.gmra.mxu0 %v23256_v12  ;;  %v21568_v12 = vld [vmem:[#allocation8 + $0x1c00] ss:$24 sps:$4 sm:$0xff]  }
 0x8c3   :  { %17473 = vmatmul.mubr.bf16.vlgmr.msra.gmra.mxu1 %v23257_v37  ;;  %17484 = vmatpush1.bf16.msra.mxu0 %v21553_v21  ;;  %v21576_v37 = vld [vmem:[#allocation8 + $0x1bd4] ss:$24 sps:$4 sm:$0xff]  }
 0x8c4   :  { %17515 = vmatprep.mubr.bf16.mxu0 %v22884_v26  ;;  %17527 = vmatpush1.bf16.msra.mxu1 %v21556_v45  ;;  %v21574_v26 = vld [vmem:[#allocation8 + $0x1bd0] ss:$24 sps:$4 sm:$0xff]   ;;  %v21645_v21 = vld [vmem:[#allocation8 + $0x1994] ss:$24 sps:$4 sm:$0xff]  }
 0x8c5   :  { %17558 = vmatprep.mubr.bf16.mxu1 %v22887_v60  ;;  %17485 = vmatprep.subr.bf16.mxu0 %v21561_v8  ;;  %v21577_v60 = vld [vmem:[#allocation8 + $0x18a0] ss:$24 sps:$4 sm:$0xff]   ;;  %v21648_v45 = vld [vmem:[#allocation8 + $0x1c94] ss:$24 sps:$4 sm:$0xff]   ;;  %v21643_v8 = vld [vmem:[#allocation8 + $0x1990] ss:$24 sps:$4 sm:$0xff]  }
 0x8c6   :  { %17528 = vmatprep.subr.bf16.mxu1 %v21564_v55  ;;  %v21646_v55 = vld [vmem:[#allocation8 + $0x1c90] ss:$24 sps:$4 sm:$0xff]  }
 0x8c7   :  { %17486 = vmatpush1.bf16.msra.mxu0 %v21559_v63  ;;  %v21651_v63 = vld [vmem:[#allocation8 + $0x1f64] ss:$24 sps:$4 sm:$0xff]  }
 0x8c8   :  { %17529 = vmatpush1.bf16.msra.mxu1 %v21562_v44  ;;  %17487 = vmatprep.subr.bf16.mxu0 %v21567_v38  ;;  %v21654_v44 = vld [vmem:[#allocation8 + $0x2264] ss:$24 sps:$4 sm:$0xff]   ;;  %v21649_v38 = vld [vmem:[#allocation8 + $0x1f60] ss:$24 sps:$4 sm:$0xff]  }
 0x8c9   :  { %17530 = vmatprep.subr.bf16.mxu1 %v21570_v35  ;;  %v21652_v35 = vld [vmem:[#allocation8 + $0x2260] ss:$24 sps:$4 sm:$0xff]  }
 0x8cb   :  { %17488 = vmatpush1.bf16.msra.mxu0 %v21565_v34  ;;  %v21657_v34 = vld [vmem:[#allocation8 + $0x1f34] ss:$24 sps:$4 sm:$0xff]  }
 0x8cc   :  { %17531 = vmatpush1.bf16.msra.mxu1 %v21568_v12  ;;  %17489 = vmatprep.subr.bf16.mxu0 %v21573_v56  ;;  %v21660_v12 = vld [vmem:[#allocation8 + $0x2234] ss:$24 sps:$4 sm:$0xff]   ;;  %v21655_v56 = vld [vmem:[#allocation8 + $0x1f30] ss:$24 sps:$4 sm:$0xff]  }
 0x8cd   :  { %17532 = vmatprep.subr.bf16.mxu1 %v21576_v37  ;;  %v21658_v37 = vld [vmem:[#allocation8 + $0x2230] ss:$24 sps:$4 sm:$0xff]  }
 0x8cf   :  { %17490 = vmatpush1.bf16.msra.mxu0 %v21571_v62  ;;  %v21663_v62 = vld [vmem:[#allocation8 + $0x1f04] ss:$24 sps:$4 sm:$0xff]  }
 0x8d0   :  { %17533 = vmatpush1.bf16.msra.mxu1 %v21574_v26  ;;  %17491 = vmatprep.subr.bf16.mxu0 %v21579_v40  ;;  %v21666_v26 = vld [vmem:[#allocation8 + $0x2204] ss:$24 sps:$4 sm:$0xff]   ;;  %v21661_v40 = vld [vmem:[#allocation8 + $0x1f00] ss:$24 sps:$4 sm:$0xff]  }
 0x8d1   :  { %17534 = vmatprep.subr.bf16.mxu1 %v21582_v58  ;;  %v21669_v58 = vld [vmem:[#allocation8 + $0x1ed4] ss:$24 sps:$4 sm:$0xff]  }
 0x8d3   :  { %17492 = vmatpush1.bf16.msra.mxu0 %v21577_v60  ;;  %v21667_v60 = vld [vmem:[#allocation8 + $0x1ed0] ss:$24 sps:$4 sm:$0xff]  }
 0x8d4   :  { %17535 = vmatpush1.bf16.msra.mxu1 %v21580_v43  ;;  %17493 = vmatprep.subr.bf16.mxu0 %v21585_v36  ;;  %v21675_v43 = vld [vmem:[#allocation8 + $0x1ea4] ss:$24 sps:$4 sm:$0xff]  }
 0x8d5   :  { %17536 = vmatprep.subr.bf16.mxu1 %v21588_v27  ;;  %v21678_v36 = vld [vmem:[#allocation8 + $0x21a4] ss:$24 sps:$4 sm:$0xff]   ;;  %v21676_v27 = vld [vmem:[#allocation8 + $0x21a0] ss:$24 sps:$4 sm:$0xff]  }
 0x8d7   :  { %17494 = vmatpush1.bf16.msra.mxu0 %v21583_v2  ;;  %v21681_v2 = vld [vmem:[#allocation8 + $0x1e74] ss:$24 sps:$4 sm:$0xff]  }
 0x8d8   :  { %17537 = vmatpush1.bf16.msra.mxu1 %v21586_v16  ;;  %17495 = vmatprep.subr.bf16.mxu0 %v21591_v19  ;;  %v21684_v16 = vld [vmem:[#allocation8 + $0x2174] ss:$24 sps:$4 sm:$0xff]   ;;  %v21679_v19 = vld [vmem:[#allocation8 + $0x1e70] ss:$24 sps:$4 sm:$0xff]  }
 0x8d9   :  { %17538 = vmatprep.subr.bf16.mxu1 %v21594_v1  ;;  %v21682_v1 = vld [vmem:[#allocation8 + $0x2170] ss:$24 sps:$4 sm:$0xff]  }
 0x8db   :  { %17496 = vmatpush1.bf16.msra.mxu0 %v21589_v6  ;;  %v21687_v6 = vld [vmem:[#allocation8 + $0x1e44] ss:$24 sps:$4 sm:$0xff]  }
 0x8dc   :  { %17539 = vmatpush1.bf16.msra.mxu1 %v21592_v53  ;;  %17497 = vmatprep.subr.bf16.mxu0 %v21597_v23  ;;  %v21690_v53 = vld [vmem:[#allocation8 + $0x2144] ss:$24 sps:$4 sm:$0xff]   ;;  %v21685_v23 = vld [vmem:[#allocation8 + $0x1e40] ss:$24 sps:$4 sm:$0xff]  }
 0x8dd   :  { %17540 = vmatprep.subr.bf16.mxu1 %v21600_v17  ;;  %v21688_v17 = vld [vmem:[#allocation8 + $0x2140] ss:$24 sps:$4 sm:$0xff]  }
 0x8df   :  { %17498 = vmatpush1.bf16.msra.mxu0 %v21595_v13  ;;  %v21693_v13 = vld [vmem:[#allocation8 + $0x1e14] ss:$24 sps:$4 sm:$0xff]  }
 0x8e0   :  { %17541 = vmatpush1.bf16.msra.mxu1 %v21598_v3  ;;  %17499 = vmatprep.subr.bf16.mxu0 %v21603_v59  ;;  %v21696_v3 = vld [vmem:[#allocation8 + $0x2114] ss:$24 sps:$4 sm:$0xff]   ;;  %v21691_v59 = vld [vmem:[#allocation8 + $0x1e10] ss:$24 sps:$4 sm:$0xff]  }
 0x8e1   :  { %17542 = vmatprep.subr.bf16.mxu1 %v21606_v15  ;;  %v21694_v15 = vld [vmem:[#allocation8 + $0x2110] ss:$24 sps:$4 sm:$0xff]  }
 0x8e3   :  { %17500 = vmatpush2.bf16.msra.mxu0 %v21601_v54  ;;  %v21699_v54 = vld [vmem:[#allocation8 + $0x20e4] ss:$24 sps:$4 sm:$0xff]  }
 0x8e4   :  { %17543 = vmatpush2.bf16.msra.mxu1 %v21604_v29  ;;  %17501 = vmatprep.subr.bf16.mxu0 %v21609_v48  ;;  %v21702_v29 = vld [vmem:[#allocation8 + $0x23e4] ss:$24 sps:$4 sm:$0xff]   ;;  %v21697_v48 = vld [vmem:[#allocation8 + $0x20e0] ss:$24 sps:$4 sm:$0xff]  }
 0x8e5   :  { %17544 = vmatprep.subr.bf16.mxu1 %v21612_v31  ;;  %v21700_v31 = vld [vmem:[#allocation8 + $0x23e0] ss:$24 sps:$4 sm:$0xff]  }
 0x8e7   :  { %17502 = vmatpush2.bf16.msra.mxu0 %v21607_v0  ;;  %v21705_v0 = vld [vmem:[#allocation8 + $0x20b4] ss:$24 sps:$4 sm:$0xff]  }
 0x8e8   :  { %17545 = vmatpush2.bf16.msra.mxu1 %v21610_v61  ;;  %17503 = vmatprep.subr.bf16.mxu0 %v21615_v20  ;;  %v21708_v61 = vld [vmem:[#allocation8 + $0x23b4] ss:$24 sps:$4 sm:$0xff]   ;;  %v21703_v20 = vld [vmem:[#allocation8 + $0x20b0] ss:$24 sps:$4 sm:$0xff]  }
 0x8e9   :  { %17546 = vmatprep.subr.bf16.mxu1 %v21618_v51  ;;  %v21706_v51 = vld [vmem:[#allocation8 + $0x23b0] ss:$24 sps:$4 sm:$0xff]  }
 0x8eb   :  { %17504 = vmatpush2.bf16.msra.mxu0 %v21613_v10  ;;  %v21711_v10 = vld [vmem:[#allocation8 + $0x2084] ss:$24 sps:$4 sm:$0xff]  }
 0x8ec   :  { %17547 = vmatpush2.bf16.msra.mxu1 %v21616_v7  ;;  %17505 = vmatprep.subr.bf16.mxu0 %v21621_v30  ;;  %v21714_v7 = vld [vmem:[#allocation8 + $0x2384] ss:$24 sps:$4 sm:$0xff]   ;;  %v21709_v30 = vld [vmem:[#allocation8 + $0x2080] ss:$24 sps:$4 sm:$0xff]  }
 0x8ed   :  { %17548 = vmatprep.subr.bf16.mxu1 %v21624_v28  ;;  %v21712_v28 = vld [vmem:[#allocation8 + $0x2380] ss:$24 sps:$4 sm:$0xff]  }
 0x8ef   :  { %17506 = vmatpush2.bf16.msra.mxu0 %v21619_v32  ;;  %v21717_v32 = vld [vmem:[#allocation8 + $0x2054] ss:$24 sps:$4 sm:$0xff]  }
 0x8f0   :  { %17549 = vmatpush2.bf16.msra.mxu1 %v21622_v9  ;;  %17507 = vmatprep.subr.bf16.mxu0 %v21627_v22  ;;  %v21720_v9 = vld [vmem:[#allocation8 + $0x2354] ss:$24 sps:$4 sm:$0xff]   ;;  %v21715_v22 = vld [vmem:[#allocation8 + $0x2050] ss:$24 sps:$4 sm:$0xff]  }
 0x8f1   :  { %17550 = vmatprep.subr.bf16.mxu1 %v21630_v57  ;;  %v21718_v57 = vld [vmem:[#allocation8 + $0x2350] ss:$24 sps:$4 sm:$0xff]  }
 0x8f3   :  { %17508 = vmatpush2.bf16.msra.mxu0 %v21625_v11  ;;  %v21723_v11 = vld [vmem:[#allocation8 + $0x2024] ss:$24 sps:$4 sm:$0xff]  }
 0x8f4   :  { %17551 = vmatpush2.bf16.msra.mxu1 %v21628_v46  ;;  %17509 = vmatprep.subr.bf16.mxu0 %v21633_v4  ;;  %v21726_v46 = vld [vmem:[#allocation8 + $0x2324] ss:$24 sps:$4 sm:$0xff]   ;;  %v21721_v4 = vld [vmem:[#allocation8 + $0x2020] ss:$24 sps:$4 sm:$0xff]  }
 0x8f5   :  { %17552 = vmatprep.subr.bf16.mxu1 %v21636_v14  ;;  %v21724_v14 = vld [vmem:[#allocation8 + $0x2320] ss:$24 sps:$4 sm:$0xff]  }
 0x8f7   :  { %17510 = vmatpush2.bf16.msra.mxu0 %v21631_v39  ;;  %v21729_v39 = vld [vmem:[#allocation8 + $0x1ff4] ss:$24 sps:$4 sm:$0xff]  }
 0x8f8   :  { %17553 = vmatpush2.bf16.msra.mxu1 %v21634_v18  ;;  %17511 = vmatprep.subr.bf16.mxu0 %v21639_v42  ;;  %v21732_v18 = vld [vmem:[#allocation8 + $0x22f4] ss:$24 sps:$4 sm:$0xff]   ;;  %v21727_v42 = vld [vmem:[#allocation8 + $0x1ff0] ss:$24 sps:$4 sm:$0xff]  }
 0x8f9   :  { %17554 = vmatprep.subr.bf16.mxu1 %v21642_v41  ;;  %v21730_v41 = vld [vmem:[#allocation8 + $0x22f0] ss:$24 sps:$4 sm:$0xff]  }
 0x8fb   :  { %17512 = vmatpush2.bf16.msra.mxu0 %v21637_v49  ;;  %v21735_v49 = vld [vmem:[#allocation8 + $0x1fc4] ss:$24 sps:$4 sm:$0xff]  }
 0x8fc   :  { %17555 = vmatpush2.bf16.msra.mxu1 %v21640_v47  ;;  %17513 = vmatprep.subr.bf16.mxu0 %v21645_v21  ;;  %v21738_v47 = vld [vmem:[#allocation8 + $0x22c4] ss:$24 sps:$4 sm:$0xff]   ;;  %v21733_v21 = vld [vmem:[#allocation8 + $0x1fc0] ss:$24 sps:$4 sm:$0xff]  }
 0x8fd   :  { %17556 = vmatprep.subr.bf16.mxu1 %v21648_v45  ;;  %v21736_v45 = vld [vmem:[#allocation8 + $0x22c0] ss:$24 sps:$4 sm:$0xff]  }
 0x8ff   :  { %17514 = vmatpush2.bf16.msra.mxu0 %v21643_v8  ;;  %v21741_v8 = vld [vmem:[#allocation8 + $0x1f94] ss:$24 sps:$4 sm:$0xff]  }
 0x900   :  { %17557 = vmatpush2.bf16.msra.mxu1 %v21646_v55  ;;  %17569 = vmatprep.subr.bf16.mxu0 %v21651_v63  ;;  %v21744_v55 = vld [vmem:[#allocation8 + $0x2294] ss:$24 sps:$4 sm:$0xff]   ;;  %v21739_v63 = vld [vmem:[#allocation8 + $0x1f90] ss:$24 sps:$4 sm:$0xff]  }
 0x901   :  { %17612 = vmatprep.subr.bf16.mxu1 %v21654_v44  ;;  %v21742_v44 = vld [vmem:[#allocation8 + $0x2290] ss:$24 sps:$4 sm:$0xff]  }
 0x902   :  { %17516 = vmatmul.mubr.bf16.vlgmr.msra.gmra.mxu0 %v22564_v52  ;;  %v21664_v52 = vld [vmem:[#allocation8 + $0x2200] ss:$24 sps:$4 sm:$0xff]  }
 0x903   :  { %17559 = vmatmul.mubr.bf16.vlgmr.msra.gmra.mxu1 %v22651_v25  ;;  %17570 = vmatpush1.bf16.msra.mxu0 %v21649_v38  ;;  %v21672_v25 = vld [vmem:[#allocation8 + $0x21d4] ss:$24 sps:$4 sm:$0xff]   ;;  %v17173_v38 = vpop.f32.mrf.mxu0 }
 0x904   :  { %17601 = vmatprep.mubr.bf16.mxu0 %v22932_v50  ;;  %17613 = vmatpush1.bf16.msra.mxu1 %v21652_v35  ;;  %v21670_v50 = vld [vmem:[#allocation8 + $0x21d0] ss:$24 sps:$4 sm:$0xff]   ;;  %v17216_v35 = vpop.f32.mrf.mxu1 }
 0x905   :  { %17644 = vmatprep.mubr.bf16.mxu1 %v22935_v33  ;;  %17571 = vmatprep.subr.bf16.mxu0 %v21657_v34  ;;  %v21673_v33 = vld [vmem:[#allocation8 + $0x1ea0] ss:$24 sps:$4 sm:$0xff]   ;;  %v17175_v34 = vpop.f32.mrf.mxu0 }
 0x906   :  { %17614 = vmatprep.subr.bf16.mxu1 %v21660_v12  ;;  %v17218_v12 = vpop.f32.mrf.mxu1 }
 0x907   :  { %17572 = vmatpush1.bf16.msra.mxu0 %v21655_v56  ;;  %v17177_v56 = vpop.f32.mrf.mxu0 }
 0x908   :  { %17615 = vmatpush1.bf16.msra.mxu1 %v21658_v37  ;;  %17573 = vmatprep.subr.bf16.mxu0 %v21663_v62  ;;  %v17220_v37 = vpop.f32.mrf.mxu1 }
 0x909   :  { %17616 = vmatprep.subr.bf16.mxu1 %v21666_v26  ;;  %v17179_v62 = vpop.f32.mrf.mxu0 }
 0x90a   :  { %v17222_v26 = vpop.f32.mrf.mxu1 }
 0x90b   :  { %17574 = vmatpush1.bf16.msra.mxu0 %v21661_v40  ;;  %v17259_v40 = vpop.f32.mrf.mxu0 }
 0x90c   :  { %17617 = vmatpush1.bf16.msra.mxu1 %v21664_v52  ;;  %17575 = vmatprep.subr.bf16.mxu0 %v21669_v58  ;;  %v17302_v52 = vpop.f32.mrf.mxu1 }
 0x90d   :  { %17618 = vmatprep.subr.bf16.mxu1 %v21672_v25  ;;  %v17261_v58 = vpop.f32.mrf.mxu0 }
 0x90e   :  { %v17304_v25 = vpop.f32.mrf.mxu1 }
 0x90f   :  { %17576 = vmatpush1.bf16.msra.mxu0 %v21667_v60  ;;  %v17263_v60 = vpop.f32.mrf.mxu0 }
 0x910   :  { %17619 = vmatpush1.bf16.msra.mxu1 %v21670_v50  ;;  %17577 = vmatprep.subr.bf16.mxu0 %v21675_v43  ;;  %v17306_v50 = vpop.f32.mrf.mxu1 }
 0x911   :  { %17620 = vmatprep.subr.bf16.mxu1 %v21678_v36  ;;  %v17265_v43 = vpop.f32.mrf.mxu0 }
 0x912   :  { %v17308_v36 = vpop.f32.mrf.mxu1 }
 0x913   :  { %17578 = vmatpush1.bf16.msra.mxu0 %v21673_v33 }
 0x914   :  { %17621 = vmatpush1.bf16.msra.mxu1 %v21676_v27  ;;  %17579 = vmatprep.subr.bf16.mxu0 %v21681_v2 }
 0x915   :  { %17622 = vmatprep.subr.bf16.mxu1 %v21684_v16  ;;  %v21881_v16 = vld [vmem:[#allocation10] sm:$0x3f] }
 0x917   :  { %17580 = vmatpush1.bf16.msra.mxu0 %v21679_v19  ;;  %v23264_v19 = vld [vmem:[#allocation18_spill] sm:$0xff] }
 0x918   :  { %17623 = vmatpush1.bf16.msra.mxu1 %v21682_v1  ;;  %17581 = vmatprep.subr.bf16.mxu0 %v21687_v6  ;;  %v10336_v1 = vrot.slane %v21881_v16, %v23264_v19 }
 0x919   :  { %17624 = vmatprep.subr.bf16.mxu1 %v21690_v53  ;;  %v23265_v53 = vld [vmem:[#allocation55_spill] sm:$0xff] }
 0x91b   :  { %17582 = vmatpush1.bf16.msra.mxu0 %v21685_v23  ;;  %v10340_v23 = vrot.slane %v21881_v16, %v23265_v53 }
 0x91c   :  { %17625 = vmatpush1.bf16.msra.mxu1 %v21688_v17  ;;  %17583 = vmatprep.subr.bf16.mxu0 %v21693_v13  ;;  %v17174_v13 = vadd.f32 %v17173_v38, %v10336_v1 }
 0x91d   :  { %17626 = vmatprep.subr.bf16.mxu1 %v21696_v3 }
 0x91f   :  { %17584 = vmatpush1.bf16.msra.mxu0 %v21691_v59 }
 0x920   :  { %17627 = vmatpush1.bf16.msra.mxu1 %v21694_v15  ;;  %17585 = vmatprep.subr.bf16.mxu0 %v21699_v54  ;;  %v17176_v15 = vadd.f32 %v17175_v34, %v10340_v23 }
 0x921   :  { %17628 = vmatprep.subr.bf16.mxu1 %v21702_v29  ;;  %v17217_v29 = vadd.f32 %v17216_v35, %v17174_v13 }
 0x923   :  { %17586 = vmatpush2.bf16.msra.mxu0 %v21697_v48  ;;  %v17178_v48 = vadd.f32 %v17177_v56, %v10336_v1 }
 0x924   :  { %17629 = vmatpush2.bf16.msra.mxu1 %v21700_v31  ;;  %17587 = vmatprep.subr.bf16.mxu0 %v21705_v0  ;;  %v17219_v0 = vadd.f32 %v17218_v12, %v17176_v15 }
 0x925   :  { %17630 = vmatprep.subr.bf16.mxu1 %v21708_v61  ;;  %v17180_v61 = vadd.f32 %v17179_v62, %v10340_v23 }
 0x927   :  { %17588 = vmatpush2.bf16.msra.mxu0 %v21703_v20  ;;  %v17260_v20 = vadd.f32 %v17259_v40, %v17217_v29 }
 0x928   :  { %17631 = vmatpush2.bf16.msra.mxu1 %v21706_v51  ;;  %17589 = vmatprep.subr.bf16.mxu0 %v21711_v10  ;;  %v17221_v10 = vadd.f32 %v17220_v37, %v17178_v48 }
 0x929   :  { %17632 = vmatprep.subr.bf16.mxu1 %v21714_v7  ;;  %v17262_v7 = vadd.f32 %v17261_v58, %v17219_v0 }
 0x92b   :  { %17590 = vmatpush2.bf16.msra.mxu0 %v21709_v30 }
 0x92c   :  { %17633 = vmatpush2.bf16.msra.mxu1 %v21712_v28  ;;  %17591 = vmatprep.subr.bf16.mxu0 %v21717_v32  ;;  %v17223_v28 = vadd.f32 %v17222_v26, %v17180_v61  ;;  %v17303_v32 = vadd.f32 %v17302_v52, %v17260_v20 }
 0x92d   :  { %17634 = vmatprep.subr.bf16.mxu1 %v21720_v9  ;;  %v17264_v9 = vadd.f32 %v17263_v60, %v17221_v10 }
 0x92f   :  { %17592 = vmatpush2.bf16.msra.mxu0 %v21715_v22 }
 0x930   :  { %17635 = vmatpush2.bf16.msra.mxu1 %v21718_v57  ;;  %17593 = vmatprep.subr.bf16.mxu0 %v21723_v11  ;;  %v17305_v57 = vadd.f32 %v17304_v25, %v17262_v7  ;;  %v17266_v11 = vadd.f32 %v17265_v43, %v17223_v28 }
 0x931   :  { %17636 = vmatprep.subr.bf16.mxu1 %v21726_v46 }
 0x933   :  { %17594 = vmatpush2.bf16.msra.mxu0 %v21721_v4 }
 0x934   :  { %17637 = vmatpush2.bf16.msra.mxu1 %v21724_v14  ;;  %17595 = vmatprep.subr.bf16.mxu0 %v21729_v39  ;;  %v17307_v14 = vadd.f32 %v17306_v50, %v17264_v9 }
 0x935   :  { %17638 = vmatprep.subr.bf16.mxu1 %v21732_v18 }
 0x937   :  { %17596 = vmatpush2.bf16.msra.mxu0 %v21727_v42 }
 0x938   :  { %17639 = vmatpush2.bf16.msra.mxu1 %v21730_v41  ;;  %17597 = vmatprep.subr.bf16.mxu0 %v21735_v49  ;;  %v17309_v41 = vadd.f32 %v17308_v36, %v17266_v11 }
 0x939   :  { %17640 = vmatprep.subr.bf16.mxu1 %v21738_v47 }
 0x93b   :  { %17598 = vmatpush2.bf16.msra.mxu0 %v21733_v21 }
 0x93c   :  { %17641 = vmatpush2.bf16.msra.mxu1 %v21736_v45  ;;  %17599 = vmatprep.subr.bf16.mxu0 %v21741_v8 }
 0x93d   :  { %17642 = vmatprep.subr.bf16.mxu1 %v21744_v55 }
 0x93f   :  { %17600 = vmatpush2.bf16.msra.mxu0 %v21739_v63 }
 0x940   :  { %17643 = vmatpush2.bf16.msra.mxu1 %v21742_v44 }
 0x942   :  { %17602 = vmatmul.mubr.bf16.vlgmr.msra.gmra.mxu0 %v22795_v24  ;;  %v17345_v33 = vpop.f32.mrf.mxu0 }
 0x943   :  { %17645 = vmatmul.mubr.bf16.vlgmr.msra.gmra.mxu1 %v22877_v5  ;;  %v17388_v24 = vpop.f32.mrf.mxu1  ;;  %v17346_v46 = vadd.f32 %v17345_v33, %v17303_v32 }
 0x944   :  { %v17347_v27 = vpop.f32.mrf.mxu0 }
 0x945   :  { %v17390_v5 = vpop.f32.mrf.mxu1  ;;  %v17348_v39 = vadd.f32 %v17347_v27, %v17305_v57  ;;  %v17389_v49 = vadd.f32 %v17388_v24, %v17346_v46 }
 0x946   :  { %v17349_v2 = vpop.f32.mrf.mxu0 }
 0x947   :  { %v17392_v6 = vpop.f32.mrf.mxu1  ;;  %v17350_v47 = vadd.f32 %v17349_v2, %v17307_v14  ;;  %v17391_v45 = vadd.f32 %v17390_v5, %v17348_v39 }
 0x948   :  { %v17351_v17 = vpop.f32.mrf.mxu0 }
 0x949   :  { %v17394_v3 = vpop.f32.mrf.mxu1  ;;  %v17352_v8 = vadd.f32 %v17351_v17, %v17309_v41  ;;  %v17393_v44 = vadd.f32 %v17392_v6, %v17350_v47 }
 0x94b   :  { %v17395_v34 = vadd.f32 %v17394_v3, %v17352_v8 }
 0x982   :  { %v17431_v59 = vpop.f32.mrf.mxu0 }
 0x983   :  { %v17474_v54 = vpop.f32.mrf.mxu1  ;;  %v17432_v55 = vadd.f32 %v17431_v59, %v17389_v49 }
 0x984   :  { %v17433_v31 = vpop.f32.mrf.mxu0 }
 0x985   :  { %v17476_v51 = vpop.f32.mrf.mxu1  ;;  %v17434_v38 = vadd.f32 %v17433_v31, %v17391_v45  ;;  %v17475_v12 = vadd.f32 %v17474_v54, %v17432_v55 }
 0x986   :  { %v17435_v30 = vpop.f32.mrf.mxu0 }
 0x987   :  { %v17478_v22 = vpop.f32.mrf.mxu1  ;;  %v17436_v56 = vadd.f32 %v17435_v30, %v17393_v44  ;;  %v17477_v62 = vadd.f32 %v17476_v51, %v17434_v38 }
 0x988   :  { %v17437_v4 = vpop.f32.mrf.mxu0 }
 0x989   :  { %v17480_v18 = vpop.f32.mrf.mxu1  ;;  %v17438_v26 = vadd.f32 %v17437_v4, %v17395_v34  ;;  %v17479_v58 = vadd.f32 %v17478_v22, %v17436_v56 }
 0x98b   :  { %v17481_v50 = vadd.f32 %v17480_v18, %v17438_v26 }
 0x9c2   :  { %v17517_v42 = vpop.f32.mrf.mxu0 }
 0x9c3   :  { %v17560_v21 = vpop.f32.mrf.mxu1  ;;  %v17518_v40 = vadd.f32 %v17517_v42, %v17475_v12 }
 0x9c4   :  { %v17519_v63 = vpop.f32.mrf.mxu0 }
 0x9c5   :  { %v17562_v35 = vpop.f32.mrf.mxu1  ;;  %v17520_v25 = vadd.f32 %v17519_v63, %v17477_v62  ;;  %v17561_v43 = vadd.f32 %v17560_v21, %v17518_v40 }
 0x9c6   :  { %v17521_v37 = vpop.f32.mrf.mxu0 }
 0x9c7   :  { %v17564_v52 = vpop.f32.mrf.mxu1  ;;  %v17522_v36 = vadd.f32 %v17521_v37, %v17479_v58  ;;  %v17563_v27 = vadd.f32 %v17562_v35, %v17520_v25 }
 0x9c8   :  { %v17523_v60 = vpop.f32.mrf.mxu0 }
 0x9c9   :  { %v17566_v33 = vpop.f32.mrf.mxu1  ;;  %v17524_v5 = vadd.f32 %v17523_v60, %v17481_v50  ;;  %v17565_v1 = vadd.f32 %v17564_v52, %v17522_v36 }
 0x9cb   :  { %v17567_v13 = vadd.f32 %v17566_v33, %v17524_v5 }
 0xa02   :  { %v17603_v24 = vpop.f32.mrf.mxu0 }
 0xa03   :  { %v17604_v2 = vadd.f32 %v17603_v24, %v17561_v43  ;;  %v17646_v16 = vpop.f32.mrf.mxu1 }
 0xa04   :  { %v17605_v19 = vpop.f32.mrf.mxu0 }
 0xa05   :  { %v17647_v6 = vadd.f32 %v17646_v16, %v17604_v2  ;;  %v17606_v53 = vadd.f32 %v17605_v19, %v17563_v27  ;;  %v17648_v23 = vpop.f32.mrf.mxu1 }
 0xa06   :  { %v17607_v17 = vpop.f32.mrf.mxu0 }
 0xa07   :  { %17659 = vst [vmem:[#allocation11 + $0x20] sm:$0xff] %v17647_v6  ;;  %v17649_v3 = vadd.f32 %v17648_v23, %v17606_v53  ;;  %v17608_v59 = vadd.f32 %v17607_v17, %v17565_v1  ;;  %v17650_v15 = vpop.f32.mrf.mxu1 }
 0xa08   :  { %v17609_v54 = vpop.f32.mrf.mxu0 }
 0xa09   :  { %17660 = vst [vmem:[#allocation11 + $0x28] sm:$0xff] %v17649_v3  ;;  %v17651_v29 = vadd.f32 %v17650_v15, %v17608_v59  ;;  %v17610_v48 = vadd.f32 %v17609_v54, %v17567_v13  ;;  %v17652_v31 = vpop.f32.mrf.mxu1 }
 0xa0b   :  { %17665 = vst [vmem:[#allocation11 + $0x50] sm:$0xff] %v17651_v29  ;;  %v17653_v0 = vadd.f32 %v17652_v31, %v17610_v48 }
 0xa0d   :  { %17666 = vst [vmem:[#allocation11 + $0x58] sm:$0xff] %v17653_v0 }
 0xa0e   :  { %21993 = shalt.err (!%p21990_p1)
}
 0xa0f   :  { %s22020_s20 = smov 768   ;;  %s22021_s21 = smov 48  }
 0xa10   :  { %17678 = dma.vmem_to_hbm [thread:$0]  %s17673_s4, 1536, %s23165_s5, [#allocation4], %s22020_s20, %s22020_s20, %s22021_s21  }
 0xa11   :  { %22008 = dma.done.wait [#allocation4], 1536  }
 0xa12   :  { %22009 = vsyncadd [#allocation4], 4294965760 }
 0xa13   :  { %17682 = vsyncpa [#allocation3], 1 }
 0xa14   :  { %17683 = vsyncpa [#allocation6], 1 }
 0xa15   :  { %17684 = vsyncpa [#allocation9], 1 }
 0xa16   :  { %17685 = vsyncpa [#allocation4], 1 }

</bundles_post_ra>
